<compile_context>
chip_gen: v6e
topology: v6e:2x2x1
jax: 0.10.0
libtpu: 0.0.40
codegen_flags: <defaults>
</compile_context>

<pallas_src>
import functools
from typing import NamedTuple, Tuple

import numpy as np
import jax
import jax.numpy as jnp
from jax.experimental import pallas as pl
from jax.experimental.pallas import tpu as pltpu

BN_EPS = 1e-5        # nn.BatchNorm2d default eps
LRELU_SLOPE = 0.2    # nn.LeakyReLU(0.2)
KSIZE = 4
STRIDE = 2
PAD = 1


class EncoderMeta(NamedTuple):
    n_layers: int
    m_tots: Tuple[float, ...]   # BatchNorm counts N*H*W per layer
    h_fin: int                  # final spatial height (= width)
    lat: int                    # latent dims
    c_in_pad: int               # input channels after lane padding
    flops: int
    transcendentals: int
    bytes_accessed: int


# ---------------------------------------------------------------------------
# Host-side (numpy) constant builders — run ONCE at init, never inside jit.
# ---------------------------------------------------------------------------
def _row_select_mats(n, h_in, h_out):
    """S[kh] @ R == im2col along H (stride 2, pad 1), zero padding folded in."""
    s = np.zeros((KSIZE, n * h_out, n * h_in), np.float32)
    for kh in range(KSIZE):
        for b in range(n):
            for ho in range(h_out):
                hi = STRIDE * ho + kh - PAD
                if 0 <= hi < h_in:
                    s[kh, b * h_out + ho, b * h_in + hi] = 1.0
    return s


def _col_structure(w_in, w_out):
    """T[kw, wi, wo] = 1 iff wi == 2*wo + kw - 1 (valid, i.e. not padding)."""
    t = np.zeros((KSIZE, w_in, w_out), np.float32)
    for kw in range(KSIZE):
        for wo in range(w_out):
            wi = STRIDE * wo + kw - PAD
            if 0 <= wi < w_in:
                t[kw, wi, wo] = 1.0
    return t


def _channel_mix(w_out, c_out):
    """M[(wo,co),(wo',co')] = 1 iff co==co': per-channel sum over the wo lane
    groups and broadcast back, done as one 0/1 matmul."""
    return np.tile(np.eye(c_out, dtype=np.float32), (w_out, w_out))


def prepare_encoder(params, n, height, width):
    """One-time host-side repacking of PyTorch-layout weights into the fused
    kernel's constant operands.  Returns (consts_tuple, EncoderMeta)."""
    consts = []
    m_tots = []
    flops = 0
    transc = 0

    ht, wd = height, width
    c_in_orig = int(np.asarray(params["convs"][0][0]).shape[1])
    c_in = max(4, c_in_orig)        # pad channels so layer-1 lane width is 256
    c_pad = c_in

    first = True
    for (wconv, gamma, beta) in params["convs"]:
        wconv = np.asarray(wconv, np.float32)
        if first and c_in != c_in_orig:
            zpad = np.zeros((wconv.shape[0], c_in - c_in_orig,
                             wconv.shape[2], wconv.shape[3]), np.float32)
            wconv = np.concatenate([wconv, zpad], axis=1)
        first = False
        c_out = int(wconv.shape[0])
        h_out, w_out = ht // STRIDE, wd // STRIDE

        s = _row_select_mats(n, ht, h_out)                       # [4, n*h_out, n*ht]
        t = _col_structure(wd, w_out)                            # [4, wd, w_out]
        # A[kh, wi*Cin+ci, wo*Cout+co] = sum_kw T[kw,wi,wo] * wconv[co,ci,kh,kw]
        a = np.einsum("kxw,oihk->hxiwo", t, wconv)
        # kh-stacked big-K operand matching the lane-concatenated row gathers.
        a = a.reshape(KSIZE * wd * c_in, w_out * c_out)
        m = _channel_mix(w_out, c_out)
        g_full = np.tile(np.asarray(gamma, np.float32), w_out).reshape(1, w_out * c_out)
        b_full = np.tile(np.asarray(beta, np.float32), w_out).reshape(1, w_out * c_out)

        consts += [jnp.asarray(s, dtype=jnp.bfloat16),
                   jnp.asarray(a, dtype=jnp.bfloat16),
                   jnp.asarray(m, dtype=jnp.float32),
                   jnp.asarray(g_full), jnp.asarray(b_full)]
        m_tots.append(float(n * h_out * w_out))

        flops += 2 * KSIZE * (n * h_out) * (n * ht) * (wd * c_in)        # S gathers
        flops += 2 * (n * h_out) * (KSIZE * wd * c_in) * (w_out * c_out)  # conv matmul
        flops += 2 * 2 * (w_out * c_out) * (w_out * c_out)                # fused BN stats
        transc += w_out * c_out                                           # rsqrt lanes

        ht, wd, c_in = h_out, w_out, c_out

    # Head: fold (C,H,W) flatten order + both Linear layers (mu|logvar) into one
    # pre-stacked [h_fin*W*C, 2L] weight (matches the lane-concat of row blocks).
    wmu, bmu = params["linear_mu"]
    wlv, blv = params["linear_lv"]
    wmu = np.asarray(wmu, np.float32); bmu = np.asarray(bmu, np.float32)
    wlv = np.asarray(wlv, np.float32); blv = np.asarray(blv, np.float32)
    lat = int(wmu.shape[0])
    wcat = np.concatenate([wmu, wlv], axis=0)                     # [2L, C*H*W]
    w4 = wcat.reshape(2 * lat, c_in, ht, wd)                      # (c, h, w) order
    w_head = np.transpose(w4, (2, 3, 1, 0)).reshape(ht * wd * c_in, 2 * lat)
    b_head = np.concatenate([bmu, blv]).reshape(1, 2 * lat)
    rowsel = np.zeros((ht, n, n * ht), np.float32)
    for hh in range(ht):
        for b in range(n):
            rowsel[hh, b, b * ht + hh] = 1.0
    consts += [jnp.asarray(rowsel, dtype=jnp.bfloat16),
               jnp.asarray(w_head, dtype=jnp.bfloat16),
               jnp.asarray(b_head, dtype=jnp.float32)]
    flops += 2 * ht * n * (n * ht) * (wd * c_in)                  # row gathers
    flops += 2 * n * (ht * wd * c_in) * (2 * lat)                 # fused head matmul
    transc += n * lat                                             # exp in reparam

    bytes_accessed = sum(int(c.size) * c.dtype.itemsize for c in consts)
    bytes_accessed += n * height * width * c_pad * 4              # relayouted x
    bytes_accessed += n * lat * 4                                 # eps
    bytes_accessed += n * 3 * lat * 4                             # packed output

    meta = EncoderMeta(
        n_layers=len(params["convs"]), m_tots=tuple(m_tots), h_fin=ht, lat=lat,
        c_in_pad=c_pad, flops=int(flops), transcendentals=int(transc),
        bytes_accessed=int(bytes_accessed))
    return tuple(consts), meta


# ---------------------------------------------------------------------------
# The single fused kernel.
# ---------------------------------------------------------------------------
def _make_kernel(n_layers, m_tots, h_fin, lat):
    def kernel(*refs):
        x_ref = refs[0]
        layer_refs = refs[1:1 + 5 * n_layers]
        idx = 1 + 5 * n_layers
        rowsel_ref, wh_ref, bh_ref, eps_ref = refs[idx:idx + 4]
        out_ref = refs[idx + 4]

        r = x_ref[...]                                            # f32 [N*H, W*C]
        for layer in range(n_layers):
            s_ref, a_ref, m_ref, g_ref, b_ref = layer_refs[5 * layer:5 * layer + 5]
            rb = r.astype(jnp.bfloat16)
            # conv 4x4 / s2 / p1: im2col along H via 0/1 selection (exact in
            # bf16); the 4 kh taps are lane-concatenated -> ONE big-K matmul.
            rows = [jnp.dot(s_ref[kh], rb, preferred_element_type=jnp.float32)
                    for kh in range(KSIZE)]
            gath = jnp.concatenate(rows, axis=1).astype(jnp.bfloat16)
            acc = jnp.dot(gath, a_ref[...], preferred_element_type=jnp.float32)

            # training-mode BatchNorm2d: one-pass stats, both reductions fused
            # into a single [2, lanes] @ M matmul (all statistics in f32).
            # TODO(synk): E[y^2]-E[y]^2 can cancel for trained weights with
            #             large post-conv means; switch to a centered second
            #             pass if that ever matters.
            inv_m = 1.0 / m_tots[layer]
            stats = jnp.concatenate(
                [jnp.sum(acc, axis=0, keepdims=True),
                 jnp.sum(acc * acc, axis=0, keepdims=True)], axis=0)
            red = jnp.dot(stats, m_ref[...],
                          preferred_element_type=jnp.float32) * inv_m
            mean = red[0:1, :]
            var = red[1:2, :] - mean * mean
            scale = jax.lax.rsqrt(var + BN_EPS) * g_ref[...]
            yn = (acc - mean) * scale + b_ref[...]
            # LeakyReLU(0.2)
            r = jnp.where(yn >= 0.0, yn, LRELU_SLOPE * yn)

        # flatten (C,H,W order folded into w_head) + fused mu|logvar head:
        # lane-concat the h_fin image rows -> one [N, h*W*C] @ [h*W*C, 2L].
        rb = r.astype(jnp.bfloat16)
        blocks = [jnp.dot(rowsel_ref[hh], rb, preferred_element_type=jnp.float32)
                  for hh in range(h_fin)]
        feat = jnp.concatenate(blocks, axis=1).astype(jnp.bfloat16)
        head = jnp.dot(feat, wh_ref[...],
                       preferred_element_type=jnp.float32) + bh_ref[...]
        mu = head[:, :lat]
        logvar = head[:, lat:]
        std = jnp.exp(0.5 * logvar)               # logvar.mul(0.5).exp_()
        z = eps_ref[...] * std + mu               # eps.mul(std).add_(mu)
        # single packed [N, 3L] output (one writeback instead of three).
        out_ref[:, 0:lat] = z
        out_ref[:, lat:2 * lat] = mu
        out_ref[:, 2 * lat:3 * lat] = logvar

    return kernel


def _forward_impl(meta, consts, x, eps):
    n, c, height, width = x.shape
    if meta.c_in_pad != c:
        x = jnp.pad(x, ((0, 0), (0, meta.c_in_pad - c), (0, 0), (0, 0)))
    # NCHW -> matmul layout [N*H, W*C]: the only relayout in the whole forward.
    x_r = jnp.transpose(x, (0, 2, 3, 1)).reshape(n * height, width * meta.c_in_pad)

    kernel = _make_kernel(meta.n_layers, meta.m_tots, meta.h_fin, meta.lat)
    inputs = (x_r, *consts, eps)
    vmem = functools.partial(pl.BlockSpec, memory_space=pltpu.MemorySpace.VMEM)
    out = pl.pallas_call(
        kernel,
        out_shape=jax.ShapeDtypeStruct((n, 3 * meta.lat), jnp.float32),
        in_specs=[vmem() for _ in inputs],
        out_specs=vmem(),
        compiler_params=pltpu.CompilerParams(vmem_limit_bytes=32 * 1024 * 1024),
        cost_estimate=pl.CostEstimate(flops=meta.flops,
                                      transcendentals=meta.transcendentals,
                                      bytes_accessed=meta.bytes_accessed),
    )(*inputs)
    lat = meta.lat
    return out[:, :lat], out[:, lat:2 * lat], out[:, 2 * lat:]


# meta is a hashable NamedTuple of Python scalars -> static; consts/x/eps traced.
encoder_forward = jax.jit(_forward_impl, static_argnums=0)


# ---------------------------------------------------------------------------
# Pure-JAX reference of the PyTorch forward (for a numerical self-check).
# ---------------------------------------------------------------------------
def _reference_forward(params, x, eps):
    h = x
    for (w, gamma, beta) in params["convs"]:
        y = jax.lax.conv_general_dilated(
            h, w, window_strides=(STRIDE, STRIDE), padding=((PAD, PAD), (PAD, PAD)),
            dimension_numbers=("NCHW", "OIHW", "NCHW"))
        mean = jnp.mean(y, axis=(0, 2, 3), keepdims=True)
        var = jnp.mean(jnp.square(y - mean), axis=(0, 2, 3), keepdims=True)
        yn = (y - mean) * jax.lax.rsqrt(var + BN_EPS)
        yn = yn * gamma.reshape(1, -1, 1, 1) + beta.reshape(1, -1, 1, 1)
        h = jnp.where(yn >= 0.0, yn, LRELU_SLOPE * yn)
    flat = h.reshape(h.shape[0], -1)
    wmu, bmu = params["linear_mu"]
    wlv, blv = params["linear_lv"]
    mu = flat @ wmu.T + bmu
    lv = flat @ wlv.T + blv
    z = eps * jnp.exp(0.5 * lv) + mu
    return z, mu, lv


def init_params(key, nc, ndf, latent_dims):
    keys = iter(jax.random.split(key, 20))

    def conv_layer(cin, cout):
        w = 0.02 * jax.random.normal(next(keys), (cout, cin, KSIZE, KSIZE), jnp.float32)
        gamma = 1.0 + 0.1 * jax.random.normal(next(keys), (cout,), jnp.float32)
        beta = 0.1 * jax.random.normal(next(keys), (cout,), jnp.float32)
        return (w, gamma, beta)

    convs = [
        conv_layer(nc, ndf),
        conv_layer(ndf, ndf * 2),
        conv_layer(ndf * 2, ndf * 4),
        conv_layer(ndf * 4, ndf * 8),
        conv_layer(ndf * 8, ndf * 8),
    ]
    feat = ndf * 8 * 4
    wmu = 0.02 * jax.random.normal(next(keys), (latent_dims, feat), jnp.float32)
    bmu = 0.02 * jax.random.normal(next(keys), (latent_dims,), jnp.float32)
    wlv = 0.02 * jax.random.normal(next(keys), (latent_dims, feat), jnp.float32)
    blv = 0.02 * jax.random.normal(next(keys), (latent_dims,), jnp.float32)
    return {"convs": convs, "linear_mu": (wmu, bmu), "linear_lv": (wlv, blv)}


if __name__ == "__main__":
    nc, ndf, latent_dims = 3, 8, 16
    batch = 2
    # Spatial size must be 64x64: five stride-2 convs end at 2x2 so the flatten
    # matches the hard-coded ndf*8*4 input width of the linear heads.
    key = jax.random.PRNGKey(0)
    kp, kx, ke = jax.random.split(key, 3)

    params = init_params(kp, nc, ndf, latent_dims)
    x = jax.random.normal(kx, (batch, nc, 64, 64), jnp.float32)
    # TODO(synk): torch.FloatTensor(...).normal_() noise cannot be reproduced
    # bit-exactly; we draw standard-normal eps with the JAX PRNG instead.
    eps = jax.random.normal(ke, (batch, latent_dims), jnp.float32)

    # One-time host-side weight repacking (hoisted out of the jitted forward).
    consts, meta = prepare_encoder(params, batch, 64, 64)

    z, mu, logvar = encoder_forward(meta, consts, x, eps)
    jax.block_until_ready((z, mu, logvar))

    assert z.shape == (batch, latent_dims)
    assert mu.shape == (batch, latent_dims)
    assert logvar.shape == (batch, latent_dims)

    # Numerical self-check against the pure-JAX f32 reference of the PyTorch
    # forward (kernel uses bf16 MXU operands with f32 accumulation/statistics,
    # so the tolerance is set accordingly).
    z_r, mu_r, lv_r = _reference_forward(params, x, eps)
    for got, ref in ((z, z_r), (mu, mu_r), (logvar, lv_r)):
        err = float(jnp.max(jnp.abs(got - ref)))
        assert err < 5e-2, f"mismatch vs reference: max abs err {err}"

    print("KERNEL_OK")
</pallas_src>

<mosaic_0001>
module attributes {stable_mosaic.version = 11 : i64} {
  func.func @kernel(%arg0: memref<128x256xf32, #tpu.memory_space<vmem>>, %arg1: memref<4x64x128xbf16, #tpu.memory_space<vmem>>, %arg2: memref<1024x256xbf16, #tpu.memory_space<vmem>>, %arg3: memref<256x256xf32, #tpu.memory_space<vmem>>, %arg4: memref<1x256xf32, #tpu.memory_space<vmem>>, %arg5: memref<1x256xf32, #tpu.memory_space<vmem>>, %arg6: memref<4x32x64xbf16, #tpu.memory_space<vmem>>, %arg7: memref<1024x256xbf16, #tpu.memory_space<vmem>>, %arg8: memref<256x256xf32, #tpu.memory_space<vmem>>, %arg9: memref<1x256xf32, #tpu.memory_space<vmem>>, %arg10: memref<1x256xf32, #tpu.memory_space<vmem>>, %arg11: memref<4x16x32xbf16, #tpu.memory_space<vmem>>, %arg12: memref<1024x256xbf16, #tpu.memory_space<vmem>>, %arg13: memref<256x256xf32, #tpu.memory_space<vmem>>, %arg14: memref<1x256xf32, #tpu.memory_space<vmem>>, %arg15: memref<1x256xf32, #tpu.memory_space<vmem>>, %arg16: memref<4x8x16xbf16, #tpu.memory_space<vmem>>, %arg17: memref<1024x256xbf16, #tpu.memory_space<vmem>>, %arg18: memref<256x256xf32, #tpu.memory_space<vmem>>, %arg19: memref<1x256xf32, #tpu.memory_space<vmem>>, %arg20: memref<1x256xf32, #tpu.memory_space<vmem>>, %arg21: memref<4x4x8xbf16, #tpu.memory_space<vmem>>, %arg22: memref<1024x128xbf16, #tpu.memory_space<vmem>>, %arg23: memref<128x128xf32, #tpu.memory_space<vmem>>, %arg24: memref<1x128xf32, #tpu.memory_space<vmem>>, %arg25: memref<1x128xf32, #tpu.memory_space<vmem>>, %arg26: memref<2x2x4xbf16, #tpu.memory_space<vmem>>, %arg27: memref<256x32xbf16, #tpu.memory_space<vmem>>, %arg28: memref<1x32xf32, #tpu.memory_space<vmem>>, %arg29: memref<2x16xf32, #tpu.memory_space<vmem>>, %arg30: memref<2x48xf32, #tpu.memory_space<vmem>>) attributes {dimension_semantics = [], scalar_prefetch = 0 : i64, scratch_operands = 0 : i64, tpu.core_type = #tpu.core_type<tc>} {
    %c0 = arith.constant 0 : index
    %c0_0 = arith.constant 0 : index
    %0 = vector.load %arg0[%c0, %c0_0] : memref<128x256xf32, #tpu.memory_space<vmem>>, vector<128x256xf32>
    %1 = arith.truncf %0 : vector<128x256xf32> to vector<128x256xbf16>
    %c0_1 = arith.constant 0 : index
    %c0_2 = arith.constant 0 : index
    %c0_3 = arith.constant 0 : index
    %2 = vector.load %arg1[%c0_1, %c0_2, %c0_3] : memref<4x64x128xbf16, #tpu.memory_space<vmem>>, vector<1x64x128xbf16>
    %3 = vector.shape_cast %2 : vector<1x64x128xbf16> to vector<64x128xbf16>
    %cst = arith.constant dense<0.000000e+00> : vector<64x256xf32>
    %4 = tpu.matmul %3, %1, %cst {dimension_numbers = #tpu.dot_dimension_numbers<[1], [0], [0], [1], [0, 0, 1, 1], [], []>} : vector<64x128xbf16>, vector<128x256xbf16>, vector<64x256xf32> -> vector<64x256xf32>
    %c1 = arith.constant 1 : index
    %c0_4 = arith.constant 0 : index
    %c0_5 = arith.constant 0 : index
    %5 = vector.load %arg1[%c1, %c0_4, %c0_5] : memref<4x64x128xbf16, #tpu.memory_space<vmem>>, vector<1x64x128xbf16>
    %6 = vector.shape_cast %5 : vector<1x64x128xbf16> to vector<64x128xbf16>
    %cst_6 = arith.constant dense<0.000000e+00> : vector<64x256xf32>
    %7 = tpu.matmul %6, %1, %cst_6 {dimension_numbers = #tpu.dot_dimension_numbers<[1], [0], [0], [1], [0, 0, 1, 1], [], []>} : vector<64x128xbf16>, vector<128x256xbf16>, vector<64x256xf32> -> vector<64x256xf32>
    %c2 = arith.constant 2 : index
    %c0_7 = arith.constant 0 : index
    %c0_8 = arith.constant 0 : index
    %8 = vector.load %arg1[%c2, %c0_7, %c0_8] : memref<4x64x128xbf16, #tpu.memory_space<vmem>>, vector<1x64x128xbf16>
    %9 = vector.shape_cast %8 : vector<1x64x128xbf16> to vector<64x128xbf16>
    %cst_9 = arith.constant dense<0.000000e+00> : vector<64x256xf32>
    %10 = tpu.matmul %9, %1, %cst_9 {dimension_numbers = #tpu.dot_dimension_numbers<[1], [0], [0], [1], [0, 0, 1, 1], [], []>} : vector<64x128xbf16>, vector<128x256xbf16>, vector<64x256xf32> -> vector<64x256xf32>
    %c3 = arith.constant 3 : index
    %c0_10 = arith.constant 0 : index
    %c0_11 = arith.constant 0 : index
    %11 = vector.load %arg1[%c3, %c0_10, %c0_11] : memref<4x64x128xbf16, #tpu.memory_space<vmem>>, vector<1x64x128xbf16>
    %12 = vector.shape_cast %11 : vector<1x64x128xbf16> to vector<64x128xbf16>
    %cst_12 = arith.constant dense<0.000000e+00> : vector<64x256xf32>
    %13 = tpu.matmul %12, %1, %cst_12 {dimension_numbers = #tpu.dot_dimension_numbers<[1], [0], [0], [1], [0, 0, 1, 1], [], []>} : vector<64x128xbf16>, vector<128x256xbf16>, vector<64x256xf32> -> vector<64x256xf32>
    %14 = tpu.concatenate %4, %7, %10, %13 in 1 : vector<64x256xf32>, vector<64x256xf32>, vector<64x256xf32>, vector<64x256xf32> -> vector<64x1024xf32>
    %15 = arith.truncf %14 : vector<64x1024xf32> to vector<64x1024xbf16>
    %c0_13 = arith.constant 0 : index
    %c0_14 = arith.constant 0 : index
    %16 = vector.load %arg2[%c0_13, %c0_14] : memref<1024x256xbf16, #tpu.memory_space<vmem>>, vector<1024x256xbf16>
    %cst_15 = arith.constant dense<0.000000e+00> : vector<64x256xf32>
    %17 = tpu.matmul %15, %16, %cst_15 {dimension_numbers = #tpu.dot_dimension_numbers<[1], [0], [0], [1], [0, 0, 1, 1], [], []>} : vector<64x1024xbf16>, vector<1024x256xbf16>, vector<64x256xf32> -> vector<64x256xf32>
    %cst_16 = arith.constant dense<0.000000e+00> : vector<256xf32>
    %18 = vector.multi_reduction <add>, %17, %cst_16 [0] : vector<64x256xf32> to vector<256xf32>
    %19 = vector.shape_cast %18 : vector<256xf32> to vector<1x256xf32>
    %20 = arith.mulf %17, %17 : vector<64x256xf32>
    %cst_17 = arith.constant dense<0.000000e+00> : vector<256xf32>
    %21 = vector.multi_reduction <add>, %20, %cst_17 [0] : vector<64x256xf32> to vector<256xf32>
    %22 = vector.shape_cast %21 : vector<256xf32> to vector<1x256xf32>
    %23 = tpu.concatenate %19, %22 in 0 : vector<1x256xf32>, vector<1x256xf32> -> vector<2x256xf32>
    %c0_18 = arith.constant 0 : index
    %c0_19 = arith.constant 0 : index
    %24 = vector.load %arg3[%c0_18, %c0_19] : memref<256x256xf32, #tpu.memory_space<vmem>>, vector<256x256xf32>
    %cst_20 = arith.constant dense<0.000000e+00> : vector<2x256xf32>
    %25 = tpu.matmul %23, %24, %cst_20 {dimension_numbers = #tpu.dot_dimension_numbers<[1], [0], [0], [1], [0, 0, 1, 1], [], []>} : vector<2x256xf32>, vector<256x256xf32>, vector<2x256xf32> -> vector<2x256xf32>
    %cst_21 = arith.constant 4.8828125E-4 : f32
    %26 = vector.broadcast %cst_21 : f32 to vector<2x256xf32>
    %27 = arith.mulf %25, %26 : vector<2x256xf32>
    %28 = vector.extract_strided_slice %27 {offsets = [0, 0], sizes = [1, 256], strides = [1, 1]} : vector<2x256xf32> to vector<1x256xf32>
    %29 = vector.extract_strided_slice %27 {offsets = [1, 0], sizes = [1, 256], strides = [1, 1]} : vector<2x256xf32> to vector<1x256xf32>
    %30 = arith.mulf %28, %28 : vector<1x256xf32>
    %31 = arith.subf %29, %30 : vector<1x256xf32>
    %cst_22 = arith.constant 9.99999974E-6 : f32
    %32 = vector.broadcast %cst_22 : f32 to vector<1x256xf32>
    %33 = arith.addf %31, %32 : vector<1x256xf32>
    %34 = math.rsqrt %33 : vector<1x256xf32>
    %c0_23 = arith.constant 0 : index
    %c0_24 = arith.constant 0 : index
    %35 = vector.load %arg4[%c0_23, %c0_24] : memref<1x256xf32, #tpu.memory_space<vmem>>, vector<1x256xf32>
    %36 = arith.mulf %34, %35 : vector<1x256xf32>
    %37 = vector.broadcast %28 : vector<1x256xf32> to vector<64x256xf32>
    %38 = arith.subf %17, %37 : vector<64x256xf32>
    %39 = vector.broadcast %36 : vector<1x256xf32> to vector<64x256xf32>
    %40 = arith.mulf %38, %39 : vector<64x256xf32>
    %c0_25 = arith.constant 0 : index
    %c0_26 = arith.constant 0 : index
    %41 = vector.load %arg5[%c0_25, %c0_26] : memref<1x256xf32, #tpu.memory_space<vmem>>, vector<1x256xf32>
    %42 = vector.broadcast %41 : vector<1x256xf32> to vector<64x256xf32>
    %43 = arith.addf %40, %42 : vector<64x256xf32>
    %cst_27 = arith.constant 0.000000e+00 : f32
    %44 = vector.broadcast %cst_27 : f32 to vector<64x256xf32>
    %45 = arith.cmpf oge, %43, %44 : vector<64x256xf32>
    %cst_28 = arith.constant 2.000000e-01 : f32
    %46 = vector.broadcast %cst_28 : f32 to vector<64x256xf32>
    %47 = arith.mulf %46, %43 : vector<64x256xf32>
    %48 = arith.select %45, %43, %47 : vector<64x256xi1>, vector<64x256xf32>
    %49 = arith.truncf %48 : vector<64x256xf32> to vector<64x256xbf16>
    %c0_29 = arith.constant 0 : index
    %c0_30 = arith.constant 0 : index
    %c0_31 = arith.constant 0 : index
    %50 = vector.load %arg6[%c0_29, %c0_30, %c0_31] : memref<4x32x64xbf16, #tpu.memory_space<vmem>>, vector<1x32x64xbf16>
    %51 = vector.shape_cast %50 : vector<1x32x64xbf16> to vector<32x64xbf16>
    %cst_32 = arith.constant dense<0.000000e+00> : vector<32x256xf32>
    %52 = tpu.matmul %51, %49, %cst_32 {dimension_numbers = #tpu.dot_dimension_numbers<[1], [0], [0], [1], [0, 0, 1, 1], [], []>} : vector<32x64xbf16>, vector<64x256xbf16>, vector<32x256xf32> -> vector<32x256xf32>
    %c1_33 = arith.constant 1 : index
    %c0_34 = arith.constant 0 : index
    %c0_35 = arith.constant 0 : index
    %53 = vector.load %arg6[%c1_33, %c0_34, %c0_35] : memref<4x32x64xbf16, #tpu.memory_space<vmem>>, vector<1x32x64xbf16>
    %54 = vector.shape_cast %53 : vector<1x32x64xbf16> to vector<32x64xbf16>
    %cst_36 = arith.constant dense<0.000000e+00> : vector<32x256xf32>
    %55 = tpu.matmul %54, %49, %cst_36 {dimension_numbers = #tpu.dot_dimension_numbers<[1], [0], [0], [1], [0, 0, 1, 1], [], []>} : vector<32x64xbf16>, vector<64x256xbf16>, vector<32x256xf32> -> vector<32x256xf32>
    %c2_37 = arith.constant 2 : index
    %c0_38 = arith.constant 0 : index
    %c0_39 = arith.constant 0 : index
    %56 = vector.load %arg6[%c2_37, %c0_38, %c0_39] : memref<4x32x64xbf16, #tpu.memory_space<vmem>>, vector<1x32x64xbf16>
    %57 = vector.shape_cast %56 : vector<1x32x64xbf16> to vector<32x64xbf16>
    %cst_40 = arith.constant dense<0.000000e+00> : vector<32x256xf32>
    %58 = tpu.matmul %57, %49, %cst_40 {dimension_numbers = #tpu.dot_dimension_numbers<[1], [0], [0], [1], [0, 0, 1, 1], [], []>} : vector<32x64xbf16>, vector<64x256xbf16>, vector<32x256xf32> -> vector<32x256xf32>
    %c3_41 = arith.constant 3 : index
    %c0_42 = arith.constant 0 : index
    %c0_43 = arith.constant 0 : index
    %59 = vector.load %arg6[%c3_41, %c0_42, %c0_43] : memref<4x32x64xbf16, #tpu.memory_space<vmem>>, vector<1x32x64xbf16>
    %60 = vector.shape_cast %59 : vector<1x32x64xbf16> to vector<32x64xbf16>
    %cst_44 = arith.constant dense<0.000000e+00> : vector<32x256xf32>
    %61 = tpu.matmul %60, %49, %cst_44 {dimension_numbers = #tpu.dot_dimension_numbers<[1], [0], [0], [1], [0, 0, 1, 1], [], []>} : vector<32x64xbf16>, vector<64x256xbf16>, vector<32x256xf32> -> vector<32x256xf32>
    %62 = tpu.concatenate %52, %55, %58, %61 in 1 : vector<32x256xf32>, vector<32x256xf32>, vector<32x256xf32>, vector<32x256xf32> -> vector<32x1024xf32>
    %63 = arith.truncf %62 : vector<32x1024xf32> to vector<32x1024xbf16>
    %c0_45 = arith.constant 0 : index
    %c0_46 = arith.constant 0 : index
    %64 = vector.load %arg7[%c0_45, %c0_46] : memref<1024x256xbf16, #tpu.memory_space<vmem>>, vector<1024x256xbf16>
    %cst_47 = arith.constant dense<0.000000e+00> : vector<32x256xf32>
    %65 = tpu.matmul %63, %64, %cst_47 {dimension_numbers = #tpu.dot_dimension_numbers<[1], [0], [0], [1], [0, 0, 1, 1], [], []>} : vector<32x1024xbf16>, vector<1024x256xbf16>, vector<32x256xf32> -> vector<32x256xf32>
    %cst_48 = arith.constant dense<0.000000e+00> : vector<256xf32>
    %66 = vector.multi_reduction <add>, %65, %cst_48 [0] : vector<32x256xf32> to vector<256xf32>
    %67 = vector.shape_cast %66 : vector<256xf32> to vector<1x256xf32>
    %68 = arith.mulf %65, %65 : vector<32x256xf32>
    %cst_49 = arith.constant dense<0.000000e+00> : vector<256xf32>
    %69 = vector.multi_reduction <add>, %68, %cst_49 [0] : vector<32x256xf32> to vector<256xf32>
    %70 = vector.shape_cast %69 : vector<256xf32> to vector<1x256xf32>
    %71 = tpu.concatenate %67, %70 in 0 : vector<1x256xf32>, vector<1x256xf32> -> vector<2x256xf32>
    %c0_50 = arith.constant 0 : index
    %c0_51 = arith.constant 0 : index
    %72 = vector.load %arg8[%c0_50, %c0_51] : memref<256x256xf32, #tpu.memory_space<vmem>>, vector<256x256xf32>
    %cst_52 = arith.constant dense<0.000000e+00> : vector<2x256xf32>
    %73 = tpu.matmul %71, %72, %cst_52 {dimension_numbers = #tpu.dot_dimension_numbers<[1], [0], [0], [1], [0, 0, 1, 1], [], []>} : vector<2x256xf32>, vector<256x256xf32>, vector<2x256xf32> -> vector<2x256xf32>
    %cst_53 = arith.constant 0.001953125 : f32
    %74 = vector.broadcast %cst_53 : f32 to vector<2x256xf32>
    %75 = arith.mulf %73, %74 : vector<2x256xf32>
    %76 = vector.extract_strided_slice %75 {offsets = [0, 0], sizes = [1, 256], strides = [1, 1]} : vector<2x256xf32> to vector<1x256xf32>
    %77 = vector.extract_strided_slice %75 {offsets = [1, 0], sizes = [1, 256], strides = [1, 1]} : vector<2x256xf32> to vector<1x256xf32>
    %78 = arith.mulf %76, %76 : vector<1x256xf32>
    %79 = arith.subf %77, %78 : vector<1x256xf32>
    %cst_54 = arith.constant 9.99999974E-6 : f32
    %80 = vector.broadcast %cst_54 : f32 to vector<1x256xf32>
    %81 = arith.addf %79, %80 : vector<1x256xf32>
    %82 = math.rsqrt %81 : vector<1x256xf32>
    %c0_55 = arith.constant 0 : index
    %c0_56 = arith.constant 0 : index
    %83 = vector.load %arg9[%c0_55, %c0_56] : memref<1x256xf32, #tpu.memory_space<vmem>>, vector<1x256xf32>
    %84 = arith.mulf %82, %83 : vector<1x256xf32>
    %85 = vector.broadcast %76 : vector<1x256xf32> to vector<32x256xf32>
    %86 = arith.subf %65, %85 : vector<32x256xf32>
    %87 = vector.broadcast %84 : vector<1x256xf32> to vector<32x256xf32>
    %88 = arith.mulf %86, %87 : vector<32x256xf32>
    %c0_57 = arith.constant 0 : index
    %c0_58 = arith.constant 0 : index
    %89 = vector.load %arg10[%c0_57, %c0_58] : memref<1x256xf32, #tpu.memory_space<vmem>>, vector<1x256xf32>
    %90 = vector.broadcast %89 : vector<1x256xf32> to vector<32x256xf32>
    %91 = arith.addf %88, %90 : vector<32x256xf32>
    %cst_59 = arith.constant 0.000000e+00 : f32
    %92 = vector.broadcast %cst_59 : f32 to vector<32x256xf32>
    %93 = arith.cmpf oge, %91, %92 : vector<32x256xf32>
    %cst_60 = arith.constant 2.000000e-01 : f32
    %94 = vector.broadcast %cst_60 : f32 to vector<32x256xf32>
    %95 = arith.mulf %94, %91 : vector<32x256xf32>
    %96 = arith.select %93, %91, %95 : vector<32x256xi1>, vector<32x256xf32>
    %97 = arith.truncf %96 : vector<32x256xf32> to vector<32x256xbf16>
    %c0_61 = arith.constant 0 : index
    %c0_62 = arith.constant 0 : index
    %c0_63 = arith.constant 0 : index
    %98 = vector.load %arg11[%c0_61, %c0_62, %c0_63] : memref<4x16x32xbf16, #tpu.memory_space<vmem>>, vector<1x16x32xbf16>
    %99 = vector.shape_cast %98 : vector<1x16x32xbf16> to vector<16x32xbf16>
    %cst_64 = arith.constant dense<0.000000e+00> : vector<16x256xf32>
    %100 = tpu.matmul %99, %97, %cst_64 {dimension_numbers = #tpu.dot_dimension_numbers<[1], [0], [0], [1], [0, 0, 1, 1], [], []>} : vector<16x32xbf16>, vector<32x256xbf16>, vector<16x256xf32> -> vector<16x256xf32>
    %c1_65 = arith.constant 1 : index
    %c0_66 = arith.constant 0 : index
    %c0_67 = arith.constant 0 : index
    %101 = vector.load %arg11[%c1_65, %c0_66, %c0_67] : memref<4x16x32xbf16, #tpu.memory_space<vmem>>, vector<1x16x32xbf16>
    %102 = vector.shape_cast %101 : vector<1x16x32xbf16> to vector<16x32xbf16>
    %cst_68 = arith.constant dense<0.000000e+00> : vector<16x256xf32>
    %103 = tpu.matmul %102, %97, %cst_68 {dimension_numbers = #tpu.dot_dimension_numbers<[1], [0], [0], [1], [0, 0, 1, 1], [], []>} : vector<16x32xbf16>, vector<32x256xbf16>, vector<16x256xf32> -> vector<16x256xf32>
    %c2_69 = arith.constant 2 : index
    %c0_70 = arith.constant 0 : index
    %c0_71 = arith.constant 0 : index
    %104 = vector.load %arg11[%c2_69, %c0_70, %c0_71] : memref<4x16x32xbf16, #tpu.memory_space<vmem>>, vector<1x16x32xbf16>
    %105 = vector.shape_cast %104 : vector<1x16x32xbf16> to vector<16x32xbf16>
    %cst_72 = arith.constant dense<0.000000e+00> : vector<16x256xf32>
    %106 = tpu.matmul %105, %97, %cst_72 {dimension_numbers = #tpu.dot_dimension_numbers<[1], [0], [0], [1], [0, 0, 1, 1], [], []>} : vector<16x32xbf16>, vector<32x256xbf16>, vector<16x256xf32> -> vector<16x256xf32>
    %c3_73 = arith.constant 3 : index
    %c0_74 = arith.constant 0 : index
    %c0_75 = arith.constant 0 : index
    %107 = vector.load %arg11[%c3_73, %c0_74, %c0_75] : memref<4x16x32xbf16, #tpu.memory_space<vmem>>, vector<1x16x32xbf16>
    %108 = vector.shape_cast %107 : vector<1x16x32xbf16> to vector<16x32xbf16>
    %cst_76 = arith.constant dense<0.000000e+00> : vector<16x256xf32>
    %109 = tpu.matmul %108, %97, %cst_76 {dimension_numbers = #tpu.dot_dimension_numbers<[1], [0], [0], [1], [0, 0, 1, 1], [], []>} : vector<16x32xbf16>, vector<32x256xbf16>, vector<16x256xf32> -> vector<16x256xf32>
    %110 = tpu.concatenate %100, %103, %106, %109 in 1 : vector<16x256xf32>, vector<16x256xf32>, vector<16x256xf32>, vector<16x256xf32> -> vector<16x1024xf32>
    %111 = arith.truncf %110 : vector<16x1024xf32> to vector<16x1024xbf16>
    %c0_77 = arith.constant 0 : index
    %c0_78 = arith.constant 0 : index
    %112 = vector.load %arg12[%c0_77, %c0_78] : memref<1024x256xbf16, #tpu.memory_space<vmem>>, vector<1024x256xbf16>
    %cst_79 = arith.constant dense<0.000000e+00> : vector<16x256xf32>
    %113 = tpu.matmul %111, %112, %cst_79 {dimension_numbers = #tpu.dot_dimension_numbers<[1], [0], [0], [1], [0, 0, 1, 1], [], []>} : vector<16x1024xbf16>, vector<1024x256xbf16>, vector<16x256xf32> -> vector<16x256xf32>
    %cst_80 = arith.constant dense<0.000000e+00> : vector<256xf32>
    %114 = vector.multi_reduction <add>, %113, %cst_80 [0] : vector<16x256xf32> to vector<256xf32>
    %115 = vector.shape_cast %114 : vector<256xf32> to vector<1x256xf32>
    %116 = arith.mulf %113, %113 : vector<16x256xf32>
    %cst_81 = arith.constant dense<0.000000e+00> : vector<256xf32>
    %117 = vector.multi_reduction <add>, %116, %cst_81 [0] : vector<16x256xf32> to vector<256xf32>
    %118 = vector.shape_cast %117 : vector<256xf32> to vector<1x256xf32>
    %119 = tpu.concatenate %115, %118 in 0 : vector<1x256xf32>, vector<1x256xf32> -> vector<2x256xf32>
    %c0_82 = arith.constant 0 : index
    %c0_83 = arith.constant 0 : index
    %120 = vector.load %arg13[%c0_82, %c0_83] : memref<256x256xf32, #tpu.memory_space<vmem>>, vector<256x256xf32>
    %cst_84 = arith.constant dense<0.000000e+00> : vector<2x256xf32>
    %121 = tpu.matmul %119, %120, %cst_84 {dimension_numbers = #tpu.dot_dimension_numbers<[1], [0], [0], [1], [0, 0, 1, 1], [], []>} : vector<2x256xf32>, vector<256x256xf32>, vector<2x256xf32> -> vector<2x256xf32>
    %cst_85 = arith.constant 7.812500e-03 : f32
    %122 = vector.broadcast %cst_85 : f32 to vector<2x256xf32>
    %123 = arith.mulf %121, %122 : vector<2x256xf32>
    %124 = vector.extract_strided_slice %123 {offsets = [0, 0], sizes = [1, 256], strides = [1, 1]} : vector<2x256xf32> to vector<1x256xf32>
    %125 = vector.extract_strided_slice %123 {offsets = [1, 0], sizes = [1, 256], strides = [1, 1]} : vector<2x256xf32> to vector<1x256xf32>
    %126 = arith.mulf %124, %124 : vector<1x256xf32>
    %127 = arith.subf %125, %126 : vector<1x256xf32>
    %cst_86 = arith.constant 9.99999974E-6 : f32
    %128 = vector.broadcast %cst_86 : f32 to vector<1x256xf32>
    %129 = arith.addf %127, %128 : vector<1x256xf32>
    %130 = math.rsqrt %129 : vector<1x256xf32>
    %c0_87 = arith.constant 0 : index
    %c0_88 = arith.constant 0 : index
    %131 = vector.load %arg14[%c0_87, %c0_88] : memref<1x256xf32, #tpu.memory_space<vmem>>, vector<1x256xf32>
    %132 = arith.mulf %130, %131 : vector<1x256xf32>
    %133 = vector.broadcast %124 : vector<1x256xf32> to vector<16x256xf32>
    %134 = arith.subf %113, %133 : vector<16x256xf32>
    %135 = vector.broadcast %132 : vector<1x256xf32> to vector<16x256xf32>
    %136 = arith.mulf %134, %135 : vector<16x256xf32>
    %c0_89 = arith.constant 0 : index
    %c0_90 = arith.constant 0 : index
    %137 = vector.load %arg15[%c0_89, %c0_90] : memref<1x256xf32, #tpu.memory_space<vmem>>, vector<1x256xf32>
    %138 = vector.broadcast %137 : vector<1x256xf32> to vector<16x256xf32>
    %139 = arith.addf %136, %138 : vector<16x256xf32>
    %cst_91 = arith.constant 0.000000e+00 : f32
    %140 = vector.broadcast %cst_91 : f32 to vector<16x256xf32>
    %141 = arith.cmpf oge, %139, %140 : vector<16x256xf32>
    %cst_92 = arith.constant 2.000000e-01 : f32
    %142 = vector.broadcast %cst_92 : f32 to vector<16x256xf32>
    %143 = arith.mulf %142, %139 : vector<16x256xf32>
    %144 = arith.select %141, %139, %143 : vector<16x256xi1>, vector<16x256xf32>
    %145 = arith.truncf %144 : vector<16x256xf32> to vector<16x256xbf16>
    %c0_93 = arith.constant 0 : index
    %c0_94 = arith.constant 0 : index
    %c0_95 = arith.constant 0 : index
    %146 = vector.load %arg16[%c0_93, %c0_94, %c0_95] : memref<4x8x16xbf16, #tpu.memory_space<vmem>>, vector<1x8x16xbf16>
    %147 = vector.shape_cast %146 : vector<1x8x16xbf16> to vector<8x16xbf16>
    %cst_96 = arith.constant dense<0.000000e+00> : vector<8x256xf32>
    %148 = tpu.matmul %147, %145, %cst_96 {dimension_numbers = #tpu.dot_dimension_numbers<[1], [0], [0], [1], [0, 0, 1, 1], [], []>} : vector<8x16xbf16>, vector<16x256xbf16>, vector<8x256xf32> -> vector<8x256xf32>
    %c1_97 = arith.constant 1 : index
    %c0_98 = arith.constant 0 : index
    %c0_99 = arith.constant 0 : index
    %149 = vector.load %arg16[%c1_97, %c0_98, %c0_99] : memref<4x8x16xbf16, #tpu.memory_space<vmem>>, vector<1x8x16xbf16>
    %150 = vector.shape_cast %149 : vector<1x8x16xbf16> to vector<8x16xbf16>
    %cst_100 = arith.constant dense<0.000000e+00> : vector<8x256xf32>
    %151 = tpu.matmul %150, %145, %cst_100 {dimension_numbers = #tpu.dot_dimension_numbers<[1], [0], [0], [1], [0, 0, 1, 1], [], []>} : vector<8x16xbf16>, vector<16x256xbf16>, vector<8x256xf32> -> vector<8x256xf32>
    %c2_101 = arith.constant 2 : index
    %c0_102 = arith.constant 0 : index
    %c0_103 = arith.constant 0 : index
    %152 = vector.load %arg16[%c2_101, %c0_102, %c0_103] : memref<4x8x16xbf16, #tpu.memory_space<vmem>>, vector<1x8x16xbf16>
    %153 = vector.shape_cast %152 : vector<1x8x16xbf16> to vector<8x16xbf16>
    %cst_104 = arith.constant dense<0.000000e+00> : vector<8x256xf32>
    %154 = tpu.matmul %153, %145, %cst_104 {dimension_numbers = #tpu.dot_dimension_numbers<[1], [0], [0], [1], [0, 0, 1, 1], [], []>} : vector<8x16xbf16>, vector<16x256xbf16>, vector<8x256xf32> -> vector<8x256xf32>
    %c3_105 = arith.constant 3 : index
    %c0_106 = arith.constant 0 : index
    %c0_107 = arith.constant 0 : index
    %155 = vector.load %arg16[%c3_105, %c0_106, %c0_107] : memref<4x8x16xbf16, #tpu.memory_space<vmem>>, vector<1x8x16xbf16>
    %156 = vector.shape_cast %155 : vector<1x8x16xbf16> to vector<8x16xbf16>
    %cst_108 = arith.constant dense<0.000000e+00> : vector<8x256xf32>
    %157 = tpu.matmul %156, %145, %cst_108 {dimension_numbers = #tpu.dot_dimension_numbers<[1], [0], [0], [1], [0, 0, 1, 1], [], []>} : vector<8x16xbf16>, vector<16x256xbf16>, vector<8x256xf32> -> vector<8x256xf32>
    %158 = tpu.concatenate %148, %151, %154, %157 in 1 : vector<8x256xf32>, vector<8x256xf32>, vector<8x256xf32>, vector<8x256xf32> -> vector<8x1024xf32>
    %159 = arith.truncf %158 : vector<8x1024xf32> to vector<8x1024xbf16>
    %c0_109 = arith.constant 0 : index
    %c0_110 = arith.constant 0 : index
    %160 = vector.load %arg17[%c0_109, %c0_110] : memref<1024x256xbf16, #tpu.memory_space<vmem>>, vector<1024x256xbf16>
    %cst_111 = arith.constant dense<0.000000e+00> : vector<8x256xf32>
    %161 = tpu.matmul %159, %160, %cst_111 {dimension_numbers = #tpu.dot_dimension_numbers<[1], [0], [0], [1], [0, 0, 1, 1], [], []>} : vector<8x1024xbf16>, vector<1024x256xbf16>, vector<8x256xf32> -> vector<8x256xf32>
    %cst_112 = arith.constant dense<0.000000e+00> : vector<256xf32>
    %162 = vector.multi_reduction <add>, %161, %cst_112 [0] : vector<8x256xf32> to vector<256xf32>
    %163 = vector.shape_cast %162 : vector<256xf32> to vector<1x256xf32>
    %164 = arith.mulf %161, %161 : vector<8x256xf32>
    %cst_113 = arith.constant dense<0.000000e+00> : vector<256xf32>
    %165 = vector.multi_reduction <add>, %164, %cst_113 [0] : vector<8x256xf32> to vector<256xf32>
    %166 = vector.shape_cast %165 : vector<256xf32> to vector<1x256xf32>
    %167 = tpu.concatenate %163, %166 in 0 : vector<1x256xf32>, vector<1x256xf32> -> vector<2x256xf32>
    %c0_114 = arith.constant 0 : index
    %c0_115 = arith.constant 0 : index
    %168 = vector.load %arg18[%c0_114, %c0_115] : memref<256x256xf32, #tpu.memory_space<vmem>>, vector<256x256xf32>
    %cst_116 = arith.constant dense<0.000000e+00> : vector<2x256xf32>
    %169 = tpu.matmul %167, %168, %cst_116 {dimension_numbers = #tpu.dot_dimension_numbers<[1], [0], [0], [1], [0, 0, 1, 1], [], []>} : vector<2x256xf32>, vector<256x256xf32>, vector<2x256xf32> -> vector<2x256xf32>
    %cst_117 = arith.constant 3.125000e-02 : f32
    %170 = vector.broadcast %cst_117 : f32 to vector<2x256xf32>
    %171 = arith.mulf %169, %170 : vector<2x256xf32>
    %172 = vector.extract_strided_slice %171 {offsets = [0, 0], sizes = [1, 256], strides = [1, 1]} : vector<2x256xf32> to vector<1x256xf32>
    %173 = vector.extract_strided_slice %171 {offsets = [1, 0], sizes = [1, 256], strides = [1, 1]} : vector<2x256xf32> to vector<1x256xf32>
    %174 = arith.mulf %172, %172 : vector<1x256xf32>
    %175 = arith.subf %173, %174 : vector<1x256xf32>
    %cst_118 = arith.constant 9.99999974E-6 : f32
    %176 = vector.broadcast %cst_118 : f32 to vector<1x256xf32>
    %177 = arith.addf %175, %176 : vector<1x256xf32>
    %178 = math.rsqrt %177 : vector<1x256xf32>
    %c0_119 = arith.constant 0 : index
    %c0_120 = arith.constant 0 : index
    %179 = vector.load %arg19[%c0_119, %c0_120] : memref<1x256xf32, #tpu.memory_space<vmem>>, vector<1x256xf32>
    %180 = arith.mulf %178, %179 : vector<1x256xf32>
    %181 = vector.broadcast %172 : vector<1x256xf32> to vector<8x256xf32>
    %182 = arith.subf %161, %181 : vector<8x256xf32>
    %183 = vector.broadcast %180 : vector<1x256xf32> to vector<8x256xf32>
    %184 = arith.mulf %182, %183 : vector<8x256xf32>
    %c0_121 = arith.constant 0 : index
    %c0_122 = arith.constant 0 : index
    %185 = vector.load %arg20[%c0_121, %c0_122] : memref<1x256xf32, #tpu.memory_space<vmem>>, vector<1x256xf32>
    %186 = vector.broadcast %185 : vector<1x256xf32> to vector<8x256xf32>
    %187 = arith.addf %184, %186 : vector<8x256xf32>
    %cst_123 = arith.constant 0.000000e+00 : f32
    %188 = vector.broadcast %cst_123 : f32 to vector<8x256xf32>
    %189 = arith.cmpf oge, %187, %188 : vector<8x256xf32>
    %cst_124 = arith.constant 2.000000e-01 : f32
    %190 = vector.broadcast %cst_124 : f32 to vector<8x256xf32>
    %191 = arith.mulf %190, %187 : vector<8x256xf32>
    %192 = arith.select %189, %187, %191 : vector<8x256xi1>, vector<8x256xf32>
    %193 = arith.truncf %192 : vector<8x256xf32> to vector<8x256xbf16>
    %c0_125 = arith.constant 0 : index
    %c0_126 = arith.constant 0 : index
    %c0_127 = arith.constant 0 : index
    %194 = vector.load %arg21[%c0_125, %c0_126, %c0_127] : memref<4x4x8xbf16, #tpu.memory_space<vmem>>, vector<1x4x8xbf16>
    %195 = vector.shape_cast %194 : vector<1x4x8xbf16> to vector<4x8xbf16>
    %cst_128 = arith.constant dense<0.000000e+00> : vector<4x256xf32>
    %196 = tpu.matmul %195, %193, %cst_128 {dimension_numbers = #tpu.dot_dimension_numbers<[1], [0], [0], [1], [0, 0, 1, 1], [], []>} : vector<4x8xbf16>, vector<8x256xbf16>, vector<4x256xf32> -> vector<4x256xf32>
    %c1_129 = arith.constant 1 : index
    %c0_130 = arith.constant 0 : index
    %c0_131 = arith.constant 0 : index
    %197 = vector.load %arg21[%c1_129, %c0_130, %c0_131] : memref<4x4x8xbf16, #tpu.memory_space<vmem>>, vector<1x4x8xbf16>
    %198 = vector.shape_cast %197 : vector<1x4x8xbf16> to vector<4x8xbf16>
    %cst_132 = arith.constant dense<0.000000e+00> : vector<4x256xf32>
    %199 = tpu.matmul %198, %193, %cst_132 {dimension_numbers = #tpu.dot_dimension_numbers<[1], [0], [0], [1], [0, 0, 1, 1], [], []>} : vector<4x8xbf16>, vector<8x256xbf16>, vector<4x256xf32> -> vector<4x256xf32>
    %c2_133 = arith.constant 2 : index
    %c0_134 = arith.constant 0 : index
    %c0_135 = arith.constant 0 : index
    %200 = vector.load %arg21[%c2_133, %c0_134, %c0_135] : memref<4x4x8xbf16, #tpu.memory_space<vmem>>, vector<1x4x8xbf16>
    %201 = vector.shape_cast %200 : vector<1x4x8xbf16> to vector<4x8xbf16>
    %cst_136 = arith.constant dense<0.000000e+00> : vector<4x256xf32>
    %202 = tpu.matmul %201, %193, %cst_136 {dimension_numbers = #tpu.dot_dimension_numbers<[1], [0], [0], [1], [0, 0, 1, 1], [], []>} : vector<4x8xbf16>, vector<8x256xbf16>, vector<4x256xf32> -> vector<4x256xf32>
    %c3_137 = arith.constant 3 : index
    %c0_138 = arith.constant 0 : index
    %c0_139 = arith.constant 0 : index
    %203 = vector.load %arg21[%c3_137, %c0_138, %c0_139] : memref<4x4x8xbf16, #tpu.memory_space<vmem>>, vector<1x4x8xbf16>
    %204 = vector.shape_cast %203 : vector<1x4x8xbf16> to vector<4x8xbf16>
    %cst_140 = arith.constant dense<0.000000e+00> : vector<4x256xf32>
    %205 = tpu.matmul %204, %193, %cst_140 {dimension_numbers = #tpu.dot_dimension_numbers<[1], [0], [0], [1], [0, 0, 1, 1], [], []>} : vector<4x8xbf16>, vector<8x256xbf16>, vector<4x256xf32> -> vector<4x256xf32>
    %206 = tpu.concatenate %196, %199, %202, %205 in 1 : vector<4x256xf32>, vector<4x256xf32>, vector<4x256xf32>, vector<4x256xf32> -> vector<4x1024xf32>
    %207 = arith.truncf %206 : vector<4x1024xf32> to vector<4x1024xbf16>
    %c0_141 = arith.constant 0 : index
    %c0_142 = arith.constant 0 : index
    %208 = vector.load %arg22[%c0_141, %c0_142] : memref<1024x128xbf16, #tpu.memory_space<vmem>>, vector<1024x128xbf16>
    %cst_143 = arith.constant dense<0.000000e+00> : vector<4x128xf32>
    %209 = tpu.matmul %207, %208, %cst_143 {dimension_numbers = #tpu.dot_dimension_numbers<[1], [0], [0], [1], [0, 0, 1, 1], [], []>} : vector<4x1024xbf16>, vector<1024x128xbf16>, vector<4x128xf32> -> vector<4x128xf32>
    %cst_144 = arith.constant dense<0.000000e+00> : vector<128xf32>
    %210 = vector.multi_reduction <add>, %209, %cst_144 [0] : vector<4x128xf32> to vector<128xf32>
    %211 = vector.shape_cast %210 : vector<128xf32> to vector<1x128xf32>
    %212 = arith.mulf %209, %209 : vector<4x128xf32>
    %cst_145 = arith.constant dense<0.000000e+00> : vector<128xf32>
    %213 = vector.multi_reduction <add>, %212, %cst_145 [0] : vector<4x128xf32> to vector<128xf32>
    %214 = vector.shape_cast %213 : vector<128xf32> to vector<1x128xf32>
    %215 = tpu.concatenate %211, %214 in 0 : vector<1x128xf32>, vector<1x128xf32> -> vector<2x128xf32>
    %c0_146 = arith.constant 0 : index
    %c0_147 = arith.constant 0 : index
    %216 = vector.load %arg23[%c0_146, %c0_147] : memref<128x128xf32, #tpu.memory_space<vmem>>, vector<128x128xf32>
    %cst_148 = arith.constant dense<0.000000e+00> : vector<2x128xf32>
    %217 = tpu.matmul %215, %216, %cst_148 {dimension_numbers = #tpu.dot_dimension_numbers<[1], [0], [0], [1], [0, 0, 1, 1], [], []>} : vector<2x128xf32>, vector<128x128xf32>, vector<2x128xf32> -> vector<2x128xf32>
    %cst_149 = arith.constant 1.250000e-01 : f32
    %218 = vector.broadcast %cst_149 : f32 to vector<2x128xf32>
    %219 = arith.mulf %217, %218 : vector<2x128xf32>
    %220 = vector.extract_strided_slice %219 {offsets = [0, 0], sizes = [1, 128], strides = [1, 1]} : vector<2x128xf32> to vector<1x128xf32>
    %221 = vector.extract_strided_slice %219 {offsets = [1, 0], sizes = [1, 128], strides = [1, 1]} : vector<2x128xf32> to vector<1x128xf32>
    %222 = arith.mulf %220, %220 : vector<1x128xf32>
    %223 = arith.subf %221, %222 : vector<1x128xf32>
    %cst_150 = arith.constant 9.99999974E-6 : f32
    %224 = vector.broadcast %cst_150 : f32 to vector<1x128xf32>
    %225 = arith.addf %223, %224 : vector<1x128xf32>
    %226 = math.rsqrt %225 : vector<1x128xf32>
    %c0_151 = arith.constant 0 : index
    %c0_152 = arith.constant 0 : index
    %227 = vector.load %arg24[%c0_151, %c0_152] : memref<1x128xf32, #tpu.memory_space<vmem>>, vector<1x128xf32>
    %228 = arith.mulf %226, %227 : vector<1x128xf32>
    %229 = vector.broadcast %220 : vector<1x128xf32> to vector<4x128xf32>
    %230 = arith.subf %209, %229 : vector<4x128xf32>
    %231 = vector.broadcast %228 : vector<1x128xf32> to vector<4x128xf32>
    %232 = arith.mulf %230, %231 : vector<4x128xf32>
    %c0_153 = arith.constant 0 : index
    %c0_154 = arith.constant 0 : index
    %233 = vector.load %arg25[%c0_153, %c0_154] : memref<1x128xf32, #tpu.memory_space<vmem>>, vector<1x128xf32>
    %234 = vector.broadcast %233 : vector<1x128xf32> to vector<4x128xf32>
    %235 = arith.addf %232, %234 : vector<4x128xf32>
    %cst_155 = arith.constant 0.000000e+00 : f32
    %236 = vector.broadcast %cst_155 : f32 to vector<4x128xf32>
    %237 = arith.cmpf oge, %235, %236 : vector<4x128xf32>
    %cst_156 = arith.constant 2.000000e-01 : f32
    %238 = vector.broadcast %cst_156 : f32 to vector<4x128xf32>
    %239 = arith.mulf %238, %235 : vector<4x128xf32>
    %240 = arith.select %237, %235, %239 : vector<4x128xi1>, vector<4x128xf32>
    %241 = arith.truncf %240 : vector<4x128xf32> to vector<4x128xbf16>
    %c0_157 = arith.constant 0 : index
    %c0_158 = arith.constant 0 : index
    %c0_159 = arith.constant 0 : index
    %242 = vector.load %arg26[%c0_157, %c0_158, %c0_159] : memref<2x2x4xbf16, #tpu.memory_space<vmem>>, vector<1x2x4xbf16>
    %243 = vector.shape_cast %242 : vector<1x2x4xbf16> to vector<2x4xbf16>
    %cst_160 = arith.constant dense<0.000000e+00> : vector<2x128xf32>
    %244 = tpu.matmul %243, %241, %cst_160 {dimension_numbers = #tpu.dot_dimension_numbers<[1], [0], [0], [1], [0, 0, 1, 1], [], []>} : vector<2x4xbf16>, vector<4x128xbf16>, vector<2x128xf32> -> vector<2x128xf32>
    %c1_161 = arith.constant 1 : index
    %c0_162 = arith.constant 0 : index
    %c0_163 = arith.constant 0 : index
    %245 = vector.load %arg26[%c1_161, %c0_162, %c0_163] : memref<2x2x4xbf16, #tpu.memory_space<vmem>>, vector<1x2x4xbf16>
    %246 = vector.shape_cast %245 : vector<1x2x4xbf16> to vector<2x4xbf16>
    %cst_164 = arith.constant dense<0.000000e+00> : vector<2x128xf32>
    %247 = tpu.matmul %246, %241, %cst_164 {dimension_numbers = #tpu.dot_dimension_numbers<[1], [0], [0], [1], [0, 0, 1, 1], [], []>} : vector<2x4xbf16>, vector<4x128xbf16>, vector<2x128xf32> -> vector<2x128xf32>
    %248 = tpu.concatenate %244, %247 in 1 : vector<2x128xf32>, vector<2x128xf32> -> vector<2x256xf32>
    %249 = arith.truncf %248 : vector<2x256xf32> to vector<2x256xbf16>
    %c0_165 = arith.constant 0 : index
    %c0_166 = arith.constant 0 : index
    %250 = vector.load %arg27[%c0_165, %c0_166] : memref<256x32xbf16, #tpu.memory_space<vmem>>, vector<256x32xbf16>
    %cst_167 = arith.constant dense<0.000000e+00> : vector<2x32xf32>
    %251 = tpu.matmul %249, %250, %cst_167 {dimension_numbers = #tpu.dot_dimension_numbers<[1], [0], [0], [1], [0, 0, 1, 1], [], []>} : vector<2x256xbf16>, vector<256x32xbf16>, vector<2x32xf32> -> vector<2x32xf32>
    %c0_168 = arith.constant 0 : index
    %c0_169 = arith.constant 0 : index
    %252 = vector.load %arg28[%c0_168, %c0_169] : memref<1x32xf32, #tpu.memory_space<vmem>>, vector<1x32xf32>
    %253 = vector.broadcast %252 : vector<1x32xf32> to vector<2x32xf32>
    %254 = arith.addf %251, %253 : vector<2x32xf32>
    %255 = vector.extract_strided_slice %254 {offsets = [0, 0], sizes = [2, 16], strides = [1, 1]} : vector<2x32xf32> to vector<2x16xf32>
    %256 = vector.extract_strided_slice %254 {offsets = [0, 16], sizes = [2, 16], strides = [1, 1]} : vector<2x32xf32> to vector<2x16xf32>
    %cst_170 = arith.constant 5.000000e-01 : f32
    %257 = vector.broadcast %cst_170 : f32 to vector<2x16xf32>
    %258 = arith.mulf %257, %256 : vector<2x16xf32>
    %259 = math.exp %258 : vector<2x16xf32>
    %c0_171 = arith.constant 0 : index
    %c0_172 = arith.constant 0 : index
    %260 = vector.load %arg29[%c0_171, %c0_172] : memref<2x16xf32, #tpu.memory_space<vmem>>, vector<2x16xf32>
    %261 = arith.mulf %260, %259 : vector<2x16xf32>
    %262 = arith.addf %261, %255 : vector<2x16xf32>
    %c0_173 = arith.constant 0 : index
    %c0_174 = arith.constant 0 : index
    %263 = vector.load %arg30[%c0_173, %c0_174] : memref<2x48xf32, #tpu.memory_space<vmem>>, vector<2x16xf32>
    tpu.vector_store %arg30[%c0_173, %c0_174], %262 {strides = array<i32>} : memref<2x48xf32, #tpu.memory_space<vmem>>, vector<2x16xf32>,
    %c0_175 = arith.constant 0 : index
    %c16 = arith.constant 16 : index
    %264 = vector.load %arg30[%c0_175, %c16] : memref<2x48xf32, #tpu.memory_space<vmem>>, vector<2x16xf32>
    tpu.vector_store %arg30[%c0_175, %c16], %255 {strides = array<i32>} : memref<2x48xf32, #tpu.memory_space<vmem>>, vector<2x16xf32>,
    %c0_176 = arith.constant 0 : index
    %c32 = arith.constant 32 : index
    %265 = vector.load %arg30[%c0_176, %c32] : memref<2x48xf32, #tpu.memory_space<vmem>>, vector<2x16xf32>
    tpu.vector_store %arg30[%c0_176, %c32], %256 {strides = array<i32>} : memref<2x48xf32, #tpu.memory_space<vmem>>, vector<2x16xf32>,
    return
  }
}

</mosaic_0001>

<bundles_post_ra>
// kernel: _forward_impl.1
= control target key start
LH: loop header
LB: loop body
LE: loop exit
PB: predicated region body
PF: predicated region fallthrough
CT: control target
= control target key end

     0   :  { %s10285_s6 = smov 1   ;;  %s10286_s10 = smov 2   ;;  %s11594_s0 = inlined_call_operand.smem [shape: u32[31], index: -1, kind: input, shape index: {}] }
   0x1   :  { %s10357_s5 = sld [smem:[%s11594_s0]]   ;;  %s10287_s14 = smov 3  }
   0x2   :  { %s10362_s9 = sld [smem:[%s11594_s0 + %s10285_s6]]   ;;  %s10288_s18 = smov 4  }
   0x3   :  { %s10367_s13 = sld [smem:[%s11594_s0 + %s10286_s10]]   ;;  %s10289_s22 = smov 5  }
   0x4   :  { %s10372_s17 = sld [smem:[%s11594_s0 + %s10287_s14]]   ;;  %s10290_s26 = smov 6  }
   0x5   :  { %s10377_s21 = sld [smem:[%s11594_s0 + %s10288_s18]]   ;;  %s10291_s30 = smov 7  }
   0x6   :  { %s10382_s25 = sld [smem:[%s11594_s0 + %s10289_s22]]   ;;  %s10292_s4 = smov 8  }
   0x7   :  { %11602 = sst [smem:[#allocation45_spill]] %s10357_s5  ;;  %s10293_s10 = smov 9  }
   0x8   :  { %11603 = sst [smem:[#allocation46_spill]] %s10362_s9  ;;  %s10294_s15 = smov 10  }
   0x9   :  { %11604 = sst [smem:[#allocation47_spill]] %s10367_s13  ;;  %s10295_s20 = smov 11  }
   0xa   :  { %s10387_s29 = sld [smem:[%s11594_s0 + %s10290_s26]]   ;;  %s10296_s26 = smov 12  }
   0xb   :  { %s10392_s3 = sld [smem:[%s11594_s0 + %s10291_s30]]   ;;  %s10297_s1 = smov 13  }
   0xc   :  { %s10397_s8 = sld [smem:[%s11594_s0 + %s10292_s4]]   ;;  %s10298_s7 = smov 14  }
   0xd   :  { %s10402_s14 = sld [smem:[%s11594_s0 + %s10293_s10]]   ;;  %s10300_s22 = smov 16  }
   0xe   :  { %s10407_s19 = sld [smem:[%s11594_s0 + %s10294_s15]]   ;;  %s10299_s15 = smov 15  }
   0xf   :  { %s10412_s24 = sld [smem:[%s11594_s0 + %s10295_s20]]   ;;  %s10301_s28 = smov 17  }
  0x10   :  { %s10417_s30 = sld [smem:[%s11594_s0 + %s10296_s26]]  }
  0x11   :  { %11605 = sst [smem:[#allocation48_spill]] %s10392_s3 }
  0x12   :  { %s10422_s6 = sld [smem:[%s11594_s0 + %s10297_s1]]  }
  0x13   :  { %s10427_s12 = sld [smem:[%s11594_s0 + %s10298_s7]]   ;;  %s10302_s7 = smov 18  }
  0x14   :  { %s10432_s20 = sld [smem:[%s11594_s0 + %s10299_s15]]   ;;  %s10303_s15 = smov 19  }
  0x15   :  { %11606 = sst [smem:[#allocation49_spill]] %s10412_s24 }
  0x16   :  { %11607 = sst [smem:[#allocation50_spill]] %s10417_s30 }
  0x17   :  { %s10437_s27 = sld [smem:[%s11594_s0 + %s10300_s22]]   ;;  %s10304_s22 = smov 20  }
  0x18   :  { %s10442_s4 = sld [smem:[%s11594_s0 + %s10301_s28]]   ;;  %s10305_s28 = smov 21  }
  0x19   :  { %11608 = sst [smem:[#allocation51_spill]] %s10427_s12 }
  0x1a   :  { %s10447_s12 = sld [smem:[%s11594_s0 + %s10302_s7]]   ;;  %s10306_s7 = smov 22  }
  0x1b   :  { %s10452_s24 = sld [smem:[%s11594_s0 + %s10303_s15]]   ;;  %s10307_s15 = smov 23  }
  0x1c   :  { %s10457_s30 = sld [smem:[%s11594_s0 + %s10304_s22]]   ;;  %s10308_s22 = smov 24  }
  0x1d   :  { %s10462_s3 = sld [smem:[%s11594_s0 + %s10305_s28]]   ;;  %s10309_s28 = smov 25  }
  0x1e   :  { %11609 = sst [smem:[#allocation52_spill]] %s10442_s4 }
  0x1f   :  { %s10467_s13 = sld [smem:[%s11594_s0 + %s10306_s7]]   ;;  %s10310_s7 = smov 26  }
  0x20   :  { %s10472_s9 = sld [smem:[%s11594_s0 + %s10307_s15]]   ;;  %s10311_s15 = smov 27  }
  0x21   :  { %11610 = sst [smem:[#allocation53_spill]] %s10452_s24 }
  0x22   :  { %s10477_s5 = sld [smem:[%s11594_s0 + %s10308_s22]]   ;;  %s10312_s22 = smov 28  }
  0x23   :  { %11611 = sst [smem:[#allocation54_spill]] %s10462_s3 }
  0x24   :  { %s10482_s3 = sld [smem:[%s11594_s0 + %s10309_s28]]   ;;  %s10313_s28 = smov 29  }
  0x25   :  { %s10487_s24 = sld [smem:[%s11594_s0 + %s10310_s7]]   ;;  %s10314_s7 = smov 30  }
  0x26   :  { %11612 = sst [smem:[#allocation55_spill]] %s10472_s9 }
  0x27   :  { %s10492_s9 = sld [smem:[%s11594_s0 + %s10311_s15]]  }
  0x28   :  { %11613 = sst [smem:[#allocation56_spill]] %s10477_s5 }
  0x29   :  { %s10497_s5 = sld [smem:[%s11594_s0 + %s10312_s22]]  }
  0x2a   :  { %s10502_s4 = sld [smem:[%s11594_s0 + %s10313_s28]]  }
  0x2b   :  { %11614 = sst [smem:[#allocation57_spill]] %s10487_s24 }
  0x2c   :  { %s10507_s24 = sld [smem:[%s11594_s0 + %s10314_s7]]  }
  0x2d   :  { %66 = vsyncpa [#allocation3], 0 }
  0x2e   :  { %67 = vsyncpa [#allocation5], 0 }
  0x2f   :  { %68 = vsyncpa [#allocation8], 0 }
  0x30   :  { %69 = vsyncpa [#allocation11], 0 }
  0x31   :  { %70 = vsyncpa [#allocation14], 0 }
  0x32   :  { %71 = vsyncpa [#allocation17], 0 }
  0x33   :  { %72 = vsyncpa [#allocation20], 0 }
  0x34   :  { %73 = vsyncpa [#allocation23], 0 }
  0x35   :  { %74 = vsyncpa [#allocation26], 0 }
  0x36   :  { %75 = vsyncpa [#allocation29], 0 }
  0x37   :  { %76 = vsyncpa [#allocation32], 0  ;;  %s10315_s15 = smov [#allocation4]   ;;  %s10316_s18 = smov [#allocation7]  }
  0x38   :  { %s101_s16 = sshll.u32 %s10315_s15, 4  ;;  %s120_s22 = sshll.u32 %s10316_s18, 4  ;;  %s102_s16 = int_to_ptr.vmem [resolvable:$true] %s101_s16  ;;  %s121_s22 = int_to_ptr.vmem [resolvable:$true] %s120_s22 }
  0x39   :  { %s9851_s23 = scalar_lea.vmem %s102_s16, 32  ;;  %p9856_p1 = scmp.lt.s32.totalorder %s102_s16, %s102_s16 }
  0x3a   :  { %p9852_p0 = scmp.ne.s32.totalorder %s102_s16, %s9851_s23  ;;  %p9857_p2 = scmp.lt.s32.totalorder %s9851_s23, %s9851_s23 }
  0x3c   :  { %p9858_p3 = por %p9857_p2, %p9856_p1 }
  0x3e   :  { %p9859_p4 = pnand %p9858_p3, %p9852_p0 }
  0x40   :  { %9862 = shalt.err (!%p9859_p4)
}
  0x41   :  { %104 = dma.hbm_to_vmem [thread:$0]  %s10377_s21, 32, %s102_s16, [#allocation5]  }
  0x42   :  { %s9871_s0 = scalar_lea.vmem %s121_s22, 1024  ;;  %p9876_p6 = scmp.lt.s32.totalorder %s121_s22, %s121_s22 }
  0x43   :  { %p9872_p5 = scmp.ne.s32.totalorder %s121_s22, %s9871_s0  ;;  %p9877_p7 = scmp.lt.s32.totalorder %s9871_s0, %s9871_s0 }
  0x45   :  { %p9878_p8 = por %p9877_p7, %p9876_p6 }
  0x47   :  { %p9879_p9 = pnand %p9878_p8, %p9872_p5 }
  0x49   :  { %9882 = shalt.err (!%p9879_p9)
}
  0x4a   :  { %s10317_s26 = smov 64   ;;  %s10318_s28 = smov 4  }
  0x4b   :  { %126 = dma.hbm_to_vmem [thread:$0]  %s10387_s29, 1024, %s121_s22, [#allocation8], %s10317_s26, %s10317_s26, %s10318_s28  }
  0x4c   :  { %s10319_s1 = smov [#allocation10]  }
  0x4d   :  { %s147_s2 = sshll.u32 %s10319_s1, 4  ;;  %s148_s2 = int_to_ptr.vmem [resolvable:$true] %s147_s2 }
  0x4e   :  { %s9891_s7 = scalar_lea.vmem %s148_s2, 32  ;;  %p9896_p11 = scmp.lt.s32.totalorder %s148_s2, %s148_s2 }
  0x4f   :  { %p9892_p10 = scmp.ne.s32.totalorder %s148_s2, %s9891_s7  ;;  %p9897_p12 = scmp.lt.s32.totalorder %s9891_s7, %s9891_s7 }
  0x51   :  { %p9898_p13 = por %p9897_p12, %p9896_p11 }
  0x53   :  { %p9899_p0 = pnand %p9898_p13, %p9892_p10 }
  0x55   :  { %9902 = shalt.err (!%p9899_p0)
}
  0x56   :  { %150 = dma.hbm_to_vmem [thread:$0]  %s10402_s14, 32, %s148_s2, [#allocation11]  }
  0x57   :  { %s10320_s21 = smov [#allocation13]   ;;  %s10321_s11 = smov [#allocation16]  }
  0x58   :  { %s170_s10 = sshll.u32 %s10320_s21, 4  ;;  %s194_s15 = sshll.u32 %s10321_s11, 4  ;;  %s171_s10 = int_to_ptr.vmem [resolvable:$true] %s170_s10  ;;  %s195_s15 = int_to_ptr.vmem [resolvable:$true] %s194_s15 }
  0x59   :  { %s9911_s16 = scalar_lea.vmem %s171_s10, 8192  ;;  %p9916_p2 = scmp.lt.s32.totalorder %s171_s10, %s171_s10 }
  0x5a   :  { %p9912_p1 = scmp.ne.s32.totalorder %s171_s10, %s9911_s16  ;;  %p9917_p3 = scmp.lt.s32.totalorder %s9911_s16, %s9911_s16 }
  0x5c   :  { %p9918_p4 = por %p9917_p3, %p9916_p2 }
  0x5e   :  { %p9919_p5 = pnand %p9918_p4, %p9912_p1 }
  0x60   :  { %9922 = shalt.err (!%p9919_p5)
}
  0x61   :  { %s10322_s29 = smov 256   ;;  %s10323_s18 = smov 16  }
  0x62   :  { %176 = dma.hbm_to_vmem [thread:$0]  %s10422_s6, 8192, %s171_s10, [#allocation14], %s10322_s29, %s10322_s29, %s10323_s18  }
  0x63   :  { %s9931_s14 = scalar_lea.vmem %s195_s15, 256  ;;  %p9936_p7 = scmp.lt.s32.totalorder %s195_s15, %s195_s15 }
  0x64   :  { %p9932_p6 = scmp.ne.s32.totalorder %s195_s15, %s9931_s14  ;;  %p9937_p8 = scmp.lt.s32.totalorder %s9931_s14, %s9931_s14 }
  0x66   :  { %p9938_p9 = por %p9937_p8, %p9936_p7 }
  0x68   :  { %p9939_p10 = pnand %p9938_p9, %p9932_p6 }
  0x6a   :  { %9942 = shalt.err (!%p9939_p10)
}
  0x6b   :  { %200 = dma.hbm_to_vmem [thread:$0]  %s10437_s27, 256, %s195_s15, [#allocation17], %s10317_s26, %s10317_s26, %s10318_s28  }
  0x6c   :  { %s10324_s22 = smov [#allocation19]   ;;  %s10325_s0 = smov [#allocation22]  }
  0x6d   :  { %s218_s23 = sshll.u32 %s10324_s22, 4  ;;  %s241_s1 = sshll.u32 %s10325_s0, 4  ;;  %s219_s23 = int_to_ptr.vmem [resolvable:$true] %s218_s23  ;;  %s242_s1 = int_to_ptr.vmem [resolvable:$true] %s241_s1 }
  0x6e   :  { %s9951_s2 = scalar_lea.vmem %s219_s23, 8192  ;;  %p9956_p12 = scmp.lt.s32.totalorder %s219_s23, %s219_s23 }
  0x6f   :  { %p9952_p11 = scmp.ne.s32.totalorder %s219_s23, %s9951_s2  ;;  %p9957_p13 = scmp.lt.s32.totalorder %s9951_s2, %s9951_s2 }
  0x71   :  { %p9958_p0 = por %p9957_p13, %p9956_p12 }
  0x73   :  { %p9959_p1 = pnand %p9958_p0, %p9952_p11 }
  0x75   :  { %9962 = shalt.err (!%p9959_p1)
}
  0x76   :  { %224 = dma.hbm_to_vmem [thread:$0]  %s10447_s12, 8192, %s219_s23, [#allocation20], %s10322_s29, %s10322_s29, %s10323_s18  }
  0x77   :  { %s9971_s6 = scalar_lea.vmem %s242_s1, 32  ;;  %p9976_p3 = scmp.lt.s32.totalorder %s242_s1, %s242_s1 }
  0x78   :  { %p9972_p2 = scmp.ne.s32.totalorder %s242_s1, %s9971_s6  ;;  %p9977_p4 = scmp.lt.s32.totalorder %s9971_s6, %s9971_s6 }
  0x7a   :  { %p9978_p5 = por %p9977_p4, %p9976_p3 }
  0x7c   :  { %p9979_p6 = pnand %p9978_p5, %p9972_p2 }
  0x7e   :  { %9982 = shalt.err (!%p9979_p6)
}
  0x7f   :  { %244 = dma.hbm_to_vmem [thread:$0]  %s10457_s30, 32, %s242_s1, [#allocation23]  }
  0x80   :  { %s10326_s27 = smov [#allocation25]   ;;  %s10327_s21 = smov [#allocation28]  }
  0x81   :  { %s262_s7 = sshll.u32 %s10326_s27, 4  ;;  %s287_s10 = sshll.u32 %s10327_s21, 4  ;;  %s263_s7 = int_to_ptr.vmem [resolvable:$true] %s262_s7  ;;  %s288_s10 = int_to_ptr.vmem [resolvable:$true] %s287_s10 }
  0x82   :  { %s9991_s11 = scalar_lea.vmem %s263_s7, 8192  ;;  %p9996_p8 = scmp.lt.s32.totalorder %s263_s7, %s263_s7 }
  0x83   :  { %p9992_p7 = scmp.ne.s32.totalorder %s263_s7, %s9991_s11  ;;  %p9997_p9 = scmp.lt.s32.totalorder %s9991_s11, %s9991_s11 }
  0x85   :  { %p9998_p10 = por %p9997_p9, %p9996_p8 }
  0x87   :  { %p9999_p11 = pnand %p9998_p10, %p9992_p7 }
  0x89   :  { %10002 = shalt.err (!%p9999_p11)
}
  0x8a   :  { %268 = dma.hbm_to_vmem [thread:$0]  %s10467_s13, 8192, %s263_s7, [#allocation26], %s10317_s26, %s10317_s26, %s10318_s28  }
  0x8b   :  { %s10011_s12 = scalar_lea.vmem %s288_s10, 16  ;;  %s10015_s30 = scalar_lea.vmem %s288_s10, 32 }
  0x8c   :  { %p10012_p12 = scmp.ne.s32.totalorder %s288_s10, %s10011_s12  ;;  %p10016_p13 = scmp.lt.s32.totalorder %s288_s10, %s288_s10 }
  0x8d   :  { %p10017_p0 = scmp.lt.s32.totalorder %s10015_s30, %s10011_s12 }
  0x8f   :  { %p10018_p1 = por %p10017_p0, %p10016_p13 }
  0x91   :  { %p10019_p2 = pnand %p10018_p1, %p10012_p12 }
  0x93   :  { %10022 = shalt.err (!%p10019_p2)
}
  0x94   :  { %290 = dma.hbm_to_vmem [thread:$0]  %s10482_s3, 16, %s288_s10, [#allocation29]  }
  0x95   :  { %s10328_s15 = smov [#allocation31]   ;;  %s10329_s14 = smov [#allocation2]  }
  0x96   :  { %s311_s16 = sshll.u32 %s10328_s15, 4  ;;  %s88_s22 = sshll.u32 %s10329_s14, 4  ;;  %s312_s16 = int_to_ptr.vmem [resolvable:$true] %s311_s16  ;;  %s89_s22 = int_to_ptr.vmem [resolvable:$true] %s88_s22 }
  0x97   :  { %s10031_s23 = scalar_lea.vmem %s312_s16, 16  ;;  %s10035_s0 = scalar_lea.vmem %s312_s16, 32 }
  0x98   :  { %p10032_p3 = scmp.ne.s32.totalorder %s312_s16, %s10031_s23  ;;  %p10036_p4 = scmp.lt.s32.totalorder %s312_s16, %s312_s16 }
  0x99   :  { %p10037_p5 = scmp.lt.s32.totalorder %s10035_s0, %s10031_s23 }
  0x9b   :  { %p10038_p6 = por %p10037_p5, %p10036_p4 }
  0x9d   :  { %p10039_p7 = pnand %p10038_p6, %p10032_p3 }
  0x9f   :  { %10042 = shalt.err (!%p10039_p7)
}
  0xa0   :  { %314 = dma.hbm_to_vmem [thread:$0]  %s10497_s5, 16, %s312_s16, [#allocation32]  }
  0xa1   :  { %s10051_s13 = scalar_lea.vmem %s89_s22, 8192  ;;  %p10056_p9 = scmp.lt.s32.totalorder %s89_s22, %s89_s22 }
  0xa2   :  { %p10052_p8 = scmp.ne.s32.totalorder %s89_s22, %s10051_s13  ;;  %p10057_p10 = scmp.lt.s32.totalorder %s10051_s13, %s10051_s13 }
  0xa4   :  { %p10058_p11 = por %p10057_p10, %p10056_p9 }
  0xa6   :  { %p10059_p12 = pnand %p10058_p11, %p10052_p8 }
  0xa8   :  { %10062 = shalt.err (!%p10059_p12)
}
  0xa9   :  { %94 = dma.hbm_to_vmem [thread:$0]  %s10372_s17, 8192, %s89_s22, [#allocation3], %s10322_s29, %s10322_s29, %s10323_s18  }
  0xaa   :  { %s10330_s3 = smov [#allocation6]   ;;  %s10331_s28 = smov [#allocation9]  }
  0xab   :  { %s111_s26 = sshll.u32 %s10330_s3, 4  ;;  %s134_s1 = sshll.u32 %s10331_s28, 4  ;;  %s112_s26 = int_to_ptr.vmem [resolvable:$true] %s111_s26  ;;  %s135_s1 = int_to_ptr.vmem [resolvable:$true] %s134_s1 }
  0xac   :  { %s10071_s2 = scalar_lea.vmem %s112_s26, 32  ;;  %p10076_p0 = scmp.lt.s32.totalorder %s112_s26, %s112_s26 }
  0xad   :  { %p10072_p13 = scmp.ne.s32.totalorder %s112_s26, %s10071_s2  ;;  %p10077_p1 = scmp.lt.s32.totalorder %s10071_s2, %s10071_s2 }
  0xaf   :  { %p10078_p2 = por %p10077_p1, %p10076_p0 }
  0xb1   :  { %p10079_p3 = pnand %p10078_p2, %p10072_p13 }
  0xb3   :  { %10082 = shalt.err (!%p10079_p3)
}
  0xb4   :  { %114 = dma.hbm_to_vmem [thread:$0]  %s10382_s25, 32, %s112_s26, [#allocation5]  }
  0xb5   :  { %s10091_s5 = scalar_lea.vmem %s135_s1, 8192  ;;  %p10096_p5 = scmp.lt.s32.totalorder %s135_s1, %s135_s1 }
  0xb6   :  { %p10092_p4 = scmp.ne.s32.totalorder %s135_s1, %s10091_s5  ;;  %p10097_p6 = scmp.lt.s32.totalorder %s10091_s5, %s10091_s5 }
  0xb8   :  { %p10098_p7 = por %p10097_p6, %p10096_p5 }
  0xba   :  { %p10099_p8 = pnand %p10098_p7, %p10092_p4 }
  0xbc   :  { %10102 = shalt.err (!%p10099_p8)
}
  0xbd   :  { %140 = dma.hbm_to_vmem [thread:$0]  %s10397_s8, 8192, %s135_s1, [#allocation8], %s10322_s29, %s10322_s29, %s10323_s18  }
  0xbe   :  { %s10332_s17 = smov [#allocation12]   ;;  %s10333_s27 = smov [#allocation15]  }
  0xbf   :  { %s157_s6 = sshll.u32 %s10332_s17, 4  ;;  %s185_s7 = sshll.u32 %s10333_s27, 4  ;;  %s158_s6 = int_to_ptr.vmem [resolvable:$true] %s157_s6  ;;  %s186_s7 = int_to_ptr.vmem [resolvable:$true] %s185_s7 }
  0xc0   :  { %s10111_s21 = scalar_lea.vmem %s158_s6, 32  ;;  %p10116_p10 = scmp.lt.s32.totalorder %s158_s6, %s158_s6 }
  0xc1   :  { %p10112_p9 = scmp.ne.s32.totalorder %s158_s6, %s10111_s21  ;;  %p10117_p11 = scmp.lt.s32.totalorder %s10111_s21, %s10111_s21 }
  0xc3   :  { %p10118_p12 = por %p10117_p11, %p10116_p10 }
  0xc5   :  { %p10119_p13 = pnand %p10118_p12, %p10112_p9 }
  0xc7   :  { %10122 = shalt.err (!%p10119_p13)
}
  0xc8   :  { %160 = dma.hbm_to_vmem [thread:$0]  %s10407_s19, 32, %s158_s6, [#allocation11]  }
  0xc9   :  { %s10131_s25 = scalar_lea.vmem %s186_s7, 32  ;;  %p10136_p1 = scmp.lt.s32.totalorder %s186_s7, %s186_s7 }
  0xca   :  { %p10132_p0 = scmp.ne.s32.totalorder %s186_s7, %s10131_s25  ;;  %p10137_p2 = scmp.lt.s32.totalorder %s10131_s25, %s10131_s25 }
  0xcc   :  { %p10138_p3 = por %p10137_p2, %p10136_p1 }
  0xce   :  { %p10139_p4 = pnand %p10138_p3, %p10132_p0 }
  0xd0   :  { %10142 = shalt.err (!%p10139_p4)
}
  0xd1   :  { %188 = dma.hbm_to_vmem [thread:$0]  %s10432_s20, 32, %s186_s7, [#allocation14]  }
  0xd2   :  { %s10334_s8 = smov [#allocation18]  }
  0xd3   :  { %s206_s29 = sshll.u32 %s10334_s8, 4  ;;  %s207_s29 = int_to_ptr.vmem [resolvable:$true] %s206_s29 }
  0xd4   :  { %s10151_s10 = scalar_lea.vmem %s207_s29, 16384  ;;  %p10156_p6 = scmp.lt.s32.totalorder %s207_s29, %s207_s29 }
  0xd5   :  { %p10152_p5 = scmp.ne.s32.totalorder %s207_s29, %s10151_s10  ;;  %p10157_p7 = scmp.lt.s32.totalorder %s10151_s10, %s10151_s10 }
  0xd7   :  { %p10158_p8 = por %p10157_p7, %p10156_p6 }
  0xd9   :  { %p10159_p9 = pnand %p10158_p8, %p10152_p5 }
  0xdb   :  { %10162 = shalt.err (!%p10159_p9)
}
  0xdc   :  { %s10335_s19 = smov 128   ;;  %s11615_s11 = sld [smem:[#allocation52_spill]] }
  0xdd   :  { %s10336_s12 = smov 8   ;;  %s10337_s30 = smov [#allocation21]  }
  0xde   :  { %s231_s15 = sshll.u32 %s10337_s30, 4  ;;  %s10338_s16 = smov [#allocation24]   ;;  %s232_s15 = int_to_ptr.vmem [resolvable:$true] %s231_s15 }
  0xdf   :  { %s250_s14 = sshll.u32 %s10338_s16, 4  ;;  %s10171_s20 = scalar_lea.vmem %s232_s15, 32  ;;  %s251_s14 = int_to_ptr.vmem [resolvable:$true] %s250_s14 }
  0xe0   :  { %p10172_p10 = scmp.ne.s32.totalorder %s232_s15, %s10171_s20  ;;  %p10176_p11 = scmp.lt.s32.totalorder %s232_s15, %s232_s15 }
  0xe1   :  { %p10177_p12 = scmp.lt.s32.totalorder %s10171_s20, %s10171_s20 }
  0xe2   :  { %212 = dma.hbm_to_vmem [thread:$0]  %s11615_s11, 16384, %s207_s29, [#allocation17], %s10335_s19, %s10335_s19, %s10336_s12  }
  0xe3   :  { %p10178_p13 = por %p10177_p12, %p10176_p11 }
  0xe5   :  { %p10179_p0 = pnand %p10178_p13, %p10172_p10 }
  0xe7   :  { %10182 = shalt.err (!%p10179_p0)
}
  0xe8   :  { %s11616_s22 = sld [smem:[#allocation53_spill]]  ;;  %s10191_s23 = scalar_lea.vmem %s251_s14, 128 }
  0xe9   :  { %p10192_p1 = scmp.ne.s32.totalorder %s251_s14, %s10191_s23  ;;  %p10196_p2 = scmp.lt.s32.totalorder %s251_s14, %s251_s14 }
  0xea   :  { %p10197_p3 = scmp.lt.s32.totalorder %s10191_s23, %s10191_s23 }
  0xec   :  { %p10198_p4 = por %p10197_p3, %p10196_p2 }
  0xee   :  { %234 = dma.hbm_to_vmem [thread:$0]  %s11616_s22, 32, %s232_s15, [#allocation20]  }
  0xef   :  { %p10199_p5 = pnand %p10198_p4, %p10192_p1 }
  0xf1   :  { %10202 = shalt.err (!%p10199_p5)
}
  0xf2   :  { %s10339_s0 = smov 32   ;;  %s11617_s13 = sld [smem:[#allocation54_spill]] }
  0xf3   :  { %s10340_s3 = smov 2   ;;  %s10341_s26 = smov [#allocation27]  }
  0xf4   :  { %s277_s28 = sshll.u32 %s10341_s26, 4  ;;  %s10342_s1 = smov [#allocation30]   ;;  %s278_s28 = int_to_ptr.vmem [resolvable:$true] %s277_s28 }
  0xf5   :  { %s296_s2 = sshll.u32 %s10342_s1, 4  ;;  %s10211_s5 = scalar_lea.vmem %s278_s28, 16  ;;  %s297_s2 = int_to_ptr.vmem [resolvable:$true] %s296_s2 }
  0xf6   :  { %p10212_p6 = scmp.ne.s32.totalorder %s278_s28, %s10211_s5  ;;  %s10215_s17 = scalar_lea.vmem %s278_s28, 32 }
  0xf7   :  { %p10216_p7 = scmp.lt.s32.totalorder %s278_s28, %s278_s28  ;;  %p10217_p8 = scmp.lt.s32.totalorder %s10215_s17, %s10211_s5 }
  0xf8   :  { %256 = dma.hbm_to_vmem [thread:$0]  %s11617_s13, 128, %s251_s14, [#allocation23], %s10339_s0, %s10339_s0, %s10340_s3  }
  0xf9   :  { %p10218_p9 = por %p10217_p8, %p10216_p7 }
  0xfb   :  { %p10219_p10 = pnand %p10218_p9, %p10212_p6 }
  0xfd   :  { %10222 = shalt.err (!%p10219_p10)
}
  0xfe   :  { %s11618_s6 = sld [smem:[#allocation56_spill]]  ;;  %s10231_s27 = scalar_lea.vmem %s297_s2, 32 }
  0xff   :  { %p10232_p11 = scmp.ne.s32.totalorder %s297_s2, %s10231_s27  ;;  %p10236_p12 = scmp.lt.s32.totalorder %s297_s2, %s297_s2 }
 0x100   :  { %p10237_p13 = scmp.lt.s32.totalorder %s10231_s27, %s10231_s27 }
 0x102   :  { %p10238_p0 = por %p10237_p13, %p10236_p12 }
 0x104   :  { %280 = dma.hbm_to_vmem [thread:$0]  %s11618_s6, 16, %s278_s28, [#allocation26]  }
 0x105   :  { %p10239_p1 = pnand %p10238_p0, %p10232_p11 }
 0x107   :  { %10242 = shalt.err (!%p10239_p1)
}
 0x108   :  { %s10343_s7 = smov 1   ;;  %s11619_s21 = sld [smem:[#allocation57_spill]] }
 0x109   :  { %s10344_s25 = smov [#allocation33]  }
 0x10a   :  { %s321_s8 = sshll.u32 %s10344_s25, 4  ;;  %s322_s8 = int_to_ptr.vmem [resolvable:$true] %s321_s8 }
 0x10b   :  { %s10251_s29 = scalar_lea.vmem %s322_s8, 32  ;;  %p10256_p3 = scmp.lt.s32.totalorder %s322_s8, %s322_s8 }
 0x10c   :  { %p10252_p2 = scmp.ne.s32.totalorder %s322_s8, %s10251_s29  ;;  %p10257_p4 = scmp.lt.s32.totalorder %s10251_s29, %s10251_s29 }
 0x10e   :  { %302 = dma.hbm_to_vmem [thread:$0]  %s11619_s21, 32, %s297_s2, [#allocation29], %s10323_s18, %s10323_s18, %s10343_s7  }
 0x10f   :  { %p10258_p5 = por %p10257_p4, %p10256_p3 }
 0x111   :  { %p10259_p6 = pnand %p10258_p5, %p10252_p2 }
 0x113   :  { %10262 = shalt.err (!%p10259_p6)
}
 0x114   :  { %324 = dma.hbm_to_vmem [thread:$0]  %s10502_s4, 32, %s322_s8, [#allocation32]  }
 0x115   :  { %10263 = dma.done.wait [#allocation3], 8192  }
 0x116   :  { %10264 = vsyncadd [#allocation3], 4294959104 }
 0x117   :  { %10265 = dma.done.wait [#allocation5], 64  }
 0x118   :  { %10266 = vsyncadd [#allocation5], 4294967232 }
 0x119   :  { %10267 = dma.done.wait [#allocation8], 9216  }
 0x11a   :  { %10268 = vsyncadd [#allocation8], 4294958080 }
 0x11b   :  { %10269 = dma.done.wait [#allocation11], 64  }
 0x11c   :  { %10270 = vsyncadd [#allocation11], 4294967232 }
 0x11d   :  { %10271 = dma.done.wait [#allocation14], 8224  }
 0x11e   :  { %10272 = vsyncadd [#allocation14], 4294959072 }
 0x11f   :  { %10273 = dma.done.wait [#allocation17], 16640  }
 0x120   :  { %10274 = vsyncadd [#allocation17], 4294950656 }
 0x121   :  { %10275 = dma.done.wait [#allocation20], 8224  }
 0x122   :  { %10276 = vsyncadd [#allocation20], 4294959072 }
 0x123   :  { %10277 = dma.done.wait [#allocation23], 160  }
 0x124   :  { %10278 = vsyncadd [#allocation23], 4294967136 }
 0x125   :  { %10279 = dma.done.wait [#allocation26], 8208  }
 0x126   :  { %10280 = vsyncadd [#allocation26], 4294959088 }
 0x127   :  { %10281 = dma.done.wait [#allocation29], 48  }
 0x128   :  { %10282 = vsyncadd [#allocation29], 4294967248 }
 0x129   :  { %10283 = dma.done.wait [#allocation32], 48  }
 0x12a   :  { %10284 = vsyncadd [#allocation32], 4294967248  ;;  %s11620_s4 = sld [smem:[#allocation45_spill]]  ;;  %v10345_v0 = vmov 0   ;;  %vm2020_vm0 = vcmask 1040384  }
 0x12b   :  { %501 = vmatprep.mubr.bf16.mxu0 %v10345_v0  ;;  %607 = vmatprep.mubr.bf16.mxu1 %v10345_v0  ;;  %s11621_s10 = sld [smem:[#allocation46_spill]] }
 0x12c   :  { %s11622_s19 = sld [smem:[#allocation47_spill]] }
 0x12d   :  { %s11623_s11 = sld [smem:[#allocation48_spill]] }
 0x12e   :  { %s11624_s12 = sld [smem:[#allocation50_spill]] }
 0x12f   :  { %s11625_s30 = sld [smem:[#allocation49_spill]] }
 0x130   :  { %v418_v1 = vld [vmem:[%s11620_s4 + $0xe8] sm:$0xff]  ;;  %v420_v2 = vld [vmem:[%s11620_s4 + $0xf8] sm:$0xff]  ;;  %v417_v3 = vld [vmem:[%s11620_s4 + $0xe0] sm:$0xff]  ;;  %s11626_s15 = sld [smem:[#allocation51_spill]] }
 0x131   :  { %v10558_v4 = vpack.c.bf16 %v420_v2, %v418_v1  ;;  %v419_v5 = vld [vmem:[%s11620_s4 + $0xf0] sm:$0xff]  ;;  %v414_v6 = vld [vmem:[%s11620_s4 + $0xc8] sm:$0xff]  ;;  %v416_v7 = vld [vmem:[%s11620_s4 + $0xd8] sm:$0xff]  ;;  %s11627_s16 = sld [smem:[#allocation55_spill]] }
 0x132   :  { %v10563_v8 = vpack.c.bf16 %v419_v5, %v417_v3  ;;  %v10565_v9 = vpack.c.bf16 %v416_v7, %v414_v6  ;;  %v413_v10 = vld [vmem:[%s11620_s4 + $0xc0] sm:$0xff]  ;;  %v415_v11 = vld [vmem:[%s11620_s4 + $0xd0] sm:$0xff]  ;;  %v410_v12 = vld [vmem:[%s11620_s4 + $0xa8] sm:$0xff] }
 0x133   :  { %469 = vmatprep.subr.bf16.mxu0 %v10558_v4  ;;  %575 = vmatprep.subr.bf16.mxu1 %v10558_v4  ;;  %v412_v13 = vld [vmem:[%s11620_s4 + $0xb8] sm:$0xff]  ;;  %v10575_v14 = vpack.c.bf16 %v415_v11, %v413_v10  ;;  %v409_v16 = vld [vmem:[%s11620_s4 + $0xa0] sm:$0xff]  ;;  %v411_v17 = vld [vmem:[%s11620_s4 + $0xb0] sm:$0xff] }
 0x134   :  { %470 = vmatpush1.bf16.msra.mxu0 %v10563_v8  ;;  %576 = vmatpush1.bf16.msra.mxu1 %v10563_v8  ;;  %v10579_v15 = vpack.c.bf16 %v412_v13, %v410_v12  ;;  %v406_v18 = vld [vmem:[%s11620_s4 + $0x88] sm:$0xff]  ;;  %v408_v19 = vld [vmem:[%s11620_s4 + $0x98] sm:$0xff]  ;;  %v10587_v20 = vpack.c.bf16 %v411_v17, %v409_v16  ;;  %v405_v22 = vld [vmem:[%s11620_s4 + $0x80] sm:$0xff] }
 0x135   :  { %471 = vmatprep.subr.bf16.mxu0 %v10565_v9  ;;  %577 = vmatprep.subr.bf16.mxu1 %v10565_v9  ;;  %v10591_v21 = vpack.c.bf16 %v408_v19, %v406_v18  ;;  %v407_v23 = vld [vmem:[%s11620_s4 + $0x90] sm:$0xff]  ;;  %v402_v24 = vld [vmem:[%s11620_s4 + $0x68] sm:$0xff]  ;;  %v404_v25 = vld [vmem:[%s11620_s4 + $0x78] sm:$0xff] }
 0x136   :  { %v401_v26 = vld [vmem:[%s11620_s4 + $0x60] sm:$0xff]  ;;  %v10600_v27 = vpack.c.bf16 %v407_v23, %v405_v22  ;;  %v403_v28 = vld [vmem:[%s11620_s4 + $0x70] sm:$0xff]  ;;  %v10605_v29 = vpack.c.bf16 %v404_v25, %v402_v24  ;;  %v398_v30 = vld [vmem:[%s11620_s4 + $0x48] sm:$0xff] }
 0x137   :  { %v400_v31 = vld [vmem:[%s11620_s4 + $0x58] sm:$0xff]  ;;  %v397_v32 = vld [vmem:[%s11620_s4 + $0x40] sm:$0xff]  ;;  %v10612_v33 = vpack.c.bf16 %v403_v28, %v401_v26  ;;  %v399_v34 = vld [vmem:[%s11620_s4 + $0x50] sm:$0xff] }
 0x138   :  { %472 = vmatpush1.bf16.msra.mxu0 %v10575_v14  ;;  %578 = vmatpush1.bf16.msra.mxu1 %v10575_v14  ;;  %v10617_v35 = vpack.c.bf16 %v400_v31, %v398_v30  ;;  %v394_v36 = vld [vmem:[%s11620_s4 + $0x28] sm:$0xff]  ;;  %v396_v37 = vld [vmem:[%s11620_s4 + $0x38] sm:$0xff]  ;;  %v393_v38 = vld [vmem:[%s11620_s4 + $0x20] sm:$0xff]  ;;  %v10624_v39 = vpack.c.bf16 %v399_v34, %v397_v32 }
 0x139   :  { %473 = vmatprep.subr.bf16.mxu0 %v10579_v15  ;;  %579 = vmatprep.subr.bf16.mxu1 %v10579_v15  ;;  %v395_v40 = vld [vmem:[%s11620_s4 + $0x30] sm:$0xff]  ;;  %v424_v41 = vpack.c.bf16 %v396_v37, %v394_v36  ;;  %v390_v42 = vld [vmem:[%s11620_s4 + $0x8] sm:$0xff]  ;;  %v392_v43 = vld [vmem:[%s11620_s4 + $0x18] sm:$0xff] }
 0x13a   :  { %v10633_v44 = vpack.c.bf16 %v395_v40, %v393_v38  ;;  %v389_v45 = vld [vmem:[%s11620_s4] sm:$0xff]  ;;  %v422_v46 = vpack.c.bf16 %v392_v43, %v390_v42  ;;  %v391_v47 = vld [vmem:[%s11620_s4 + $0x10] sm:$0xff]  ;;  %v8949_v51 = vld [vmem:[%s11621_s10 + $0x8] sm:$0xff]  }
 0x13b   :  { %v10639_v48 = vpack.c.bf16 %v391_v47, %v389_v45  ;;  %v8947_v49 = vld [vmem:[%s11621_s10] sm:$0xff]   ;;  %v8950_v52 = vld [vmem:[%s11621_s10 + $0x28] sm:$0xff]   ;;  %v8951_v53 = vld [vmem:[%s11621_s10 + $0x10] sm:$0xff]  }
 0x13c   :  { %474 = vmatpush1.bf16.msra.mxu0 %v10587_v20  ;;  %580 = vmatpush1.bf16.msra.mxu1 %v10587_v20  ;;  %v8948_v50 = vld [vmem:[%s11621_s10 + $0x20] sm:$0xff]   ;;  %v8952_v54 = vld [vmem:[%s11621_s10 + $0x30] sm:$0xff]   ;;  %v8953_v55 = vld [vmem:[%s11621_s10 + $0x18] sm:$0xff]  }
 0x13d   :  { %475 = vmatprep.subr.bf16.mxu0 %v10591_v21  ;;  %581 = vmatprep.subr.bf16.mxu1 %v10591_v21  ;;  %v8954_v56 = vld [vmem:[%s11621_s10 + $0x38] sm:$0xff]   ;;  %v8955_v59 = vld [vmem:[%s11621_s10 + $0x40] sm:$0xff]   ;;  %v8957_v6 = vld [vmem:[%s11621_s10 + $0x48] sm:$0xff]  }
 0x13e   :  { %v8965_v57 = vld [vmem:[%s11622_s19 + $0x74] ss:$8 sps:$4 sm:$0xff]   ;;  %v8956_v60 = vld [vmem:[%s11621_s10 + $0x60] sm:$0xff]   ;;  %v8963_v61 = vld [vmem:[%s11622_s19 + $0x70] ss:$8 sps:$4 sm:$0xff]  }
 0x13f   :  { %v8968_v58 = vld [vmem:[%s11622_s19 + $0x174] ss:$8 sps:$4 sm:$0xff]   ;;  %v8966_v62 = vld [vmem:[%s11622_s19 + $0x170] ss:$8 sps:$4 sm:$0xff]   ;;  %v8971_v63 = vld [vmem:[%s11622_s19 + $0x64] ss:$8 sps:$4 sm:$0xff]  }
 0x140   :  { %476 = vmatpush1.bf16.msra.mxu0 %v10600_v27  ;;  %582 = vmatpush1.bf16.msra.mxu1 %v10600_v27  ;;  %v8974_v1 = vld [vmem:[%s11622_s19 + $0x164] ss:$8 sps:$4 sm:$0xff]   ;;  %v8969_v2 = vld [vmem:[%s11622_s19 + $0x60] ss:$8 sps:$4 sm:$0xff]   ;;  %v8980_v5 = vld [vmem:[%s11622_s19 + $0x154] ss:$8 sps:$4 sm:$0xff]  }
 0x141   :  { %477 = vmatprep.subr.bf16.mxu0 %v10605_v29  ;;  %583 = vmatprep.subr.bf16.mxu1 %v10605_v29  ;;  %v8972_v3 = vld [vmem:[%s11622_s19 + $0x160] ss:$8 sps:$4 sm:$0xff]   ;;  %v8983_v10 = vld [vmem:[%s11622_s19 + $0x44] ss:$8 sps:$4 sm:$0xff]   ;;  %v8959_v16 = vld [vmem:[%s11621_s10 + $0x50] sm:$0xff]  }
 0x142   :  { %v8958_v7 = vld [vmem:[%s11621_s10 + $0x68] sm:$0xff]   ;;  %v8960_v17 = vld [vmem:[%s11621_s10 + $0x70] sm:$0xff]   ;;  %v8961_v26 = vld [vmem:[%s11621_s10 + $0x58] sm:$0xff]  }
 0x143   :  { %v8986_v11 = vld [vmem:[%s11622_s19 + $0x144] ss:$8 sps:$4 sm:$0xff]   ;;  %v8981_v12 = vld [vmem:[%s11622_s19 + $0x40] ss:$8 sps:$4 sm:$0xff]   ;;  %v8987_v18 = vld [vmem:[%s11622_s19 + $0x30] ss:$8 sps:$4 sm:$0xff]  }
 0x144   :  { %478 = vmatpush1.bf16.msra.mxu0 %v10612_v33  ;;  %584 = vmatpush1.bf16.msra.mxu1 %v10612_v33  ;;  %v8984_v13 = vld [vmem:[%s11622_s19 + $0x140] ss:$8 sps:$4 sm:$0xff]   ;;  %v8990_v19 = vld [vmem:[%s11622_s19 + $0x130] ss:$8 sps:$4 sm:$0xff]   ;;  %v9001_v24 = vld [vmem:[%s11622_s19 + $0x14] ss:$8 sps:$4 sm:$0xff]  }
 0x145   :  { %479 = vmatprep.subr.bf16.mxu0 %v10617_v35  ;;  %585 = vmatprep.subr.bf16.mxu1 %v10617_v35  ;;  %v8993_v22 = vld [vmem:[%s11622_s19 + $0x20] ss:$8 sps:$4 sm:$0xff]   ;;  %v9004_v25 = vld [vmem:[%s11622_s19 + $0x114] ss:$8 sps:$4 sm:$0xff]   ;;  %v8999_v28 = vld [vmem:[%s11622_s19 + $0x10] ss:$8 sps:$4 sm:$0xff]  }
 0x146   :  { %v8996_v23 = vld [vmem:[%s11622_s19 + $0x120] ss:$8 sps:$4 sm:$0xff]   ;;  %v9007_v30 = vld [vmem:[%s11622_s19 + $0x4] ss:$8 sps:$4 sm:$0xff]   ;;  %v9013_v34 = vld [vmem:[%s11622_s19 + $0xf4] ss:$8 sps:$4 sm:$0xff]  }
 0x147   :  { %v9010_v31 = vld [vmem:[%s11622_s19 + $0x104] ss:$8 sps:$4 sm:$0xff]   ;;  %v9005_v32 = vld [vmem:[%s11622_s19] ss:$8 sps:$4 sm:$0xff]   ;;  %v9011_v36 = vld [vmem:[%s11622_s19 + $0xf0] ss:$8 sps:$4 sm:$0xff]  }
 0x148   :  { %480 = vmatpush1.bf16.msra.mxu0 %v10624_v39  ;;  %586 = vmatpush1.bf16.msra.mxu1 %v10624_v39  ;;  %v9014_v37 = vld [vmem:[%s11622_s19 + $0x1f0] ss:$8 sps:$4 sm:$0xff]   ;;  %v9019_v38 = vld [vmem:[%s11622_s19 + $0xe4] ss:$8 sps:$4 sm:$0xff]   ;;  %v9017_v40 = vld [vmem:[%s11622_s19 + $0xe0] ss:$8 sps:$4 sm:$0xff]  }
 0x149   :  { %481 = vmatprep.subr.bf16.mxu0 %v424_v41  ;;  %587 = vmatprep.subr.bf16.mxu1 %v424_v41  ;;  %v9025_v42 = vld [vmem:[%s11622_s19 + $0xd4] ss:$8 sps:$4 sm:$0xff]   ;;  %v9026_v45 = vld [vmem:[%s11622_s19 + $0x1d0] ss:$8 sps:$4 sm:$0xff]   ;;  %v9034_v47 = vld [vmem:[%s11622_s19 + $0x1c4] ss:$8 sps:$4 sm:$0xff]  }
 0x14a   :  { %v9028_v43 = vld [vmem:[%s11622_s19 + $0x1d4] ss:$8 sps:$4 sm:$0xff]  }
 0x14c   :  { %482 = vmatpush1.bf16.msra.mxu0 %v10633_v44  ;;  %588 = vmatpush1.bf16.msra.mxu1 %v10633_v44 }
 0x14d   :  { %483 = vmatprep.subr.bf16.mxu0 %v422_v46  ;;  %589 = vmatprep.subr.bf16.mxu1 %v422_v46 }
 0x150   :  { %484 = vmatpush1.bf16.msra.mxu0 %v10639_v48  ;;  %590 = vmatpush1.bf16.msra.mxu1 %v10639_v48 }
 0x151   :  { %681 = vmatprep.subr.bf16.mxu0 %v10558_v4  ;;  %787 = vmatprep.subr.bf16.mxu1 %v10558_v4  ;;  %v8977_v4 = vld [vmem:[%s11622_s19 + $0x54] ss:$8 sps:$4 sm:$0xff]  }
 0x153   :  { %502 = vmatmul.mubr.bf16.vlgmr.msra.gmra.mxu0 %v8947_v49  ;;  %608 = vmatmul.mubr.bf16.vlgmr.msra.gmra.mxu1 %v8948_v50  ;;  %v9032_v49 = vld [vmem:[%s11622_s19 + $0x1c0] ss:$8 sps:$4 sm:$0xff]   ;;  %v9037_v50 = vld [vmem:[%s11622_s19 + $0xb4] ss:$8 sps:$4 sm:$0xff]  }
 0x154   :  { %511 = vmatprep.mubr.bf16.mxu0 %v10345_v0  ;;  %617 = vmatprep.mubr.bf16.mxu1 %v10345_v0 }
 0x155   :  { %682 = vmatpush1.bf16.msra.mxu0 %v10563_v8  ;;  %788 = vmatpush1.bf16.msra.mxu1 %v10563_v8  ;;  %v8975_v8 = vld [vmem:[%s11622_s19 + $0x50] ss:$8 sps:$4 sm:$0xff]  }
 0x156   :  { %683 = vmatprep.subr.bf16.mxu0 %v10565_v9  ;;  %789 = vmatprep.subr.bf16.mxu1 %v10565_v9  ;;  %v8978_v9 = vld [vmem:[%s11622_s19 + $0x150] ss:$8 sps:$4 sm:$0xff]  }
 0x159   :  { %684 = vmatpush1.bf16.msra.mxu0 %v10575_v14  ;;  %790 = vmatpush1.bf16.msra.mxu1 %v10575_v14  ;;  %v8989_v14 = vld [vmem:[%s11622_s19 + $0x34] ss:$8 sps:$4 sm:$0xff]  }
 0x15a   :  { %685 = vmatprep.subr.bf16.mxu0 %v10579_v15  ;;  %791 = vmatprep.subr.bf16.mxu1 %v10579_v15  ;;  %v8992_v15 = vld [vmem:[%s11622_s19 + $0x134] ss:$8 sps:$4 sm:$0xff]  }
 0x15b   :  { %512 = vmatmul.mubr.bf16.gmra.mxu0 %v8949_v51  ;;  %618 = vmatmul.mubr.bf16.gmra.mxu1 %v8950_v52  ;;  %v9040_v51 = vld [vmem:[%s11622_s19 + $0x1b4] ss:$8 sps:$4 sm:$0xff]   ;;  %v9035_v52 = vld [vmem:[%s11622_s19 + $0xb0] ss:$8 sps:$4 sm:$0xff]  }
 0x15c   :  { %521 = vmatprep.mubr.bf16.mxu0 %v10345_v0  ;;  %627 = vmatprep.mubr.bf16.mxu1 %v10345_v0 }
 0x15d   :  { %686 = vmatpush1.bf16.msra.mxu0 %v10587_v20  ;;  %792 = vmatpush1.bf16.msra.mxu1 %v10587_v20  ;;  %v8995_v20 = vld [vmem:[%s11622_s19 + $0x24] ss:$8 sps:$4 sm:$0xff]  }
 0x15e   :  { %687 = vmatprep.subr.bf16.mxu0 %v10591_v21  ;;  %793 = vmatprep.subr.bf16.mxu1 %v10591_v21  ;;  %v8998_v21 = vld [vmem:[%s11622_s19 + $0x124] ss:$8 sps:$4 sm:$0xff]  }
 0x161   :  { %688 = vmatpush1.bf16.msra.mxu0 %v10600_v27  ;;  %794 = vmatpush1.bf16.msra.mxu1 %v10600_v27  ;;  %v8962_v27 = vld [vmem:[%s11621_s10 + $0x78] sm:$0xff]  }
 0x162   :  { %689 = vmatprep.subr.bf16.mxu0 %v10605_v29  ;;  %795 = vmatprep.subr.bf16.mxu1 %v10605_v29  ;;  %v9002_v29 = vld [vmem:[%s11622_s19 + $0x110] ss:$8 sps:$4 sm:$0xff]  }
 0x163   :  { %522 = vmatmul.mubr.bf16.gmra.mxu0 %v8951_v53  ;;  %628 = vmatmul.mubr.bf16.gmra.mxu1 %v8952_v54  ;;  %v9038_v53 = vld [vmem:[%s11622_s19 + $0x1b0] ss:$8 sps:$4 sm:$0xff]   ;;  %v9043_v54 = vld [vmem:[%s11622_s19 + $0xa4] ss:$8 sps:$4 sm:$0xff]  }
 0x164   :  { %531 = vmatprep.mubr.bf16.mxu0 %v10345_v0  ;;  %637 = vmatprep.mubr.bf16.mxu1 %v10345_v0 }
 0x165   :  { %690 = vmatpush1.bf16.msra.mxu0 %v10612_v33  ;;  %796 = vmatpush1.bf16.msra.mxu1 %v10612_v33  ;;  %v9008_v33 = vld [vmem:[%s11622_s19 + $0x100] ss:$8 sps:$4 sm:$0xff]  }
 0x166   :  { %691 = vmatprep.subr.bf16.mxu0 %v10617_v35  ;;  %797 = vmatprep.subr.bf16.mxu1 %v10617_v35  ;;  %v9016_v35 = vld [vmem:[%s11622_s19 + $0x1f4] ss:$8 sps:$4 sm:$0xff]  }
 0x169   :  { %692 = vmatpush1.bf16.msra.mxu0 %v10624_v39  ;;  %798 = vmatpush1.bf16.msra.mxu1 %v10624_v39  ;;  %v9022_v39 = vld [vmem:[%s11622_s19 + $0x1e4] ss:$8 sps:$4 sm:$0xff]  }
 0x16a   :  { %693 = vmatprep.subr.bf16.mxu0 %v424_v41  ;;  %799 = vmatprep.subr.bf16.mxu1 %v424_v41  ;;  %v9020_v41 = vld [vmem:[%s11622_s19 + $0x1e0] ss:$8 sps:$4 sm:$0xff]  }
 0x16b   :  { %532 = vmatmul.mubr.bf16.gmra.mxu0 %v8953_v55  ;;  %638 = vmatmul.mubr.bf16.gmra.mxu1 %v8954_v56  ;;  %v9046_v55 = vld [vmem:[%s11622_s19 + $0x1a4] ss:$8 sps:$4 sm:$0xff]   ;;  %v9041_v56 = vld [vmem:[%s11622_s19 + $0xa0] ss:$8 sps:$4 sm:$0xff]  }
 0x16c   :  { %713 = vmatprep.mubr.bf16.mxu0 %v10345_v0  ;;  %819 = vmatprep.mubr.bf16.mxu1 %v10345_v0 }
 0x16d   :  { %694 = vmatpush1.bf16.msra.mxu0 %v10633_v44  ;;  %800 = vmatpush1.bf16.msra.mxu1 %v10633_v44  ;;  %v9023_v44 = vld [vmem:[%s11622_s19 + $0xd0] ss:$8 sps:$4 sm:$0xff]  }
 0x16e   :  { %695 = vmatprep.subr.bf16.mxu0 %v422_v46  ;;  %801 = vmatprep.subr.bf16.mxu1 %v422_v46  ;;  %v9031_v46 = vld [vmem:[%s11622_s19 + $0xc4] ss:$8 sps:$4 sm:$0xff]  }
 0x171   :  { %696 = vmatpush1.bf16.msra.mxu0 %v10639_v48  ;;  %802 = vmatpush1.bf16.msra.mxu1 %v10639_v48  ;;  %v9029_v48 = vld [vmem:[%s11622_s19 + $0xc0] ss:$8 sps:$4 sm:$0xff]  }
 0x172   :  { %1660 = vmatprep.subr.bf16.mxu0 %v8965_v57  ;;  %1733 = vmatprep.subr.bf16.mxu1 %v8968_v58  ;;  %v9044_v57 = vld [vmem:[%s11622_s19 + $0x1a0] ss:$8 sps:$4 sm:$0xff]   ;;  %v9049_v58 = vld [vmem:[%s11622_s19 + $0x94] ss:$8 sps:$4 sm:$0xff]  }
 0x174   :  { %714 = vmatmul.mubr.bf16.vlgmr.msra.gmra.mxu0 %v8955_v59  ;;  %820 = vmatmul.mubr.bf16.vlgmr.msra.gmra.mxu1 %v8956_v60  ;;  %v9052_v59 = vld [vmem:[%s11622_s19 + $0x194] ss:$8 sps:$4 sm:$0xff]   ;;  %v9047_v60 = vld [vmem:[%s11622_s19 + $0x90] ss:$8 sps:$4 sm:$0xff]  }
 0x175   :  { %723 = vmatprep.mubr.bf16.mxu0 %v10345_v0  ;;  %829 = vmatprep.mubr.bf16.mxu1 %v10345_v0 }
 0x176   :  { %1661 = vmatpush1.bf16.msra.mxu0 %v8963_v61  ;;  %1734 = vmatpush1.bf16.msra.mxu1 %v8966_v62  ;;  %v9050_v61 = vld [vmem:[%s11622_s19 + $0x190] ss:$8 sps:$4 sm:$0xff]   ;;  %v9055_v62 = vld [vmem:[%s11622_s19 + $0x84] ss:$8 sps:$4 sm:$0xff]  }
 0x177   :  { %1662 = vmatprep.subr.bf16.mxu0 %v8971_v63  ;;  %1735 = vmatprep.subr.bf16.mxu1 %v8974_v1  ;;  %v9058_v63 = vld [vmem:[%s11622_s19 + $0x184] ss:$8 sps:$4 sm:$0xff]   ;;  %v9053_v1 = vld [vmem:[%s11622_s19 + $0x80] ss:$8 sps:$4 sm:$0xff]  }
 0x17a   :  { %1663 = vmatpush1.bf16.msra.mxu0 %v8969_v2  ;;  %1736 = vmatpush1.bf16.msra.mxu1 %v8972_v3  ;;  %v9056_v2 = vld [vmem:[%s11622_s19 + $0x180] ss:$8 sps:$4 sm:$0xff]   ;;  %v9061_v3 = vld [vmem:[%s11622_s19 + $0x274] ss:$8 sps:$4 sm:$0xff]  }
 0x17b   :  { %1664 = vmatprep.subr.bf16.mxu0 %v8977_v4  ;;  %1737 = vmatprep.subr.bf16.mxu1 %v8980_v5  ;;  %v9064_v4 = vld [vmem:[%s11622_s19 + $0x374] ss:$8 sps:$4 sm:$0xff]  }
 0x17c   :  { %724 = vmatmul.mubr.bf16.gmra.mxu0 %v8957_v6  ;;  %830 = vmatmul.mubr.bf16.gmra.mxu1 %v8958_v7 }
 0x17d   :  { %733 = vmatprep.mubr.bf16.mxu0 %v10345_v0  ;;  %839 = vmatprep.mubr.bf16.mxu1 %v10345_v0 }
 0x17e   :  { %1665 = vmatpush1.bf16.msra.mxu0 %v8975_v8  ;;  %1738 = vmatpush1.bf16.msra.mxu1 %v8978_v9 }
 0x17f   :  { %1666 = vmatprep.subr.bf16.mxu0 %v8983_v10  ;;  %1739 = vmatprep.subr.bf16.mxu1 %v8986_v11  ;;  %v9059_v11 = vld [vmem:[%s11622_s19 + $0x270] ss:$8 sps:$4 sm:$0xff]  }
 0x182   :  { %1667 = vmatpush1.bf16.msra.mxu0 %v8981_v12  ;;  %1740 = vmatpush1.bf16.msra.mxu1 %v8984_v13  ;;  %v9062_v12 = vld [vmem:[%s11622_s19 + $0x370] ss:$8 sps:$4 sm:$0xff]  }
 0x183   :  { %1668 = vmatprep.subr.bf16.mxu0 %v8989_v14  ;;  %1741 = vmatprep.subr.bf16.mxu1 %v8992_v15  ;;  %v9067_v15 = vld [vmem:[%s11622_s19 + $0x264] ss:$8 sps:$4 sm:$0xff]  }
 0x184   :  { %734 = vmatmul.mubr.bf16.gmra.mxu0 %v8959_v16  ;;  %840 = vmatmul.mubr.bf16.gmra.mxu1 %v8960_v17  ;;  %v9070_v16 = vld [vmem:[%s11622_s19 + $0x364] ss:$8 sps:$4 sm:$0xff]  }
 0x185   :  { %743 = vmatprep.mubr.bf16.mxu0 %v10345_v0  ;;  %849 = vmatprep.mubr.bf16.mxu1 %v10345_v0 }
 0x186   :  { %1669 = vmatpush1.bf16.msra.mxu0 %v8987_v18  ;;  %1742 = vmatpush1.bf16.msra.mxu1 %v8990_v19 }
 0x187   :  { %1670 = vmatprep.subr.bf16.mxu0 %v8995_v20  ;;  %1743 = vmatprep.subr.bf16.mxu1 %v8998_v21 }
 0x18a   :  { %1671 = vmatpush1.bf16.msra.mxu0 %v8993_v22  ;;  %1744 = vmatpush1.bf16.msra.mxu1 %v8996_v23  ;;  %v9065_v23 = vld [vmem:[%s11622_s19 + $0x260] ss:$8 sps:$4 sm:$0xff]  }
 0x18b   :  { %1672 = vmatprep.subr.bf16.mxu0 %v9001_v24  ;;  %1745 = vmatprep.subr.bf16.mxu1 %v9004_v25  ;;  %v9068_v24 = vld [vmem:[%s11622_s19 + $0x360] ss:$8 sps:$4 sm:$0xff]   ;;  %v9073_v25 = vld [vmem:[%s11622_s19 + $0x254] ss:$8 sps:$4 sm:$0xff]  }
 0x18c   :  { %744 = vmatmul.mubr.bf16.gmra.mxu0 %v8961_v26  ;;  %850 = vmatmul.mubr.bf16.gmra.mxu1 %v8962_v27  ;;  %v9076_v26 = vld [vmem:[%s11622_s19 + $0x354] ss:$8 sps:$4 sm:$0xff]  }
 0x18e   :  { %1673 = vmatpush1.bf16.msra.mxu0 %v8999_v28  ;;  %1746 = vmatpush1.bf16.msra.mxu1 %v9002_v29 }
 0x18f   :  { %1674 = vmatprep.subr.bf16.mxu0 %v9007_v30  ;;  %1747 = vmatprep.subr.bf16.mxu1 %v9010_v31  ;;  %v9071_v31 = vld [vmem:[%s11622_s19 + $0x250] ss:$8 sps:$4 sm:$0xff]  }
 0x192   :  { %1675 = vmatpush1.bf16.msra.mxu0 %v9005_v32  ;;  %1748 = vmatpush1.bf16.msra.mxu1 %v9008_v33  ;;  %v9074_v32 = vld [vmem:[%s11622_s19 + $0x350] ss:$8 sps:$4 sm:$0xff]   ;;  %v9079_v33 = vld [vmem:[%s11622_s19 + $0x244] ss:$8 sps:$4 sm:$0xff]  }
 0x193   :  { %1676 = vmatprep.subr.bf16.mxu0 %v9013_v34  ;;  %1749 = vmatprep.subr.bf16.mxu1 %v9016_v35  ;;  %v9082_v34 = vld [vmem:[%s11622_s19 + $0x344] ss:$8 sps:$4 sm:$0xff]  }
 0x196   :  { %1677 = vmatpush2.bf16.msra.mxu0 %v9011_v36  ;;  %1750 = vmatpush2.bf16.msra.mxu1 %v9014_v37 }
 0x197   :  { %1678 = vmatprep.subr.bf16.mxu0 %v9019_v38  ;;  %1751 = vmatprep.subr.bf16.mxu1 %v9022_v39 }
 0x19a   :  { %1679 = vmatpush2.bf16.msra.mxu0 %v9017_v40  ;;  %1752 = vmatpush2.bf16.msra.mxu1 %v9020_v41 }
 0x19b   :  { %1680 = vmatprep.subr.bf16.mxu0 %v9025_v42  ;;  %1753 = vmatprep.subr.bf16.mxu1 %v9028_v43  ;;  %v9077_v43 = vld [vmem:[%s11622_s19 + $0x240] ss:$8 sps:$4 sm:$0xff]  }
 0x19e   :  { %1681 = vmatpush2.bf16.msra.mxu0 %v9023_v44  ;;  %1754 = vmatpush2.bf16.msra.mxu1 %v9026_v45  ;;  %v9080_v44 = vld [vmem:[%s11622_s19 + $0x340] ss:$8 sps:$4 sm:$0xff]   ;;  %v9085_v45 = vld [vmem:[%s11622_s19 + $0x234] ss:$8 sps:$4 sm:$0xff]  }
 0x19f   :  { %1682 = vmatprep.subr.bf16.mxu0 %v9031_v46  ;;  %1755 = vmatprep.subr.bf16.mxu1 %v9034_v47  ;;  %v9088_v46 = vld [vmem:[%s11622_s19 + $0x334] ss:$8 sps:$4 sm:$0xff]  }
 0x1a2   :  { %1683 = vmatpush2.bf16.msra.mxu0 %v9029_v48  ;;  %1756 = vmatpush2.bf16.msra.mxu1 %v9032_v49 }
 0x1a3   :  { %1684 = vmatprep.subr.bf16.mxu0 %v9037_v50  ;;  %1757 = vmatprep.subr.bf16.mxu1 %v9040_v51  ;;  %v9083_v51 = vld [vmem:[%s11622_s19 + $0x230] ss:$8 sps:$4 sm:$0xff]  }
 0x1a6   :  { %1685 = vmatpush2.bf16.msra.mxu0 %v9035_v52  ;;  %1758 = vmatpush2.bf16.msra.mxu1 %v9038_v53  ;;  %v9086_v52 = vld [vmem:[%s11622_s19 + $0x330] ss:$8 sps:$4 sm:$0xff]   ;;  %v9091_v53 = vld [vmem:[%s11622_s19 + $0x224] ss:$8 sps:$4 sm:$0xff]  }
 0x1a7   :  { %1686 = vmatprep.subr.bf16.mxu0 %v9043_v54  ;;  %1759 = vmatprep.subr.bf16.mxu1 %v9046_v55  ;;  %v9094_v54 = vld [vmem:[%s11622_s19 + $0x324] ss:$8 sps:$4 sm:$0xff]  }
 0x1aa   :  { %1687 = vmatpush2.bf16.msra.mxu0 %v9041_v56  ;;  %1760 = vmatpush2.bf16.msra.mxu1 %v9044_v57 }
 0x1ab   :  { %1688 = vmatprep.subr.bf16.mxu0 %v9049_v58  ;;  %1761 = vmatprep.subr.bf16.mxu1 %v9052_v59 }
 0x1ae   :  { %1689 = vmatpush2.bf16.msra.mxu0 %v9047_v60  ;;  %1762 = vmatpush2.bf16.msra.mxu1 %v9050_v61 }
 0x1af   :  { %1690 = vmatprep.subr.bf16.mxu0 %v9055_v62  ;;  %1763 = vmatprep.subr.bf16.mxu1 %v9058_v63  ;;  %v9089_v63 = vld [vmem:[%s11622_s19 + $0x220] ss:$8 sps:$4 sm:$0xff]  }
 0x1b2   :  { %1691 = vmatpush2.bf16.msra.mxu0 %v9053_v1  ;;  %1764 = vmatpush2.bf16.msra.mxu1 %v9056_v2  ;;  %v9092_v1 = vld [vmem:[%s11622_s19 + $0x320] ss:$8 sps:$4 sm:$0xff]   ;;  %v9097_v2 = vld [vmem:[%s11622_s19 + $0x214] ss:$8 sps:$4 sm:$0xff]  }
 0x1b3   :  { %1806 = vmatprep.subr.bf16.mxu0 %v9061_v3  ;;  %1879 = vmatprep.subr.bf16.mxu1 %v9064_v4  ;;  %v9100_v3 = vld [vmem:[%s11622_s19 + $0x314] ss:$8 sps:$4 sm:$0xff]  }
 0x213   :  { %v503_v5 = vpop.f32.mrf.mxu0  ;;  %v609_v6 = vpop.f32.mrf.mxu1 }
 0x215   :  { %v505_v7 = vpop.f32.mrf.mxu0  ;;  %v611_v8 = vpop.f32.mrf.mxu1 }
 0x217   :  { %v507_v9 = vpop.f32.mrf.mxu0  ;;  %v613_v10 = vpop.f32.mrf.mxu1 }
 0x218   :  { %v860_v19 = vpack.c.bf16 %v507_v9, %v503_v5  ;;  %v862_v20 = vpack.c.bf16 %v613_v10, %v609_v6  ;;  %v9098_v9 = vld [vmem:[%s11622_s19 + $0x310] ss:$8 sps:$4 sm:$0xff]   ;;  %v9103_v10 = vld [vmem:[%s11622_s19 + $0x204] ss:$8 sps:$4 sm:$0xff]  }
 0x219   :  { %v509_v13 = vpop.f32.mrf.mxu0  ;;  %v615_v14 = vpop.f32.mrf.mxu1 }
 0x21a   :  { %v861_v17 = vpack.c.bf16 %v509_v13, %v505_v7  ;;  %v863_v18 = vpack.c.bf16 %v615_v14, %v611_v8  ;;  %v9095_v8 = vld [vmem:[%s11622_s19 + $0x210] ss:$8 sps:$4 sm:$0xff]  }
 0x21b   :  { %v513_v21 = vpop.f32.mrf.mxu0  ;;  %v619_v22 = vpop.f32.mrf.mxu1 }
 0x21c   :  { %1692 = vmatprep.mubr.bf16.mxu0 %v861_v17  ;;  %1765 = vmatprep.mubr.bf16.mxu1 %v863_v18  ;;  %v9101_v18 = vld [vmem:[%s11622_s19 + $0x200] ss:$8 sps:$4 sm:$0xff]  }
 0x21d   :  { %1693 = vmatmul.mubr.bf16.vlgmr.msra.gmra.mxu0 %v860_v19  ;;  %1766 = vmatmul.mubr.bf16.vlgmr.msra.gmra.mxu1 %v862_v20  ;;  %v515_v27 = vpop.f32.mrf.mxu0  ;;  %v621_v28 = vpop.f32.mrf.mxu1  ;;  %v9104_v19 = vld [vmem:[%s11622_s19 + $0x300] ss:$8 sps:$4 sm:$0xff]  }
 0x21e   :  { %1807 = vmatpush1.bf16.msra.mxu0 %v9059_v11  ;;  %1880 = vmatpush1.bf16.msra.mxu1 %v9062_v12  ;;  %v9106_v11 = vld [vmem:[%s11622_s19 + $0x304] ss:$8 sps:$4 sm:$0xff]  }
 0x21f   :  { %1808 = vmatprep.subr.bf16.mxu0 %v9067_v15  ;;  %1881 = vmatprep.subr.bf16.mxu1 %v9070_v16  ;;  %v517_v29 = vpop.f32.mrf.mxu0  ;;  %v623_v30 = vpop.f32.mrf.mxu1 }
 0x220   :  { %v868_v35 = vpack.c.bf16 %v517_v29, %v513_v21  ;;  %v870_v36 = vpack.c.bf16 %v623_v30, %v619_v22  ;;  %v9109_v22 = vld [vmem:[%s11622_s19 + $0x2f4] ss:$8 sps:$4 sm:$0xff]   ;;  %v9115_v30 = vld [vmem:[%s11622_s19 + $0x2e4] ss:$8 sps:$4 sm:$0xff]  }
 0x221   :  { %v519_v37 = vpop.f32.mrf.mxu0  ;;  %v625_v38 = vpop.f32.mrf.mxu1 }
 0x222   :  { %1809 = vmatpush1.bf16.msra.mxu0 %v9065_v23  ;;  %1882 = vmatpush1.bf16.msra.mxu1 %v9068_v24  ;;  %v869_v39 = vpack.c.bf16 %v519_v37, %v515_v27  ;;  %v871_v40 = vpack.c.bf16 %v625_v38, %v621_v28  ;;  %v9112_v23 = vld [vmem:[%s11622_s19 + $0x3f4] ss:$8 sps:$4 sm:$0xff]   ;;  %v9110_v27 = vld [vmem:[%s11622_s19 + $0x3f0] ss:$8 sps:$4 sm:$0xff]   ;;  %v9116_v37 = vld [vmem:[%s11622_s19 + $0x3e0] ss:$8 sps:$4 sm:$0xff]  }
 0x223   :  { %1810 = vmatprep.subr.bf16.mxu0 %v9073_v25  ;;  %1883 = vmatprep.subr.bf16.mxu1 %v9076_v26  ;;  %v523_v41 = vpop.f32.mrf.mxu0  ;;  %v629_v42 = vpop.f32.mrf.mxu1  ;;  %v9107_v26 = vld [vmem:[%s11622_s19 + $0x2f0] ss:$8 sps:$4 sm:$0xff]  }
 0x224   :  { %1702 = vmatprep.mubr.bf16.mxu0 %v869_v39  ;;  %1775 = vmatprep.mubr.bf16.mxu1 %v871_v40  ;;  %v9121_v40 = vld [vmem:[%s11622_s19 + $0x2d4] ss:$8 sps:$4 sm:$0xff]  }
 0x225   :  { %v525_v47 = vpop.f32.mrf.mxu0  ;;  %v631_v48 = vpop.f32.mrf.mxu1  ;;  %1703 = vmatmul.mubr.bf16.gmra.mxu0 %v868_v35  ;;  %1776 = vmatmul.mubr.bf16.gmra.mxu1 %v870_v36  ;;  %v9113_v36 = vld [vmem:[%s11622_s19 + $0x2e0] ss:$8 sps:$4 sm:$0xff]  }
 0x226   :  { %1811 = vmatpush1.bf16.msra.mxu0 %v9071_v31  ;;  %1884 = vmatpush1.bf16.msra.mxu1 %v9074_v32  ;;  %v9118_v31 = vld [vmem:[%s11622_s19 + $0x3e4] ss:$8 sps:$4 sm:$0xff]  }
 0x227   :  { %1812 = vmatprep.subr.bf16.mxu0 %v9079_v33  ;;  %1885 = vmatprep.subr.bf16.mxu1 %v9082_v34  ;;  %v527_v49 = vpop.f32.mrf.mxu0  ;;  %v633_v50 = vpop.f32.mrf.mxu1 }
 0x228   :  { %v876_v55 = vpack.c.bf16 %v527_v49, %v523_v41  ;;  %v878_v56 = vpack.c.bf16 %v633_v50, %v629_v42  ;;  %v9124_v41 = vld [vmem:[%s11622_s19 + $0x3d4] ss:$8 sps:$4 sm:$0xff]   ;;  %v9125_v50 = vld [vmem:[%s11622_s19 + $0x2c0] ss:$8 sps:$4 sm:$0xff]  }
 0x229   :  { %v529_v57 = vpop.f32.mrf.mxu0  ;;  %v635_v58 = vpop.f32.mrf.mxu1 }
 0x22a   :  { %1813 = vmatpush1.bf16.msra.mxu0 %v9077_v43  ;;  %1886 = vmatpush1.bf16.msra.mxu1 %v9080_v44  ;;  %v877_v59 = vpack.c.bf16 %v529_v57, %v525_v47  ;;  %v879_v60 = vpack.c.bf16 %v635_v58, %v631_v48  ;;  %v9119_v44 = vld [vmem:[%s11622_s19 + $0x2d0] ss:$8 sps:$4 sm:$0xff]   ;;  %v9130_v47 = vld [vmem:[%s11622_s19 + $0x3c4] ss:$8 sps:$4 sm:$0xff]  }
 0x22b   :  { %1814 = vmatprep.subr.bf16.mxu0 %v9085_v45  ;;  %1887 = vmatprep.subr.bf16.mxu1 %v9088_v46  ;;  %v533_v61 = vpop.f32.mrf.mxu0  ;;  %v639_v62 = vpop.f32.mrf.mxu1  ;;  %v9122_v45 = vld [vmem:[%s11622_s19 + $0x3d0] ss:$8 sps:$4 sm:$0xff]   ;;  %v9127_v46 = vld [vmem:[%s11622_s19 + $0x2c4] ss:$8 sps:$4 sm:$0xff]  }
 0x22c   :  { %1712 = vmatprep.mubr.bf16.mxu0 %v877_v59  ;;  %1785 = vmatprep.mubr.bf16.mxu1 %v879_v60  ;;  %v9134_v57 = vld [vmem:[%s11622_s19 + $0x3b0] ss:$8 sps:$4 sm:$0xff]   ;;  %v9139_v58 = vld [vmem:[%s11622_s19 + $0x2a4] ss:$8 sps:$4 sm:$0xff]  }
 0x22d   :  { %v535_v4 = vpop.f32.mrf.mxu0  ;;  %v641_v5 = vpop.f32.mrf.mxu1  ;;  %1713 = vmatmul.mubr.bf16.gmra.mxu0 %v876_v55  ;;  %1786 = vmatmul.mubr.bf16.gmra.mxu1 %v878_v56  ;;  %v9131_v56 = vld [vmem:[%s11622_s19 + $0x2b0] ss:$8 sps:$4 sm:$0xff]   ;;  %v9142_v59 = vld [vmem:[%s11622_s19 + $0x3a4] ss:$8 sps:$4 sm:$0xff]  }
 0x22e   :  { %1815 = vmatpush1.bf16.msra.mxu0 %v9083_v51  ;;  %1888 = vmatpush1.bf16.msra.mxu1 %v9086_v52  ;;  %v9128_v51 = vld [vmem:[%s11622_s19 + $0x3c0] ss:$8 sps:$4 sm:$0xff]   ;;  %v9133_v52 = vld [vmem:[%s11622_s19 + $0x2b4] ss:$8 sps:$4 sm:$0xff]  }
 0x22f   :  { %1816 = vmatprep.subr.bf16.mxu0 %v9091_v53  ;;  %1889 = vmatprep.subr.bf16.mxu1 %v9094_v54  ;;  %v537_v6 = vpop.f32.mrf.mxu0  ;;  %v643_v7 = vpop.f32.mrf.mxu1  ;;  %v9136_v53 = vld [vmem:[%s11622_s19 + $0x3b4] ss:$8 sps:$4 sm:$0xff]  }
 0x230   :  { %v884_v12 = vpack.c.bf16 %v537_v6, %v533_v61  ;;  %v886_v13 = vpack.c.bf16 %v643_v7, %v639_v62  ;;  %v9137_v62 = vld [vmem:[%s11622_s19 + $0x2a0] ss:$8 sps:$4 sm:$0xff]   ;;  %v9146_v6 = vld [vmem:[%s11622_s19 + $0x390] ss:$8 sps:$4 sm:$0xff]   ;;  %v9151_v7 = vld [vmem:[%s11622_s19 + $0x284] ss:$8 sps:$4 sm:$0xff]  }
 0x231   :  { %v539_v14 = vpop.f32.mrf.mxu0  ;;  %v645_v15 = vpop.f32.mrf.mxu1 }
 0x232   :  { %1817 = vmatpush1.bf16.msra.mxu0 %v9089_v63  ;;  %1890 = vmatpush1.bf16.msra.mxu1 %v9092_v1  ;;  %v885_v16 = vpack.c.bf16 %v539_v14, %v535_v4  ;;  %v887_v17 = vpack.c.bf16 %v645_v15, %v641_v5  ;;  %v9140_v63 = vld [vmem:[%s11622_s19 + $0x3a0] ss:$8 sps:$4 sm:$0xff]   ;;  %v9145_v1 = vld [vmem:[%s11622_s19 + $0x294] ss:$8 sps:$4 sm:$0xff]   ;;  %v9143_v5 = vld [vmem:[%s11622_s19 + $0x290] ss:$8 sps:$4 sm:$0xff]  }
 0x233   :  { %1818 = vmatprep.subr.bf16.mxu0 %v9097_v2  ;;  %1891 = vmatprep.subr.bf16.mxu1 %v9100_v3  ;;  %v9148_v2 = vld [vmem:[%s11622_s19 + $0x394] ss:$8 sps:$4 sm:$0xff]  }
 0x234   :  { %1722 = vmatprep.mubr.bf16.mxu0 %v885_v16  ;;  %1795 = vmatprep.mubr.bf16.mxu1 %v887_v17  ;;  %v10797_v20 = vpop.f32.mrf.mxu0  ;;  %v10799_v21 = vpop.f32.mrf.mxu1 }
 0x235   :  { %1723 = vmatmul.mubr.bf16.gmra.mxu0 %v884_v12  ;;  %1796 = vmatmul.mubr.bf16.gmra.mxu1 %v886_v13  ;;  %v9152_v12 = vld [vmem:[%s11622_s19 + $0x380] ss:$8 sps:$4 sm:$0xff]  }
 0x236   :  { %1819 = vmatpush1.bf16.msra.mxu0 %v9095_v8  ;;  %1892 = vmatpush1.bf16.msra.mxu1 %v9098_v9  ;;  %v717_v24 = vpop.f32.mrf.mxu0  ;;  %v823_v25 = vpop.f32.mrf.mxu1  ;;  %v9154_v8 = vld [vmem:[%s11622_s19 + $0x384] ss:$8 sps:$4 sm:$0xff]  }
 0x237   :  { %1820 = vmatprep.subr.bf16.mxu0 %v9103_v10  ;;  %1893 = vmatprep.subr.bf16.mxu1 %v9106_v11  ;;  %v9149_v11 = vld [vmem:[%s11622_s19 + $0x280] ss:$8 sps:$4 sm:$0xff]  }
 0x238   :  { %v10805_v28 = vpop.f32.mrf.mxu0  ;;  %v10807_v29 = vpop.f32.mrf.mxu1 }
 0x239   :  { %v864_v17 = vpack.c.bf16 %v10805_v28, %v10797_v20 }
 0x23a   :  { %1821 = vmatpush1.bf16.msra.mxu0 %v9101_v18  ;;  %1894 = vmatpush1.bf16.msra.mxu1 %v9104_v19  ;;  %v721_v32 = vpop.f32.mrf.mxu0  ;;  %v827_v33 = vpop.f32.mrf.mxu1  ;;  %v866_v18 = vpack.c.bf16 %v10807_v29, %v10799_v21 }
 0x23b   :  { %1822 = vmatprep.subr.bf16.mxu0 %v9109_v22  ;;  %1895 = vmatprep.subr.bf16.mxu1 %v9112_v23  ;;  %v865_v34 = vpack.c.bf16 %v721_v32, %v717_v24  ;;  %v867_v35 = vpack.c.bf16 %v827_v33, %v823_v25 }
 0x23c   :  { %v10813_v38 = vpop.f32.mrf.mxu0  ;;  %v10815_v39 = vpop.f32.mrf.mxu1 }
 0x23d   :  { %1838 = vmatprep.mubr.bf16.mxu0 %v865_v34  ;;  %1911 = vmatprep.mubr.bf16.mxu1 %v867_v35 }
 0x23e   :  { %1823 = vmatpush2.bf16.msra.mxu0 %v9107_v26  ;;  %1896 = vmatpush2.bf16.msra.mxu1 %v9110_v27  ;;  %v10819_v42 = vpop.f32.mrf.mxu0  ;;  %v10821_v43 = vpop.f32.mrf.mxu1 }
 0x23f   :  { %1824 = vmatprep.subr.bf16.mxu0 %v9115_v30  ;;  %1897 = vmatprep.subr.bf16.mxu1 %v9118_v31 }
 0x240   :  { %v10827_v48 = vpop.f32.mrf.mxu0  ;;  %v10829_v49 = vpop.f32.mrf.mxu1 }
 0x241   :  { %v872_v27 = vpack.c.bf16 %v10827_v48, %v10813_v38  ;;  %v874_v30 = vpack.c.bf16 %v10829_v49, %v10815_v39  ;;  %v2053_v38 = vld [vmem:[#allocation2 + $0xf0] sm:$0xff]  ;;  %v2052_v39 = vld [vmem:[#allocation2 + $0xe8] sm:$0xff]  ;;  %v2043_v48 = vld [vmem:[#allocation2 + $0xa0] sm:$0xff] }
 0x242   :  { %1825 = vmatpush2.bf16.msra.mxu0 %v9113_v36  ;;  %1898 = vmatpush2.bf16.msra.mxu1 %v9116_v37  ;;  %v731_v54 = vpop.f32.mrf.mxu0  ;;  %v837_v55 = vpop.f32.mrf.mxu1  ;;  %v2054_v37 = vld [vmem:[#allocation2 + $0xf8] sm:$0xff] }
 0x243   :  { %1826 = vmatprep.subr.bf16.mxu0 %v9121_v40  ;;  %1899 = vmatprep.subr.bf16.mxu1 %v9124_v41  ;;  %v873_v15 = vpack.c.bf16 %v731_v54, %v10819_v42  ;;  %v875_v16 = vpack.c.bf16 %v837_v55, %v10821_v43  ;;  %v2051_v40 = vld [vmem:[#allocation2 + $0xe0] sm:$0xff]  ;;  %v2050_v41 = vld [vmem:[#allocation2 + $0xd8] sm:$0xff]  ;;  %v2049_v42 = vld [vmem:[#allocation2 + $0xd0] sm:$0xff] }
 0x244   :  { %v735_v60 = vpop.f32.mrf.mxu0  ;;  %v841_v61 = vpop.f32.mrf.mxu1  ;;  %v2048_v43 = vld [vmem:[#allocation2 + $0xc8] sm:$0xff]  ;;  %v2042_v49 = vld [vmem:[#allocation2 + $0x98] sm:$0xff]  ;;  %v2037_v54 = vld [vmem:[#allocation2 + $0x70] sm:$0xff] }
 0x245   :  { %v2036_v55 = vld [vmem:[#allocation2 + $0x68] sm:$0xff] }
 0x246   :  { %1827 = vmatpush2.bf16.msra.mxu0 %v9119_v44  ;;  %1900 = vmatpush2.bf16.msra.mxu1 %v9122_v45  ;;  %v737_v3 = vpop.f32.mrf.mxu0  ;;  %v843_v4 = vpop.f32.mrf.mxu1  ;;  %v2047_v44 = vld [vmem:[#allocation2 + $0xc0] sm:$0xff]  ;;  %v2046_v45 = vld [vmem:[#allocation2 + $0xb8] sm:$0xff] }
 0x247   :  { %1828 = vmatprep.subr.bf16.mxu0 %v9127_v46  ;;  %1901 = vmatprep.subr.bf16.mxu1 %v9130_v47  ;;  %v2045_v46 = vld [vmem:[#allocation2 + $0xb0] sm:$0xff]  ;;  %v2044_v47 = vld [vmem:[#allocation2 + $0xa8] sm:$0xff] }
 0x248   :  { %v739_v9 = vpop.f32.mrf.mxu0  ;;  %v845_v10 = vpop.f32.mrf.mxu1 }
 0x249   :  { %v880_v33 = vpack.c.bf16 %v739_v9, %v735_v60  ;;  %v882_v34 = vpack.c.bf16 %v845_v10, %v841_v61  ;;  %v2031_v60 = vld [vmem:[#allocation2 + $0x40] sm:$0xff]  ;;  %v2030_v61 = vld [vmem:[#allocation2 + $0x38] sm:$0xff] }
 0x24a   :  { %1829 = vmatpush2.bf16.msra.mxu0 %v9125_v50  ;;  %1902 = vmatpush2.bf16.msra.mxu1 %v9128_v51  ;;  %v741_v13 = vpop.f32.mrf.mxu0  ;;  %v847_v14 = vpop.f32.mrf.mxu1  ;;  %v2041_v50 = vld [vmem:[#allocation2 + $0x90] sm:$0xff]  ;;  %v2040_v51 = vld [vmem:[#allocation2 + $0x88] sm:$0xff]  ;;  %v2083_v9 = vld [vmem:[#allocation2 + $0x1e0] sm:$0xff] }
 0x24b   :  { %1830 = vmatprep.subr.bf16.mxu0 %v9133_v52  ;;  %1903 = vmatprep.subr.bf16.mxu1 %v9136_v53  ;;  %v881_v25 = vpack.c.bf16 %v741_v13, %v737_v3  ;;  %v883_v26 = vpack.c.bf16 %v847_v14, %v843_v4  ;;  %v2039_v52 = vld [vmem:[#allocation2 + $0x80] sm:$0xff]  ;;  %v2038_v53 = vld [vmem:[#allocation2 + $0x78] sm:$0xff]  ;;  %v2025_v3 = vld [vmem:[#allocation2 + $0x10] sm:$0xff] }
 0x24c   :  { %v745_v19 = vpop.f32.mrf.mxu0  ;;  %v851_v22 = vpop.f32.mrf.mxu1  ;;  %v2024_v4 = vld [vmem:[#allocation2 + $0x8] sm:$0xff]  ;;  %v2082_v10 = vld [vmem:[#allocation2 + $0x1d8] sm:$0xff]  ;;  %v2079_v13 = vld [vmem:[#allocation2 + $0x1c0] sm:$0xff] }
 0x24d   :  { %v2078_v14 = vld [vmem:[#allocation2 + $0x1b8] sm:$0xff] }
 0x24e   :  { %1831 = vmatpush2.bf16.msra.mxu0 %v9131_v56  ;;  %1904 = vmatpush2.bf16.msra.mxu1 %v9134_v57  ;;  %v747_v23 = vpop.f32.mrf.mxu0  ;;  %v853_v24 = vpop.f32.mrf.mxu1  ;;  %v2035_v56 = vld [vmem:[#allocation2 + $0x60] sm:$0xff]  ;;  %v2034_v57 = vld [vmem:[#allocation2 + $0x58] sm:$0xff] }
 0x24f   :  { %1832 = vmatprep.subr.bf16.mxu0 %v9139_v58  ;;  %1905 = vmatprep.subr.bf16.mxu1 %v9142_v59  ;;  %v2033_v58 = vld [vmem:[#allocation2 + $0x50] sm:$0xff]  ;;  %v2032_v59 = vld [vmem:[#allocation2 + $0x48] sm:$0xff] }
 0x250   :  { %v749_v20 = vpop.f32.mrf.mxu0  ;;  %v855_v28 = vpop.f32.mrf.mxu1 }
 0x251   :  { %v888_v35 = vpack.c.bf16 %v749_v20, %v745_v19  ;;  %v890_v36 = vpack.c.bf16 %v855_v28, %v851_v22  ;;  %v2073_v19 = vld [vmem:[#allocation2 + $0x190] sm:$0xff]  ;;  %v2072_v22 = vld [vmem:[#allocation2 + $0x188] sm:$0xff] }
 0x252   :  { %1833 = vmatpush2.bf16.msra.mxu0 %v9137_v62  ;;  %1906 = vmatpush2.bf16.msra.mxu1 %v9140_v63  ;;  %v751_v21 = vpop.f32.mrf.mxu0  ;;  %v857_v29 = vpop.f32.mrf.mxu1  ;;  %v2029_v62 = vld [vmem:[#allocation2 + $0x30] sm:$0xff]  ;;  %v2028_v63 = vld [vmem:[#allocation2 + $0x28] sm:$0xff] }
 0x253   :  { %1834 = vmatprep.subr.bf16.mxu0 %v9145_v1  ;;  %1907 = vmatprep.subr.bf16.mxu1 %v9148_v2  ;;  %v889_v31 = vpack.c.bf16 %v751_v21, %v747_v23  ;;  %v891_v32 = vpack.c.bf16 %v857_v29, %v853_v24  ;;  %v2027_v1 = vld [vmem:[#allocation2 + $0x20] sm:$0xff]  ;;  %v2026_v2 = vld [vmem:[#allocation2 + $0x18] sm:$0xff]  ;;  %v2065_v20 = vld [vmem:[#allocation2 + $0x150] sm:$0xff] }
 0x254   :  { %v2071_v23 = vld [vmem:[#allocation2 + $0x180] sm:$0xff]  ;;  %v2070_v24 = vld [vmem:[#allocation2 + $0x178] sm:$0xff]  ;;  %v2064_v28 = vld [vmem:[#allocation2 + $0x148] sm:$0xff] }
 0x255   :  { %v2063_v21 = vld [vmem:[#allocation2 + $0x140] sm:$0xff]  ;;  %v2062_v29 = vld [vmem:[#allocation2 + $0x138] sm:$0xff] }
 0x256   :  { %1835 = vmatpush2.bf16.msra.mxu0 %v9143_v5  ;;  %1908 = vmatpush2.bf16.msra.mxu1 %v9146_v6  ;;  %v2023_v5 = vld [vmem:[#allocation2] sm:$0xff]  ;;  %v2086_v6 = vld [vmem:[#allocation2 + $0x1f8] sm:$0xff] }
 0x257   :  { %1836 = vmatprep.subr.bf16.mxu0 %v9151_v7  ;;  %1909 = vmatprep.subr.bf16.mxu1 %v9154_v8  ;;  %v2085_v7 = vld [vmem:[#allocation2 + $0x1f0] sm:$0xff]  ;;  %v2084_v8 = vld [vmem:[#allocation2 + $0x1e8] sm:$0xff] }
 0x25a   :  { %1837 = vmatpush2.bf16.msra.mxu0 %v9149_v11  ;;  %1910 = vmatpush2.bf16.msra.mxu1 %v9152_v12  ;;  %v2081_v11 = vld [vmem:[#allocation2 + $0x1d0] sm:$0xff]  ;;  %v2080_v12 = vld [vmem:[#allocation2 + $0x1c8] sm:$0xff] }
 0x25b   :  { %2087 = vmatprep.subr.mxu0 %v2054_v37  ;;  %v2055_v37 = vld [vmem:[#allocation2 + $0x100] sm:$0xff] }
 0x25d   :  { %1839 = vmatmul.mubr.bf16.vlgmr.msra.gmra.mxu0 %v864_v17  ;;  %1912 = vmatmul.mubr.bf16.vlgmr.msra.gmra.mxu1 %v866_v18  ;;  %v2075_v17 = vld [vmem:[#allocation2 + $0x1a0] sm:$0xff]  ;;  %v2074_v18 = vld [vmem:[#allocation2 + $0x198] sm:$0xff] }
 0x25e   :  { %1848 = vmatprep.mubr.bf16.mxu0 %v873_v15  ;;  %1921 = vmatprep.mubr.bf16.mxu1 %v875_v16  ;;  %v2077_v15 = vld [vmem:[#allocation2 + $0x1b0] sm:$0xff]  ;;  %v2076_v16 = vld [vmem:[#allocation2 + $0x1a8] sm:$0xff] }
 0x25f   :  { %2088 = vmatpush1.msra.mxu0 %v2053_v38 }
 0x260   :  { %2089 = vmatprep.subr.mxu0 %v2052_v39 }
 0x261   :  { %2090 = vmatpush1.msra.mxu0 %v2051_v40 }
 0x262   :  { %2091 = vmatprep.subr.mxu0 %v2050_v41 }
 0x263   :  { %2092 = vmatpush1.msra.mxu0 %v2049_v42 }
 0x264   :  { %2093 = vmatprep.subr.mxu0 %v2048_v43 }
 0x265   :  { %1849 = vmatmul.mubr.bf16.gmra.mxu0 %v872_v27  ;;  %1922 = vmatmul.mubr.bf16.gmra.mxu1 %v874_v30  ;;  %v2067_v27 = vld [vmem:[#allocation2 + $0x160] sm:$0xff]  ;;  %v2066_v30 = vld [vmem:[#allocation2 + $0x158] sm:$0xff] }
 0x266   :  { %1858 = vmatprep.mubr.bf16.mxu0 %v881_v25  ;;  %1931 = vmatprep.mubr.bf16.mxu1 %v883_v26  ;;  %v2069_v25 = vld [vmem:[#allocation2 + $0x170] sm:$0xff]  ;;  %v2068_v26 = vld [vmem:[#allocation2 + $0x168] sm:$0xff] }
 0x267   :  { %2094 = vmatpush1.msra.mxu0 %v2047_v44 }
 0x268   :  { %2095 = vmatprep.subr.mxu0 %v2046_v45 }
 0x269   :  { %2096 = vmatpush1.msra.mxu0 %v2045_v46 }
 0x26a   :  { %2097 = vmatprep.subr.mxu0 %v2044_v47 }
 0x26b   :  { %2098 = vmatpush1.msra.mxu0 %v2043_v48 }
 0x26c   :  { %2099 = vmatprep.subr.mxu0 %v2042_v49 }
 0x26d   :  { %1859 = vmatmul.mubr.bf16.gmra.mxu0 %v880_v33  ;;  %1932 = vmatmul.mubr.bf16.gmra.mxu1 %v882_v34  ;;  %v2059_v33 = vld [vmem:[#allocation2 + $0x120] sm:$0xff]  ;;  %v2058_v34 = vld [vmem:[#allocation2 + $0x118] sm:$0xff] }
 0x26e   :  { %1868 = vmatprep.mubr.bf16.mxu0 %v889_v31  ;;  %1941 = vmatprep.mubr.bf16.mxu1 %v891_v32  ;;  %v2061_v31 = vld [vmem:[#allocation2 + $0x130] sm:$0xff]  ;;  %v2060_v32 = vld [vmem:[#allocation2 + $0x128] sm:$0xff] }
 0x26f   :  { %2100 = vmatpush1.msra.mxu0 %v2041_v50 }
 0x270   :  { %2101 = vmatprep.subr.mxu0 %v2040_v51 }
 0x271   :  { %2102 = vmatpush1.msra.mxu0 %v2039_v52 }
 0x272   :  { %2103 = vmatprep.subr.mxu0 %v2038_v53 }
 0x273   :  { %2104 = vmatpush1.msra.mxu0 %v2037_v54 }
 0x274   :  { %2105 = vmatprep.subr.mxu0 %v2036_v55 }
 0x275   :  { %1869 = vmatmul.mubr.bf16.gmra.mxu0 %v888_v35  ;;  %1942 = vmatmul.mubr.bf16.gmra.mxu1 %v890_v36  ;;  %v2057_v35 = vld [vmem:[#allocation2 + $0x110] sm:$0xff]  ;;  %v2056_v36 = vld [vmem:[#allocation2 + $0x108] sm:$0xff] }
 0x276   :  { %2447 = vmatprep.mubr.bf16.mxu1 %v10345_v0  ;;  %2106 = vmatpush1.msra.mxu0 %v2035_v56 }
 0x277   :  { %2107 = vmatprep.subr.mxu0 %v2034_v57 }
 0x278   :  { %2108 = vmatpush1.msra.mxu0 %v2033_v58 }
 0x279   :  { %2109 = vmatprep.subr.mxu0 %v2032_v59 }
 0x27a   :  { %2110 = vmatpush1.msra.mxu0 %v2031_v60 }
 0x27b   :  { %2111 = vmatprep.subr.mxu0 %v2030_v61 }
 0x27c   :  { %2112 = vmatpush1.msra.mxu0 %v2029_v62 }
 0x27d   :  { %2113 = vmatprep.subr.mxu0 %v2028_v63 }
 0x27e   :  { %2114 = vmatpush1.msra.mxu0 %v2027_v1 }
 0x27f   :  { %2115 = vmatprep.subr.mxu0 %v2026_v2 }
 0x280   :  { %2116 = vmatpush1.msra.mxu0 %v2025_v3 }
 0x281   :  { %2117 = vmatprep.subr.mxu0 %v2024_v4 }
 0x282   :  { %2118 = vmatpush1.msra.mxu0 %v2023_v5 }
 0x283   :  { %2119 = vmatprep.subr.mxu0 %v2086_v6 }
 0x284   :  { %2120 = vmatpush2.msra.mxu0 %v2085_v7 }
 0x285   :  { %2121 = vmatprep.subr.mxu0 %v2084_v8 }
 0x286   :  { %2122 = vmatpush2.msra.mxu0 %v2083_v9 }
 0x287   :  { %2123 = vmatprep.subr.mxu0 %v2082_v10 }
 0x288   :  { %2124 = vmatpush2.msra.mxu0 %v2081_v11 }
 0x289   :  { %2125 = vmatprep.subr.mxu0 %v2080_v12 }
 0x28a   :  { %2126 = vmatpush2.msra.mxu0 %v2079_v13 }
 0x28b   :  { %2127 = vmatprep.subr.mxu0 %v2078_v14 }
 0x28c   :  { %2128 = vmatpush2.msra.mxu0 %v2077_v15 }
 0x28d   :  { %2129 = vmatprep.subr.mxu0 %v2076_v16 }
 0x28e   :  { %2130 = vmatpush2.msra.mxu0 %v2075_v17 }
 0x28f   :  { %2131 = vmatprep.subr.mxu0 %v2074_v18 }
 0x290   :  { %2132 = vmatpush2.msra.mxu0 %v2073_v19 }
 0x291   :  { %2133 = vmatprep.subr.mxu0 %v2072_v22 }
 0x292   :  { %2134 = vmatpush2.msra.mxu0 %v2071_v23 }
 0x293   :  { %2135 = vmatprep.subr.mxu0 %v2070_v24 }
 0x294   :  { %2136 = vmatpush2.msra.mxu0 %v2069_v25 }
 0x295   :  { %2137 = vmatprep.subr.mxu0 %v2068_v26 }
 0x296   :  { %2138 = vmatpush2.msra.mxu0 %v2067_v27 }
 0x297   :  { %2139 = vmatprep.subr.mxu0 %v2066_v30 }
 0x298   :  { %2140 = vmatpush2.msra.mxu0 %v2065_v20 }
 0x299   :  { %2141 = vmatprep.subr.mxu0 %v2064_v28 }
 0x29a   :  { %2142 = vmatpush2.msra.mxu0 %v2063_v21 }
 0x29b   :  { %2143 = vmatprep.subr.mxu0 %v2062_v29 }
 0x29c   :  { %2144 = vmatpush2.msra.mxu0 %v2061_v31 }
 0x29d   :  { %2145 = vmatprep.subr.mxu0 %v2060_v32 }
 0x29e   :  { %2146 = vmatpush2.msra.mxu0 %v2059_v33 }
 0x29f   :  { %2147 = vmatprep.subr.mxu0 %v2058_v34 }
 0x2a0   :  { %2148 = vmatpush2.msra.mxu0 %v2057_v35 }
 0x2a1   :  { %2149 = vmatprep.subr.mxu0 %v2056_v36 }
 0x2a2   :  { %2150 = vmatpush2.msra.mxu0 %v2055_v37 }
 0x2dd   :  { %v1694_v38 = vpop.f32.mrf.mxu0  ;;  %v1767_v39 = vpop.f32.mrf.mxu1 }
 0x2de   :  { %v1768_v18 = vadd.f32 %v1767_v39, %v1694_v38 }
 0x2df   :  { %v1696_v40 = vpop.f32.mrf.mxu0  ;;  %v1769_v41 = vpop.f32.mrf.mxu1 }
 0x2e0   :  { %v1770_v26 = vadd.f32 %v1769_v41, %v1696_v40 }
 0x2e1   :  { %v1698_v42 = vpop.f32.mrf.mxu0  ;;  %v1771_v43 = vpop.f32.mrf.mxu1 }
 0x2e2   :  { %v1772_v15 = vadd.f32 %v1771_v43, %v1698_v42 }
 0x2e3   :  { %v1700_v44 = vpop.f32.mrf.mxu0  ;;  %v1773_v45 = vpop.f32.mrf.mxu1 }
 0x2e4   :  { %v1774_v19 = vadd.f32 %v1773_v45, %v1700_v44 }
 0x2e5   :  { %v1704_v46 = vpop.f32.mrf.mxu0  ;;  %v1777_v47 = vpop.f32.mrf.mxu1 }
 0x2e6   :  { %v1778_v22 = vadd.f32 %v1777_v47, %v1704_v46 }
 0x2e7   :  { %v1706_v48 = vpop.f32.mrf.mxu0  ;;  %v1779_v49 = vpop.f32.mrf.mxu1 }
 0x2e8   :  { %v1780_v20 = vadd.f32 %v1779_v49, %v1706_v48 }
 0x2e9   :  { %v1708_v50 = vpop.f32.mrf.mxu0  ;;  %v1781_v51 = vpop.f32.mrf.mxu1 }
 0x2ea   :  { %v1782_v28 = vadd.f32 %v1781_v51, %v1708_v50 }
 0x2eb   :  { %v1710_v52 = vpop.f32.mrf.mxu0  ;;  %v1783_v53 = vpop.f32.mrf.mxu1 }
 0x2ec   :  { %v1784_v33 = vadd.f32 %v1783_v53, %v1710_v52 }
 0x2ed   :  { %v1714_v54 = vpop.f32.mrf.mxu0  ;;  %v1787_v55 = vpop.f32.mrf.mxu1 }
 0x2ee   :  { %v1788_v39 = vadd.f32 %v1787_v55, %v1714_v54 }
 0x2ef   :  { %v1716_v56 = vpop.f32.mrf.mxu0  ;;  %v1789_v57 = vpop.f32.mrf.mxu1 }
 0x2f0   :  { %v1790_v46 = vadd.f32 %v1789_v57, %v1716_v56 }
 0x2f1   :  { %v1718_v58 = vpop.f32.mrf.mxu0  ;;  %v1791_v59 = vpop.f32.mrf.mxu1 }
 0x2f2   :  { %v1792_v47 = vadd.f32 %v1791_v59, %v1718_v58 }
 0x2f3   :  { %v1720_v60 = vpop.f32.mrf.mxu0  ;;  %v1793_v61 = vpop.f32.mrf.mxu1 }
 0x2f4   :  { %v1794_v50 = vadd.f32 %v1793_v61, %v1720_v60 }
 0x2f5   :  { %v1724_v62 = vpop.f32.mrf.mxu0  ;;  %v1797_v63 = vpop.f32.mrf.mxu1 }
 0x2f7   :  { %v1726_v1 = vpop.f32.mrf.mxu0  ;;  %v1799_v2 = vpop.f32.mrf.mxu1 }
 0x2f9   :  { %v10860_v3 = vpop.f32.mrf.mxu0  ;;  %v1801_v4 = vpop.f32.mrf.mxu1 }
 0x2fb   :  { %v10862_v5 = vpop.f32.mrf.mxu0  ;;  %v10864_v6 = vpop.f32.mrf.mxu1 }
 0x31d   :  { %v1840_v7 = vpop.f32.mrf.mxu0  ;;  %v1913_v8 = vpop.f32.mrf.mxu1 }
 0x31e   :  { %v1841_v27 = vadd.f32 %v1840_v7, %v1768_v18  ;;  %v1798_v7 = vadd.f32 %v1797_v63, %v1724_v62 }
 0x31f   :  { %v1842_v9 = vpop.f32.mrf.mxu0  ;;  %v1915_v10 = vpop.f32.mrf.mxu1 }
 0x320   :  { %v1843_v32 = vadd.f32 %v1842_v9, %v1770_v26  ;;  %v10868_v42 = vadd.f32 %v1913_v8, %v1841_v27  ;;  %v1800_v8 = vadd.f32 %v1799_v2, %v1726_v1 }
 0x321   :  { %v1844_v11 = vpop.f32.mrf.mxu0  ;;  %v1917_v12 = vpop.f32.mrf.mxu1 }
 0x322   :  { %v1845_v23 = vadd.f32 %v1844_v11, %v1772_v15  ;;  %v10874_v48 = vadd.f32 %v1915_v10, %v1843_v32  ;;  %v1978_v9 = vmul.f32 %v10868_v42, %v10868_v42  ;;  %v1802_v11 = vadd.f32 %v1801_v4, %v10860_v3 }
 0x323   :  { %v1846_v13 = vpop.f32.mrf.mxu0  ;;  %v1919_v14 = vpop.f32.mrf.mxu1 }
 0x324   :  { %v1847_v30 = vadd.f32 %v1846_v13, %v1774_v19  ;;  %v10866_v34 = vadd.f32 %v1917_v12, %v1845_v23  ;;  %v1979_v62 = vmul.f32 %v10874_v48, %v10874_v48 }
 0x325   :  { %v1850_v16 = vpop.f32.mrf.mxu0  ;;  %v1923_v17 = vpop.f32.mrf.mxu1 }
 0x326   :  { %v1851_v21 = vadd.f32 %v1850_v16, %v1778_v22  ;;  %v10870_v43 = vadd.f32 %v1919_v14, %v1847_v30  ;;  %v1980_v51 = vmul.f32 %v10866_v34, %v10866_v34  ;;  %v1952_v63 = vadd.f32 %v10866_v34, %v10868_v42 }
 0x327   :  { %v1852_v24 = vpop.f32.mrf.mxu0  ;;  %v1925_v25 = vpop.f32.mrf.mxu1 }
 0x328   :  { %v1853_v35 = vadd.f32 %v1852_v24, %v1780_v20  ;;  %v10872_v40 = vadd.f32 %v1923_v17, %v1851_v21  ;;  %v1981_v56 = vmul.f32 %v10870_v43, %v10870_v43  ;;  %v1994_v2 = vadd.f32 %v1980_v51, %v1978_v9 }
 0x329   :  { %v1854_v29 = vpop.f32.mrf.mxu0  ;;  %v1927_v31 = vpop.f32.mrf.mxu1  ;;  %v1965_v3 = vadd.f32 %v10870_v43, %v10874_v48 }
 0x32a   :  { %v1855_v36 = vadd.f32 %v1854_v29, %v1782_v28  ;;  %v10878_v52 = vadd.f32 %v1925_v25, %v1853_v35  ;;  %v1982_v57 = vmul.f32 %v10872_v40, %v10872_v40  ;;  %v1953_v4 = vadd.f32 %v1952_v63, %v10872_v40 }
 0x32b   :  { %v1856_v37 = vpop.f32.mrf.mxu0  ;;  %v1929_v38 = vpop.f32.mrf.mxu1  ;;  %v2007_v19 = vadd.f32 %v1981_v56, %v1979_v62 }
 0x32c   :  { %v1857_v41 = vadd.f32 %v1856_v37, %v1784_v33  ;;  %v10880_v53 = vadd.f32 %v1927_v31, %v1855_v36  ;;  %v1983_v12 = vmul.f32 %v10878_v52, %v10878_v52  ;;  %v1995_v22 = vadd.f32 %v1994_v2, %v1982_v57 }
 0x32d   :  { %v1860_v44 = vpop.f32.mrf.mxu0  ;;  %v1933_v45 = vpop.f32.mrf.mxu1  ;;  %v1966_v27 = vadd.f32 %v1965_v3, %v10878_v52  ;;  %v1804_v36 = vadd.f32 %v10864_v6, %v10862_v5 }
 0x32e   :  { %v1861_v49 = vadd.f32 %v1860_v44, %v1788_v39  ;;  %v10888_v58 = vadd.f32 %v1929_v38, %v1857_v41  ;;  %v1984_v13 = vmul.f32 %v10880_v53, %v10880_v53  ;;  %v1954_v30 = vadd.f32 %v1953_v4, %v10880_v53 }
 0x32f   :  { %v1862_v54 = vpop.f32.mrf.mxu0  ;;  %v1935_v55 = vpop.f32.mrf.mxu1  ;;  %v2008_v21 = vadd.f32 %v2007_v19, %v1983_v12 }
 0x330   :  { %v10890_v59 = vadd.f32 %v1933_v45, %v1861_v49  ;;  %v1863_v60 = vadd.f32 %v1862_v54, %v1790_v46  ;;  %v1985_v23 = vmul.f32 %v10888_v58, %v10888_v58  ;;  %v1996_v29 = vadd.f32 %v1995_v22, %v1984_v13 }
 0x331   :  { %v1864_v61 = vpop.f32.mrf.mxu0  ;;  %v1937_v10 = vpop.f32.mrf.mxu1  ;;  %v1967_v37 = vadd.f32 %v1966_v27, %v10888_v58 }
 0x332   :  { %v1865_v1 = vadd.f32 %v1864_v61, %v1792_v47  ;;  %v10901_v14 = vadd.f32 %v1935_v55, %v1863_v60  ;;  %v1986_v24 = vmul.f32 %v10890_v59, %v10890_v59  ;;  %v1955_v38 = vadd.f32 %v1954_v30, %v10890_v59 }
 0x333   :  { %v1866_v15 = vpop.f32.mrf.mxu0  ;;  %v1939_v16 = vpop.f32.mrf.mxu1  ;;  %v2009_v41 = vadd.f32 %v2008_v21, %v1985_v23 }
 0x334   :  { %v10906_v17 = vadd.f32 %v1937_v10, %v1865_v1  ;;  %v1867_v18 = vadd.f32 %v1866_v15, %v1794_v50  ;;  %v1987_v31 = vmul.f32 %v10901_v14, %v10901_v14  ;;  %v1997_v44 = vadd.f32 %v1996_v29, %v1986_v24 }
 0x335   :  { %v1870_v25 = vpop.f32.mrf.mxu0  ;;  %v1943_v26 = vpop.f32.mrf.mxu1  ;;  %v1968_v50 = vadd.f32 %v1967_v37, %v10901_v14 }
 0x336   :  { %v10914_v20 = vadd.f32 %v1939_v16, %v1867_v18  ;;  %v1871_v28 = vadd.f32 %v1870_v25, %v1798_v7  ;;  %v1988_v32 = vmul.f32 %v10906_v17, %v10906_v17  ;;  %v1956_v51 = vadd.f32 %v1955_v38, %v10906_v17 }
 0x337   :  { %v1872_v33 = vpop.f32.mrf.mxu0  ;;  %v1945_v35 = vpop.f32.mrf.mxu1  ;;  %v2010_v54 = vadd.f32 %v2009_v41, %v1987_v31 }
 0x338   :  { %v10924_v39 = vadd.f32 %v1943_v26, %v1871_v28  ;;  %v1989_v45 = vmul.f32 %v10914_v20, %v10914_v20  ;;  %v1873_v46 = vadd.f32 %v1872_v33, %v1800_v8  ;;  %v1998_v55 = vadd.f32 %v1997_v44, %v1988_v32 }
 0x339   :  { %v1874_v47 = vpop.f32.mrf.mxu0  ;;  %v1947_v49 = vpop.f32.mrf.mxu1  ;;  %v1969_v56 = vadd.f32 %v1968_v50, %v10914_v20 }
 0x33a   :  { %v1990_v5 = vmul.f32 %v10924_v39, %v10924_v39  ;;  %v1875_v6 = vadd.f32 %v1874_v47, %v1802_v11  ;;  %v10932_v7 = vadd.f32 %v1945_v35, %v1873_v46  ;;  %v1957_v57 = vadd.f32 %v1956_v51, %v10924_v39 }
 0x33b   :  { %v1876_v9 = vpop.f32.mrf.mxu0  ;;  %v2011_v61 = vadd.f32 %v2010_v54, %v1989_v45  ;;  %v1949_v63 = vpop.f32.mrf.mxu1 }
 0x33c   :  { %v10936_v8 = vadd.f32 %v1947_v49, %v1875_v6  ;;  %v1877_v60 = vadd.f32 %v1876_v9, %v1804_v36  ;;  %v1999_v10 = vadd.f32 %v1998_v55, %v1990_v5  ;;  %v1991_v62 = vmul.f32 %v10932_v7, %v10932_v7 }
 0x33d   :  { %v1970_v11 = vadd.f32 %v1969_v56, %v10932_v7 }
 0x33e   :  { %v1958_v1 = vadd.f32 %v1957_v57, %v10936_v8  ;;  %v1992_v2 = vmul.f32 %v10936_v8, %v10936_v8  ;;  %v10944_v12 = vadd.f32 %v1949_v63, %v1877_v60  ;;  %v2012_v13 = vadd.f32 %v2011_v61, %v1991_v62 }
 0x33f   :  { %v2176_v61 = vlaneseq }
 0x340   :  { %v1959_v15 = vrot.slane %v1958_v1, 4  ;;  %v2000_v16 = vadd.f32 %v1999_v10, %v1992_v2  ;;  %v1971_v3 = vadd.f32 %v1970_v11, %v10944_v12  ;;  %v1993_v4 = vmul.f32 %v10944_v12, %v10944_v12  ;;  %v2174_v2 = vld [vmem:[#allocation4] sm:$0x3] }
 0x341   :  { %v2177_v11 = vshrl.u32 %v2176_v61, 7 }
 0x342   :  { %v1960_v18 = vadd.f32 %v1959_v15, %v1958_v1  ;;  %v2001_v19 = vrot.slane %v2000_v16, 4  ;;  %v1972_v22 = vrot.slane %v1971_v3, 4  ;;  %v2013_v23 = vadd.f32 %v2012_v13, %v1993_v4 }
 0x343   :  { %v10952_v1 = vsub.s32 0, %v2177_v11  ;;  %v10954_v13 = vsub.s32 1, %v2177_v11 }
 0x344   :  { %v1961_v24 = vrot.slane %v1960_v18, 2  ;;  %v2002_v25 = vadd.f32 %v2001_v19, %v2000_v16  ;;  %v1973_v26 = vadd.f32 %v1972_v22, %v1971_v3  ;;  %v2014_v27 = vrot.slane %v2013_v23, 4  ;;  %v2236_v16 = vld [vmem:[#allocation6] sm:$0x3] }
 0x345   :  { %v2179_v3 = vrot.slane %v2174_v2, %v10952_v1  ;;  %v10965_v19 = vrot.slane %v2236_v16, %v10952_v1 }
 0x346   :  { %v2003_v30 = vrot.slane %v2002_v25, 2  ;;  %v1974_v28 = vrot.slane %v1973_v26, 2  ;;  %v2015_v21 = vadd.f32 %v2014_v27, %v2013_v23  ;;  %v1962_v29 = vadd.f32 %v1961_v24, %v1960_v18 }
 0x347   :  { %v2183_v18 = vrot.slane %v2174_v2, %v10954_v13  ;;  %v10968_v23 = vrot.slane %v2236_v16, %v10954_v13 }
 0x348   :  { %v2004_v31 = vadd.f32 %v2003_v30, %v2002_v25  ;;  %v1975_v32 = vadd.f32 %v1974_v28, %v1973_v26  ;;  %v2016_v33 = vrot.slane %v2015_v21, 2  ;;  %v1963_v38 = vrot.slane %v1962_v29, 1 }
 0x34a   :  { %v1976_v35 = vrot.slane %v1975_v32, 1  ;;  %v2017_v36 = vadd.f32 %v2016_v33, %v2015_v21  ;;  %v2005_v37 = vrot.slane %v2004_v31, 1  ;;  %v1964_v47 = vadd.f32 %v1963_v38, %v1962_v29 }
 0x34c   :  { %v2018_v41 = vrot.slane %v2017_v36, 1  ;;  %v2006_v44 = vadd.f32 %v2005_v37, %v2004_v31  ;;  %v1977_v45 = vadd.f32 %v1976_v35, %v1975_v32 }
 0x34e   :  { %v2019_v46 = vadd.f32 %v2018_v41, %v2017_v36  ;;  %v2021_v50 = vsel %vm2020_vm0, %v1964_v47, %v2006_v44 }
 0x350   :  { %v2022_v49 = vsel %vm2020_vm0, %v1977_v45, %v2019_v46 }
 0x351   :  { %2151 = vmatprep.mubr.f32.mxu0 %v2022_v49 }
 0x352   :  { %2152 = vmatmul.mubr.f32.vlgmr.msra.gmra.mxu0 %v2021_v50 }
 0x353   :  { %2373 = vmatprep.mubr.bf16.mxu0 %v10345_v0 }
 0x412   :  { %v2153_v51 = vpop.f32.mrf.mxu0 }
 0x413   :  { %v2158_v5 = vmul.f32 0.00048828125, %v2153_v51 }
 0x414   :  { %v2155_v6 = vpop.f32.mrf.mxu0 }
 0x415   :  { %v2160_v54 = vmul.f32 %v2158_v5, %v2158_v5  ;;  %v2159_v55 = vmul.f32 0.00048828125, %v2155_v6  ;;  %v10957_v15 = vrot.slane %v2158_v5, %v10952_v1 }
 0x417   :  { %v2164_v9 = vrot.slane %v2160_v54, 7  ;;  %v2161_v56 = vmul.f32 %v2159_v55, %v2159_v55  ;;  %v10961_v4 = vrot.slane %v2159_v55, %v10952_v1  ;;  %v2208_v24 = vsub.f32 %v10924_v39, %v10957_v15 }
 0x418   :  { %v2210_v25 = vsub.f32 %v10936_v8, %v10957_v15  ;;  %v2204_v26 = vsub.f32 %v10890_v59, %v10957_v15  ;;  %v2206_v28 = vsub.f32 %v10906_v17, %v10957_v15  ;;  %v2200_v21 = vsub.f32 %v10872_v40, %v10957_v15 }
 0x419   :  { %v2168_v57 = vsub.f32 %v2158_v5, %v2164_v9  ;;  %v2165_v60 = vrot.slane %v2161_v56, 7  ;;  %v2209_v30 = vsub.f32 %v10932_v7, %v10961_v4  ;;  %v2211_v39 = vsub.f32 %v10944_v12, %v10961_v4 }
 0x41a   :  { %v2205_v8 = vsub.f32 %v10901_v14, %v10961_v4  ;;  %v2207_v59 = vsub.f32 %v10914_v20, %v10961_v4  ;;  %v2201_v31 = vsub.f32 %v10878_v52, %v10961_v4  ;;  %v2203_v40 = vsub.f32 %v10888_v58, %v10961_v4 }
 0x41b   :  { %v2170_v10 = vadd.f32 1e-05, %v2168_v57  ;;  %v2169_v62 = vsub.f32 %v2159_v55, %v2165_v60  ;;  %v2202_v32 = vsub.f32 %v10880_v53, %v10957_v15  ;;  %v2197_v12 = vsub.f32 %v10874_v48, %v10961_v4 }
 0x41c   :  { %v2199_v14 = vsub.f32 %v10870_v43, %v10961_v4  ;;  %v2196_v20 = vsub.f32 %v10868_v42, %v10957_v15  ;;  %v2198_v52 = vsub.f32 %v10866_v34, %v10957_v15 }
 0x41d   :  { %9823 = vrsqrt.f32 %v2170_v10  ;;  %v2171_v63 = vadd.f32 1e-05, %v2169_v62 }
 0x41f   :  { %9825 = vrsqrt.f32 %v2171_v63 }
 0x42a   :  { %v9824_v22 = vpop.eup %9823 }
 0x42b   :  { %v2186_v27 = vmul.f32 %v9824_v22, %v2179_v3 }
 0x42c   :  { %v9826_v29 = vpop.eup %9825 }
 0x42d   :  { %v10991_v7 = vrot.slane %v2186_v27, %v10954_v13  ;;  %v2187_v17 = vmul.f32 %v9826_v29, %v2183_v18 }
 0x42f   :  { %v11006_v33 = vrot.slane %v2187_v17, %v10954_v13  ;;  %v2232_v58 = vmul.f32 %v10991_v7, %v2208_v24  ;;  %v2234_v35 = vmul.f32 %v10991_v7, %v2210_v25  ;;  %v2228_v53 = vmul.f32 %v10991_v7, %v2204_v26 }
 0x430   :  { %v2230_v36 = vmul.f32 %v10991_v7, %v2206_v28  ;;  %v2224_v37 = vmul.f32 %v10991_v7, %v2200_v21  ;;  %v2226_v38 = vmul.f32 %v10991_v7, %v2202_v32  ;;  %v11015_v42 = vmul.f32 %v10991_v7, %v2196_v20 }
 0x431   :  { %v2233_v41 = vmul.f32 %v11006_v33, %v2209_v30  ;;  %v2235_v44 = vmul.f32 %v11006_v33, %v2211_v39  ;;  %v2260_v45 = vadd.f32 %v10965_v19, %v2232_v58  ;;  %v2262_v46 = vadd.f32 %v10965_v19, %v2234_v35 }
 0x432   :  { %v2229_v47 = vmul.f32 %v11006_v33, %v2205_v8  ;;  %v2231_v49 = vmul.f32 %v11006_v33, %v2207_v59  ;;  %v2256_v50 = vadd.f32 %v10965_v19, %v2228_v53  ;;  %v2258_v51 = vadd.f32 %v10965_v19, %v2230_v36 }
 0x433   :  { %v2261_v5 = vadd.f32 %v10968_v23, %v2233_v41  ;;  %v2263_v6 = vadd.f32 %v10968_v23, %v2235_v44  ;;  %vm2276_vm1 = vcmp.ge.f32.partialorder %v2260_v45, 0.0  ;;  %vm2278_vm2 = vcmp.ge.f32.partialorder %v2262_v46, 0.0 }
 0x434   :  { %v2292_v54 = vmul.f32 0.2, %v2260_v45  ;;  %v2294_v55 = vmul.f32 0.2, %v2262_v46  ;;  %v2257_v9 = vadd.f32 %v10968_v23, %v2229_v47  ;;  %v2259_v56 = vadd.f32 %v10968_v23, %v2231_v49 }
 0x435   :  { %vm2277_vm3 = vcmp.ge.f32.partialorder %v2261_v5, 0.0  ;;  %vm2279_vm4 = vcmp.ge.f32.partialorder %v2263_v6, 0.0  ;;  %v2293_v57 = vmul.f32 0.2, %v2261_v5  ;;  %v2295_v60 = vmul.f32 0.2, %v2263_v6 }
 0x436   :  { %v2308_v61 = vsel %vm2276_vm1, %v2260_v45, %v2292_v54  ;;  %v2310_v10 = vsel %vm2278_vm2, %v2262_v46, %v2294_v55  ;;  %vm2273_vm5 = vcmp.ge.f32.partialorder %v2257_v9, 0.0  ;;  %vm2275_vm6 = vcmp.ge.f32.partialorder %v2259_v56, 0.0  ;;  %v9159_v54 = vld [vmem:[#allocation7 + $0x20] sm:$0xff]   ;;  %v9160_v55 = vld [vmem:[#allocation7 + $0x30] sm:$0xff]  }
 0x437   :  { %v2309_v62 = vsel %vm2277_vm3, %v2261_v5, %v2293_v57  ;;  %v2311_v63 = vsel %vm2279_vm4, %v2263_v6, %v2295_v60  ;;  %v11029_v11 = vpack.c.bf16 %v2310_v10, %v2308_v61  ;;  %v2289_v2 = vmul.f32 0.2, %v2257_v9  ;;  %v9165_v5 = vld [vmem:[%s11623_s11 + $0x74] ss:$8 sps:$4 sm:$0xff]   ;;  %v9171_v57 = vld [vmem:[%s11623_s11 + $0x64] ss:$8 sps:$4 sm:$0xff]  }
 0x438   :  { %v11031_v16 = vpack.c.bf16 %v2311_v63, %v2309_v62  ;;  %v2291_v3 = vmul.f32 0.2, %v2259_v56  ;;  %vm2272_vm7 = vcmp.ge.f32.partialorder %v2256_v50, 0.0  ;;  %vm2274_vm8 = vcmp.ge.f32.partialorder %v2258_v51, 0.0  ;;  %v9168_v6 = vld [vmem:[%s11623_s11 + $0x174] ss:$8 sps:$4 sm:$0xff]  }
 0x439   :  { %v2305_v18 = vsel %vm2273_vm5, %v2257_v9, %v2289_v2  ;;  %v2288_v22 = vmul.f32 0.2, %v2256_v50  ;;  %v2290_v24 = vmul.f32 0.2, %v2258_v51  ;;  %v2225_v25 = vmul.f32 %v11006_v33, %v2201_v31  ;;  %v9163_v9 = vld [vmem:[%s11623_s11 + $0x70] ss:$8 sps:$4 sm:$0xff]  }
 0x43a   :  { %2349 = vmatprep.subr.bf16.mxu0 %v11031_v16  ;;  %2423 = vmatprep.subr.bf16.mxu1 %v11031_v16  ;;  %v2307_v26 = vsel %vm2275_vm6, %v2259_v56, %v2291_v3  ;;  %v2227_v27 = vmul.f32 %v11006_v33, %v2203_v40  ;;  %v2252_v30 = vadd.f32 %v10965_v19, %v2224_v37  ;;  %vm2334_vm2 = vcmask 523264   ;;  %v9166_v56 = vld [vmem:[%s11623_s11 + $0x170] ss:$8 sps:$4 sm:$0xff]   ;;  %v9174_v60 = vld [vmem:[%s11623_s11 + $0x164] ss:$8 sps:$4 sm:$0xff]   ;;  %v9162_v2 = vld [vmem:[#allocation7 + $0x38] sm:$0xff]  }
 0x43b   :  { %2350 = vmatpush1.bf16.msra.mxu0 %v11029_v11  ;;  %2424 = vmatpush1.bf16.msra.mxu1 %v11029_v11  ;;  %v11040_v28 = vpack.c.bf16 %v2307_v26, %v2305_v18  ;;  %v2304_v21 = vsel %vm2272_vm7, %v2256_v50, %v2288_v22  ;;  %v2306_v29 = vsel %vm2274_vm8, %v2258_v51, %v2290_v24  ;;  %v9155_v50 = vld [vmem:[#allocation7] sm:$0xff]   ;;  %v9158_v51 = vld [vmem:[#allocation7 + $0x18] sm:$0xff]   ;;  %v9178_v3 = vld [vmem:[%s11623_s11 + $0x150] ss:$8 sps:$4 sm:$0xff]  }
 0x43c   :  { %v11042_v39 = vpack.c.bf16 %v2306_v29, %v2304_v21  ;;  %v2253_v8 = vadd.f32 %v10968_v23, %v2225_v25  ;;  %v2255_v59 = vadd.f32 %v10968_v23, %v2227_v27  ;;  %v2254_v31 = vadd.f32 %v10965_v19, %v2226_v38  ;;  %v9169_v61 = vld [vmem:[%s11623_s11 + $0x60] ss:$8 sps:$4 sm:$0xff]   ;;  %v9177_v62 = vld [vmem:[%s11623_s11 + $0x54] ss:$8 sps:$4 sm:$0xff]   ;;  %v9183_v18 = vld [vmem:[%s11623_s11 + $0x44] ss:$8 sps:$4 sm:$0xff]  }
 0x43d   :  { %2351 = vmatprep.subr.bf16.mxu0 %v11040_v28  ;;  %2425 = vmatprep.subr.bf16.mxu1 %v11040_v28  ;;  %vm2268_vm9 = vcmp.ge.f32.partialorder %v2252_v30, 0.0  ;;  %v2284_v17 = vmul.f32 0.2, %v2252_v30  ;;  %v2221_v40 = vmul.f32 %v11006_v33, %v2197_v12  ;;  %v2223_v32 = vmul.f32 %v11006_v33, %v2199_v14  ;;  %v9172_v10 = vld [vmem:[%s11623_s11 + $0x160] ss:$8 sps:$4 sm:$0xff]  }
 0x43e   :  { %vm2269_vm10 = vcmp.ge.f32.partialorder %v2253_v8, 0.0  ;;  %vm2271_vm11 = vcmp.ge.f32.partialorder %v2255_v59, 0.0  ;;  %v2285_v20 = vmul.f32 0.2, %v2253_v8  ;;  %v2287_v58 = vmul.f32 0.2, %v2255_v59 }
 0x43f   :  { %2352 = vmatpush1.bf16.msra.mxu0 %v11042_v39  ;;  %2426 = vmatpush1.bf16.msra.mxu1 %v11042_v39  ;;  %vm2270_vm12 = vcmp.ge.f32.partialorder %v2254_v31, 0.0  ;;  %v2286_v35 = vmul.f32 0.2, %v2254_v31  ;;  %v2300_v53 = vsel %vm2268_vm9, %v2252_v30, %v2284_v17  ;;  %v2249_v48 = vadd.f32 %v10968_v23, %v2221_v40  ;;  %v9180_v63 = vld [vmem:[%s11623_s11 + $0x154] ss:$8 sps:$4 sm:$0xff]  }
 0x440   :  { %v2301_v36 = vsel %vm2269_vm10, %v2253_v8, %v2285_v20  ;;  %v2303_v12 = vsel %vm2271_vm11, %v2255_v59, %v2287_v58  ;;  %v2251_v37 = vadd.f32 %v10968_v23, %v2223_v32  ;;  %v2222_v43 = vmul.f32 %v10991_v7, %v2198_v52  ;;  %v9186_v22 = vld [vmem:[%s11623_s11 + $0x144] ss:$8 sps:$4 sm:$0xff]   ;;  %v9181_v24 = vld [vmem:[%s11623_s11 + $0x40] ss:$8 sps:$4 sm:$0xff]   ;;  %v9189_v26 = vld [vmem:[%s11623_s11 + $0x34] ss:$8 sps:$4 sm:$0xff]  }
 0x441   :  { %v2315_v4 = vpack.c.bf16 %v2303_v12, %v2301_v36  ;;  %v2302_v14 = vsel %vm2270_vm12, %v2254_v31, %v2286_v35  ;;  %vm2265_vm13 = vcmp.ge.f32.partialorder %v2249_v48, 0.0  ;;  %v2281_v33 = vmul.f32 0.2, %v2249_v48  ;;  %v9184_v25 = vld [vmem:[%s11623_s11 + $0x140] ss:$8 sps:$4 sm:$0xff]  }
 0x442   :  { %v2314_v38 = vpack.c.bf16 %v2302_v14, %v2300_v53  ;;  %vm2267_vm14 = vcmp.ge.f32.partialorder %v2251_v37, 0.0  ;;  %v2283_v41 = vmul.f32 0.2, %v2251_v37  ;;  %v2248_v44 = vadd.f32 %v10965_v19, %v11015_v42  ;;  %v9156_v42 = vld [vmem:[#allocation7 + $0x10] sm:$0xff]   ;;  %v9195_v21 = vld [vmem:[%s11623_s11 + $0x24] ss:$8 sps:$4 sm:$0xff]  }
 0x443   :  { %2353 = vmatprep.subr.bf16.mxu0 %v2315_v4  ;;  %2427 = vmatprep.subr.bf16.mxu1 %v2315_v4  ;;  %v2297_v45 = vsel %vm2265_vm13, %v2249_v48, %v2281_v33  ;;  %v2250_v23 = vadd.f32 %v10965_v19, %v2222_v43  ;;  %v9157_v19 = vld [vmem:[#allocation7 + $0x8] sm:$0xff]   ;;  %v9192_v27 = vld [vmem:[%s11623_s11 + $0x134] ss:$8 sps:$4 sm:$0xff]   ;;  %v9196_v8 = vld [vmem:[%s11623_s11 + $0x120] ss:$8 sps:$4 sm:$0xff]   ;;  %vm3910_vm11 = vcmask 261120  }
 0x444   :  { %2354 = vmatpush1.bf16.msra.mxu0 %v2314_v38  ;;  %2428 = vmatpush1.bf16.msra.mxu1 %v2314_v38  ;;  %v2299_v34 = vsel %vm2267_vm14, %v2251_v37, %v2283_v41  ;;  %vm2264_vm15 = vcmp.ge.f32.partialorder %v2248_v44, 0.0  ;;  %v2280_v15 = vmul.f32 0.2, %v2248_v44  ;;  %v9187_v30 = vld [vmem:[%s11623_s11 + $0x30] ss:$8 sps:$4 sm:$0xff]  }
 0x445   :  { %v2313_v7 = vpack.c.bf16 %v2299_v34, %v2297_v45  ;;  %vm2266_vm1 = vcmp.ge.f32.partialorder %v2250_v23, 0.0  ;;  %v2282_v52 = vmul.f32 0.2, %v2250_v23  ;;  %v9198_v29 = vld [vmem:[%s11623_s11 + $0x124] ss:$8 sps:$4 sm:$0xff]  }
 0x446   :  { %v2296_v46 = vsel %vm2264_vm15, %v2248_v44, %v2280_v15  ;;  %v9201_v59 = vld [vmem:[%s11623_s11 + $0x14] ss:$8 sps:$4 sm:$0xff]   ;;  %v9199_v17 = vld [vmem:[%s11623_s11 + $0x10] ss:$8 sps:$4 sm:$0xff]   ;;  %v9207_v32 = vld [vmem:[%s11623_s11 + $0x4] ss:$8 sps:$4 sm:$0xff]  }
 0x447   :  { %2355 = vmatprep.subr.bf16.mxu0 %v2313_v7  ;;  %2429 = vmatprep.subr.bf16.mxu1 %v2313_v7  ;;  %v2298_v47 = vsel %vm2266_vm1, %v2250_v23, %v2282_v52  ;;  %v9204_v31 = vld [vmem:[%s11623_s11 + $0x114] ss:$8 sps:$4 sm:$0xff]   ;;  %v9202_v40 = vld [vmem:[%s11623_s11 + $0x110] ss:$8 sps:$4 sm:$0xff]   ;;  %v9210_v20 = vld [vmem:[%s11623_s11 + $0x104] ss:$8 sps:$4 sm:$0xff]  }
 0x448   :  { %v2312_v49 = vpack.c.bf16 %v2298_v47, %v2296_v46  ;;  %v9205_v58 = vld [vmem:[%s11623_s11] ss:$8 sps:$4 sm:$0xff]   ;;  %v9213_v53 = vld [vmem:[%s11623_s11 + $0xf4] ss:$8 sps:$4 sm:$0xff]   ;;  %v9211_v36 = vld [vmem:[%s11623_s11 + $0xf0] ss:$8 sps:$4 sm:$0xff]  }
 0x449   :  { %v9208_v35 = vld [vmem:[%s11623_s11 + $0x100] ss:$8 sps:$4 sm:$0xff]   ;;  %v9216_v48 = vld [vmem:[%s11623_s11 + $0x1f4] ss:$8 sps:$4 sm:$0xff]   ;;  %v9214_v12 = vld [vmem:[%s11623_s11 + $0x1f0] ss:$8 sps:$4 sm:$0xff]  }
 0x44a   :  { %2356 = vmatpush1.bf16.msra.mxu0 %v2312_v49  ;;  %2430 = vmatpush1.bf16.msra.mxu1 %v2312_v49  ;;  %v9219_v37 = vld [vmem:[%s11623_s11 + $0xe4] ss:$8 sps:$4 sm:$0xff]   ;;  %v9220_v14 = vld [vmem:[%s11623_s11 + $0x1e0] ss:$8 sps:$4 sm:$0xff]   ;;  %v9225_v33 = vld [vmem:[%s11623_s11 + $0xd4] ss:$8 sps:$4 sm:$0xff]  }
 0x44b   :  { %2497 = vmatprep.subr.bf16.mxu1 %v11031_v16  ;;  %2571 = vmatprep.subr.bf16.mxu0 %v11031_v16  ;;  %v9175_v16 = vld [vmem:[%s11623_s11 + $0x50] ss:$8 sps:$4 sm:$0xff]   ;;  %v9222_v43 = vld [vmem:[%s11623_s11 + $0x1e4] ss:$8 sps:$4 sm:$0xff]   ;;  %v9229_v34 = vld [vmem:[%s11623_s11 + $0xc0] ss:$8 sps:$4 sm:$0xff]  }
 0x44c   :  { %v9223_v41 = vld [vmem:[%s11623_s11 + $0xd0] ss:$8 sps:$4 sm:$0xff]   ;;  %v9231_v45 = vld [vmem:[%s11623_s11 + $0xc4] ss:$8 sps:$4 sm:$0xff]   ;;  %v9232_v15 = vld [vmem:[%s11623_s11 + $0x1c0] ss:$8 sps:$4 sm:$0xff]  }
 0x44d   :  { %8196 = vmatmul.mubr.msk.bf16.vlgmr.msra.gmra.mxu0 %vm2334_vm2, %v9155_v50  ;;  %8200 = vmatmul.mubr.msk.bf16.vlgmr.msra.gmra.mxu1 %vm2334_vm2, %v9156_v42  ;;  %v9226_v44 = vld [vmem:[%s11623_s11 + $0x1d0] ss:$8 sps:$4 sm:$0xff]   ;;  %v9234_v23 = vld [vmem:[%s11623_s11 + $0x1c4] ss:$8 sps:$4 sm:$0xff]   ;;  %v9240_v52 = vld [vmem:[%s11623_s11 + $0x1b4] ss:$8 sps:$4 sm:$0xff]  }
 0x44e   :  { %2498 = vmatpush1.bf16.msra.mxu1 %v11029_v11  ;;  %2572 = vmatpush1.bf16.msra.mxu0 %v11029_v11  ;;  %v9161_v11 = vld [vmem:[#allocation7 + $0x28] sm:$0xff]   ;;  %v9241_v42 = vld [vmem:[%s11623_s11 + $0xa0] ss:$8 sps:$4 sm:$0xff]   ;;  %vm5321_vm1 = vcmask 130048  }
 0x44f   :  { %2499 = vmatprep.subr.bf16.mxu1 %v11040_v28  ;;  %2573 = vmatprep.subr.bf16.mxu0 %v11040_v28  ;;  %v9190_v28 = vld [vmem:[%s11623_s11 + $0x130] ss:$8 sps:$4 sm:$0xff]   ;;  %v9246_v50 = vld [vmem:[%s11623_s11 + $0x1a4] ss:$8 sps:$4 sm:$0xff]  }
 0x450   :  { %2383 = vmatprep.mubr.bf16.mxu0 %v10345_v0  ;;  %2457 = vmatprep.mubr.bf16.mxu1 %v10345_v0  ;;  %v9235_v46 = vld [vmem:[%s11623_s11 + $0xb0] ss:$8 sps:$4 sm:$0xff]  }
 0x451   :  { %v9238_v47 = vld [vmem:[%s11623_s11 + $0x1b0] ss:$8 sps:$4 sm:$0xff]  }
 0x452   :  { %2500 = vmatpush1.bf16.msra.mxu1 %v11042_v39  ;;  %2574 = vmatpush1.bf16.msra.mxu0 %v11042_v39  ;;  %v9193_v39 = vld [vmem:[%s11623_s11 + $0x20] ss:$8 sps:$4 sm:$0xff]  }
 0x453   :  { %2501 = vmatprep.subr.bf16.mxu1 %v2315_v4  ;;  %2575 = vmatprep.subr.bf16.mxu0 %v2315_v4  ;;  %v9217_v4 = vld [vmem:[%s11623_s11 + $0xe0] ss:$8 sps:$4 sm:$0xff]  }
 0x455   :  { %8197 = vmatmul.mubr.msk.bf16.gmra.mxu0 %vm2334_vm2, %v9157_v19  ;;  %8201 = vmatmul.mubr.msk.bf16.gmra.mxu1 %vm2334_vm2, %v9158_v51  ;;  %v9244_v19 = vld [vmem:[%s11623_s11 + $0x1a0] ss:$8 sps:$4 sm:$0xff]   ;;  %v9249_v51 = vld [vmem:[%s11623_s11 + $0x94] ss:$8 sps:$4 sm:$0xff]  }
 0x456   :  { %2502 = vmatpush1.bf16.msra.mxu1 %v2314_v38  ;;  %2576 = vmatpush1.bf16.msra.mxu0 %v2314_v38  ;;  %v9228_v38 = vld [vmem:[%s11623_s11 + $0x1d4] ss:$8 sps:$4 sm:$0xff]  }
 0x457   :  { %2503 = vmatprep.subr.bf16.mxu1 %v2313_v7  ;;  %2577 = vmatprep.subr.bf16.mxu0 %v2313_v7  ;;  %v9237_v7 = vld [vmem:[%s11623_s11 + $0xb4] ss:$8 sps:$4 sm:$0xff]  }
 0x458   :  { %2521 = vmatprep.mubr.bf16.mxu1 %v10345_v0  ;;  %2595 = vmatprep.mubr.bf16.mxu0 %v10345_v0 }
 0x45a   :  { %2504 = vmatpush1.bf16.msra.mxu1 %v2312_v49  ;;  %2578 = vmatpush1.bf16.msra.mxu0 %v2312_v49  ;;  %v9243_v49 = vld [vmem:[%s11623_s11 + $0xa4] ss:$8 sps:$4 sm:$0xff]  }
 0x45b   :  { %3400 = vmatprep.subr.bf16.mxu1 %v9165_v5  ;;  %3453 = vmatprep.subr.bf16.mxu0 %v9168_v6  ;;  %v9252_v5 = vld [vmem:[%s11623_s11 + $0x194] ss:$8 sps:$4 sm:$0xff]   ;;  %v9247_v6 = vld [vmem:[%s11623_s11 + $0x90] ss:$8 sps:$4 sm:$0xff]  }
 0x45d   :  { %8204 = vmatmul.mubr.msk.bf16.vlgmr.msra.gmra.mxu1 %vm2334_vm2, %v9159_v54  ;;  %8208 = vmatmul.mubr.msk.bf16.vlgmr.msra.gmra.mxu0 %vm2334_vm2, %v9160_v55  ;;  %v9250_v54 = vld [vmem:[%s11623_s11 + $0x190] ss:$8 sps:$4 sm:$0xff]   ;;  %v9255_v55 = vld [vmem:[%s11623_s11 + $0x84] ss:$8 sps:$4 sm:$0xff]  }
 0x45e   :  { %2531 = vmatprep.mubr.bf16.mxu1 %v10345_v0  ;;  %2605 = vmatprep.mubr.bf16.mxu0 %v10345_v0 }
 0x45f   :  { %3401 = vmatpush1.bf16.msra.mxu1 %v9163_v9  ;;  %3454 = vmatpush1.bf16.msra.mxu0 %v9166_v56  ;;  %v9258_v9 = vld [vmem:[%s11623_s11 + $0x184] ss:$8 sps:$4 sm:$0xff]   ;;  %v9253_v56 = vld [vmem:[%s11623_s11 + $0x80] ss:$8 sps:$4 sm:$0xff]  }
 0x460   :  { %3402 = vmatprep.subr.bf16.mxu1 %v9171_v57  ;;  %3455 = vmatprep.subr.bf16.mxu0 %v9174_v60  ;;  %v9256_v57 = vld [vmem:[%s11623_s11 + $0x180] ss:$8 sps:$4 sm:$0xff]   ;;  %v9261_v60 = vld [vmem:[%s11623_s11 + $0x274] ss:$8 sps:$4 sm:$0xff]  }
 0x463   :  { %3403 = vmatpush1.bf16.msra.mxu1 %v9169_v61  ;;  %3456 = vmatpush1.bf16.msra.mxu0 %v9172_v10  ;;  %v9264_v61 = vld [vmem:[%s11623_s11 + $0x374] ss:$8 sps:$4 sm:$0xff]  }
 0x464   :  { %3404 = vmatprep.subr.bf16.mxu1 %v9177_v62  ;;  %3457 = vmatprep.subr.bf16.mxu0 %v9180_v63 }
 0x465   :  { %8205 = vmatmul.mubr.msk.bf16.gmra.mxu1 %vm2334_vm2, %v9161_v11  ;;  %8209 = vmatmul.mubr.msk.bf16.gmra.mxu0 %vm2334_vm2, %v9162_v2 }
 0x467   :  { %3405 = vmatpush1.bf16.msra.mxu1 %v9175_v16  ;;  %3458 = vmatpush1.bf16.msra.mxu0 %v9178_v3 }
 0x468   :  { %3406 = vmatprep.subr.bf16.mxu1 %v9183_v18  ;;  %3459 = vmatprep.subr.bf16.mxu0 %v9186_v22 }
 0x46b   :  { %3407 = vmatpush1.bf16.msra.mxu1 %v9181_v24  ;;  %3460 = vmatpush1.bf16.msra.mxu0 %v9184_v25  ;;  %v9259_v25 = vld [vmem:[%s11623_s11 + $0x270] ss:$8 sps:$4 sm:$0xff]  }
 0x46c   :  { %3408 = vmatprep.subr.bf16.mxu1 %v9189_v26  ;;  %3461 = vmatprep.subr.bf16.mxu0 %v9192_v27  ;;  %v9262_v26 = vld [vmem:[%s11623_s11 + $0x370] ss:$8 sps:$4 sm:$0xff]  }
 0x46f   :  { %3409 = vmatpush1.bf16.msra.mxu1 %v9187_v30  ;;  %3462 = vmatpush1.bf16.msra.mxu0 %v9190_v28  ;;  %v9267_v28 = vld [vmem:[%s11623_s11 + $0x264] ss:$8 sps:$4 sm:$0xff]  }
 0x470   :  { %3410 = vmatprep.subr.bf16.mxu1 %v9195_v21  ;;  %3463 = vmatprep.subr.bf16.mxu0 %v9198_v29  ;;  %v9270_v21 = vld [vmem:[%s11623_s11 + $0x364] ss:$8 sps:$4 sm:$0xff]  }
 0x473   :  { %3411 = vmatpush1.bf16.msra.mxu1 %v9193_v39  ;;  %3464 = vmatpush1.bf16.msra.mxu0 %v9196_v8 }
 0x474   :  { %3412 = vmatprep.subr.bf16.mxu1 %v9201_v59  ;;  %3465 = vmatprep.subr.bf16.mxu0 %v9204_v31  ;;  %v9265_v31 = vld [vmem:[%s11623_s11 + $0x260] ss:$8 sps:$4 sm:$0xff]  }
 0x477   :  { %3413 = vmatpush1.bf16.msra.mxu1 %v9199_v17  ;;  %3466 = vmatpush1.bf16.msra.mxu0 %v9202_v40  ;;  %v9268_v17 = vld [vmem:[%s11623_s11 + $0x360] ss:$8 sps:$4 sm:$0xff]   ;;  %v9273_v40 = vld [vmem:[%s11623_s11 + $0x254] ss:$8 sps:$4 sm:$0xff]  }
 0x478   :  { %3414 = vmatprep.subr.bf16.mxu1 %v9207_v32  ;;  %3467 = vmatprep.subr.bf16.mxu0 %v9210_v20  ;;  %v9276_v32 = vld [vmem:[%s11623_s11 + $0x354] ss:$8 sps:$4 sm:$0xff]  }
 0x47b   :  { %3415 = vmatpush1.bf16.msra.mxu1 %v9205_v58  ;;  %3468 = vmatpush1.bf16.msra.mxu0 %v9208_v35 }
 0x47c   :  { %3416 = vmatprep.subr.bf16.mxu1 %v9213_v53  ;;  %3469 = vmatprep.subr.bf16.mxu0 %v9216_v48 }
 0x47f   :  { %3417 = vmatpush2.bf16.msra.mxu1 %v9211_v36  ;;  %3470 = vmatpush2.bf16.msra.mxu0 %v9214_v12  ;;  %v9271_v12 = vld [vmem:[%s11623_s11 + $0x250] ss:$8 sps:$4 sm:$0xff]  }
 0x480   :  { %3418 = vmatprep.subr.bf16.mxu1 %v9219_v37  ;;  %3471 = vmatprep.subr.bf16.mxu0 %v9222_v43  ;;  %v9274_v37 = vld [vmem:[%s11623_s11 + $0x350] ss:$8 sps:$4 sm:$0xff]  }
 0x483   :  { %3419 = vmatpush2.bf16.msra.mxu1 %v9217_v4  ;;  %3472 = vmatpush2.bf16.msra.mxu0 %v9220_v14  ;;  %v9279_v14 = vld [vmem:[%s11623_s11 + $0x244] ss:$8 sps:$4 sm:$0xff]  }
 0x484   :  { %3420 = vmatprep.subr.bf16.mxu1 %v9225_v33  ;;  %3473 = vmatprep.subr.bf16.mxu0 %v9228_v38  ;;  %v9282_v33 = vld [vmem:[%s11623_s11 + $0x344] ss:$8 sps:$4 sm:$0xff]  }
 0x487   :  { %3421 = vmatpush2.bf16.msra.mxu1 %v9223_v41  ;;  %3474 = vmatpush2.bf16.msra.mxu0 %v9226_v44 }
 0x488   :  { %3422 = vmatprep.subr.bf16.mxu1 %v9231_v45  ;;  %3475 = vmatprep.subr.bf16.mxu0 %v9234_v23  ;;  %v9277_v23 = vld [vmem:[%s11623_s11 + $0x240] ss:$8 sps:$4 sm:$0xff]  }
 0x48b   :  { %3423 = vmatpush2.bf16.msra.mxu1 %v9229_v34  ;;  %3476 = vmatpush2.bf16.msra.mxu0 %v9232_v15  ;;  %v9280_v34 = vld [vmem:[%s11623_s11 + $0x340] ss:$8 sps:$4 sm:$0xff]   ;;  %v9285_v15 = vld [vmem:[%s11623_s11 + $0x234] ss:$8 sps:$4 sm:$0xff]  }
 0x48c   :  { %3424 = vmatprep.subr.bf16.mxu1 %v9237_v7  ;;  %3477 = vmatprep.subr.bf16.mxu0 %v9240_v52  ;;  %v9288_v7 = vld [vmem:[%s11623_s11 + $0x334] ss:$8 sps:$4 sm:$0xff]  }
 0x48f   :  { %3425 = vmatpush2.bf16.msra.mxu1 %v9235_v46  ;;  %3478 = vmatpush2.bf16.msra.mxu0 %v9238_v47 }
 0x490   :  { %3426 = vmatprep.subr.bf16.mxu1 %v9243_v49  ;;  %3479 = vmatprep.subr.bf16.mxu0 %v9246_v50  ;;  %v9283_v50 = vld [vmem:[%s11623_s11 + $0x230] ss:$8 sps:$4 sm:$0xff]  }
 0x493   :  { %3427 = vmatpush2.bf16.msra.mxu1 %v9241_v42  ;;  %3480 = vmatpush2.bf16.msra.mxu0 %v9244_v19  ;;  %v9286_v42 = vld [vmem:[%s11623_s11 + $0x330] ss:$8 sps:$4 sm:$0xff]  }
 0x494   :  { %3428 = vmatprep.subr.bf16.mxu1 %v9249_v51  ;;  %3481 = vmatprep.subr.bf16.mxu0 %v9252_v5  ;;  %v9291_v5 = vld [vmem:[%s11623_s11 + $0x224] ss:$8 sps:$4 sm:$0xff]  }
 0x497   :  { %3429 = vmatpush2.bf16.msra.mxu1 %v9247_v6  ;;  %3482 = vmatpush2.bf16.msra.mxu0 %v9250_v54  ;;  %v9294_v6 = vld [vmem:[%s11623_s11 + $0x324] ss:$8 sps:$4 sm:$0xff]   ;;  %v9289_v54 = vld [vmem:[%s11623_s11 + $0x220] ss:$8 sps:$4 sm:$0xff]  }
 0x498   :  { %3430 = vmatprep.subr.bf16.mxu1 %v9255_v55  ;;  %3483 = vmatprep.subr.bf16.mxu0 %v9258_v9  ;;  %v9292_v55 = vld [vmem:[%s11623_s11 + $0x320] ss:$8 sps:$4 sm:$0xff]   ;;  %v9297_v9 = vld [vmem:[%s11623_s11 + $0x214] ss:$8 sps:$4 sm:$0xff]  }
 0x49b   :  { %3431 = vmatpush2.bf16.msra.mxu1 %v9253_v56  ;;  %3484 = vmatpush2.bf16.msra.mxu0 %v9256_v57  ;;  %v9300_v56 = vld [vmem:[%s11623_s11 + $0x314] ss:$8 sps:$4 sm:$0xff]   ;;  %v9295_v57 = vld [vmem:[%s11623_s11 + $0x210] ss:$8 sps:$4 sm:$0xff]  }
 0x49c   :  { %3506 = vmatprep.subr.bf16.mxu1 %v9261_v60  ;;  %3559 = vmatprep.subr.bf16.mxu0 %v9264_v61  ;;  %v9298_v60 = vld [vmem:[%s11623_s11 + $0x310] ss:$8 sps:$4 sm:$0xff]   ;;  %v9303_v61 = vld [vmem:[%s11623_s11 + $0x204] ss:$8 sps:$4 sm:$0xff]  }
 0x50d   :  { %v2375_v10 = vpop.f32.mrf.mxu0  ;;  %v2449_v62 = vpop.f32.mrf.mxu1 }
 0x50f   :  { %v2377_v63 = vpop.f32.mrf.mxu0  ;;  %v2451_v11 = vpop.f32.mrf.mxu1 }
 0x511   :  { %v2379_v2 = vpop.f32.mrf.mxu0  ;;  %v2453_v16 = vpop.f32.mrf.mxu1 }
 0x512   :  { %v2616_v27 = vpack.c.bf16 %v2379_v2, %v2375_v10  ;;  %v2618_v30 = vpack.c.bf16 %v2453_v16, %v2449_v62  ;;  %v9306_v10 = vld [vmem:[%s11623_s11 + $0x304] ss:$8 sps:$4 sm:$0xff]   ;;  %v9301_v62 = vld [vmem:[%s11623_s11 + $0x200] ss:$8 sps:$4 sm:$0xff]   ;;  %v9312_v2 = vld [vmem:[%s11623_s11 + $0x3f4] ss:$8 sps:$4 sm:$0xff]  }
 0x513   :  { %v2381_v3 = vpop.f32.mrf.mxu0  ;;  %v2455_v18 = vpop.f32.mrf.mxu1  ;;  %v9307_v16 = vld [vmem:[%s11623_s11 + $0x2f0] ss:$8 sps:$4 sm:$0xff]  }
 0x514   :  { %v2617_v22 = vpack.c.bf16 %v2381_v3, %v2377_v63  ;;  %v2619_v24 = vpack.c.bf16 %v2455_v18, %v2451_v11  ;;  %v9304_v63 = vld [vmem:[%s11623_s11 + $0x300] ss:$8 sps:$4 sm:$0xff]   ;;  %v9309_v11 = vld [vmem:[%s11623_s11 + $0x2f4] ss:$8 sps:$4 sm:$0xff]   ;;  %v9310_v3 = vld [vmem:[%s11623_s11 + $0x3f0] ss:$8 sps:$4 sm:$0xff]  }
 0x515   :  { %v2385_v29 = vpop.f32.mrf.mxu0  ;;  %v2459_v39 = vpop.f32.mrf.mxu1  ;;  %v9315_v18 = vld [vmem:[%s11623_s11 + $0x2e4] ss:$8 sps:$4 sm:$0xff]  }
 0x516   :  { %3432 = vmatprep.mubr.bf16.mxu1 %v2617_v22  ;;  %3485 = vmatprep.mubr.bf16.mxu0 %v2619_v24  ;;  %v9318_v22 = vld [vmem:[%s11623_s11 + $0x3e4] ss:$8 sps:$4 sm:$0xff]   ;;  %v9313_v24 = vld [vmem:[%s11623_s11 + $0x2e0] ss:$8 sps:$4 sm:$0xff]  }
 0x517   :  { %3433 = vmatmul.mubr.bf16.vlgmr.msra.gmra.mxu1 %v2616_v27  ;;  %3486 = vmatmul.mubr.bf16.vlgmr.msra.gmra.mxu0 %v2618_v30  ;;  %v2387_v8 = vpop.f32.mrf.mxu0  ;;  %v2461_v59 = vpop.f32.mrf.mxu1  ;;  %v9324_v27 = vld [vmem:[%s11623_s11 + $0x3d4] ss:$8 sps:$4 sm:$0xff]   ;;  %v9319_v30 = vld [vmem:[%s11623_s11 + $0x2d0] ss:$8 sps:$4 sm:$0xff]  }
 0x518   :  { %3507 = vmatpush1.bf16.msra.mxu1 %v9259_v25  ;;  %3560 = vmatpush1.bf16.msra.mxu0 %v9262_v26  ;;  %v9316_v25 = vld [vmem:[%s11623_s11 + $0x3e0] ss:$8 sps:$4 sm:$0xff]   ;;  %v9321_v26 = vld [vmem:[%s11623_s11 + $0x2d4] ss:$8 sps:$4 sm:$0xff]  }
 0x519   :  { %3508 = vmatprep.subr.bf16.mxu1 %v9267_v28  ;;  %3561 = vmatprep.subr.bf16.mxu0 %v9270_v21  ;;  %v2389_v20 = vpop.f32.mrf.mxu0  ;;  %v2463_v58 = vpop.f32.mrf.mxu1  ;;  %v9322_v28 = vld [vmem:[%s11623_s11 + $0x3d0] ss:$8 sps:$4 sm:$0xff]   ;;  %v9327_v21 = vld [vmem:[%s11623_s11 + $0x2c4] ss:$8 sps:$4 sm:$0xff]  }
 0x51a   :  { %v2624_v35 = vpack.c.bf16 %v2389_v20, %v2385_v29  ;;  %v2626_v53 = vpack.c.bf16 %v2463_v58, %v2459_v39  ;;  %v9330_v29 = vld [vmem:[%s11623_s11 + $0x3c4] ss:$8 sps:$4 sm:$0xff]   ;;  %v9325_v39 = vld [vmem:[%s11623_s11 + $0x2c0] ss:$8 sps:$4 sm:$0xff]  }
 0x51b   :  { %v2391_v48 = vpop.f32.mrf.mxu0  ;;  %v2465_v36 = vpop.f32.mrf.mxu1  ;;  %v9342_v20 = vld [vmem:[%s11623_s11 + $0x3a4] ss:$8 sps:$4 sm:$0xff]  }
 0x51c   :  { %3509 = vmatpush1.bf16.msra.mxu1 %v9265_v31  ;;  %3562 = vmatpush1.bf16.msra.mxu0 %v9268_v17  ;;  %v2625_v43 = vpack.c.bf16 %v2391_v48, %v2387_v8  ;;  %v2627_v4 = vpack.c.bf16 %v2465_v36, %v2461_v59  ;;  %v9328_v8 = vld [vmem:[%s11623_s11 + $0x3c0] ss:$8 sps:$4 sm:$0xff]   ;;  %v9333_v59 = vld [vmem:[%s11623_s11 + $0x2b4] ss:$8 sps:$4 sm:$0xff]   ;;  %v9331_v17 = vld [vmem:[%s11623_s11 + $0x2b0] ss:$8 sps:$4 sm:$0xff]  }
 0x51d   :  { %3510 = vmatprep.subr.bf16.mxu1 %v9273_v40  ;;  %3563 = vmatprep.subr.bf16.mxu0 %v9276_v32  ;;  %v11168_v38 = vpop.f32.mrf.mxu1  ;;  %v11170_v41 = vpop.f32.mrf.mxu0  ;;  %v9336_v31 = vld [vmem:[%s11623_s11 + $0x3b4] ss:$8 sps:$4 sm:$0xff]   ;;  %v9334_v40 = vld [vmem:[%s11623_s11 + $0x3b0] ss:$8 sps:$4 sm:$0xff]   ;;  %v9339_v32 = vld [vmem:[%s11623_s11 + $0x2a4] ss:$8 sps:$4 sm:$0xff]  }
 0x51e   :  { %3442 = vmatprep.mubr.bf16.mxu1 %v2625_v43  ;;  %3495 = vmatprep.mubr.bf16.mxu0 %v2627_v4  ;;  %v9340_v48 = vld [vmem:[%s11623_s11 + $0x3a0] ss:$8 sps:$4 sm:$0xff]   ;;  %v9345_v36 = vld [vmem:[%s11623_s11 + $0x294] ss:$8 sps:$4 sm:$0xff]   ;;  %v9343_v4 = vld [vmem:[%s11623_s11 + $0x290] ss:$8 sps:$4 sm:$0xff]  }
 0x51f   :  { %3443 = vmatmul.mubr.bf16.gmra.mxu1 %v2624_v35  ;;  %3496 = vmatmul.mubr.bf16.gmra.mxu0 %v2626_v53  ;;  %v2525_v44 = vpop.f32.mrf.mxu1  ;;  %v2599_v45 = vpop.f32.mrf.mxu0  ;;  %v9337_v53 = vld [vmem:[%s11623_s11 + $0x2a0] ss:$8 sps:$4 sm:$0xff]  }
 0x520   :  { %3511 = vmatpush1.bf16.msra.mxu1 %v9271_v12  ;;  %3564 = vmatpush1.bf16.msra.mxu0 %v9274_v37  ;;  %v9348_v12 = vld [vmem:[%s11623_s11 + $0x394] ss:$8 sps:$4 sm:$0xff]  }
 0x521   :  { %3512 = vmatprep.subr.bf16.mxu1 %v9279_v14  ;;  %3565 = vmatprep.subr.bf16.mxu0 %v9282_v33  ;;  %v11176_v52 = vpop.f32.mrf.mxu1  ;;  %v11178_v46 = vpop.f32.mrf.mxu0  ;;  %v9346_v14 = vld [vmem:[%s11623_s11 + $0x390] ss:$8 sps:$4 sm:$0xff]   ;;  %v9351_v33 = vld [vmem:[%s11623_s11 + $0x284] ss:$8 sps:$4 sm:$0xff]  }
 0x523   :  { %v2529_v47 = vpop.f32.mrf.mxu1  ;;  %v2603_v49 = vpop.f32.mrf.mxu0 }
 0x524   :  { %3513 = vmatpush1.bf16.msra.mxu1 %v9277_v23  ;;  %3566 = vmatpush1.bf16.msra.mxu0 %v9280_v34  ;;  %v2621_v19 = vpack.c.bf16 %v2529_v47, %v2525_v44  ;;  %v2623_v51 = vpack.c.bf16 %v2603_v49, %v2599_v45  ;;  %v9354_v44 = vld [vmem:[%s11623_s11 + $0x384] ss:$8 sps:$4 sm:$0xff]   ;;  %v9349_v34 = vld [vmem:[%s11623_s11 + $0x280] ss:$8 sps:$4 sm:$0xff]  }
 0x525   :  { %3514 = vmatprep.subr.bf16.mxu1 %v9285_v15  ;;  %3567 = vmatprep.subr.bf16.mxu0 %v9288_v7  ;;  %v2533_v58 = vpop.f32.mrf.mxu1  ;;  %v2607_v35 = vpop.f32.mrf.mxu0  ;;  %v9352_v15 = vld [vmem:[%s11623_s11 + $0x380] ss:$8 sps:$4 sm:$0xff]  }
 0x526   :  { %3538 = vmatprep.mubr.bf16.mxu1 %v2621_v19  ;;  %3591 = vmatprep.mubr.bf16.mxu0 %v2623_v51  ;;  %v2622_v19 = vpack.c.bf16 %v11178_v46, %v11170_v41  ;;  %v3683_v41 = vld [vmem:[#allocation9 + $0xc8] sm:$0xff]  ;;  %v3682_v46 = vld [vmem:[#allocation9 + $0xc0] sm:$0xff] }
 0x527   :  { %v2535_v37 = vpop.f32.mrf.mxu1  ;;  %v2609_v43 = vpop.f32.mrf.mxu0 }
 0x528   :  { %3515 = vmatpush1.bf16.msra.mxu1 %v9283_v50  ;;  %3568 = vmatpush1.bf16.msra.mxu0 %v9286_v42  ;;  %v2620_v42 = vpack.c.bf16 %v11176_v52, %v11168_v38  ;;  %v3685_v38 = vld [vmem:[#allocation9 + $0xd8] sm:$0xff]  ;;  %v3684_v52 = vld [vmem:[#allocation9 + $0xd0] sm:$0xff] }
 0x529   :  { %3516 = vmatprep.subr.bf16.mxu1 %v9291_v5  ;;  %3569 = vmatprep.subr.bf16.mxu0 %v9294_v6  ;;  %v2537_v45 = vpop.f32.mrf.mxu1  ;;  %v2611_v23 = vpop.f32.mrf.mxu0  ;;  %v3689_v6 = vld [vmem:[#allocation9 + $0xf8] sm:$0xff] }
 0x52a   :  { %v2628_v51 = vpack.c.bf16 %v2537_v45, %v2533_v58  ;;  %v2630_v5 = vpack.c.bf16 %v2611_v23, %v2607_v35  ;;  %v3716_v58 = vld [vmem:[#allocation9 + $0x1d0] sm:$0xff]  ;;  %v3715_v35 = vld [vmem:[#allocation9 + $0x1c8] sm:$0xff] }
 0x52b   :  { %v2539_v7 = vpop.f32.mrf.mxu1  ;;  %v2613_v47 = vpop.f32.mrf.mxu0  ;;  %v3704_v45 = vld [vmem:[#allocation9 + $0x170] sm:$0xff]  ;;  %v3703_v23 = vld [vmem:[#allocation9 + $0x168] sm:$0xff] }
 0x52c   :  { %3517 = vmatpush1.bf16.msra.mxu1 %v9289_v54  ;;  %3570 = vmatpush1.bf16.msra.mxu0 %v9292_v55  ;;  %v2629_v49 = vpack.c.bf16 %v2539_v7, %v2535_v37  ;;  %v2631_v50 = vpack.c.bf16 %v2613_v47, %v2609_v43  ;;  %v3688_v54 = vld [vmem:[#allocation9 + $0xf0] sm:$0xff]  ;;  %v3687_v55 = vld [vmem:[#allocation9 + $0xe8] sm:$0xff]  ;;  %v3710_v37 = vld [vmem:[#allocation9 + $0x1a0] sm:$0xff] }
 0x52d   :  { %3518 = vmatprep.subr.bf16.mxu1 %v9297_v9  ;;  %3571 = vmatprep.subr.bf16.mxu0 %v9300_v56  ;;  %v3686_v9 = vld [vmem:[#allocation9 + $0xe0] sm:$0xff]  ;;  %v3681_v56 = vld [vmem:[#allocation9 + $0xb8] sm:$0xff]  ;;  %v3700_v7 = vld [vmem:[#allocation9 + $0x150] sm:$0xff] }
 0x52e   :  { %v3709_v43 = vld [vmem:[#allocation9 + $0x198] sm:$0xff]  ;;  %v3699_v47 = vld [vmem:[#allocation9 + $0x148] sm:$0xff] }
 0x530   :  { %3519 = vmatpush1.bf16.msra.mxu1 %v9295_v57  ;;  %3572 = vmatpush1.bf16.msra.mxu0 %v9298_v60  ;;  %v3680_v57 = vld [vmem:[#allocation9 + $0xb0] sm:$0xff]  ;;  %v3679_v60 = vld [vmem:[#allocation9 + $0xa8] sm:$0xff] }
 0x531   :  { %3520 = vmatprep.subr.bf16.mxu1 %v9303_v61  ;;  %3573 = vmatprep.subr.bf16.mxu0 %v9306_v10  ;;  %v3678_v61 = vld [vmem:[#allocation9 + $0xa0] sm:$0xff]  ;;  %v3677_v10 = vld [vmem:[#allocation9 + $0x98] sm:$0xff] }
 0x534   :  { %3521 = vmatpush1.bf16.msra.mxu1 %v9301_v62  ;;  %3574 = vmatpush1.bf16.msra.mxu0 %v9304_v63  ;;  %v3676_v62 = vld [vmem:[#allocation9 + $0x90] sm:$0xff]  ;;  %v3675_v63 = vld [vmem:[#allocation9 + $0x88] sm:$0xff] }
 0x535   :  { %3522 = vmatprep.subr.bf16.mxu1 %v9309_v11  ;;  %3575 = vmatprep.subr.bf16.mxu0 %v9312_v2  ;;  %v3674_v11 = vld [vmem:[#allocation9 + $0x80] sm:$0xff]  ;;  %v3673_v2 = vld [vmem:[#allocation9 + $0x78] sm:$0xff] }
 0x538   :  { %3523 = vmatpush2.bf16.msra.mxu1 %v9307_v16  ;;  %3576 = vmatpush2.bf16.msra.mxu0 %v9310_v3  ;;  %v3672_v16 = vld [vmem:[#allocation9 + $0x70] sm:$0xff]  ;;  %v3671_v3 = vld [vmem:[#allocation9 + $0x68] sm:$0xff] }
 0x539   :  { %3524 = vmatprep.subr.bf16.mxu1 %v9315_v18  ;;  %3577 = vmatprep.subr.bf16.mxu0 %v9318_v22  ;;  %v3670_v18 = vld [vmem:[#allocation9 + $0x60] sm:$0xff]  ;;  %v3669_v22 = vld [vmem:[#allocation9 + $0x58] sm:$0xff] }
 0x53c   :  { %3525 = vmatpush2.bf16.msra.mxu1 %v9313_v24  ;;  %3578 = vmatpush2.bf16.msra.mxu0 %v9316_v25  ;;  %v3668_v24 = vld [vmem:[#allocation9 + $0x50] sm:$0xff]  ;;  %v3667_v25 = vld [vmem:[#allocation9 + $0x48] sm:$0xff] }
 0x53d   :  { %3526 = vmatprep.subr.bf16.mxu1 %v9321_v26  ;;  %3579 = vmatprep.subr.bf16.mxu0 %v9324_v27  ;;  %v3666_v26 = vld [vmem:[#allocation9 + $0x40] sm:$0xff]  ;;  %v3665_v27 = vld [vmem:[#allocation9 + $0x38] sm:$0xff] }
 0x540   :  { %3527 = vmatpush2.bf16.msra.mxu1 %v9319_v30  ;;  %3580 = vmatpush2.bf16.msra.mxu0 %v9322_v28  ;;  %v3664_v30 = vld [vmem:[#allocation9 + $0x30] sm:$0xff]  ;;  %v3663_v28 = vld [vmem:[#allocation9 + $0x28] sm:$0xff] }
 0x541   :  { %3528 = vmatprep.subr.bf16.mxu1 %v9327_v21  ;;  %3581 = vmatprep.subr.bf16.mxu0 %v9330_v29  ;;  %v3662_v21 = vld [vmem:[#allocation9 + $0x20] sm:$0xff]  ;;  %v3661_v29 = vld [vmem:[#allocation9 + $0x18] sm:$0xff] }
 0x544   :  { %3529 = vmatpush2.bf16.msra.mxu1 %v9325_v39  ;;  %3582 = vmatpush2.bf16.msra.mxu0 %v9328_v8  ;;  %v3660_v39 = vld [vmem:[#allocation9 + $0x10] sm:$0xff]  ;;  %v3659_v8 = vld [vmem:[#allocation9 + $0x8] sm:$0xff] }
 0x545   :  { %3530 = vmatprep.subr.bf16.mxu1 %v9333_v59  ;;  %3583 = vmatprep.subr.bf16.mxu0 %v9336_v31  ;;  %v3658_v59 = vld [vmem:[#allocation9] sm:$0xff]  ;;  %v3721_v31 = vld [vmem:[#allocation9 + $0x1f8] sm:$0xff] }
 0x548   :  { %3531 = vmatpush2.bf16.msra.mxu1 %v9331_v17  ;;  %3584 = vmatpush2.bf16.msra.mxu0 %v9334_v40  ;;  %v3720_v17 = vld [vmem:[#allocation9 + $0x1f0] sm:$0xff]  ;;  %v3719_v40 = vld [vmem:[#allocation9 + $0x1e8] sm:$0xff] }
 0x549   :  { %3532 = vmatprep.subr.bf16.mxu1 %v9339_v32  ;;  %3585 = vmatprep.subr.bf16.mxu0 %v9342_v20  ;;  %v3718_v32 = vld [vmem:[#allocation9 + $0x1e0] sm:$0xff]  ;;  %v3717_v20 = vld [vmem:[#allocation9 + $0x1d8] sm:$0xff] }
 0x54c   :  { %3533 = vmatpush2.bf16.msra.mxu1 %v9337_v53  ;;  %3586 = vmatpush2.bf16.msra.mxu0 %v9340_v48  ;;  %v3714_v53 = vld [vmem:[#allocation9 + $0x1c0] sm:$0xff]  ;;  %v3713_v48 = vld [vmem:[#allocation9 + $0x1b8] sm:$0xff] }
 0x54d   :  { %3534 = vmatprep.subr.bf16.mxu1 %v9345_v36  ;;  %3587 = vmatprep.subr.bf16.mxu0 %v9348_v12  ;;  %v3712_v36 = vld [vmem:[#allocation9 + $0x1b0] sm:$0xff]  ;;  %v3711_v12 = vld [vmem:[#allocation9 + $0x1a8] sm:$0xff] }
 0x550   :  { %3535 = vmatpush2.bf16.msra.mxu1 %v9343_v4  ;;  %3588 = vmatpush2.bf16.msra.mxu0 %v9346_v14  ;;  %v3708_v4 = vld [vmem:[#allocation9 + $0x190] sm:$0xff]  ;;  %v3707_v14 = vld [vmem:[#allocation9 + $0x188] sm:$0xff] }
 0x551   :  { %3536 = vmatprep.subr.bf16.mxu1 %v9351_v33  ;;  %3589 = vmatprep.subr.bf16.mxu0 %v9354_v44  ;;  %v3706_v33 = vld [vmem:[#allocation9 + $0x180] sm:$0xff]  ;;  %v3705_v44 = vld [vmem:[#allocation9 + $0x178] sm:$0xff] }
 0x554   :  { %3537 = vmatpush2.bf16.msra.mxu1 %v9349_v34  ;;  %3590 = vmatpush2.bf16.msra.mxu0 %v9352_v15  ;;  %v3702_v34 = vld [vmem:[#allocation9 + $0x160] sm:$0xff]  ;;  %v3701_v15 = vld [vmem:[#allocation9 + $0x158] sm:$0xff] }
 0x555   :  { %3722 = vmatprep.subr.mxu1 %v3689_v6  ;;  %v3692_v6 = vld [vmem:[#allocation9 + $0x110] sm:$0xff] }
 0x557   :  { %3539 = vmatmul.mubr.bf16.vlgmr.msra.gmra.mxu1 %v2620_v42  ;;  %3592 = vmatmul.mubr.bf16.vlgmr.msra.gmra.mxu0 %v2622_v19  ;;  %v3696_v42 = vld [vmem:[#allocation9 + $0x130] sm:$0xff]  ;;  %v3695_v19 = vld [vmem:[#allocation9 + $0x128] sm:$0xff] }
 0x558   :  { %3548 = vmatprep.mubr.bf16.mxu1 %v2629_v49  ;;  %3601 = vmatprep.mubr.bf16.mxu0 %v2631_v50  ;;  %v3698_v49 = vld [vmem:[#allocation9 + $0x140] sm:$0xff]  ;;  %v3697_v50 = vld [vmem:[#allocation9 + $0x138] sm:$0xff] }
 0x559   :  { %3723 = vmatpush1.msra.mxu1 %v3688_v54  ;;  %v3691_v54 = vld [vmem:[#allocation9 + $0x108] sm:$0xff] }
 0x55a   :  { %3724 = vmatprep.subr.mxu1 %v3687_v55  ;;  %v3690_v55 = vld [vmem:[#allocation9 + $0x100] sm:$0xff] }
 0x55b   :  { %3725 = vmatpush1.msra.mxu1 %v3686_v9 }
 0x55c   :  { %3726 = vmatprep.subr.mxu1 %v3685_v38 }
 0x55d   :  { %3727 = vmatpush1.msra.mxu1 %v3684_v52 }
 0x55e   :  { %3728 = vmatprep.subr.mxu1 %v3683_v41 }
 0x55f   :  { %3549 = vmatmul.mubr.bf16.gmra.mxu1 %v2628_v51  ;;  %3602 = vmatmul.mubr.bf16.gmra.mxu0 %v2630_v5  ;;  %v3694_v51 = vld [vmem:[#allocation9 + $0x120] sm:$0xff]  ;;  %v3693_v5 = vld [vmem:[#allocation9 + $0x118] sm:$0xff] }
 0x560   :  { %3946 = vmatprep.mubr.bf16.mxu0 %v10345_v0  ;;  %3729 = vmatpush1.msra.mxu1 %v3682_v46 }
 0x561   :  { %3730 = vmatprep.subr.mxu1 %v3681_v56 }
 0x562   :  { %3731 = vmatpush1.msra.mxu1 %v3680_v57 }
 0x563   :  { %3732 = vmatprep.subr.mxu1 %v3679_v60 }
 0x564   :  { %3733 = vmatpush1.msra.mxu1 %v3678_v61 }
 0x565   :  { %3734 = vmatprep.subr.mxu1 %v3677_v10 }
 0x566   :  { %3735 = vmatpush1.msra.mxu1 %v3676_v62 }
 0x567   :  { %3736 = vmatprep.subr.mxu1 %v3675_v63 }
 0x568   :  { %3737 = vmatpush1.msra.mxu1 %v3674_v11 }
 0x569   :  { %3738 = vmatprep.subr.mxu1 %v3673_v2 }
 0x56a   :  { %3739 = vmatpush1.msra.mxu1 %v3672_v16 }
 0x56b   :  { %3740 = vmatprep.subr.mxu1 %v3671_v3 }
 0x56c   :  { %3741 = vmatpush1.msra.mxu1 %v3670_v18 }
 0x56d   :  { %3742 = vmatprep.subr.mxu1 %v3669_v22 }
 0x56e   :  { %3743 = vmatpush1.msra.mxu1 %v3668_v24 }
 0x56f   :  { %3744 = vmatprep.subr.mxu1 %v3667_v25 }
 0x570   :  { %3745 = vmatpush1.msra.mxu1 %v3666_v26 }
 0x571   :  { %3746 = vmatprep.subr.mxu1 %v3665_v27 }
 0x572   :  { %3747 = vmatpush1.msra.mxu1 %v3664_v30 }
 0x573   :  { %3748 = vmatprep.subr.mxu1 %v3663_v28 }
 0x574   :  { %3749 = vmatpush1.msra.mxu1 %v3662_v21 }
 0x575   :  { %3750 = vmatprep.subr.mxu1 %v3661_v29 }
 0x576   :  { %3751 = vmatpush1.msra.mxu1 %v3660_v39 }
 0x577   :  { %3752 = vmatprep.subr.mxu1 %v3659_v8 }
 0x578   :  { %3753 = vmatpush1.msra.mxu1 %v3658_v59 }
 0x579   :  { %3754 = vmatprep.subr.mxu1 %v3721_v31 }
 0x57a   :  { %3755 = vmatpush2.msra.mxu1 %v3720_v17 }
 0x57b   :  { %3756 = vmatprep.subr.mxu1 %v3719_v40 }
 0x57c   :  { %3757 = vmatpush2.msra.mxu1 %v3718_v32 }
 0x57d   :  { %3758 = vmatprep.subr.mxu1 %v3717_v20 }
 0x57e   :  { %3759 = vmatpush2.msra.mxu1 %v3716_v58 }
 0x57f   :  { %3760 = vmatprep.subr.mxu1 %v3715_v35 }
 0x580   :  { %3761 = vmatpush2.msra.mxu1 %v3714_v53 }
 0x581   :  { %3762 = vmatprep.subr.mxu1 %v3713_v48 }
 0x582   :  { %3763 = vmatpush2.msra.mxu1 %v3712_v36 }
 0x583   :  { %3764 = vmatprep.subr.mxu1 %v3711_v12 }
 0x584   :  { %3765 = vmatpush2.msra.mxu1 %v3710_v37 }
 0x585   :  { %3766 = vmatprep.subr.mxu1 %v3709_v43 }
 0x586   :  { %3767 = vmatpush2.msra.mxu1 %v3708_v4 }
 0x587   :  { %3768 = vmatprep.subr.mxu1 %v3707_v14 }
 0x588   :  { %3769 = vmatpush2.msra.mxu1 %v3706_v33 }
 0x589   :  { %3770 = vmatprep.subr.mxu1 %v3705_v44 }
 0x58a   :  { %3771 = vmatpush2.msra.mxu1 %v3704_v45 }
 0x58b   :  { %3772 = vmatprep.subr.mxu1 %v3703_v23 }
 0x58c   :  { %3773 = vmatpush2.msra.mxu1 %v3702_v34 }
 0x58d   :  { %3774 = vmatprep.subr.mxu1 %v3701_v15 }
 0x58e   :  { %3775 = vmatpush2.msra.mxu1 %v3700_v7 }
 0x58f   :  { %3776 = vmatprep.subr.mxu1 %v3699_v47 }
 0x590   :  { %3777 = vmatpush2.msra.mxu1 %v3698_v49 }
 0x591   :  { %3778 = vmatprep.subr.mxu1 %v3697_v50 }
 0x592   :  { %3779 = vmatpush2.msra.mxu1 %v3696_v42 }
 0x593   :  { %3780 = vmatprep.subr.mxu1 %v3695_v19 }
 0x594   :  { %3781 = vmatpush2.msra.mxu1 %v3694_v51 }
 0x595   :  { %3782 = vmatprep.subr.mxu1 %v3693_v5 }
 0x596   :  { %3783 = vmatpush2.msra.mxu1 %v3692_v6 }
 0x597   :  { %3784 = vmatprep.subr.mxu1 %v3691_v54 }
 0x598   :  { %3785 = vmatpush2.msra.mxu1 %v3690_v55 }
 0x5d7   :  { %v3434_v9 = vpop.f32.mrf.mxu1  ;;  %v3487_v38 = vpop.f32.mrf.mxu0 }
 0x5d8   :  { %v3488_v24 = vadd.f32 %v3487_v38, %v3434_v9 }
 0x5d9   :  { %v3436_v52 = vpop.f32.mrf.mxu1  ;;  %v3489_v41 = vpop.f32.mrf.mxu0 }
 0x5da   :  { %v3490_v30 = vadd.f32 %v3489_v41, %v3436_v52 }
 0x5db   :  { %v3438_v46 = vpop.f32.mrf.mxu1  ;;  %v3491_v56 = vpop.f32.mrf.mxu0 }
 0x5dc   :  { %v3492_v27 = vadd.f32 %v3491_v56, %v3438_v46 }
 0x5dd   :  { %v3440_v57 = vpop.f32.mrf.mxu1  ;;  %v3493_v60 = vpop.f32.mrf.mxu0 }
 0x5de   :  { %v3494_v39 = vadd.f32 %v3493_v60, %v3440_v57 }
 0x5df   :  { %v3444_v61 = vpop.f32.mrf.mxu1  ;;  %v3497_v10 = vpop.f32.mrf.mxu0 }
 0x5e0   :  { %v3498_v40 = vadd.f32 %v3497_v10, %v3444_v61 }
 0x5e1   :  { %v3446_v62 = vpop.f32.mrf.mxu1  ;;  %v3499_v63 = vpop.f32.mrf.mxu0 }
 0x5e2   :  { %v3500_v12 = vadd.f32 %v3499_v63, %v3446_v62 }
 0x5e3   :  { %v3448_v11 = vpop.f32.mrf.mxu1  ;;  %v3501_v2 = vpop.f32.mrf.mxu0 }
 0x5e4   :  { %v3502_v33 = vadd.f32 %v3501_v2, %v3448_v11 }
 0x5e5   :  { %v3450_v16 = vpop.f32.mrf.mxu1  ;;  %v3503_v3 = vpop.f32.mrf.mxu0 }
 0x5e6   :  { %v3504_v47 = vadd.f32 %v3503_v3, %v3450_v16 }
 0x617   :  { %v3540_v18 = vpop.f32.mrf.mxu1  ;;  %v3593_v22 = vpop.f32.mrf.mxu0 }
 0x618   :  { %v3541_v28 = vadd.f32 %v3540_v18, %v3488_v24 }
 0x619   :  { %v3542_v25 = vpop.f32.mrf.mxu1  ;;  %v3595_v26 = vpop.f32.mrf.mxu0 }
 0x61a   :  { %v3543_v59 = vadd.f32 %v3542_v25, %v3490_v30  ;;  %v11233_v58 = vadd.f32 %v3593_v22, %v3541_v28 }
 0x61b   :  { %v3544_v21 = vpop.f32.mrf.mxu1  ;;  %v3597_v29 = vpop.f32.mrf.mxu0 }
 0x61c   :  { %v3545_v8 = vadd.f32 %v3544_v21, %v3492_v27  ;;  %v11237_v37 = vadd.f32 %v3595_v26, %v3543_v59  ;;  %v3630_v45 = vmul.f32 %v11233_v58, %v11233_v58 }
 0x61d   :  { %v3546_v31 = vpop.f32.mrf.mxu1  ;;  %v3599_v17 = vpop.f32.mrf.mxu0 }
 0x61e   :  { %v11231_v32 = vadd.f32 %v3597_v29, %v3545_v8  ;;  %v3547_v20 = vadd.f32 %v3546_v31, %v3494_v39  ;;  %v3631_v19 = vmul.f32 %v11237_v37, %v11237_v37 }
 0x61f   :  { %v3550_v35 = vpop.f32.mrf.mxu1  ;;  %v3603_v53 = vpop.f32.mrf.mxu0 }
 0x620   :  { %v11235_v48 = vadd.f32 %v3599_v17, %v3547_v20  ;;  %v3551_v36 = vadd.f32 %v3550_v35, %v3498_v40  ;;  %v3632_v43 = vmul.f32 %v11231_v32, %v11231_v32  ;;  %v3612_v49 = vadd.f32 %v11231_v32, %v11233_v58 }
 0x621   :  { %v3552_v4 = vpop.f32.mrf.mxu1  ;;  %v3605_v14 = vpop.f32.mrf.mxu0 }
 0x622   :  { %v11241_v44 = vadd.f32 %v3603_v53, %v3551_v36  ;;  %v3633_v23 = vmul.f32 %v11235_v48, %v11235_v48  ;;  %v3553_v34 = vadd.f32 %v3552_v4, %v3500_v12  ;;  %v3638_v51 = vadd.f32 %v3632_v43, %v3630_v45  ;;  %v9368_v45 = vld [vmem:[%s11624_s12 + $0x170] ss:$8 sps:$4 sm:$0xff]  }
 0x623   :  { %v3554_v15 = vpop.f32.mrf.mxu1  ;;  %v3607_v7 = vpop.f32.mrf.mxu0  ;;  %v3621_v54 = vadd.f32 %v11235_v48, %v11237_v37 }
 0x624   :  { %v3634_v50 = vmul.f32 %v11241_v44, %v11241_v44  ;;  %v3555_v42 = vadd.f32 %v3554_v15, %v3502_v33  ;;  %v11253_v5 = vadd.f32 %v3605_v14, %v3553_v34  ;;  %v3613_v55 = vadd.f32 %v3612_v49, %v11241_v44  ;;  %v9374_v34 = vld [vmem:[%s11624_s12 + $0x160] ss:$8 sps:$4 sm:$0xff]   ;;  %v9376_v15 = vld [vmem:[%s11624_s12 + $0x164] ss:$8 sps:$4 sm:$0xff]  }
 0x625   :  { %v3556_v6 = vpop.f32.mrf.mxu1  ;;  %v3647_v52 = vadd.f32 %v3633_v23, %v3631_v19  ;;  %v3609_v56 = vpop.f32.mrf.mxu0  ;;  %v9370_v23 = vld [vmem:[%s11624_s12 + $0x174] ss:$8 sps:$4 sm:$0xff]   ;;  %v9386_v49 = vld [vmem:[%s11624_s12 + $0x140] ss:$8 sps:$4 sm:$0xff]  }
 0x626   :  { %v11258_v9 = vadd.f32 %v3607_v7, %v3555_v42  ;;  %v3557_v38 = vadd.f32 %v3556_v6, %v3504_v47  ;;  %v3639_v41 = vadd.f32 %v3638_v51, %v3634_v50  ;;  %v3635_v46 = vmul.f32 %v11253_v5, %v11253_v5  ;;  %4938 = vmatprep.subr.bf16.mxu1 %v9370_v23  ;;  %v9380_v7 = vld [vmem:[%s11624_s12 + $0x150] ss:$8 sps:$4 sm:$0xff]   ;;  %v9382_v47 = vld [vmem:[%s11624_s12 + $0x154] ss:$8 sps:$4 sm:$0xff]   ;;  %v9388_v50 = vld [vmem:[%s11624_s12 + $0x144] ss:$8 sps:$4 sm:$0xff]  }
 0x627   :  { %v3622_v57 = vadd.f32 %v3621_v54, %v11253_v5  ;;  %v9392_v42 = vld [vmem:[%s11624_s12 + $0x130] ss:$8 sps:$4 sm:$0xff]   ;;  %v9394_v19 = vld [vmem:[%s11624_s12 + $0x134] ss:$8 sps:$4 sm:$0xff]   ;;  %v9398_v51 = vld [vmem:[%s11624_s12 + $0x120] ss:$8 sps:$4 sm:$0xff]  }
 0x628   :  { %v3614_v60 = vadd.f32 %v3613_v55, %v11258_v9  ;;  %v3636_v61 = vmul.f32 %v11258_v9, %v11258_v9  ;;  %v11266_v10 = vadd.f32 %v3609_v56, %v3557_v38  ;;  %v3648_v62 = vadd.f32 %v3647_v52, %v3635_v46  ;;  %v9400_v6 = vld [vmem:[%s11624_s12 + $0x124] ss:$8 sps:$4 sm:$0xff]   ;;  %v9404_v54 = vld [vmem:[%s11624_s12 + $0x110] ss:$8 sps:$4 sm:$0xff]   ;;  %v9406_v55 = vld [vmem:[%s11624_s12 + $0x114] ss:$8 sps:$4 sm:$0xff]  }
 0x629   :  { %v9410_v38 = vld [vmem:[%s11624_s12 + $0x100] ss:$8 sps:$4 sm:$0xff]   ;;  %v9412_v52 = vld [vmem:[%s11624_s12 + $0x104] ss:$8 sps:$4 sm:$0xff]   ;;  %v9418_v46 = vld [vmem:[%s11624_s12 + $0x1f4] ss:$8 sps:$4 sm:$0xff]  }
 0x62a   :  { %v3615_v63 = vrot.slane %v3614_v60, 4  ;;  %v3640_v11 = vadd.f32 %v3639_v41, %v3636_v61  ;;  %v3623_v2 = vadd.f32 %v3622_v57, %v11266_v10  ;;  %v3637_v16 = vmul.f32 %v11266_v10, %v11266_v10  ;;  %v9416_v41 = vld [vmem:[%s11624_s12 + $0x1f0] ss:$8 sps:$4 sm:$0xff]   ;;  %v9422_v56 = vld [vmem:[%s11624_s12 + $0x1e0] ss:$8 sps:$4 sm:$0xff]  }
 0x62b   :  { %v9424_v57 = vld [vmem:[%s11624_s12 + $0x1e4] ss:$8 sps:$4 sm:$0xff]   ;;  %v9430_v61 = vld [vmem:[%s11624_s12 + $0x1d4] ss:$8 sps:$4 sm:$0xff]  }
 0x62c   :  { %v3616_v3 = vadd.f32 %v3615_v63, %v3614_v60  ;;  %v3641_v18 = vrot.slane %v3640_v11, 4  ;;  %v3624_v22 = vrot.slane %v3623_v2, 4  ;;  %v3649_v24 = vadd.f32 %v3648_v62, %v3637_v16  ;;  %v9428_v60 = vld [vmem:[%s11624_s12 + $0x1d0] ss:$8 sps:$4 sm:$0xff]   ;;  %v9434_v62 = vld [vmem:[%s11624_s12 + $0x1c0] ss:$8 sps:$4 sm:$0xff]  }
 0x62d   :  { %v9436_v63 = vld [vmem:[%s11624_s12 + $0x1c4] ss:$8 sps:$4 sm:$0xff]  }
 0x62e   :  { %v3617_v25 = vrot.slane %v3616_v3, 2  ;;  %v3642_v26 = vadd.f32 %v3641_v18, %v3640_v11  ;;  %v3625_v27 = vadd.f32 %v3624_v22, %v3623_v2  ;;  %v3650_v30 = vrot.slane %v3649_v24, 4 }
 0x630   :  { %v3643_v28 = vrot.slane %v3642_v26, 2  ;;  %v3626_v21 = vrot.slane %v3625_v27, 2  ;;  %v3651_v29 = vadd.f32 %v3650_v30, %v3649_v24  ;;  %v3618_v39 = vadd.f32 %v3617_v25, %v3616_v3 }
 0x632   :  { %v3644_v8 = vadd.f32 %v3643_v28, %v3642_v26  ;;  %v3627_v59 = vadd.f32 %v3626_v21, %v3625_v27  ;;  %v3652_v31 = vrot.slane %v3651_v29, 2  ;;  %v3619_v35 = vrot.slane %v3618_v39, 1  ;;  %v3809_v21 = vld [vmem:[#allocation10] sm:$0x3] }
 0x634   :  { %v3628_v17 = vrot.slane %v3627_v59, 1  ;;  %v3653_v40 = vadd.f32 %v3652_v31, %v3651_v29  ;;  %v3645_v20 = vrot.slane %v3644_v8, 1  ;;  %v3620_v4 = vadd.f32 %v3619_v35, %v3618_v39 }
 0x635   :  { %v3814_v29 = vrot.slane %v3809_v21, %v10952_v1  ;;  %v3818_v31 = vrot.slane %v3809_v21, %v10954_v13  ;;  %v9361_v21 = vld [vmem:[%s11624_s12 + $0x74] ss:$8 sps:$4 sm:$0xff]  }
 0x636   :  { %v3654_v53 = vrot.slane %v3653_v40, 1  ;;  %v3646_v36 = vadd.f32 %v3645_v20, %v3644_v8  ;;  %v3629_v12 = vadd.f32 %v3628_v17, %v3627_v59  ;;  %v3855_v8 = vld [vmem:[#allocation12] sm:$0x3] }
 0x637   :  { %v3860_v35 = vrot.slane %v3855_v8, %v10952_v1 }
 0x638   :  { %v3655_v43 = vadd.f32 %v3654_v53, %v3653_v40  ;;  %v3656_v33 = vsel %vm2020_vm0, %v3620_v4, %v3646_v36 }
 0x63a   :  { %v3657_v14 = vsel %vm2020_vm0, %v3629_v12, %v3655_v43 }
 0x63b   :  { %3786 = vmatprep.mubr.f32.mxu1 %v3657_v14 }
 0x63c   :  { %3787 = vmatmul.mubr.f32.vlgmr.msra.gmra.mxu1 %v3656_v33 }
 0x63d   :  { %4939 = vmatpush1.bf16.msra.mxu1 %v9368_v45  ;;  %v3864_v45 = vrot.slane %v3855_v8, %v10954_v13  ;;  %v9364_v8 = vld [vmem:[%s11624_s12 + $0x64] ss:$8 sps:$4 sm:$0xff]  }
 0x63e   :  { %4940 = vmatprep.subr.bf16.mxu1 %v9376_v15 }
 0x641   :  { %4941 = vmatpush1.bf16.msra.mxu1 %v9374_v34 }
 0x642   :  { %4942 = vmatprep.subr.bf16.mxu1 %v9382_v47 }
 0x645   :  { %4943 = vmatpush1.bf16.msra.mxu1 %v9380_v7 }
 0x646   :  { %4944 = vmatprep.subr.bf16.mxu1 %v9388_v50 }
 0x649   :  { %4945 = vmatpush1.bf16.msra.mxu1 %v9386_v49 }
 0x64a   :  { %4946 = vmatprep.subr.bf16.mxu1 %v9394_v19 }
 0x64d   :  { %4947 = vmatpush1.bf16.msra.mxu1 %v9392_v42 }
 0x64e   :  { %4948 = vmatprep.subr.bf16.mxu1 %v9400_v6 }
 0x651   :  { %4949 = vmatpush1.bf16.msra.mxu1 %v9398_v51 }
 0x652   :  { %4950 = vmatprep.subr.bf16.mxu1 %v9406_v55 }
 0x655   :  { %4951 = vmatpush1.bf16.msra.mxu1 %v9404_v54 }
 0x656   :  { %4952 = vmatprep.subr.bf16.mxu1 %v9412_v52 }
 0x659   :  { %4953 = vmatpush1.bf16.msra.mxu1 %v9410_v38 }
 0x65a   :  { %4954 = vmatprep.subr.bf16.mxu1 %v9418_v46 }
 0x65d   :  { %4955 = vmatpush2.bf16.msra.mxu1 %v9416_v41 }
 0x65e   :  { %4956 = vmatprep.subr.bf16.mxu1 %v9424_v57 }
 0x661   :  { %4957 = vmatpush2.bf16.msra.mxu1 %v9422_v56 }
 0x662   :  { %4958 = vmatprep.subr.bf16.mxu1 %v9430_v61 }
 0x665   :  { %4959 = vmatpush2.bf16.msra.mxu1 %v9428_v60 }
 0x666   :  { %4960 = vmatprep.subr.bf16.mxu1 %v9436_v63 }
 0x669   :  { %4961 = vmatpush2.bf16.msra.mxu1 %v9434_v62 }
 0x6fc   :  { %v3788_v11 = vpop.f32.mrf.mxu1 }
 0x6fd   :  { %v3793_v2 = vmul.f32 0.001953125, %v3788_v11 }
 0x6fe   :  { %v3790_v16 = vpop.f32.mrf.mxu1 }
 0x6ff   :  { %v3795_v3 = vmul.f32 %v3793_v2, %v3793_v2  ;;  %v3794_v18 = vmul.f32 0.001953125, %v3790_v16  ;;  %v3826_v39 = vrot.slane %v3793_v2, %v10952_v1 }
 0x701   :  { %v3799_v22 = vrot.slane %v3795_v3, 7  ;;  %v3796_v24 = vmul.f32 %v3794_v18, %v3794_v18  ;;  %v3830_v17 = vrot.slane %v3794_v18, %v10952_v1  ;;  %v3831_v20 = vsub.f32 %v11233_v58, %v3826_v39 }
 0x702   :  { %v3833_v36 = vsub.f32 %v11231_v32, %v3826_v39  ;;  %v3835_v12 = vsub.f32 %v11241_v44, %v3826_v39  ;;  %v3837_v43 = vsub.f32 %v11258_v9, %v3826_v39  ;;  %v9359_v39 = vld [vmem:[%s11624_s12 + $0x70] ss:$8 sps:$4 sm:$0xff]  }
 0x703   :  { %v3803_v25 = vsub.f32 %v3793_v2, %v3799_v22  ;;  %v3800_v26 = vrot.slane %v3796_v24, 7  ;;  %v3832_v33 = vsub.f32 %v11237_v37, %v3830_v17  ;;  %v3834_v7 = vsub.f32 %v11235_v48, %v3830_v17 }
 0x704   :  { %v3836_v47 = vsub.f32 %v11253_v5, %v3830_v17  ;;  %v3838_v32 = vsub.f32 %v11266_v10, %v3830_v17  ;;  %v9365_v17 = vld [vmem:[%s11624_s12 + $0x50] ss:$8 sps:$4 sm:$0xff]  }
 0x705   :  { %v3805_v27 = vadd.f32 1e-05, %v3803_v25  ;;  %v3804_v30 = vsub.f32 %v3794_v18, %v3800_v26 }
 0x707   :  { %9827 = vrsqrt.f32 %v3805_v27  ;;  %v3806_v28 = vadd.f32 1e-05, %v3804_v30  ;;  %v9355_v27 = vld [vmem:[%s11625_s30] sm:$0xff]   ;;  %v9356_v30 = vld [vmem:[%s11625_s30 + $0x8] sm:$0xff]  }
 0x709   :  { %9829 = vrsqrt.f32 %v3806_v28  ;;  %v9357_v28 = vld [vmem:[%s11625_s30 + $0x10] sm:$0xff]  }
 0x714   :  { %v9828_v59 = vpop.eup %9827 }
 0x715   :  { %v3821_v40 = vmul.f32 %v9828_v59, %v3814_v29  ;;  %v9358_v29 = vld [vmem:[%s11625_s30 + $0x18] sm:$0xff]   ;;  %v9362_v59 = vld [vmem:[%s11624_s12 + $0x60] ss:$8 sps:$4 sm:$0xff]  }
 0x716   :  { %v9830_v53 = vpop.eup %9829 }
 0x717   :  { %v3842_v4 = vrot.slane %v3821_v40, %v10954_v13  ;;  %v3822_v14 = vmul.f32 %v9830_v53, %v3818_v31  ;;  %v9367_v31 = vld [vmem:[%s11624_s12 + $0x54] ss:$8 sps:$4 sm:$0xff]   ;;  %v9373_v40 = vld [vmem:[%s11624_s12 + $0x44] ss:$8 sps:$4 sm:$0xff]   ;;  %v9377_v53 = vld [vmem:[%s11624_s12 + $0x30] ss:$8 sps:$4 sm:$0xff]  }
 0x719   :  { %v3851_v23 = vmul.f32 %v3842_v4, %v3835_v12  ;;  %v3853_v34 = vmul.f32 %v3842_v4, %v3837_v43  ;;  %v3847_v15 = vmul.f32 %v3842_v4, %v3831_v20  ;;  %v3849_v58 = vmul.f32 %v3842_v4, %v3833_v36  ;;  %v9371_v20 = vld [vmem:[%s11624_s12 + $0x40] ss:$8 sps:$4 sm:$0xff]   ;;  %v9385_v36 = vld [vmem:[%s11624_s12 + $0x24] ss:$8 sps:$4 sm:$0xff]   ;;  %v9391_v43 = vld [vmem:[%s11624_s12 + $0x14] ss:$8 sps:$4 sm:$0xff]  }
 0x71a   :  { %v3846_v44 = vrot.slane %v3822_v14, %v10954_v13  ;;  %v9383_v12 = vld [vmem:[%s11624_s12 + $0x20] ss:$8 sps:$4 sm:$0xff]   ;;  %v9389_v4 = vld [vmem:[%s11624_s12 + $0x10] ss:$8 sps:$4 sm:$0xff]   ;;  %v9397_v14 = vld [vmem:[%s11624_s12 + $0x4] ss:$8 sps:$4 sm:$0xff]  }
 0x71b   :  { %v3871_v9 = vadd.f32 %v3860_v35, %v3851_v23  ;;  %v3873_v49 = vadd.f32 %v3860_v35, %v3853_v34  ;;  %v3867_v50 = vadd.f32 %v3860_v35, %v3847_v15  ;;  %v3869_v42 = vadd.f32 %v3860_v35, %v3849_v58  ;;  %v9379_v35 = vld [vmem:[%s11624_s12 + $0x34] ss:$8 sps:$4 sm:$0xff]   ;;  %v9401_v23 = vld [vmem:[%s11624_s12 + $0xf0] ss:$8 sps:$4 sm:$0xff]   ;;  %v9409_v34 = vld [vmem:[%s11624_s12 + $0xe4] ss:$8 sps:$4 sm:$0xff]  }
 0x71c   :  { %v3852_v19 = vmul.f32 %v3846_v44, %v3836_v47  ;;  %v3854_v37 = vmul.f32 %v3846_v44, %v3838_v32  ;;  %v3848_v51 = vmul.f32 %v3846_v44, %v3832_v33  ;;  %v3850_v6 = vmul.f32 %v3846_v44, %v3834_v7  ;;  %v9395_v33 = vld [vmem:[%s11624_s12] ss:$8 sps:$4 sm:$0xff]   ;;  %v9415_v58 = vld [vmem:[%s11624_s12 + $0xd4] ss:$8 sps:$4 sm:$0xff]   ;;  %v9413_v7 = vld [vmem:[%s11624_s12 + $0xd0] ss:$8 sps:$4 sm:$0xff]  }
 0x71d   :  { %vm3879_vm3 = vcmp.ge.f32.partialorder %v3871_v9, 0.0  ;;  %vm3881_vm4 = vcmp.ge.f32.partialorder %v3873_v49, 0.0  ;;  %v3887_v54 = vmul.f32 0.2, %v3871_v9  ;;  %v3889_v55 = vmul.f32 0.2, %v3873_v49 }
 0x71e   :  { %v3872_v38 = vadd.f32 %v3864_v45, %v3852_v19  ;;  %v3874_v48 = vadd.f32 %v3864_v45, %v3854_v37  ;;  %v3868_v52 = vadd.f32 %v3864_v45, %v3848_v51  ;;  %v3870_v5 = vadd.f32 %v3864_v45, %v3850_v6  ;;  %v9403_v45 = vld [vmem:[%s11624_s12 + $0xf4] ss:$8 sps:$4 sm:$0xff]   ;;  %v9407_v15 = vld [vmem:[%s11624_s12 + $0xe0] ss:$8 sps:$4 sm:$0xff]   ;;  %v9421_v47 = vld [vmem:[%s11624_s12 + $0xc4] ss:$8 sps:$4 sm:$0xff]  }
 0x71f   :  { %v3895_v41 = vsel %vm3879_vm3, %v3871_v9, %v3887_v54  ;;  %v3897_v10 = vsel %vm3881_vm4, %v3873_v49, %v3889_v55  ;;  %vm3875_vm5 = vcmp.ge.f32.partialorder %v3867_v50, 0.0  ;;  %vm3877_vm10 = vcmp.ge.f32.partialorder %v3869_v42, 0.0  ;;  %v9440_v32 = vld [vmem:[%s11624_s12 + $0x1b0] ss:$8 sps:$4 sm:$0xff]   ;;  %v9419_v44 = vld [vmem:[%s11624_s12 + $0xc0] ss:$8 sps:$4 sm:$0xff]  }
 0x720   :  { %vm3880_vm6 = vcmp.ge.f32.partialorder %v3872_v38, 0.0  ;;  %vm3882_vm7 = vcmp.ge.f32.partialorder %v3874_v48, 0.0  ;;  %v3888_v46 = vmul.f32 0.2, %v3872_v38  ;;  %v3890_v56 = vmul.f32 0.2, %v3874_v48 }
 0x721   :  { %vm3876_vm8 = vcmp.ge.f32.partialorder %v3868_v52, 0.0  ;;  %vm3878_vm9 = vcmp.ge.f32.partialorder %v3870_v5, 0.0  ;;  %v3884_v57 = vmul.f32 0.2, %v3868_v52  ;;  %v3886_v62 = vmul.f32 0.2, %v3870_v5 }
 0x722   :  { %v3896_v60 = vsel %vm3880_vm6, %v3872_v38, %v3888_v46  ;;  %v3898_v61 = vsel %vm3882_vm7, %v3874_v48, %v3890_v56  ;;  %v3883_v63 = vmul.f32 0.2, %v3867_v50  ;;  %v3885_v16 = vmul.f32 0.2, %v3869_v42  ;;  %v9442_v9 = vld [vmem:[%s11624_s12 + $0x1b4] ss:$8 sps:$4 sm:$0xff]  }
 0x723   :  { %v3902_v11 = vpack.c.bf16 %v3898_v61, %v3896_v60  ;;  %v3892_v2 = vsel %vm3876_vm8, %v3868_v52, %v3884_v57  ;;  %v3901_v3 = vpack.c.bf16 %v3897_v10, %v3895_v41  ;;  %v3894_v18 = vsel %vm3878_vm9, %v3870_v5, %v3886_v62  ;;  %v9427_v49 = vld [vmem:[%s11624_s12 + $0xb4] ss:$8 sps:$4 sm:$0xff]   ;;  %4962 = vmatprep.subr.bf16.mxu1 %v9442_v9  ;;  %v9433_v19 = vld [vmem:[%s11624_s12 + $0xa4] ss:$8 sps:$4 sm:$0xff]   ;;  %v9431_v51 = vld [vmem:[%s11624_s12 + $0xa0] ss:$8 sps:$4 sm:$0xff]  }
 0x724   :  { %v3900_v22 = vpack.c.bf16 %v3894_v18, %v3892_v2  ;;  %v3891_v24 = vsel %vm3875_vm5, %v3867_v50, %v3883_v63  ;;  %v3893_v25 = vsel %vm3877_vm10, %v3869_v42, %v3885_v16  ;;  %4963 = vmatpush2.bf16.msra.mxu1 %v9440_v32  ;;  %v9425_v50 = vld [vmem:[%s11624_s12 + $0xb0] ss:$8 sps:$4 sm:$0xff]   ;;  %v9446_v42 = vld [vmem:[%s11624_s12 + $0x1a0] ss:$8 sps:$4 sm:$0xff]   ;;  %v9448_v37 = vld [vmem:[%s11624_s12 + $0x1a4] ss:$8 sps:$4 sm:$0xff]  }
 0x725   :  { %3926 = vmatprep.subr.bf16.mxu0 %v3902_v11  ;;  %v3899_v26 = vpack.c.bf16 %v3893_v25, %v3891_v24  ;;  %4964 = vmatprep.subr.bf16.mxu1 %v9448_v37  ;;  %v9449_v6 = vld [vmem:[%s11624_s12 + $0x190] ss:$8 sps:$4 sm:$0xff]   ;;  %v9451_v54 = vld [vmem:[%s11624_s12 + $0x194] ss:$8 sps:$4 sm:$0xff]   ;;  %v9455_v48 = vld [vmem:[%s11624_s12 + $0x180] ss:$8 sps:$4 sm:$0xff]  }
 0x726   :  { %3927 = vmatpush1.bf16.msra.mxu0 %v3901_v3  ;;  %v9439_v55 = vld [vmem:[%s11624_s12 + $0x94] ss:$8 sps:$4 sm:$0xff]   ;;  %v9437_v38 = vld [vmem:[%s11624_s12 + $0x90] ss:$8 sps:$4 sm:$0xff]   ;;  %v9457_v52 = vld [vmem:[%s11624_s12 + $0x184] ss:$8 sps:$4 sm:$0xff]  }
 0x727   :  { %3928 = vmatprep.subr.bf16.mxu0 %v3900_v22  ;;  %v9445_v5 = vld [vmem:[%s11624_s12 + $0x84] ss:$8 sps:$4 sm:$0xff]   ;;  %v9443_v41 = vld [vmem:[%s11624_s12 + $0x80] ss:$8 sps:$4 sm:$0xff]   ;;  %v9454_v10 = vld [vmem:[%s11624_s12 + $0x274] ss:$8 sps:$4 sm:$0xff]  }
 0x728   :  { %4965 = vmatpush2.bf16.msra.mxu1 %v9446_v42  ;;  %v9466_v46 = vld [vmem:[%s11624_s12 + $0x374] ss:$8 sps:$4 sm:$0xff]   ;;  %v9452_v63 = vld [vmem:[%s11624_s12 + $0x270] ss:$8 sps:$4 sm:$0xff]   ;;  %v9460_v16 = vld [vmem:[%s11624_s12 + $0x264] ss:$8 sps:$4 sm:$0xff]  }
 0x729   :  { %4966 = vmatprep.subr.bf16.mxu1 %v9451_v54  ;;  %v9458_v18 = vld [vmem:[%s11624_s12 + $0x260] ss:$8 sps:$4 sm:$0xff]   ;;  %v9463_v24 = vld [vmem:[%s11624_s12 + $0x254] ss:$8 sps:$4 sm:$0xff]   ;;  %v9488_v32 = vld [vmem:[%s11624_s12 + $0x330] ss:$8 sps:$4 sm:$0xff]  }
 0x72a   :  { %3929 = vmatpush1.bf16.msra.mxu0 %v3899_v26  ;;  %v9493_v9 = vld [vmem:[%s11624_s12 + $0x204] ss:$8 sps:$4 sm:$0xff]   ;;  %v9494_v42 = vld [vmem:[%s11624_s12 + $0x320] ss:$8 sps:$4 sm:$0xff]   ;;  %v9502_v37 = vld [vmem:[%s11624_s12 + $0x314] ss:$8 sps:$4 sm:$0xff]  }
 0x72b   :  { %3980 = vmatprep.subr.bf16.mxu0 %v3902_v11  ;;  %v9505_v54 = vld [vmem:[%s11624_s12 + $0x2e4] ss:$8 sps:$4 sm:$0xff]   ;;  %vm6684_vm4 = vcmask 1043456   ;;  %vm6680_vm5 = vcmask 64512   ;;  %vm10347_vm6 = vmmov 0   ;;  %vm7695_vm7 = vcmask 1041408  }
 0x72c   :  { %4967 = vmatpush2.bf16.msra.mxu1 %v9449_v6  ;;  %v9500_v6 = vld [vmem:[%s11624_s12 + $0x310] ss:$8 sps:$4 sm:$0xff]   ;;  %vm7691_vm8 = vcmask 31744   ;;  %vm7971_vm9 = vcmask 123904   ;;  %vm7977_vm10 = vcmask 255104  }
 0x72d   :  { %8339 = vmatmul.mubr.msk.bf16.vlgmr.msra.gmra.mxu0 %vm3910_vm11, %v9355_v27  ;;  %4968 = vmatprep.subr.bf16.mxu1 %v9457_v52  ;;  %v9461_v27 = vld [vmem:[%s11624_s12 + $0x250] ss:$8 sps:$4 sm:$0xff]   ;;  %v9511_v52 = vld [vmem:[%s11624_s12 + $0x2d4] ss:$8 sps:$4 sm:$0xff]  }
 0x72e   :  { %3981 = vmatpush1.bf16.msra.mxu0 %v3901_v3  ;;  %4000 = vmatprep.mubr.bf16.mxu0 %v10345_v0 }
 0x72f   :  { %3982 = vmatprep.subr.bf16.mxu0 %v3900_v22 }
 0x730   :  { %4969 = vmatpush2.bf16.msra.mxu1 %v9455_v48  ;;  %v9506_v48 = vld [vmem:[%s11624_s12 + $0x300] ss:$8 sps:$4 sm:$0xff]  }
 0x731   :  { %5024 = vmatprep.subr.bf16.mxu1 %v9466_v46  ;;  %v9517_v46 = vld [vmem:[%s11624_s12 + $0x2c4] ss:$8 sps:$4 sm:$0xff]  }
 0x732   :  { %3983 = vmatpush1.bf16.msra.mxu0 %v3899_v26 }
 0x733   :  { %4034 = vmatprep.subr.bf16.mxu0 %v3902_v11 }
 0x735   :  { %8343 = vmatmul.mubr.msk.bf16.vlgmr.msra.gmra.mxu0 %vm3910_vm11, %v9356_v30  ;;  %v9464_v30 = vld [vmem:[%s11624_s12 + $0x370] ss:$8 sps:$4 sm:$0xff]  }
 0x736   :  { %4035 = vmatpush1.bf16.msra.mxu0 %v3901_v3  ;;  %4054 = vmatprep.mubr.bf16.mxu0 %v10345_v0 }
 0x737   :  { %4036 = vmatprep.subr.bf16.mxu0 %v3900_v22 }
 0x73a   :  { %4037 = vmatpush1.bf16.msra.mxu0 %v3899_v26 }
 0x73b   :  { %4088 = vmatprep.subr.bf16.mxu0 %v3902_v11 }
 0x73d   :  { %8347 = vmatmul.mubr.msk.bf16.vlgmr.msra.gmra.mxu0 %vm3910_vm11, %v9357_v28 }
 0x73e   :  { %4089 = vmatpush1.bf16.msra.mxu0 %v3901_v3  ;;  %4108 = vmatprep.mubr.bf16.mxu0 %v10345_v0 }
 0x73f   :  { %4090 = vmatprep.subr.bf16.mxu0 %v3900_v22 }
 0x742   :  { %4091 = vmatpush1.bf16.msra.mxu0 %v3899_v26 }
 0x743   :  { %4895 = vmatprep.subr.bf16.mxu0 %v9361_v21  ;;  %v9469_v21 = vld [vmem:[%s11624_s12 + $0x244] ss:$8 sps:$4 sm:$0xff]  }
 0x745   :  { %8351 = vmatmul.mubr.msk.bf16.vlgmr.msra.gmra.mxu0 %vm3910_vm11, %v9358_v29  ;;  %v9472_v29 = vld [vmem:[%s11624_s12 + $0x364] ss:$8 sps:$4 sm:$0xff]   ;;  %vm7979_vm11 = vcmask 386304  }
 0x746   :  { %4896 = vmatpush1.bf16.msra.mxu0 %v9359_v39 }
 0x747   :  { %4897 = vmatprep.subr.bf16.mxu0 %v9364_v8 }
 0x74a   :  { %4898 = vmatpush1.bf16.msra.mxu0 %v9362_v59  ;;  %v9467_v59 = vld [vmem:[%s11624_s12 + $0x240] ss:$8 sps:$4 sm:$0xff]  }
 0x74b   :  { %4899 = vmatprep.subr.bf16.mxu0 %v9367_v31  ;;  %v9470_v31 = vld [vmem:[%s11624_s12 + $0x360] ss:$8 sps:$4 sm:$0xff]  }
 0x74e   :  { %4900 = vmatpush1.bf16.msra.mxu0 %v9365_v17  ;;  %v9475_v17 = vld [vmem:[%s11624_s12 + $0x234] ss:$8 sps:$4 sm:$0xff]  }
 0x74f   :  { %4901 = vmatprep.subr.bf16.mxu0 %v9373_v40  ;;  %v9478_v40 = vld [vmem:[%s11624_s12 + $0x354] ss:$8 sps:$4 sm:$0xff]  }
 0x752   :  { %4902 = vmatpush1.bf16.msra.mxu0 %v9371_v20 }
 0x753   :  { %4903 = vmatprep.subr.bf16.mxu0 %v9379_v35 }
 0x756   :  { %4904 = vmatpush1.bf16.msra.mxu0 %v9377_v53  ;;  %v9473_v53 = vld [vmem:[%s11624_s12 + $0x230] ss:$8 sps:$4 sm:$0xff]  }
 0x757   :  { %4905 = vmatprep.subr.bf16.mxu0 %v9385_v36  ;;  %v9476_v36 = vld [vmem:[%s11624_s12 + $0x350] ss:$8 sps:$4 sm:$0xff]  }
 0x75a   :  { %4906 = vmatpush1.bf16.msra.mxu0 %v9383_v12 }
 0x75b   :  { %4907 = vmatprep.subr.bf16.mxu0 %v9391_v43  ;;  %v9481_v43 = vld [vmem:[%s11624_s12 + $0x224] ss:$8 sps:$4 sm:$0xff]  }
 0x75e   :  { %4908 = vmatpush1.bf16.msra.mxu0 %v9389_v4  ;;  %v9484_v4 = vld [vmem:[%s11624_s12 + $0x344] ss:$8 sps:$4 sm:$0xff]  }
 0x75f   :  { %4909 = vmatprep.subr.bf16.mxu0 %v9397_v14 }
 0x762   :  { %4910 = vmatpush1.bf16.msra.mxu0 %v9395_v33 }
 0x763   :  { %4911 = vmatprep.subr.bf16.mxu0 %v9403_v45  ;;  %v9479_v45 = vld [vmem:[%s11624_s12 + $0x220] ss:$8 sps:$4 sm:$0xff]  }
 0x766   :  { %4912 = vmatpush2.bf16.msra.mxu0 %v9401_v23  ;;  %v9482_v23 = vld [vmem:[%s11624_s12 + $0x340] ss:$8 sps:$4 sm:$0xff]  }
 0x767   :  { %4913 = vmatprep.subr.bf16.mxu0 %v9409_v34  ;;  %v9487_v34 = vld [vmem:[%s11624_s12 + $0x214] ss:$8 sps:$4 sm:$0xff]  }
 0x76a   :  { %4914 = vmatpush2.bf16.msra.mxu0 %v9407_v15  ;;  %v9490_v15 = vld [vmem:[%s11624_s12 + $0x334] ss:$8 sps:$4 sm:$0xff]  }
 0x76b   :  { %4915 = vmatprep.subr.bf16.mxu0 %v9415_v58 }
 0x76e   :  { %4916 = vmatpush2.bf16.msra.mxu0 %v9413_v7 }
 0x76f   :  { %4917 = vmatprep.subr.bf16.mxu0 %v9421_v47  ;;  %v9485_v47 = vld [vmem:[%s11624_s12 + $0x210] ss:$8 sps:$4 sm:$0xff]  }
 0x772   :  { %4918 = vmatpush2.bf16.msra.mxu0 %v9419_v44 }
 0x773   :  { %4919 = vmatprep.subr.bf16.mxu0 %v9427_v49  ;;  %v9496_v49 = vld [vmem:[%s11624_s12 + $0x324] ss:$8 sps:$4 sm:$0xff]  }
 0x776   :  { %4920 = vmatpush2.bf16.msra.mxu0 %v9425_v50  ;;  %v9491_v50 = vld [vmem:[%s11624_s12 + $0x200] ss:$8 sps:$4 sm:$0xff]  }
 0x777   :  { %4921 = vmatprep.subr.bf16.mxu0 %v9433_v19  ;;  %v9499_v19 = vld [vmem:[%s11624_s12 + $0x2f4] ss:$8 sps:$4 sm:$0xff]  }
 0x77a   :  { %4922 = vmatpush2.bf16.msra.mxu0 %v9431_v51  ;;  %v9497_v51 = vld [vmem:[%s11624_s12 + $0x2f0] ss:$8 sps:$4 sm:$0xff]  }
 0x77b   :  { %4923 = vmatprep.subr.bf16.mxu0 %v9439_v55  ;;  %v9508_v55 = vld [vmem:[%s11624_s12 + $0x304] ss:$8 sps:$4 sm:$0xff]  }
 0x77e   :  { %4924 = vmatpush2.bf16.msra.mxu0 %v9437_v38  ;;  %v9503_v38 = vld [vmem:[%s11624_s12 + $0x2e0] ss:$8 sps:$4 sm:$0xff]  }
 0x77f   :  { %4925 = vmatprep.subr.bf16.mxu0 %v9445_v5  ;;  %v9514_v5 = vld [vmem:[%s11624_s12 + $0x3f4] ss:$8 sps:$4 sm:$0xff]  }
 0x782   :  { %4926 = vmatpush2.bf16.msra.mxu0 %v9443_v41  ;;  %v9509_v41 = vld [vmem:[%s11624_s12 + $0x2d0] ss:$8 sps:$4 sm:$0xff]  }
 0x783   :  { %4981 = vmatprep.subr.bf16.mxu0 %v9454_v10  ;;  %v9512_v10 = vld [vmem:[%s11624_s12 + $0x3f0] ss:$8 sps:$4 sm:$0xff]  }
 0x7ed   :  { %v3948_v56 = vpop.f32.mrf.mxu0 }
 0x7ef   :  { %v3950_v57 = vpop.f32.mrf.mxu0 }
 0x7f1   :  { %v3952_v60 = vpop.f32.mrf.mxu0 }
 0x7f2   :  { %v4119_v11 = vpack.c.bf16 %v3952_v60, %v3948_v56  ;;  %v9520_v56 = vld [vmem:[%s11624_s12 + $0x3e4] ss:$8 sps:$4 sm:$0xff]   ;;  %v9518_v60 = vld [vmem:[%s11624_s12 + $0x3e0] ss:$8 sps:$4 sm:$0xff]  }
 0x7f3   :  { %v3954_v61 = vpop.f32.mrf.mxu0 }
 0x7f4   :  { %v4120_v62 = vpack.c.bf16 %v3954_v61, %v3950_v57  ;;  %v9515_v57 = vld [vmem:[%s11624_s12 + $0x2c0] ss:$8 sps:$4 sm:$0xff]   ;;  %v9523_v61 = vld [vmem:[%s11624_s12 + $0x2b4] ss:$8 sps:$4 sm:$0xff]  }
 0x7f5   :  { %v4002_v2 = vpop.f32.mrf.mxu0 }
 0x7f6   :  { %4927 = vmatprep.mubr.bf16.mxu0 %v4120_v62  ;;  %v9526_v62 = vld [vmem:[%s11624_s12 + $0x3d4] ss:$8 sps:$4 sm:$0xff]  }
 0x7f7   :  { %v4004_v3 = vpop.f32.mrf.mxu0  ;;  %4928 = vmatmul.mubr.bf16.vlgmr.msra.gmra.mxu0 %v4119_v11  ;;  %v9524_v11 = vld [vmem:[%s11624_s12 + $0x3d0] ss:$8 sps:$4 sm:$0xff]  }
 0x7f8   :  { %4982 = vmatpush1.bf16.msra.mxu0 %v9452_v63  ;;  %v9521_v63 = vld [vmem:[%s11624_s12 + $0x2b0] ss:$8 sps:$4 sm:$0xff]  }
 0x7f9   :  { %v4006_v22 = vpop.f32.mrf.mxu0  ;;  %4983 = vmatprep.subr.bf16.mxu0 %v9460_v16  ;;  %v9532_v16 = vld [vmem:[%s11624_s12 + $0x3c4] ss:$8 sps:$4 sm:$0xff]  }
 0x7fa   :  { %v4121_v28 = vpack.c.bf16 %v4006_v22, %v4002_v2  ;;  %v9529_v2 = vld [vmem:[%s11624_s12 + $0x2a4] ss:$8 sps:$4 sm:$0xff]   ;;  %v9535_v22 = vld [vmem:[%s11624_s12 + $0x294] ss:$8 sps:$4 sm:$0xff]  }
 0x7fb   :  { %v4008_v25 = vpop.f32.mrf.mxu0 }
 0x7fc   :  { %v4122_v26 = vpack.c.bf16 %v4008_v25, %v4004_v3  ;;  %4984 = vmatpush1.bf16.msra.mxu0 %v9458_v18  ;;  %v9527_v3 = vld [vmem:[%s11624_s12 + $0x2a0] ss:$8 sps:$4 sm:$0xff]   ;;  %v9533_v25 = vld [vmem:[%s11624_s12 + $0x290] ss:$8 sps:$4 sm:$0xff]  }
 0x7fd   :  { %4985 = vmatprep.subr.bf16.mxu0 %v9463_v24  ;;  %v11375_v39 = vpop.f32.mrf.mxu0  ;;  %v9530_v18 = vld [vmem:[%s11624_s12 + $0x3c0] ss:$8 sps:$4 sm:$0xff]   ;;  %v9538_v24 = vld [vmem:[%s11624_s12 + $0x3b4] ss:$8 sps:$4 sm:$0xff]  }
 0x7fe   :  { %4970 = vmatprep.mubr.bf16.mxu1 %v4122_v26  ;;  %v9536_v26 = vld [vmem:[%s11624_s12 + $0x3b0] ss:$8 sps:$4 sm:$0xff]  }
 0x7ff   :  { %4971 = vmatmul.mubr.bf16.vlgmr.msra.gmra.mxu1 %v4121_v28  ;;  %v4058_v8 = vpop.f32.mrf.mxu0  ;;  %v9539_v28 = vld [vmem:[%s11624_s12 + $0x280] ss:$8 sps:$4 sm:$0xff]  }
 0x800   :  { %4986 = vmatpush1.bf16.msra.mxu0 %v9461_v27  ;;  %5025 = vmatpush1.bf16.msra.mxu1 %v9464_v30  ;;  %v9541_v27 = vld [vmem:[%s11624_s12 + $0x284] ss:$8 sps:$4 sm:$0xff]  }
 0x801   :  { %4987 = vmatprep.subr.bf16.mxu0 %v9469_v21  ;;  %5026 = vmatprep.subr.bf16.mxu1 %v9472_v29  ;;  %v11381_v20 = vpop.f32.mrf.mxu0  ;;  %v9544_v30 = vld [vmem:[%s11624_s12 + $0x3a4] ss:$8 sps:$4 sm:$0xff]   ;;  %v9542_v21 = vld [vmem:[%s11624_s12 + $0x3a0] ss:$8 sps:$4 sm:$0xff]   ;;  %v9547_v29 = vld [vmem:[%s11624_s12 + $0x394] ss:$8 sps:$4 sm:$0xff]  }
 0x803   :  { %v4062_v35 = vpop.f32.mrf.mxu0 }
 0x804   :  { %4988 = vmatpush1.bf16.msra.mxu0 %v9467_v59  ;;  %5027 = vmatpush1.bf16.msra.mxu1 %v9470_v31  ;;  %v4124_v12 = vpack.c.bf16 %v4062_v35, %v4058_v8  ;;  %v9545_v8 = vld [vmem:[%s11624_s12 + $0x390] ss:$8 sps:$4 sm:$0xff]   ;;  %v4123_v59 = vpack.c.bf16 %v11381_v20, %v11375_v39  ;;  %v9550_v31 = vld [vmem:[%s11624_s12 + $0x384] ss:$8 sps:$4 sm:$0xff]  }
 0x805   :  { %4989 = vmatprep.subr.bf16.mxu0 %v9475_v17  ;;  %5028 = vmatprep.subr.bf16.mxu1 %v9478_v40  ;;  %v11387_v14 = vpop.f32.mrf.mxu0  ;;  %v9548_v17 = vld [vmem:[%s11624_s12 + $0x380] ss:$8 sps:$4 sm:$0xff]   ;;  %v5127_v20 = vld [vmem:[#allocation13 + $0xd0] sm:$0xff] }
 0x806   :  { %5013 = vmatprep.mubr.bf16.mxu0 %v4124_v12  ;;  %v5132_v35 = vld [vmem:[#allocation13 + $0xf8] sm:$0xff]  ;;  %v5129_v12 = vld [vmem:[#allocation13 + $0xe0] sm:$0xff] }
 0x807   :  { %v4112_v33 = vpop.f32.mrf.mxu0  ;;  %v5128_v39 = vld [vmem:[#allocation13 + $0xd8] sm:$0xff] }
 0x808   :  { %4990 = vmatpush1.bf16.msra.mxu0 %v9473_v53  ;;  %5029 = vmatpush1.bf16.msra.mxu1 %v9476_v36  ;;  %v5131_v53 = vld [vmem:[#allocation13 + $0xf0] sm:$0xff]  ;;  %v5130_v36 = vld [vmem:[#allocation13 + $0xe8] sm:$0xff] }
 0x809   :  { %4991 = vmatprep.subr.bf16.mxu0 %v9481_v43  ;;  %5030 = vmatprep.subr.bf16.mxu1 %v9484_v4  ;;  %v11393_v58 = vpop.f32.mrf.mxu0  ;;  %v5126_v43 = vld [vmem:[#allocation13 + $0xc8] sm:$0xff]  ;;  %v5125_v4 = vld [vmem:[#allocation13 + $0xc0] sm:$0xff] }
 0x80a   :  { %v4125_v40 = vpack.c.bf16 %v11393_v58, %v11387_v14  ;;  %v5123_v14 = vld [vmem:[#allocation13 + $0xb0] sm:$0xff]  ;;  %v5118_v58 = vld [vmem:[#allocation13 + $0x88] sm:$0xff] }
 0x80b   :  { %v4116_v7 = vpop.f32.mrf.mxu0 }
 0x80c   :  { %4992 = vmatpush1.bf16.msra.mxu0 %v9479_v45  ;;  %5031 = vmatpush1.bf16.msra.mxu1 %v9482_v23  ;;  %v4126_v44 = vpack.c.bf16 %v4116_v7, %v4112_v33  ;;  %v5124_v33 = vld [vmem:[#allocation13 + $0xb8] sm:$0xff]  ;;  %v5122_v45 = vld [vmem:[#allocation13 + $0xa8] sm:$0xff]  ;;  %v5121_v23 = vld [vmem:[#allocation13 + $0xa0] sm:$0xff] }
 0x80d   :  { %4993 = vmatprep.subr.bf16.mxu0 %v9487_v34  ;;  %5032 = vmatprep.subr.bf16.mxu1 %v9490_v15  ;;  %v5120_v34 = vld [vmem:[#allocation13 + $0x98] sm:$0xff]  ;;  %v5119_v15 = vld [vmem:[#allocation13 + $0x90] sm:$0xff]  ;;  %v5117_v7 = vld [vmem:[#allocation13 + $0x80] sm:$0xff] }
 0x80e   :  { %5056 = vmatprep.mubr.bf16.mxu1 %v4126_v44  ;;  %v5114_v44 = vld [vmem:[#allocation13 + $0x68] sm:$0xff] }
 0x810   :  { %4994 = vmatpush1.bf16.msra.mxu0 %v9485_v47  ;;  %5033 = vmatpush1.bf16.msra.mxu1 %v9488_v32  ;;  %v5116_v47 = vld [vmem:[#allocation13 + $0x78] sm:$0xff]  ;;  %v5115_v32 = vld [vmem:[#allocation13 + $0x70] sm:$0xff] }
 0x811   :  { %4995 = vmatprep.subr.bf16.mxu0 %v9493_v9  ;;  %5034 = vmatprep.subr.bf16.mxu1 %v9496_v49  ;;  %v5113_v9 = vld [vmem:[#allocation13 + $0x60] sm:$0xff]  ;;  %v5112_v49 = vld [vmem:[#allocation13 + $0x58] sm:$0xff] }
 0x814   :  { %4996 = vmatpush1.bf16.msra.mxu0 %v9491_v50  ;;  %5035 = vmatpush1.bf16.msra.mxu1 %v9494_v42  ;;  %v5111_v50 = vld [vmem:[#allocation13 + $0x50] sm:$0xff]  ;;  %v5110_v42 = vld [vmem:[#allocation13 + $0x48] sm:$0xff] }
 0x815   :  { %4997 = vmatprep.subr.bf16.mxu0 %v9499_v19  ;;  %5036 = vmatprep.subr.bf16.mxu1 %v9502_v37  ;;  %v5109_v19 = vld [vmem:[#allocation13 + $0x40] sm:$0xff]  ;;  %v5108_v37 = vld [vmem:[#allocation13 + $0x38] sm:$0xff] }
 0x818   :  { %4998 = vmatpush2.bf16.msra.mxu0 %v9497_v51  ;;  %5037 = vmatpush1.bf16.msra.mxu1 %v9500_v6  ;;  %v5107_v51 = vld [vmem:[#allocation13 + $0x30] sm:$0xff]  ;;  %v5106_v6 = vld [vmem:[#allocation13 + $0x28] sm:$0xff] }
 0x819   :  { %4999 = vmatprep.subr.bf16.mxu0 %v9505_v54  ;;  %5038 = vmatprep.subr.bf16.mxu1 %v9508_v55  ;;  %v5105_v54 = vld [vmem:[#allocation13 + $0x20] sm:$0xff]  ;;  %v5104_v55 = vld [vmem:[#allocation13 + $0x18] sm:$0xff] }
 0x81c   :  { %5000 = vmatpush2.bf16.msra.mxu0 %v9503_v38  ;;  %5039 = vmatpush1.bf16.msra.mxu1 %v9506_v48  ;;  %v5103_v38 = vld [vmem:[#allocation13 + $0x10] sm:$0xff]  ;;  %v5102_v48 = vld [vmem:[#allocation13 + $0x8] sm:$0xff] }
 0x81d   :  { %5001 = vmatprep.subr.bf16.mxu0 %v9511_v52  ;;  %5040 = vmatprep.subr.bf16.mxu1 %v9514_v5  ;;  %v5101_v52 = vld [vmem:[#allocation13] sm:$0xff]  ;;  %v5164_v5 = vld [vmem:[#allocation13 + $0x1f8] sm:$0xff] }
 0x820   :  { %5002 = vmatpush2.bf16.msra.mxu0 %v9509_v41  ;;  %5041 = vmatpush2.bf16.msra.mxu1 %v9512_v10  ;;  %v5163_v41 = vld [vmem:[#allocation13 + $0x1f0] sm:$0xff]  ;;  %v5162_v10 = vld [vmem:[#allocation13 + $0x1e8] sm:$0xff] }
 0x821   :  { %5003 = vmatprep.subr.bf16.mxu0 %v9517_v46  ;;  %5042 = vmatprep.subr.bf16.mxu1 %v9520_v56  ;;  %v5161_v46 = vld [vmem:[#allocation13 + $0x1e0] sm:$0xff]  ;;  %v5160_v56 = vld [vmem:[#allocation13 + $0x1d8] sm:$0xff] }
 0x824   :  { %5004 = vmatpush2.bf16.msra.mxu0 %v9515_v57  ;;  %5043 = vmatpush2.bf16.msra.mxu1 %v9518_v60  ;;  %v5159_v57 = vld [vmem:[#allocation13 + $0x1d0] sm:$0xff]  ;;  %v5158_v60 = vld [vmem:[#allocation13 + $0x1c8] sm:$0xff] }
 0x825   :  { %5005 = vmatprep.subr.bf16.mxu0 %v9523_v61  ;;  %5044 = vmatprep.subr.bf16.mxu1 %v9526_v62  ;;  %v5157_v61 = vld [vmem:[#allocation13 + $0x1c0] sm:$0xff]  ;;  %v5156_v62 = vld [vmem:[#allocation13 + $0x1b8] sm:$0xff] }
 0x828   :  { %5006 = vmatpush2.bf16.msra.mxu0 %v9521_v63  ;;  %5045 = vmatpush2.bf16.msra.mxu1 %v9524_v11  ;;  %v5155_v63 = vld [vmem:[#allocation13 + $0x1b0] sm:$0xff]  ;;  %v5154_v11 = vld [vmem:[#allocation13 + $0x1a8] sm:$0xff] }
 0x829   :  { %5007 = vmatprep.subr.bf16.mxu0 %v9529_v2  ;;  %5046 = vmatprep.subr.bf16.mxu1 %v9532_v16  ;;  %v5153_v2 = vld [vmem:[#allocation13 + $0x1a0] sm:$0xff]  ;;  %v5152_v16 = vld [vmem:[#allocation13 + $0x198] sm:$0xff] }
 0x82c   :  { %5008 = vmatpush2.bf16.msra.mxu0 %v9527_v3  ;;  %5047 = vmatpush2.bf16.msra.mxu1 %v9530_v18  ;;  %v5151_v3 = vld [vmem:[#allocation13 + $0x190] sm:$0xff]  ;;  %v5150_v18 = vld [vmem:[#allocation13 + $0x188] sm:$0xff] }
 0x82d   :  { %5009 = vmatprep.subr.bf16.mxu0 %v9535_v22  ;;  %5048 = vmatprep.subr.bf16.mxu1 %v9538_v24  ;;  %v5149_v22 = vld [vmem:[#allocation13 + $0x180] sm:$0xff]  ;;  %v5148_v24 = vld [vmem:[#allocation13 + $0x178] sm:$0xff] }
 0x830   :  { %5010 = vmatpush2.bf16.msra.mxu0 %v9533_v25  ;;  %5049 = vmatpush2.bf16.msra.mxu1 %v9536_v26  ;;  %v5147_v25 = vld [vmem:[#allocation13 + $0x170] sm:$0xff]  ;;  %v5146_v26 = vld [vmem:[#allocation13 + $0x168] sm:$0xff] }
 0x831   :  { %5011 = vmatprep.subr.bf16.mxu0 %v9541_v27  ;;  %5050 = vmatprep.subr.bf16.mxu1 %v9544_v30  ;;  %v5145_v27 = vld [vmem:[#allocation13 + $0x160] sm:$0xff]  ;;  %v5144_v30 = vld [vmem:[#allocation13 + $0x158] sm:$0xff] }
 0x834   :  { %5012 = vmatpush2.bf16.msra.mxu0 %v9539_v28  ;;  %5051 = vmatpush2.bf16.msra.mxu1 %v9542_v21  ;;  %v5143_v28 = vld [vmem:[#allocation13 + $0x150] sm:$0xff]  ;;  %v5142_v21 = vld [vmem:[#allocation13 + $0x148] sm:$0xff] }
 0x835   :  { %5052 = vmatprep.subr.bf16.mxu1 %v9547_v29  ;;  %5165 = vmatprep.subr.mxu0 %v5132_v35  ;;  %v5141_v29 = vld [vmem:[#allocation13 + $0x140] sm:$0xff]  ;;  %v5135_v35 = vld [vmem:[#allocation13 + $0x110] sm:$0xff] }
 0x837   :  { %5014 = vmatmul.mubr.bf16.vlgmr.msra.gmra.mxu0 %v4123_v59  ;;  %v5139_v59 = vld [vmem:[#allocation13 + $0x130] sm:$0xff] }
 0x838   :  { %5053 = vmatpush2.bf16.msra.mxu1 %v9545_v8  ;;  %5166 = vmatpush1.msra.mxu0 %v5131_v53  ;;  %v5140_v8 = vld [vmem:[#allocation13 + $0x138] sm:$0xff]  ;;  %v5134_v53 = vld [vmem:[#allocation13 + $0x108] sm:$0xff] }
 0x839   :  { %5054 = vmatprep.subr.bf16.mxu1 %v9550_v31  ;;  %5167 = vmatprep.subr.mxu0 %v5130_v36  ;;  %v5138_v31 = vld [vmem:[#allocation13 + $0x128] sm:$0xff]  ;;  %v5133_v36 = vld [vmem:[#allocation13 + $0x100] sm:$0xff] }
 0x83a   :  { %5168 = vmatpush1.msra.mxu0 %v5129_v12 }
 0x83b   :  { %5169 = vmatprep.subr.mxu0 %v5128_v39 }
 0x83c   :  { %5055 = vmatpush2.bf16.msra.mxu1 %v9548_v17  ;;  %5170 = vmatpush1.msra.mxu0 %v5127_v20  ;;  %v5137_v17 = vld [vmem:[#allocation13 + $0x120] sm:$0xff] }
 0x83d   :  { %5171 = vmatprep.subr.mxu0 %v5126_v43 }
 0x83e   :  { %5172 = vmatpush1.msra.mxu0 %v5125_v4 }
 0x83f   :  { %5057 = vmatmul.mubr.bf16.vlgmr.msra.gmra.mxu1 %v4125_v40  ;;  %5173 = vmatprep.subr.mxu0 %v5124_v33  ;;  %v5136_v40 = vld [vmem:[#allocation13 + $0x118] sm:$0xff] }
 0x840   :  { %5357 = vmatprep.mubr.bf16.mxu1 %v10345_v0  ;;  %5174 = vmatpush1.msra.mxu0 %v5123_v14 }
 0x841   :  { %5175 = vmatprep.subr.mxu0 %v5122_v45 }
 0x842   :  { %5176 = vmatpush1.msra.mxu0 %v5121_v23 }
 0x843   :  { %5177 = vmatprep.subr.mxu0 %v5120_v34 }
 0x844   :  { %5178 = vmatpush1.msra.mxu0 %v5119_v15 }
 0x845   :  { %5179 = vmatprep.subr.mxu0 %v5118_v58 }
 0x846   :  { %5180 = vmatpush1.msra.mxu0 %v5117_v7 }
 0x847   :  { %5181 = vmatprep.subr.mxu0 %v5116_v47 }
 0x848   :  { %5182 = vmatpush1.msra.mxu0 %v5115_v32 }
 0x849   :  { %5183 = vmatprep.subr.mxu0 %v5114_v44 }
 0x84a   :  { %5184 = vmatpush1.msra.mxu0 %v5113_v9 }
 0x84b   :  { %5185 = vmatprep.subr.mxu0 %v5112_v49 }
 0x84c   :  { %5186 = vmatpush1.msra.mxu0 %v5111_v50 }
 0x84d   :  { %5187 = vmatprep.subr.mxu0 %v5110_v42 }
 0x84e   :  { %5188 = vmatpush1.msra.mxu0 %v5109_v19 }
 0x84f   :  { %5189 = vmatprep.subr.mxu0 %v5108_v37 }
 0x850   :  { %5190 = vmatpush1.msra.mxu0 %v5107_v51 }
 0x851   :  { %5191 = vmatprep.subr.mxu0 %v5106_v6 }
 0x852   :  { %5192 = vmatpush1.msra.mxu0 %v5105_v54 }
 0x853   :  { %5193 = vmatprep.subr.mxu0 %v5104_v55 }
 0x854   :  { %5194 = vmatpush1.msra.mxu0 %v5103_v38 }
 0x855   :  { %5195 = vmatprep.subr.mxu0 %v5102_v48 }
 0x856   :  { %5196 = vmatpush1.msra.mxu0 %v5101_v52 }
 0x857   :  { %5197 = vmatprep.subr.mxu0 %v5164_v5 }
 0x858   :  { %5198 = vmatpush2.msra.mxu0 %v5163_v41 }
 0x859   :  { %5199 = vmatprep.subr.mxu0 %v5162_v10 }
 0x85a   :  { %5200 = vmatpush2.msra.mxu0 %v5161_v46 }
 0x85b   :  { %5201 = vmatprep.subr.mxu0 %v5160_v56 }
 0x85c   :  { %5202 = vmatpush2.msra.mxu0 %v5159_v57 }
 0x85d   :  { %5203 = vmatprep.subr.mxu0 %v5158_v60 }
 0x85e   :  { %5204 = vmatpush2.msra.mxu0 %v5157_v61 }
 0x85f   :  { %5205 = vmatprep.subr.mxu0 %v5156_v62 }
 0x860   :  { %5206 = vmatpush2.msra.mxu0 %v5155_v63 }
 0x861   :  { %5207 = vmatprep.subr.mxu0 %v5154_v11 }
 0x862   :  { %5208 = vmatpush2.msra.mxu0 %v5153_v2 }
 0x863   :  { %5209 = vmatprep.subr.mxu0 %v5152_v16 }
 0x864   :  { %5210 = vmatpush2.msra.mxu0 %v5151_v3 }
 0x865   :  { %5211 = vmatprep.subr.mxu0 %v5150_v18 }
 0x866   :  { %5212 = vmatpush2.msra.mxu0 %v5149_v22 }
 0x867   :  { %5213 = vmatprep.subr.mxu0 %v5148_v24 }
 0x868   :  { %5214 = vmatpush2.msra.mxu0 %v5147_v25 }
 0x869   :  { %5215 = vmatprep.subr.mxu0 %v5146_v26 }
 0x86a   :  { %5216 = vmatpush2.msra.mxu0 %v5145_v27 }
 0x86b   :  { %5217 = vmatprep.subr.mxu0 %v5144_v30 }
 0x86c   :  { %5218 = vmatpush2.msra.mxu0 %v5143_v28 }
 0x86d   :  { %5219 = vmatprep.subr.mxu0 %v5142_v21 }
 0x86e   :  { %5220 = vmatpush2.msra.mxu0 %v5141_v29 }
 0x86f   :  { %5221 = vmatprep.subr.mxu0 %v5140_v8 }
 0x870   :  { %5222 = vmatpush2.msra.mxu0 %v5139_v59 }
 0x871   :  { %5223 = vmatprep.subr.mxu0 %v5138_v31 }
 0x872   :  { %5224 = vmatpush2.msra.mxu0 %v5137_v17 }
 0x873   :  { %5225 = vmatprep.subr.mxu0 %v5136_v40 }
 0x874   :  { %5226 = vmatpush2.msra.mxu0 %v5135_v35 }
 0x875   :  { %5227 = vmatprep.subr.mxu0 %v5134_v53 }
 0x876   :  { %5228 = vmatpush2.msra.mxu0 %v5133_v36 }
 0x8b7   :  { %v4929_v12 = vpop.f32.mrf.mxu0 }
 0x8b9   :  { %v4931_v39 = vpop.f32.mrf.mxu0 }
 0x8bb   :  { %v4933_v20 = vpop.f32.mrf.mxu0 }
 0x8bd   :  { %v4935_v4 = vpop.f32.mrf.mxu0 }
 0x8bf   :  { %v4972_v43 = vpop.f32.mrf.mxu1 }
 0x8c0   :  { %v4973_v58 = vadd.f32 %v4972_v43, %v4929_v12  ;;  %v9566_v43 = vld [vmem:[#allocation18 + $0x160] ss:$8 sps:$4 sm:$0xff]  }
 0x8c1   :  { %v4974_v33 = vpop.f32.mrf.mxu1 }
 0x8c2   :  { %v4975_v7 = vadd.f32 %v4974_v33, %v4931_v39  ;;  %v9560_v39 = vld [vmem:[#allocation18 + $0x170] ss:$8 sps:$4 sm:$0xff]  }
 0x8c3   :  { %v4976_v45 = vpop.f32.mrf.mxu1  ;;  %v9572_v33 = vld [vmem:[#allocation18 + $0x150] ss:$8 sps:$4 sm:$0xff]  }
 0x8c4   :  { %v4977_v32 = vadd.f32 %v4976_v45, %v4933_v20  ;;  %v9562_v20 = vld [vmem:[#allocation18 + $0x174] ss:$8 sps:$4 sm:$0xff]   ;;  %v9578_v45 = vld [vmem:[#allocation18 + $0x140] ss:$8 sps:$4 sm:$0xff]  }
 0x8c5   :  { %v4978_v34 = vpop.f32.mrf.mxu1  ;;  %6321 = vmatprep.subr.bf16.mxu0 %v9562_v20 }
 0x8c6   :  { %v4979_v42 = vadd.f32 %v4978_v34, %v4935_v4  ;;  %v9568_v4 = vld [vmem:[#allocation18 + $0x164] ss:$8 sps:$4 sm:$0xff]   ;;  %v9584_v34 = vld [vmem:[#allocation18 + $0x130] ss:$8 sps:$4 sm:$0xff]  }
 0x8f7   :  { %v5015_v14 = vpop.f32.mrf.mxu0 }
 0x8f8   :  { %v5016_v44 = vadd.f32 %v5015_v14, %v4973_v58  ;;  %v9574_v14 = vld [vmem:[#allocation18 + $0x154] ss:$8 sps:$4 sm:$0xff]   ;;  %v9590_v58 = vld [vmem:[#allocation18 + $0x120] ss:$8 sps:$4 sm:$0xff]  }
 0x8f9   :  { %v5017_v23 = vpop.f32.mrf.mxu0 }
 0x8fa   :  { %v5018_v9 = vadd.f32 %v5017_v23, %v4975_v7  ;;  %v9580_v23 = vld [vmem:[#allocation18 + $0x144] ss:$8 sps:$4 sm:$0xff]  }
 0x8fb   :  { %v5019_v15 = vpop.f32.mrf.mxu0  ;;  %v9592_v7 = vld [vmem:[#allocation18 + $0x124] ss:$8 sps:$4 sm:$0xff]  }
 0x8fc   :  { %v5020_v19 = vadd.f32 %v5019_v15, %v4977_v32  ;;  %v9586_v15 = vld [vmem:[#allocation18 + $0x134] ss:$8 sps:$4 sm:$0xff]  }
 0x8fd   :  { %v5021_v49 = vpop.f32.mrf.mxu0  ;;  %v9598_v32 = vld [vmem:[#allocation18 + $0x114] ss:$8 sps:$4 sm:$0xff]  }
 0x8fe   :  { %v5022_v54 = vadd.f32 %v5021_v49, %v4979_v42  ;;  %v9608_v49 = vld [vmem:[#allocation18 + $0x1f0] ss:$8 sps:$4 sm:$0xff]   ;;  %v9614_v42 = vld [vmem:[#allocation18 + $0x1e0] ss:$8 sps:$4 sm:$0xff]  }
 0x8ff   :  { %v5058_v47 = vpop.f32.mrf.mxu1 }
 0x900   :  { %v11442_v37 = vadd.f32 %v5058_v47, %v5016_v44  ;;  %v9596_v47 = vld [vmem:[#allocation18 + $0x110] ss:$8 sps:$4 sm:$0xff]   ;;  %v9602_v44 = vld [vmem:[#allocation18 + $0x100] ss:$8 sps:$4 sm:$0xff]  }
 0x901   :  { %v5060_v50 = vpop.f32.mrf.mxu1 }
 0x902   :  { %v11444_v51 = vadd.f32 %v5060_v50, %v5018_v9  ;;  %v5081_v48 = vmul.f32 %v11442_v37, %v11442_v37  ;;  %v9604_v9 = vld [vmem:[#allocation18 + $0x104] ss:$8 sps:$4 sm:$0xff]   ;;  %v9610_v50 = vld [vmem:[#allocation18 + $0x1f4] ss:$8 sps:$4 sm:$0xff]  }
 0x903   :  { %v5062_v6 = vpop.f32.mrf.mxu1 }
 0x904   :  { %v11446_v55 = vadd.f32 %v5062_v6, %v5020_v19  ;;  %v5082_v10 = vmul.f32 %v11444_v51, %v11444_v51  ;;  %v9616_v19 = vld [vmem:[#allocation18 + $0x1e4] ss:$8 sps:$4 sm:$0xff]   ;;  %v9620_v6 = vld [vmem:[#allocation18 + $0x1d0] ss:$8 sps:$4 sm:$0xff]  }
 0x905   :  { %v5064_v38 = vpop.f32.mrf.mxu1 }
 0x906   :  { %v5067_v52 = vadd.f32 %v11446_v55, %v11442_v37  ;;  %v5083_v5 = vmul.f32 %v11446_v55, %v11446_v55  ;;  %v11454_v41 = vadd.f32 %v5064_v38, %v5022_v54  ;;  %v9622_v54 = vld [vmem:[#allocation18 + $0x1d4] ss:$8 sps:$4 sm:$0xff]   ;;  %v9626_v38 = vld [vmem:[#allocation18 + $0x1c0] ss:$8 sps:$4 sm:$0xff]  }
 0x908   :  { %v5068_v46 = vrot.slane %v5067_v52, 4  ;;  %v5085_v56 = vadd.f32 %v5083_v5, %v5081_v48  ;;  %v5074_v57 = vadd.f32 %v11454_v41, %v11444_v51  ;;  %v5084_v60 = vmul.f32 %v11454_v41, %v11454_v41  ;;  %v9628_v48 = vld [vmem:[#allocation18 + $0x1c4] ss:$8 sps:$4 sm:$0xff]   ;;  %v9634_v5 = vld [vmem:[#allocation18 + $0x1b4] ss:$8 sps:$4 sm:$0xff]  }
 0x90a   :  { %v5069_v61 = vadd.f32 %v5068_v46, %v5067_v52  ;;  %v5086_v62 = vrot.slane %v5085_v56, 4  ;;  %v5075_v63 = vrot.slane %v5074_v57, 4  ;;  %v5092_v11 = vadd.f32 %v5084_v60, %v5082_v10  ;;  %v9632_v52 = vld [vmem:[#allocation18 + $0x1b0] ss:$8 sps:$4 sm:$0xff]  }
 0x90c   :  { %v5070_v2 = vrot.slane %v5069_v61, 2  ;;  %v5087_v16 = vadd.f32 %v5086_v62, %v5085_v56  ;;  %v5076_v3 = vadd.f32 %v5075_v63, %v5074_v57  ;;  %v5093_v18 = vrot.slane %v5092_v11, 4 }
 0x90e   :  { %v5088_v22 = vrot.slane %v5087_v16, 2  ;;  %v5077_v24 = vrot.slane %v5076_v3, 2  ;;  %v5094_v25 = vadd.f32 %v5093_v18, %v5092_v11  ;;  %v5071_v26 = vadd.f32 %v5070_v2, %v5069_v61  ;;  %v5252_v18 = vld [vmem:[%s11626_s15] sm:$0x3] }
 0x910   :  { %v5089_v27 = vadd.f32 %v5088_v22, %v5087_v16  ;;  %v5078_v30 = vadd.f32 %v5077_v24, %v5076_v3  ;;  %v5095_v28 = vrot.slane %v5094_v25, 2  ;;  %v5072_v59 = vrot.slane %v5071_v26, 1 }
 0x911   :  { %v5257_v22 = vrot.slane %v5252_v18, %v10952_v1 }
 0x912   :  { %v5079_v21 = vrot.slane %v5078_v30, 1  ;;  %v5096_v29 = vadd.f32 %v5095_v28, %v5094_v25  ;;  %v5090_v8 = vrot.slane %v5089_v27, 1  ;;  %v5073_v53 = vadd.f32 %v5072_v59, %v5071_v26  ;;  %v5290_v25 = vld [vmem:[#allocation15] sm:$0x3] }
 0x913   :  { %v5261_v26 = vrot.slane %v5252_v18, %v10954_v13  ;;  %v9605_v18 = vld [vmem:[#allocation18 + $0xd0] ss:$8 sps:$4 sm:$0xff]  }
 0x914   :  { %v5097_v31 = vrot.slane %v5096_v29, 1  ;;  %v5091_v17 = vadd.f32 %v5090_v8, %v5089_v27  ;;  %v5080_v40 = vadd.f32 %v5079_v21, %v5078_v30 }
 0x916   :  { %v5098_v35 = vadd.f32 %v5097_v31, %v5096_v29  ;;  %v5099_v12 = vsel %vm2020_vm0, %v5073_v53, %v5091_v17  ;;  %v5295_v29 = vrot.slane %v5290_v25, %v10952_v1 }
 0x918   :  { %v5100_v36 = vsel %vm2020_vm0, %v5080_v40, %v5098_v35  ;;  %v5299_v35 = vrot.slane %v5290_v25, %v10954_v13  ;;  %v9638_v25 = vld [vmem:[#allocation18 + $0x1a0] ss:$8 sps:$4 sm:$0xff]  }
 0x919   :  { %5229 = vmatprep.mubr.f32.mxu0 %v5100_v36 }
 0x91a   :  { %5230 = vmatmul.mubr.f32.vlgmr.msra.gmra.mxu0 %v5099_v12 }
 0x91b   :  { %6322 = vmatpush1.bf16.msra.mxu0 %v9560_v39 }
 0x91c   :  { %6323 = vmatprep.subr.bf16.mxu0 %v9568_v4 }
 0x91f   :  { %6324 = vmatpush1.bf16.msra.mxu0 %v9566_v43 }
 0x920   :  { %6325 = vmatprep.subr.bf16.mxu0 %v9574_v14 }
 0x923   :  { %6326 = vmatpush1.bf16.msra.mxu0 %v9572_v33 }
 0x924   :  { %6327 = vmatprep.subr.bf16.mxu0 %v9580_v23 }
 0x927   :  { %6328 = vmatpush1.bf16.msra.mxu0 %v9578_v45 }
 0x928   :  { %6329 = vmatprep.subr.bf16.mxu0 %v9586_v15 }
 0x92b   :  { %6330 = vmatpush1.bf16.msra.mxu0 %v9584_v34 }
 0x92c   :  { %6331 = vmatprep.subr.bf16.mxu0 %v9592_v7 }
 0x92f   :  { %6332 = vmatpush1.bf16.msra.mxu0 %v9590_v58 }
 0x930   :  { %6333 = vmatprep.subr.bf16.mxu0 %v9598_v32  ;;  %v5320_v32 = vld [vmem:[#allocation16] sm:$0xf] }
 0x933   :  { %6334 = vmatpush1.bf16.msra.mxu0 %v9596_v47 }
 0x934   :  { %6335 = vmatprep.subr.bf16.mxu0 %v9604_v9  ;;  %v5413_v9 = vld [vmem:[#allocation16 + $0x8] sm:$0xf] }
 0x937   :  { %6336 = vmatpush1.bf16.msra.mxu0 %v9602_v44  ;;  %v5367_v44 = vld [vmem:[#allocation16 + $0x4] sm:$0xf] }
 0x938   :  { %6337 = vmatprep.subr.bf16.mxu0 %v9610_v50  ;;  %v5459_v50 = vld [vmem:[#allocation16 + $0xc] sm:$0xf] }
 0x93b   :  { %6338 = vmatpush2.bf16.msra.mxu0 %v9608_v49  ;;  %v9553_v49 = vld [vmem:[#allocation18 + $0x74] ss:$8 sps:$4 sm:$0xff]  }
 0x93c   :  { %6339 = vmatprep.subr.bf16.mxu0 %v9616_v19  ;;  %v9556_v19 = vld [vmem:[#allocation18 + $0x64] ss:$8 sps:$4 sm:$0xff]  }
 0x93f   :  { %6340 = vmatpush2.bf16.msra.mxu0 %v9614_v42  ;;  %v9551_v42 = vld [vmem:[#allocation18 + $0x70] ss:$8 sps:$4 sm:$0xff]  }
 0x940   :  { %6341 = vmatprep.subr.bf16.mxu0 %v9622_v54  ;;  %v9559_v54 = vld [vmem:[#allocation18 + $0x54] ss:$8 sps:$4 sm:$0xff]  }
 0x943   :  { %6342 = vmatpush2.bf16.msra.mxu0 %v9620_v6  ;;  %v9554_v6 = vld [vmem:[#allocation18 + $0x60] ss:$8 sps:$4 sm:$0xff]  }
 0x944   :  { %6343 = vmatprep.subr.bf16.mxu0 %v9628_v48  ;;  %v9565_v48 = vld [vmem:[#allocation18 + $0x44] ss:$8 sps:$4 sm:$0xff]  }
 0x947   :  { %6344 = vmatpush2.bf16.msra.mxu0 %v9626_v38  ;;  %v9557_v38 = vld [vmem:[#allocation18 + $0x50] ss:$8 sps:$4 sm:$0xff]  }
 0x948   :  { %6345 = vmatprep.subr.bf16.mxu0 %v9634_v5  ;;  %v9571_v5 = vld [vmem:[#allocation18 + $0x34] ss:$8 sps:$4 sm:$0xff]  }
 0x94b   :  { %6346 = vmatpush2.bf16.msra.mxu0 %v9632_v52  ;;  %v9563_v52 = vld [vmem:[#allocation18 + $0x40] ss:$8 sps:$4 sm:$0xff]  }
 0x9da   :  { %v5231_v10 = vpop.f32.mrf.mxu0 }
 0x9db   :  { %v5236_v46 = vmul.f32 0.0078125, %v5231_v10  ;;  %v9569_v10 = vld [vmem:[#allocation18 + $0x30] ss:$8 sps:$4 sm:$0xff]  }
 0x9dc   :  { %v5233_v56 = vpop.f32.mrf.mxu0 }
 0x9dd   :  { %v5238_v57 = vmul.f32 %v5236_v46, %v5236_v46  ;;  %v5237_v60 = vmul.f32 0.0078125, %v5233_v56  ;;  %v5269_v24 = vrot.slane %v5236_v46, %v10952_v1  ;;  %v9575_v56 = vld [vmem:[#allocation18 + $0x20] ss:$8 sps:$4 sm:$0xff]  }
 0x9df   :  { %v5242_v61 = vrot.slane %v5238_v57, 7  ;;  %v5239_v62 = vmul.f32 %v5237_v60, %v5237_v60  ;;  %v5273_v30 = vrot.slane %v5237_v60, %v10952_v1  ;;  %v5274_v8 = vsub.f32 %v11442_v37, %v5269_v24  ;;  %v9583_v57 = vld [vmem:[#allocation18 + $0x14] ss:$8 sps:$4 sm:$0xff]  }
 0x9e0   :  { %v5276_v59 = vsub.f32 %v11446_v55, %v5269_v24  ;;  %v9611_v24 = vld [vmem:[#allocation18 + $0xc0] ss:$8 sps:$4 sm:$0xff]  }
 0x9e1   :  { %v5246_v63 = vsub.f32 %v5236_v46, %v5242_v61  ;;  %v5243_v11 = vrot.slane %v5239_v62, 7  ;;  %v5275_v40 = vsub.f32 %v11444_v51, %v5273_v30  ;;  %v5277_v12 = vsub.f32 %v11454_v41, %v5273_v30  ;;  %v9577_v46 = vld [vmem:[#allocation18 + $0x24] ss:$8 sps:$4 sm:$0xff]   ;;  %v9587_v62 = vld [vmem:[#allocation18] ss:$8 sps:$4 sm:$0xff]  }
 0x9e2   :  { %v9589_v61 = vld [vmem:[#allocation18 + $0x4] ss:$8 sps:$4 sm:$0xff]   ;;  %v9617_v30 = vld [vmem:[#allocation18 + $0xb0] ss:$8 sps:$4 sm:$0xff]  }
 0x9e3   :  { %v5248_v2 = vadd.f32 1e-05, %v5246_v63  ;;  %v5247_v16 = vsub.f32 %v5237_v60, %v5243_v11  ;;  %v9581_v60 = vld [vmem:[#allocation18 + $0x10] ss:$8 sps:$4 sm:$0xff]   ;;  %v9595_v63 = vld [vmem:[#allocation18 + $0xf4] ss:$8 sps:$4 sm:$0xff]  }
 0x9e4   :  { %v9593_v11 = vld [vmem:[#allocation18 + $0xf0] ss:$8 sps:$4 sm:$0xff]  }
 0x9e5   :  { %9831 = vrsqrt.f32 %v5248_v2  ;;  %v5249_v3 = vadd.f32 1e-05, %v5247_v16  ;;  %v9601_v2 = vld [vmem:[#allocation18 + $0xe4] ss:$8 sps:$4 sm:$0xff]   ;;  %v9599_v16 = vld [vmem:[#allocation18 + $0xe0] ss:$8 sps:$4 sm:$0xff]  }
 0x9e7   :  { %9833 = vrsqrt.f32 %v5249_v3  ;;  %v9607_v3 = vld [vmem:[#allocation18 + $0xd4] ss:$8 sps:$4 sm:$0xff]  }
 0x9f2   :  { %v9832_v27 = vpop.eup %9831 }
 0x9f3   :  { %v5264_v28 = vmul.f32 %v9832_v27, %v5257_v22  ;;  %v9613_v22 = vld [vmem:[#allocation18 + $0xc4] ss:$8 sps:$4 sm:$0xff]  }
 0x9f4   :  { %v9834_v21 = vpop.eup %9833  ;;  %v9640_v27 = vld [vmem:[#allocation18 + $0x1a4] ss:$8 sps:$4 sm:$0xff]  }
 0x9f5   :  { %v5281_v31 = vrot.slane %v5264_v28, %v10954_v13  ;;  %v5265_v17 = vmul.f32 %v9834_v21, %v5261_v26  ;;  %v9619_v26 = vld [vmem:[#allocation18 + $0xb4] ss:$8 sps:$4 sm:$0xff]   ;;  %6347 = vmatprep.subr.bf16.mxu0 %v9640_v27  ;;  %v9641_v28 = vld [vmem:[#allocation18 + $0x190] ss:$8 sps:$4 sm:$0xff]   ;;  %v9686_v27 = vld [vmem:[#allocation18 + $0x320] ss:$8 sps:$4 sm:$0xff]  }
 0x9f6   :  { %6348 = vmatpush2.bf16.msra.mxu0 %v9638_v25  ;;  %v9643_v21 = vld [vmem:[#allocation18 + $0x194] ss:$8 sps:$4 sm:$0xff]  }
 0x9f7   :  { %v5286_v53 = vmul.f32 %v5281_v31, %v5274_v8  ;;  %v5288_v36 = vmul.f32 %v5281_v31, %v5276_v59  ;;  %v5285_v39 = vrot.slane %v5265_v17, %v10954_v13  ;;  %6349 = vmatprep.subr.bf16.mxu0 %v9643_v21  ;;  %v9623_v8 = vld [vmem:[#allocation18 + $0xa0] ss:$8 sps:$4 sm:$0xff]   ;;  %v9649_v31 = vld [vmem:[#allocation18 + $0x184] ss:$8 sps:$4 sm:$0xff]   ;;  %v9631_v17 = vld [vmem:[#allocation18 + $0x94] ss:$8 sps:$4 sm:$0xff]  }
 0x9f8   :  { %v9647_v59 = vld [vmem:[#allocation18 + $0x180] ss:$8 sps:$4 sm:$0xff]   ;;  %v9689_v21 = vld [vmem:[#allocation18 + $0x2f0] ss:$8 sps:$4 sm:$0xff]  }
 0x9f9   :  { %v5302_v20 = vadd.f32 %v5295_v29, %v5286_v53  ;;  %v5304_v43 = vadd.f32 %v5295_v29, %v5288_v36  ;;  %v5287_v4 = vmul.f32 %v5285_v39, %v5275_v40  ;;  %v5289_v33 = vmul.f32 %v5285_v39, %v5277_v12  ;;  %v9625_v29 = vld [vmem:[#allocation18 + $0xa4] ss:$8 sps:$4 sm:$0xff]   ;;  %v9629_v40 = vld [vmem:[#allocation18 + $0x90] ss:$8 sps:$4 sm:$0xff]   ;;  %v9658_v53 = vld [vmem:[#allocation18 + $0x374] ss:$8 sps:$4 sm:$0xff]  }
 0x9fa   :  { %6350 = vmatpush2.bf16.msra.mxu0 %v9641_v28  ;;  %v9635_v36 = vld [vmem:[#allocation18 + $0x80] ss:$8 sps:$4 sm:$0xff]   ;;  %v9646_v12 = vld [vmem:[#allocation18 + $0x274] ss:$8 sps:$4 sm:$0xff]  }
 0x9fb   :  { %v5303_v37 = vadd.f32 %v5299_v35, %v5287_v4  ;;  %v5305_v14 = vadd.f32 %v5299_v35, %v5289_v33  ;;  %vm5306_vm12 = vcmp.ge.f32.partialorder %v5302_v20, 0.0  ;;  %vm5308_vm13 = vcmp.ge.f32.partialorder %v5304_v43, 0.0  ;;  %6351 = vmatprep.subr.bf16.mxu0 %v9649_v31  ;;  %v9637_v35 = vld [vmem:[#allocation18 + $0x84] ss:$8 sps:$4 sm:$0xff]   ;;  %v9644_v4 = vld [vmem:[#allocation18 + $0x270] ss:$8 sps:$4 sm:$0xff]  }
 0x9fc   :  { %v5310_v55 = vmul.f32 0.2, %v5302_v20  ;;  %v5312_v45 = vmul.f32 0.2, %v5304_v43  ;;  %v9694_v28 = vld [vmem:[#allocation18 + $0x314] ss:$8 sps:$4 sm:$0xff]  }
 0x9fd   :  { %vm5307_vm14 = vcmp.ge.f32.partialorder %v5303_v37, 0.0  ;;  %vm5309_vm15 = vcmp.ge.f32.partialorder %v5305_v14, 0.0  ;;  %v5311_v51 = vmul.f32 0.2, %v5303_v37  ;;  %v5313_v23 = vmul.f32 0.2, %v5305_v14 }
 0x9fe   :  { %v5314_v34 = vsel %vm5306_vm12, %v5302_v20, %v5310_v55  ;;  %v5316_v15 = vsel %vm5308_vm13, %v5304_v43, %v5312_v45  ;;  %6352 = vmatpush2.bf16.msra.mxu0 %v9647_v59  ;;  %v9650_v45 = vld [vmem:[#allocation18 + $0x260] ss:$8 sps:$4 sm:$0xff]   ;;  %v9700_v59 = vld [vmem:[#allocation18 + $0x304] ss:$8 sps:$4 sm:$0xff]  }
 0x9ff   :  { %v5315_v58 = vsel %vm5307_vm14, %v5303_v37, %v5311_v51  ;;  %v5317_v41 = vsel %vm5309_vm15, %v5305_v14, %v5313_v23  ;;  %v5318_v47 = vpack.c.bf16 %v5316_v15, %v5314_v34  ;;  %6403 = vmatprep.subr.bf16.mxu0 %v9658_v53  ;;  %v9652_v14 = vld [vmem:[#allocation18 + $0x264] ss:$8 sps:$4 sm:$0xff]   ;;  %v9655_v23 = vld [vmem:[#allocation18 + $0x254] ss:$8 sps:$4 sm:$0xff]   ;;  %v9695_v31 = vld [vmem:[#allocation18 + $0x2e0] ss:$8 sps:$4 sm:$0xff]  }
 0xa00   :  { %v5319_v7 = vpack.c.bf16 %v5317_v41, %v5315_v58  ;;  %v9653_v58 = vld [vmem:[#allocation18 + $0x250] ss:$8 sps:$4 sm:$0xff]  }
 0xa01   :  { %v9656_v41 = vld [vmem:[#allocation18 + $0x370] ss:$8 sps:$4 sm:$0xff]  }
 0xa02   :  { %5339 = vmatprep.subr.bf16.mxu1 %v5319_v7  ;;  %v9701_v53 = vld [vmem:[#allocation18 + $0x2d0] ss:$8 sps:$4 sm:$0xff]  }
 0xa03   :  { %5340 = vmatpush1.bf16.msra.mxu1 %v5318_v47 }
 0xa04   :  { %5385 = vmatprep.subr.bf16.mxu1 %v5319_v7 }
 0xa06   :  { %8480 = vmatmul.mubr.msk.bf16.vlgmr.msra.gmra.mxu1 %vm5321_vm1, %v5320_v32  ;;  %v9661_v32 = vld [vmem:[#allocation18 + $0x244] ss:$8 sps:$4 sm:$0xff]  }
 0xa07   :  { %5386 = vmatpush1.bf16.msra.mxu1 %v5318_v47  ;;  %5403 = vmatprep.mubr.bf16.mxu1 %v10345_v0 }
 0xa08   :  { %5431 = vmatprep.subr.bf16.mxu1 %v5319_v7 }
 0xa0e   :  { %8481 = vmatmul.mubr.msk.bf16.vlgmr.msra.gmra.mxu1 %vm5321_vm1, %v5367_v44  ;;  %v9664_v44 = vld [vmem:[#allocation18 + $0x364] ss:$8 sps:$4 sm:$0xff]  }
 0xa0f   :  { %5432 = vmatpush1.bf16.msra.mxu1 %v5318_v47  ;;  %5449 = vmatprep.mubr.bf16.mxu1 %v10345_v0 }
 0xa10   :  { %5477 = vmatprep.subr.bf16.mxu1 %v5319_v7 }
 0xa16   :  { %8482 = vmatmul.mubr.msk.bf16.vlgmr.msra.gmra.mxu1 %vm5321_vm1, %v5413_v9 }
 0xa17   :  { %5478 = vmatpush1.bf16.msra.mxu1 %v5318_v47  ;;  %5495 = vmatprep.mubr.bf16.mxu1 %v10345_v0 }
 0xa18   :  { %6280 = vmatprep.subr.bf16.mxu1 %v9553_v49  ;;  %v9659_v49 = vld [vmem:[#allocation18 + $0x240] ss:$8 sps:$4 sm:$0xff]  }
 0xa1e   :  { %8483 = vmatmul.mubr.msk.bf16.vlgmr.msra.gmra.mxu1 %vm5321_vm1, %v5459_v50  ;;  %v9662_v50 = vld [vmem:[#allocation18 + $0x360] ss:$8 sps:$4 sm:$0xff]  }
 0xa1f   :  { %6281 = vmatpush1.bf16.msra.mxu1 %v9551_v42  ;;  %v9667_v42 = vld [vmem:[#allocation18 + $0x234] ss:$8 sps:$4 sm:$0xff]  }
 0xa20   :  { %6282 = vmatprep.subr.bf16.mxu1 %v9556_v19  ;;  %v9670_v19 = vld [vmem:[#allocation18 + $0x354] ss:$8 sps:$4 sm:$0xff]  }
 0xa23   :  { %6283 = vmatpush1.bf16.msra.mxu1 %v9554_v6 }
 0xa24   :  { %6284 = vmatprep.subr.bf16.mxu1 %v9559_v54 }
 0xa27   :  { %6285 = vmatpush1.bf16.msra.mxu1 %v9557_v38  ;;  %v9665_v38 = vld [vmem:[#allocation18 + $0x230] ss:$8 sps:$4 sm:$0xff]  }
 0xa28   :  { %6286 = vmatprep.subr.bf16.mxu1 %v9565_v48  ;;  %v9668_v48 = vld [vmem:[#allocation18 + $0x350] ss:$8 sps:$4 sm:$0xff]  }
 0xa2b   :  { %6287 = vmatpush1.bf16.msra.mxu1 %v9563_v52 }
 0xa2c   :  { %6288 = vmatprep.subr.bf16.mxu1 %v9571_v5  ;;  %v9673_v5 = vld [vmem:[#allocation18 + $0x224] ss:$8 sps:$4 sm:$0xff]  }
 0xa2f   :  { %6289 = vmatpush1.bf16.msra.mxu1 %v9569_v10  ;;  %v9676_v10 = vld [vmem:[#allocation18 + $0x344] ss:$8 sps:$4 sm:$0xff]  }
 0xa30   :  { %6290 = vmatprep.subr.bf16.mxu1 %v9577_v46 }
 0xa33   :  { %6291 = vmatpush1.bf16.msra.mxu1 %v9575_v56 }
 0xa34   :  { %6292 = vmatprep.subr.bf16.mxu1 %v9583_v57  ;;  %v9671_v57 = vld [vmem:[#allocation18 + $0x220] ss:$8 sps:$4 sm:$0xff]  }
 0xa37   :  { %6293 = vmatpush1.bf16.msra.mxu1 %v9581_v60  ;;  %v9674_v60 = vld [vmem:[#allocation18 + $0x340] ss:$8 sps:$4 sm:$0xff]  }
 0xa38   :  { %6294 = vmatprep.subr.bf16.mxu1 %v9589_v61  ;;  %v9679_v61 = vld [vmem:[#allocation18 + $0x214] ss:$8 sps:$4 sm:$0xff]  }
 0xa3b   :  { %6295 = vmatpush1.bf16.msra.mxu1 %v9587_v62  ;;  %v9682_v62 = vld [vmem:[#allocation18 + $0x334] ss:$8 sps:$4 sm:$0xff]  }
 0xa3c   :  { %6296 = vmatprep.subr.bf16.mxu1 %v9595_v63 }
 0xa3f   :  { %6297 = vmatpush2.bf16.msra.mxu1 %v9593_v11 }
 0xa40   :  { %6298 = vmatprep.subr.bf16.mxu1 %v9601_v2  ;;  %v9677_v2 = vld [vmem:[#allocation18 + $0x210] ss:$8 sps:$4 sm:$0xff]  }
 0xa43   :  { %6299 = vmatpush2.bf16.msra.mxu1 %v9599_v16  ;;  %v9680_v16 = vld [vmem:[#allocation18 + $0x330] ss:$8 sps:$4 sm:$0xff]  }
 0xa44   :  { %6300 = vmatprep.subr.bf16.mxu1 %v9607_v3 }
 0xa47   :  { %6301 = vmatpush2.bf16.msra.mxu1 %v9605_v18  ;;  %v9685_v18 = vld [vmem:[#allocation18 + $0x204] ss:$8 sps:$4 sm:$0xff]  }
 0xa48   :  { %6302 = vmatprep.subr.bf16.mxu1 %v9613_v22  ;;  %v9688_v22 = vld [vmem:[#allocation18 + $0x324] ss:$8 sps:$4 sm:$0xff]  }
 0xa4b   :  { %6303 = vmatpush2.bf16.msra.mxu1 %v9611_v24 }
 0xa4c   :  { %6304 = vmatprep.subr.bf16.mxu1 %v9619_v26  ;;  %v9683_v26 = vld [vmem:[#allocation18 + $0x200] ss:$8 sps:$4 sm:$0xff]  }
 0xa4f   :  { %6305 = vmatpush2.bf16.msra.mxu1 %v9617_v30  ;;  %v9691_v30 = vld [vmem:[#allocation18 + $0x2f4] ss:$8 sps:$4 sm:$0xff]  }
 0xa50   :  { %6306 = vmatprep.subr.bf16.mxu1 %v9625_v29  ;;  %v9692_v29 = vld [vmem:[#allocation18 + $0x310] ss:$8 sps:$4 sm:$0xff]  }
 0xa53   :  { %6307 = vmatpush2.bf16.msra.mxu1 %v9623_v8  ;;  %v9697_v8 = vld [vmem:[#allocation18 + $0x2e4] ss:$8 sps:$4 sm:$0xff]  }
 0xa54   :  { %6308 = vmatprep.subr.bf16.mxu1 %v9631_v17  ;;  %v9698_v17 = vld [vmem:[#allocation18 + $0x300] ss:$8 sps:$4 sm:$0xff]  }
 0xa57   :  { %6309 = vmatpush2.bf16.msra.mxu1 %v9629_v40  ;;  %v9703_v40 = vld [vmem:[#allocation18 + $0x2d4] ss:$8 sps:$4 sm:$0xff]  }
 0xa58   :  { %6310 = vmatprep.subr.bf16.mxu1 %v9637_v35  ;;  %v9706_v35 = vld [vmem:[#allocation18 + $0x3f4] ss:$8 sps:$4 sm:$0xff]  }
 0xa5b   :  { %6311 = vmatpush2.bf16.msra.mxu1 %v9635_v36  ;;  %v9704_v36 = vld [vmem:[#allocation18 + $0x3f0] ss:$8 sps:$4 sm:$0xff]  }
 0xa5c   :  { %6362 = vmatprep.subr.bf16.mxu1 %v9646_v12  ;;  %v9709_v12 = vld [vmem:[#allocation18 + $0x2c4] ss:$8 sps:$4 sm:$0xff]  }
 0xac6   :  { %v5359_v39 = vpop.f32.mrf.mxu1 }
 0xac7   :  { %v5504_v33 = vpack.c.bf16 %v5359_v39, %v5359_v39  ;;  %v9712_v39 = vld [vmem:[#allocation18 + $0x3e4] ss:$8 sps:$4 sm:$0xff]  }
 0xac8   :  { %v5361_v20 = vpop.f32.mrf.mxu1 }
 0xac9   :  { %v5505_v43 = vpack.c.bf16 %v5361_v20, %v5361_v20  ;;  %v9707_v20 = vld [vmem:[#allocation18 + $0x2c0] ss:$8 sps:$4 sm:$0xff]  }
 0xaca   :  { %v5363_v37 = vpop.f32.mrf.mxu1 }
 0xacb   :  { %6312 = vmatprep.mubr.bf16.mxu1 %v5505_v43  ;;  %v9710_v43 = vld [vmem:[#allocation18 + $0x3e0] ss:$8 sps:$4 sm:$0xff]   ;;  %v9713_v37 = vld [vmem:[#allocation18 + $0x2b0] ss:$8 sps:$4 sm:$0xff]  }
 0xacc   :  { %v5364_v55 = vpop.f32.mrf.mxu1  ;;  %6313 = vmatmul.mubr.bf16.vlgmr.msra.gmra.mxu1 %v5504_v33  ;;  %v9718_v33 = vld [vmem:[#allocation18 + $0x3d4] ss:$8 sps:$4 sm:$0xff]  }
 0xacd   :  { %6363 = vmatpush1.bf16.msra.mxu1 %v9644_v4  ;;  %v9715_v4 = vld [vmem:[#allocation18 + $0x2b4] ss:$8 sps:$4 sm:$0xff]   ;;  %v9721_v55 = vld [vmem:[#allocation18 + $0x2a4] ss:$8 sps:$4 sm:$0xff]  }
 0xace   :  { %v5405_v51 = vpop.f32.mrf.mxu1  ;;  %6364 = vmatprep.subr.bf16.mxu1 %v9652_v14  ;;  %v9716_v14 = vld [vmem:[#allocation18 + $0x3d0] ss:$8 sps:$4 sm:$0xff]  }
 0xacf   :  { %v5506_v7 = vpack.c.bf16 %v5405_v51, %v5405_v51  ;;  %v9719_v51 = vld [vmem:[#allocation18 + $0x2a0] ss:$8 sps:$4 sm:$0xff]  }
 0xad0   :  { %v5407_v34 = vpop.f32.mrf.mxu1 }
 0xad1   :  { %v5507_v15 = vpack.c.bf16 %v5407_v34, %v5407_v34  ;;  %6365 = vmatpush1.bf16.msra.mxu1 %v9650_v45  ;;  %v9724_v45 = vld [vmem:[#allocation18 + $0x3c4] ss:$8 sps:$4 sm:$0xff]   ;;  %v9727_v34 = vld [vmem:[#allocation18 + $0x294] ss:$8 sps:$4 sm:$0xff]  }
 0xad2   :  { %6366 = vmatprep.subr.bf16.mxu1 %v9655_v23  ;;  %v5409_v47 = vpop.f32.mrf.mxu1  ;;  %v9722_v23 = vld [vmem:[#allocation18 + $0x3c0] ss:$8 sps:$4 sm:$0xff]  }
 0xad3   :  { %6353 = vmatprep.mubr.bf16.mxu0 %v5507_v15  ;;  %v9730_v15 = vld [vmem:[#allocation18 + $0x3b4] ss:$8 sps:$4 sm:$0xff]   ;;  %v9736_v47 = vld [vmem:[#allocation18 + $0x3a4] ss:$8 sps:$4 sm:$0xff]  }
 0xad4   :  { %6354 = vmatmul.mubr.bf16.vlgmr.msra.gmra.mxu0 %v5506_v7  ;;  %v5410_v9 = vpop.f32.mrf.mxu1  ;;  %v9733_v7 = vld [vmem:[#allocation18 + $0x284] ss:$8 sps:$4 sm:$0xff]  }
 0xad5   :  { %6367 = vmatpush1.bf16.msra.mxu1 %v9653_v58  ;;  %6404 = vmatpush1.bf16.msra.mxu0 %v9656_v41  ;;  %v9725_v58 = vld [vmem:[#allocation18 + $0x290] ss:$8 sps:$4 sm:$0xff]   ;;  %v9739_v9 = vld [vmem:[#allocation18 + $0x394] ss:$8 sps:$4 sm:$0xff]  }
 0xad6   :  { %6368 = vmatprep.subr.bf16.mxu1 %v9661_v32  ;;  %6405 = vmatprep.subr.bf16.mxu0 %v9664_v44  ;;  %v11484_v6 = vpop.f32.mrf.mxu1  ;;  %v9728_v41 = vld [vmem:[#allocation18 + $0x3b0] ss:$8 sps:$4 sm:$0xff]   ;;  %v9731_v32 = vld [vmem:[#allocation18 + $0x280] ss:$8 sps:$4 sm:$0xff]  }
 0xad7   :  { %v9734_v44 = vld [vmem:[#allocation18 + $0x3a0] ss:$8 sps:$4 sm:$0xff]  }
 0xad8   :  { %v5453_v54 = vpop.f32.mrf.mxu1 }
 0xad9   :  { %6369 = vmatpush1.bf16.msra.mxu1 %v9659_v49  ;;  %6406 = vmatpush1.bf16.msra.mxu0 %v9662_v50  ;;  %v5509_v52 = vpack.c.bf16 %v5453_v54, %v5453_v54  ;;  %v9737_v49 = vld [vmem:[#allocation18 + $0x390] ss:$8 sps:$4 sm:$0xff]   ;;  %v5508_v50 = vpack.c.bf16 %v11484_v6, %v11484_v6 }
 0xada   :  { %6370 = vmatprep.subr.bf16.mxu1 %v9667_v42  ;;  %6407 = vmatprep.subr.bf16.mxu0 %v9670_v19  ;;  %v5455_v46 = vpop.f32.mrf.mxu1  ;;  %v9742_v42 = vld [vmem:[#allocation18 + $0x384] ss:$8 sps:$4 sm:$0xff]   ;;  %v9740_v19 = vld [vmem:[#allocation18 + $0x380] ss:$8 sps:$4 sm:$0xff]   ;;  %v6499_v6 = vld [vmem:[#allocation19 + $0xd8] sm:$0xff] }
 0xadb   :  { %6394 = vmatprep.mubr.bf16.mxu1 %v5509_v52  ;;  %v6501_v52 = vld [vmem:[#allocation19 + $0xe8] sm:$0xff] }
 0xadc   :  { %v5456_v56 = vpop.f32.mrf.mxu1  ;;  %v6497_v46 = vld [vmem:[#allocation19 + $0xc8] sm:$0xff] }
 0xadd   :  { %6371 = vmatpush1.bf16.msra.mxu1 %v9665_v38  ;;  %6408 = vmatpush1.bf16.msra.mxu0 %v9668_v48  ;;  %v6503_v38 = vld [vmem:[#allocation19 + $0xf8] sm:$0xff]  ;;  %v6502_v48 = vld [vmem:[#allocation19 + $0xf0] sm:$0xff]  ;;  %v6496_v56 = vld [vmem:[#allocation19 + $0xc0] sm:$0xff] }
 0xade   :  { %6372 = vmatprep.subr.bf16.mxu1 %v9673_v5  ;;  %6409 = vmatprep.subr.bf16.mxu0 %v9676_v10  ;;  %v11486_v63 = vpop.f32.mrf.mxu1  ;;  %v6500_v5 = vld [vmem:[#allocation19 + $0xe0] sm:$0xff]  ;;  %v6498_v10 = vld [vmem:[#allocation19 + $0xd0] sm:$0xff] }
 0xadf   :  { %v5510_v54 = vpack.c.bf16 %v11486_v63, %v11486_v63  ;;  %v6491_v63 = vld [vmem:[#allocation19 + $0x98] sm:$0xff] }
 0xae0   :  { %v5499_v11 = vpop.f32.mrf.mxu1 }
 0xae1   :  { %6373 = vmatpush1.bf16.msra.mxu1 %v9671_v57  ;;  %6410 = vmatpush1.bf16.msra.mxu0 %v9674_v60  ;;  %v5511_v3 = vpack.c.bf16 %v5499_v11, %v5499_v11  ;;  %v6495_v57 = vld [vmem:[#allocation19 + $0xb8] sm:$0xff]  ;;  %v6494_v60 = vld [vmem:[#allocation19 + $0xb0] sm:$0xff] }
 0xae2   :  { %6374 = vmatprep.subr.bf16.mxu1 %v9679_v61  ;;  %6411 = vmatprep.subr.bf16.mxu0 %v9682_v62  ;;  %v5501_v24 = vpop.f32.mrf.mxu1  ;;  %v6493_v61 = vld [vmem:[#allocation19 + $0xa8] sm:$0xff]  ;;  %v6492_v62 = vld [vmem:[#allocation19 + $0xa0] sm:$0xff]  ;;  %v6490_v11 = vld [vmem:[#allocation19 + $0x90] sm:$0xff] }
 0xae3   :  { %6435 = vmatprep.mubr.bf16.mxu0 %v5511_v3  ;;  %v6487_v3 = vld [vmem:[#allocation19 + $0x78] sm:$0xff]  ;;  %v6484_v24 = vld [vmem:[#allocation19 + $0x60] sm:$0xff] }
 0xae4   :  { %v5502_v25 = vpop.f32.mrf.mxu1 }
 0xae5   :  { %6375 = vmatpush1.bf16.msra.mxu1 %v9677_v2  ;;  %6412 = vmatpush1.bf16.msra.mxu0 %v9680_v16  ;;  %v6489_v2 = vld [vmem:[#allocation19 + $0x88] sm:$0xff]  ;;  %v6488_v16 = vld [vmem:[#allocation19 + $0x80] sm:$0xff]  ;;  %v6483_v25 = vld [vmem:[#allocation19 + $0x58] sm:$0xff] }
 0xae6   :  { %6376 = vmatprep.subr.bf16.mxu1 %v9685_v18  ;;  %6413 = vmatprep.subr.bf16.mxu0 %v9688_v22  ;;  %v6486_v18 = vld [vmem:[#allocation19 + $0x70] sm:$0xff]  ;;  %v6485_v22 = vld [vmem:[#allocation19 + $0x68] sm:$0xff] }
 0xae9   :  { %6377 = vmatpush1.bf16.msra.mxu1 %v9683_v26  ;;  %6414 = vmatpush1.bf16.msra.mxu0 %v9686_v27  ;;  %v6482_v26 = vld [vmem:[#allocation19 + $0x50] sm:$0xff]  ;;  %v6481_v27 = vld [vmem:[#allocation19 + $0x48] sm:$0xff] }
 0xaea   :  { %6378 = vmatprep.subr.bf16.mxu1 %v9691_v30  ;;  %6415 = vmatprep.subr.bf16.mxu0 %v9694_v28  ;;  %v6480_v30 = vld [vmem:[#allocation19 + $0x40] sm:$0xff]  ;;  %v6479_v28 = vld [vmem:[#allocation19 + $0x38] sm:$0xff] }
 0xaed   :  { %6379 = vmatpush2.bf16.msra.mxu1 %v9689_v21  ;;  %6416 = vmatpush1.bf16.msra.mxu0 %v9692_v29  ;;  %v6478_v21 = vld [vmem:[#allocation19 + $0x30] sm:$0xff]  ;;  %v6477_v29 = vld [vmem:[#allocation19 + $0x28] sm:$0xff] }
 0xaee   :  { %6380 = vmatprep.subr.bf16.mxu1 %v9697_v8  ;;  %6417 = vmatprep.subr.bf16.mxu0 %v9700_v59  ;;  %v6476_v8 = vld [vmem:[#allocation19 + $0x20] sm:$0xff]  ;;  %v6475_v59 = vld [vmem:[#allocation19 + $0x18] sm:$0xff] }
 0xaf1   :  { %6381 = vmatpush2.bf16.msra.mxu1 %v9695_v31  ;;  %6418 = vmatpush1.bf16.msra.mxu0 %v9698_v17  ;;  %v6474_v31 = vld [vmem:[#allocation19 + $0x10] sm:$0xff]  ;;  %v6473_v17 = vld [vmem:[#allocation19 + $0x8] sm:$0xff] }
 0xaf2   :  { %6382 = vmatprep.subr.bf16.mxu1 %v9703_v40  ;;  %6419 = vmatprep.subr.bf16.mxu0 %v9706_v35  ;;  %v6472_v40 = vld [vmem:[#allocation19] sm:$0xff]  ;;  %v6535_v35 = vld [vmem:[#allocation19 + $0x1f8] sm:$0xff] }
 0xaf5   :  { %6383 = vmatpush2.bf16.msra.mxu1 %v9701_v53  ;;  %6420 = vmatpush2.bf16.msra.mxu0 %v9704_v36  ;;  %v6534_v53 = vld [vmem:[#allocation19 + $0x1f0] sm:$0xff]  ;;  %v6533_v36 = vld [vmem:[#allocation19 + $0x1e8] sm:$0xff] }
 0xaf6   :  { %6384 = vmatprep.subr.bf16.mxu1 %v9709_v12  ;;  %6421 = vmatprep.subr.bf16.mxu0 %v9712_v39  ;;  %v6532_v12 = vld [vmem:[#allocation19 + $0x1e0] sm:$0xff]  ;;  %v6531_v39 = vld [vmem:[#allocation19 + $0x1d8] sm:$0xff] }
 0xaf9   :  { %6385 = vmatpush2.bf16.msra.mxu1 %v9707_v20  ;;  %6422 = vmatpush2.bf16.msra.mxu0 %v9710_v43  ;;  %v6530_v20 = vld [vmem:[#allocation19 + $0x1d0] sm:$0xff]  ;;  %v6529_v43 = vld [vmem:[#allocation19 + $0x1c8] sm:$0xff] }
 0xafa   :  { %6386 = vmatprep.subr.bf16.mxu1 %v9715_v4  ;;  %6423 = vmatprep.subr.bf16.mxu0 %v9718_v33  ;;  %v6528_v4 = vld [vmem:[#allocation19 + $0x1c0] sm:$0xff]  ;;  %v6527_v33 = vld [vmem:[#allocation19 + $0x1b8] sm:$0xff] }
 0xafd   :  { %6387 = vmatpush2.bf16.msra.mxu1 %v9713_v37  ;;  %6424 = vmatpush2.bf16.msra.mxu0 %v9716_v14  ;;  %v6526_v37 = vld [vmem:[#allocation19 + $0x1b0] sm:$0xff]  ;;  %v6525_v14 = vld [vmem:[#allocation19 + $0x1a8] sm:$0xff] }
 0xafe   :  { %6388 = vmatprep.subr.bf16.mxu1 %v9721_v55  ;;  %6425 = vmatprep.subr.bf16.mxu0 %v9724_v45  ;;  %v6524_v55 = vld [vmem:[#allocation19 + $0x1a0] sm:$0xff]  ;;  %v6523_v45 = vld [vmem:[#allocation19 + $0x198] sm:$0xff] }
 0xb01   :  { %6389 = vmatpush2.bf16.msra.mxu1 %v9719_v51  ;;  %6426 = vmatpush2.bf16.msra.mxu0 %v9722_v23  ;;  %v6522_v51 = vld [vmem:[#allocation19 + $0x190] sm:$0xff]  ;;  %v6521_v23 = vld [vmem:[#allocation19 + $0x188] sm:$0xff] }
 0xb02   :  { %6390 = vmatprep.subr.bf16.mxu1 %v9727_v34  ;;  %6427 = vmatprep.subr.bf16.mxu0 %v9730_v15  ;;  %v6520_v34 = vld [vmem:[#allocation19 + $0x180] sm:$0xff]  ;;  %v6519_v15 = vld [vmem:[#allocation19 + $0x178] sm:$0xff] }
 0xb05   :  { %6391 = vmatpush2.bf16.msra.mxu1 %v9725_v58  ;;  %6428 = vmatpush2.bf16.msra.mxu0 %v9728_v41  ;;  %v6518_v58 = vld [vmem:[#allocation19 + $0x170] sm:$0xff]  ;;  %v6517_v41 = vld [vmem:[#allocation19 + $0x168] sm:$0xff] }
 0xb06   :  { %6392 = vmatprep.subr.bf16.mxu1 %v9733_v7  ;;  %6429 = vmatprep.subr.bf16.mxu0 %v9736_v47  ;;  %v6516_v7 = vld [vmem:[#allocation19 + $0x160] sm:$0xff]  ;;  %v6515_v47 = vld [vmem:[#allocation19 + $0x158] sm:$0xff] }
 0xb09   :  { %6393 = vmatpush2.bf16.msra.mxu1 %v9731_v32  ;;  %6430 = vmatpush2.bf16.msra.mxu0 %v9734_v44  ;;  %v6514_v32 = vld [vmem:[#allocation19 + $0x150] sm:$0xff]  ;;  %v6513_v44 = vld [vmem:[#allocation19 + $0x148] sm:$0xff] }
 0xb0a   :  { %6431 = vmatprep.subr.bf16.mxu0 %v9739_v9  ;;  %6536 = vmatprep.subr.mxu1 %v6503_v38  ;;  %v6512_v9 = vld [vmem:[#allocation19 + $0x140] sm:$0xff]  ;;  %v6506_v38 = vld [vmem:[#allocation19 + $0x110] sm:$0xff] }
 0xb0c   :  { %6395 = vmatmul.mubr.bf16.vlgmr.msra.gmra.mxu1 %v5508_v50  ;;  %v6510_v50 = vld [vmem:[#allocation19 + $0x130] sm:$0xff] }
 0xb0d   :  { %6432 = vmatpush2.bf16.msra.mxu0 %v9737_v49  ;;  %6537 = vmatpush1.msra.mxu1 %v6502_v48  ;;  %v6511_v49 = vld [vmem:[#allocation19 + $0x138] sm:$0xff]  ;;  %v6505_v48 = vld [vmem:[#allocation19 + $0x108] sm:$0xff] }
 0xb0e   :  { %6433 = vmatprep.subr.bf16.mxu0 %v9742_v42  ;;  %6538 = vmatprep.subr.mxu1 %v6501_v52  ;;  %v6509_v42 = vld [vmem:[#allocation19 + $0x128] sm:$0xff]  ;;  %v6504_v52 = vld [vmem:[#allocation19 + $0x100] sm:$0xff] }
 0xb0f   :  { %6539 = vmatpush1.msra.mxu1 %v6500_v5 }
 0xb10   :  { %6540 = vmatprep.subr.mxu1 %v6499_v6 }
 0xb11   :  { %6434 = vmatpush2.bf16.msra.mxu0 %v9740_v19  ;;  %6541 = vmatpush1.msra.mxu1 %v6498_v10  ;;  %v6508_v19 = vld [vmem:[#allocation19 + $0x120] sm:$0xff] }
 0xb12   :  { %6542 = vmatprep.subr.mxu1 %v6497_v46 }
 0xb13   :  { %6543 = vmatpush1.msra.mxu1 %v6496_v56 }
 0xb14   :  { %6436 = vmatmul.mubr.bf16.vlgmr.msra.gmra.mxu0 %v5510_v54  ;;  %6544 = vmatprep.subr.mxu1 %v6495_v57  ;;  %v6507_v54 = vld [vmem:[#allocation19 + $0x118] sm:$0xff] }
 0xb15   :  { %6723 = vmatprep.mubr.bf16.mxu0 %v10345_v0  ;;  %6545 = vmatpush1.msra.mxu1 %v6494_v60 }
 0xb16   :  { %6546 = vmatprep.subr.mxu1 %v6493_v61 }
 0xb17   :  { %6547 = vmatpush1.msra.mxu1 %v6492_v62 }
 0xb18   :  { %6548 = vmatprep.subr.mxu1 %v6491_v63 }
 0xb19   :  { %6549 = vmatpush1.msra.mxu1 %v6490_v11 }
 0xb1a   :  { %6550 = vmatprep.subr.mxu1 %v6489_v2 }
 0xb1b   :  { %6551 = vmatpush1.msra.mxu1 %v6488_v16 }
 0xb1c   :  { %6552 = vmatprep.subr.mxu1 %v6487_v3 }
 0xb1d   :  { %6553 = vmatpush1.msra.mxu1 %v6486_v18 }
 0xb1e   :  { %6554 = vmatprep.subr.mxu1 %v6485_v22 }
 0xb1f   :  { %6555 = vmatpush1.msra.mxu1 %v6484_v24 }
 0xb20   :  { %6556 = vmatprep.subr.mxu1 %v6483_v25 }
 0xb21   :  { %6557 = vmatpush1.msra.mxu1 %v6482_v26 }
 0xb22   :  { %6558 = vmatprep.subr.mxu1 %v6481_v27 }
 0xb23   :  { %6559 = vmatpush1.msra.mxu1 %v6480_v30 }
 0xb24   :  { %6560 = vmatprep.subr.mxu1 %v6479_v28 }
 0xb25   :  { %6561 = vmatpush1.msra.mxu1 %v6478_v21 }
 0xb26   :  { %6562 = vmatprep.subr.mxu1 %v6477_v29 }
 0xb27   :  { %6563 = vmatpush1.msra.mxu1 %v6476_v8 }
 0xb28   :  { %6564 = vmatprep.subr.mxu1 %v6475_v59 }
 0xb29   :  { %6565 = vmatpush1.msra.mxu1 %v6474_v31 }
 0xb2a   :  { %6566 = vmatprep.subr.mxu1 %v6473_v17 }
 0xb2b   :  { %6567 = vmatpush1.msra.mxu1 %v6472_v40 }
 0xb2c   :  { %6568 = vmatprep.subr.mxu1 %v6535_v35 }
 0xb2d   :  { %6569 = vmatpush2.msra.mxu1 %v6534_v53 }
 0xb2e   :  { %6570 = vmatprep.subr.mxu1 %v6533_v36 }
 0xb2f   :  { %6571 = vmatpush2.msra.mxu1 %v6532_v12 }
 0xb30   :  { %6572 = vmatprep.subr.mxu1 %v6531_v39 }
 0xb31   :  { %6573 = vmatpush2.msra.mxu1 %v6530_v20 }
 0xb32   :  { %6574 = vmatprep.subr.mxu1 %v6529_v43 }
 0xb33   :  { %6575 = vmatpush2.msra.mxu1 %v6528_v4 }
 0xb34   :  { %6576 = vmatprep.subr.mxu1 %v6527_v33 }
 0xb35   :  { %6577 = vmatpush2.msra.mxu1 %v6526_v37 }
 0xb36   :  { %6578 = vmatprep.subr.mxu1 %v6525_v14 }
 0xb37   :  { %6579 = vmatpush2.msra.mxu1 %v6524_v55 }
 0xb38   :  { %6580 = vmatprep.subr.mxu1 %v6523_v45 }
 0xb39   :  { %6581 = vmatpush2.msra.mxu1 %v6522_v51 }
 0xb3a   :  { %6582 = vmatprep.subr.mxu1 %v6521_v23 }
 0xb3b   :  { %6583 = vmatpush2.msra.mxu1 %v6520_v34 }
 0xb3c   :  { %6584 = vmatprep.subr.mxu1 %v6519_v15 }
 0xb3d   :  { %6585 = vmatpush2.msra.mxu1 %v6518_v58 }
 0xb3e   :  { %6586 = vmatprep.subr.mxu1 %v6517_v41 }
 0xb3f   :  { %6587 = vmatpush2.msra.mxu1 %v6516_v7 }
 0xb40   :  { %6588 = vmatprep.subr.mxu1 %v6515_v47 }
 0xb41   :  { %6589 = vmatpush2.msra.mxu1 %v6514_v32  ;;  %v9748_v32 = vld [vmem:[#allocation25 + $0xf8] sm:$0xff]  }
 0xb42   :  { %6590 = vmatprep.subr.mxu1 %v6513_v44  ;;  %v9750_v44 = vld [vmem:[#allocation25 + $0xb8] sm:$0xff]  }
 0xb43   :  { %6591 = vmatpush2.msra.mxu1 %v6512_v9  ;;  %v9752_v9 = vld [vmem:[#allocation25 + $0xf0] sm:$0xff]  }
 0xb44   :  { %6592 = vmatprep.subr.mxu1 %v6511_v49  ;;  %v9754_v49 = vld [vmem:[#allocation25 + $0xb0] sm:$0xff]  }
 0xb45   :  { %6593 = vmatpush2.msra.mxu1 %v6510_v50  ;;  %v9756_v50 = vld [vmem:[#allocation25 + $0xe8] sm:$0xff]  }
 0xb46   :  { %6594 = vmatprep.subr.mxu1 %v6509_v42  ;;  %v9758_v42 = vld [vmem:[#allocation25 + $0xa8] sm:$0xff]  }
 0xb47   :  { %6595 = vmatpush2.msra.mxu1 %v6508_v19  ;;  %v9760_v19 = vld [vmem:[#allocation25 + $0xe0] sm:$0xff]  }
 0xb48   :  { %6596 = vmatprep.subr.mxu1 %v6507_v54  ;;  %v9762_v54 = vld [vmem:[#allocation25 + $0xa0] sm:$0xff]  }
 0xb49   :  { %6597 = vmatpush2.msra.mxu1 %v6506_v38  ;;  %v9764_v38 = vld [vmem:[#allocation25 + $0xd8] sm:$0xff]  }
 0xb4a   :  { %6598 = vmatprep.subr.mxu1 %v6505_v48  ;;  %v9766_v48 = vld [vmem:[#allocation25 + $0x98] sm:$0xff]  }
 0xb4b   :  { %6599 = vmatpush2.msra.mxu1 %v6504_v52 }
 0xb4c   :  { %8727 = vmatprep.subr.bf16.mxu1 %v9748_v32  ;;  %v9755_v32 = vld [vmem:[#allocation25 + $0x58] sm:$0xff]  }
 0xb8c   :  { %v6314_v5 = vpop.f32.mrf.mxu1 }
 0xb8e   :  { %v6316_v6 = vpop.f32.mrf.mxu1 }
 0xb90   :  { %v6318_v10 = vpop.f32.mrf.mxu1 }
 0xb92   :  { %v6319_v46 = vpop.f32.mrf.mxu1 }
 0xb94   :  { %v6355_v56 = vpop.f32.mrf.mxu0 }
 0xb95   :  { %v6356_v2 = vadd.f32 %v6355_v56, %v6314_v5 }
 0xb96   :  { %v6357_v57 = vpop.f32.mrf.mxu0 }
 0xb97   :  { %v6358_v3 = vadd.f32 %v6357_v57, %v6316_v6 }
 0xb98   :  { %v6359_v60 = vpop.f32.mrf.mxu0 }
 0xb9a   :  { %v6360_v61 = vpop.f32.mrf.mxu0 }
 0xbcc   :  { %v6396_v62 = vpop.f32.mrf.mxu1 }
 0xbcd   :  { %v6397_v18 = vadd.f32 %v6396_v62, %v6356_v2  ;;  %v6623_v2 = vld [vmem:[#allocation21] sm:$0x3] }
 0xbce   :  { %v6398_v63 = vpop.f32.mrf.mxu1 }
 0xbcf   :  { %v6399_v24 = vadd.f32 %v6398_v63, %v6358_v3 }
 0xbd0   :  { %v6400_v11 = vpop.f32.mrf.mxu1 }
 0xbd2   :  { %v6401_v16 = vpop.f32.mrf.mxu1 }
 0xbd3   :  { %v6628_v16 = vrot.slane %v6623_v2, %v10952_v1 }
 0xbd4   :  { %v6437_v22 = vpop.f32.mrf.mxu0 }
 0xbd5   :  { %v11493_v25 = vadd.f32 %v6437_v22, %v6397_v18  ;;  %v6632_v18 = vrot.slane %v6623_v2, %v10954_v13 }
 0xbd6   :  { %v6439_v26 = vpop.f32.mrf.mxu0 }
 0xbd7   :  { %v6444_v27 = vrot.slane %v11493_v25, 4  ;;  %v6456_v30 = vmul.f32 %v11493_v25, %v11493_v25  ;;  %v11498_v28 = vadd.f32 %v6439_v26, %v6399_v24  ;;  %v6657_v24 = vld [vmem:[#allocation22] sm:$0x3] }
 0xbd8   :  { %v6441_v21 = vpop.f32.mrf.mxu0 }
 0xbd9   :  { %v6445_v29 = vadd.f32 %v6444_v27, %v11493_v25  ;;  %v6458_v8 = vrot.slane %v6456_v30, 4  ;;  %v6450_v59 = vrot.slane %v11498_v28, 4  ;;  %v6457_v31 = vmul.f32 %v11498_v28, %v11498_v28 }
 0xbda   :  { %v6442_v17 = vpop.f32.mrf.mxu0 }
 0xbdb   :  { %v6446_v40 = vrot.slane %v6445_v29, 2  ;;  %v6459_v35 = vadd.f32 %v6458_v8, %v6456_v30  ;;  %v6451_v53 = vadd.f32 %v6450_v59, %v11498_v28  ;;  %v6464_v36 = vrot.slane %v6457_v31, 4 }
 0xbdc   :  { %v6662_v59 = vrot.slane %v6657_v24, %v10952_v1 }
 0xbdd   :  { %v6460_v12 = vrot.slane %v6459_v35, 2  ;;  %v6452_v39 = vrot.slane %v6451_v53, 2  ;;  %v6465_v20 = vadd.f32 %v6464_v36, %v6457_v31  ;;  %v6447_v43 = vadd.f32 %v6446_v40, %v6445_v29 }
 0xbdf   :  { %v6453_v4 = vadd.f32 %v6452_v39, %v6451_v53  ;;  %v6466_v33 = vrot.slane %v6465_v20, 2  ;;  %v6461_v37 = vadd.f32 %v6460_v12, %v6459_v35  ;;  %v6448_v51 = vrot.slane %v6447_v43, 1 }
 0xbe0   :  { %v6666_v35 = vrot.slane %v6657_v24, %v10954_v13 }
 0xbe1   :  { %v6454_v14 = vrot.slane %v6453_v4, 1  ;;  %v6467_v55 = vadd.f32 %v6466_v33, %v6465_v20  ;;  %v6462_v45 = vrot.slane %v6461_v37, 1  ;;  %v6449_v41 = vadd.f32 %v6448_v51, %v6447_v43  ;;  %v6825_v51 = vld [vmem:[#allocation24 + $0x6] sm:$0x3] }
 0xbe3   :  { %v6468_v23 = vrot.slane %v6467_v55, 1  ;;  %v6463_v34 = vadd.f32 %v6462_v45, %v6461_v37  ;;  %v6455_v15 = vadd.f32 %v6454_v14, %v6453_v4  ;;  %v6679_v37 = vld [vmem:[#allocation24] sm:$0x3]  ;;  %v6733_v14 = vld [vmem:[#allocation24 + $0x2] sm:$0x3] }
 0xbe4   :  { %v9743_v45 = vld [vmem:[#allocation25 + $0x78] sm:$0xff]  }
 0xbe5   :  { %v6469_v58 = vadd.f32 %v6468_v23, %v6467_v55  ;;  %v6470_v47 = vsel %vm2020_vm0, %v6449_v41, %v6463_v34  ;;  %v6779_v55 = vld [vmem:[#allocation24 + $0x4] sm:$0x3]  ;;  %v9745_v34 = vld [vmem:[#allocation25 + $0x70] sm:$0xff]   ;;  %v9749_v41 = vld [vmem:[#allocation25 + $0x28] sm:$0xff]  }
 0xbe6   :  { %v9744_v23 = vld [vmem:[#allocation25 + $0x38] sm:$0xff]  }
 0xbe7   :  { %v6471_v7 = vsel %vm2020_vm0, %v6455_v15, %v6469_v58  ;;  %v9746_v15 = vld [vmem:[#allocation25 + $0x30] sm:$0xff]   ;;  %v9747_v58 = vld [vmem:[#allocation25 + $0x68] sm:$0xff]  }
 0xbe8   :  { %6600 = vmatprep.mubr.f32.mxu1 %v6471_v7  ;;  %v9751_v7 = vld [vmem:[#allocation25 + $0x60] sm:$0xff]  }
 0xbe9   :  { %6601 = vmatmul.mubr.f32.vlgmr.msra.gmra.mxu1 %v6470_v47  ;;  %v9753_v47 = vld [vmem:[#allocation25 + $0x20] sm:$0xff]  }
 0xbea   :  { %8728 = vmatpush3.bf16.msra.mxu1 %v9750_v44  ;;  %v9759_v44 = vld [vmem:[#allocation25 + $0x50] sm:$0xff]  }
 0xbeb   :  { %8729 = vmatprep.subr.bf16.mxu1 %v9752_v9  ;;  %v9761_v9 = vld [vmem:[#allocation25 + $0x10] sm:$0xff]  }
 0xbee   :  { %8730 = vmatpush3.bf16.msra.mxu1 %v9754_v49  ;;  %v9763_v49 = vld [vmem:[#allocation25 + $0x48] sm:$0xff]  }
 0xbef   :  { %8731 = vmatprep.subr.bf16.mxu1 %v9756_v50  ;;  %v9765_v50 = vld [vmem:[#allocation25 + $0x8] sm:$0xff]  }
 0xbf2   :  { %8732 = vmatpush3.bf16.msra.mxu1 %v9758_v42  ;;  %v9767_v42 = vld [vmem:[#allocation25 + $0x40] sm:$0xff]  }
 0xbf3   :  { %8733 = vmatprep.subr.bf16.mxu1 %v9760_v19  ;;  %v9768_v19 = vld [vmem:[#allocation25 + $0xd0] sm:$0xff]  }
 0xbf6   :  { %8734 = vmatpush3.bf16.msra.mxu1 %v9762_v54  ;;  %v9769_v54 = vld [vmem:[#allocation25] sm:$0xff]  }
 0xbf7   :  { %8735 = vmatprep.subr.bf16.mxu1 %v9764_v38  ;;  %v9770_v38 = vld [vmem:[#allocation25 + $0x90] sm:$0xff]  }
 0xbfa   :  { %8736 = vmatpush3.bf16.msra.mxu1 %v9766_v48  ;;  %v9771_v48 = vld [vmem:[#allocation25 + $0xc8] sm:$0xff]  }
 0xbfb   :  { %8737 = vmatprep.subr.bf16.mxu1 %v9768_v19 }
 0xbfe   :  { %8738 = vmatpush3.bf16.msra.mxu1 %v9770_v38  ;;  %v7581_v38 = vld [vmem:[%s11627_s16 + $0x78] sm:$0xff] }
 0xbff   :  { %8739 = vmatprep.subr.bf16.mxu1 %v9771_v48  ;;  %v7580_v48 = vld [vmem:[%s11627_s16 + $0x70] sm:$0xff] }
 0xca9   :  { %v6602_v52 = vpop.f32.mrf.mxu1 }
 0xcaa   :  { %v6607_v5 = vmul.f32 0.03125, %v6602_v52  ;;  %v9772_v52 = vld [vmem:[#allocation25 + $0x178] sm:$0xff]  }
 0xcab   :  { %v6604_v6 = vpop.f32.mrf.mxu1 }
 0xcac   :  { %v6609_v10 = vmul.f32 %v6607_v5, %v6607_v5  ;;  %v6608_v46 = vmul.f32 0.03125, %v6604_v6  ;;  %v6640_v3 = vrot.slane %v6607_v5, %v10952_v1  ;;  %v9775_v6 = vld [vmem:[#allocation25 + $0xc0] sm:$0xff]  }
 0xcae   :  { %v6613_v56 = vrot.slane %v6609_v10, 7  ;;  %v6610_v57 = vmul.f32 %v6608_v46, %v6608_v46  ;;  %v6644_v27 = vrot.slane %v6608_v46, %v10952_v1  ;;  %v6645_v21 = vsub.f32 %v11493_v25, %v6640_v3  ;;  %v9777_v10 = vld [vmem:[#allocation25 + $0x80] sm:$0xff]  }
 0xcb0   :  { %v6617_v60 = vsub.f32 %v6607_v5, %v6613_v56  ;;  %v6614_v61 = vrot.slane %v6610_v57, 7  ;;  %v6646_v17 = vsub.f32 %v11498_v28, %v6644_v27  ;;  %v9773_v5 = vld [vmem:[#allocation25 + $0x88] sm:$0xff]   ;;  %v9782_v27 = vld [vmem:[#allocation25 + $0x1b8] sm:$0xff]  }
 0xcb1   :  { %8740 = vmatpush3.bf16.msra.mxu1 %v9773_v5  ;;  %v7578_v5 = vld [vmem:[%s11627_s16 + $0x60] sm:$0xff] }
 0xcb2   :  { %v6619_v62 = vadd.f32 1e-05, %v6617_v60  ;;  %v6618_v63 = vsub.f32 %v6608_v46, %v6614_v61  ;;  %8741 = vmatprep.subr.bf16.mxu1 %v9775_v6  ;;  %v9780_v46 = vld [vmem:[#allocation25 + $0x1f8] sm:$0xff]  }
 0xcb3   :  { %v9774_v61 = vld [vmem:[#allocation25 + $0x138] sm:$0xff]  }
 0xcb4   :  { %9835 = vrsqrt.f32 %v6619_v62  ;;  %v6620_v11 = vadd.f32 1e-05, %v6618_v63  ;;  %v7577_v6 = vld [vmem:[%s11627_s16 + $0x58] sm:$0xff] }
 0xcb5   :  { %8742 = vmatpush3.bf16.msra.mxu1 %v9777_v10  ;;  %v7576_v10 = vld [vmem:[%s11627_s16 + $0x50] sm:$0xff] }
 0xcb6   :  { %9837 = vrsqrt.f32 %v6620_v11  ;;  %8771 = vmatprep.subr.bf16.mxu1 %v9780_v46  ;;  %v9776_v11 = vld [vmem:[#allocation25 + $0x170] sm:$0xff]   ;;  %v7575_v46 = vld [vmem:[%s11627_s16 + $0x48] sm:$0xff] }
 0xcc1   :  { %v9836_v22 = vpop.eup %9835 }
 0xcc2   :  { %v6635_v26 = vmul.f32 %v9836_v22, %v6628_v16  ;;  %v9778_v16 = vld [vmem:[#allocation25 + $0x130] sm:$0xff]  }
 0xcc3   :  { %v9838_v30 = vpop.eup %9837 }
 0xcc4   :  { %v6650_v29 = vrot.slane %v6635_v26, %v10954_v13  ;;  %v6636_v8 = vmul.f32 %v9838_v30, %v6632_v18  ;;  %v9779_v18 = vld [vmem:[#allocation25 + $0x168] sm:$0xff]  }
 0xcc5   :  { %v9781_v26 = vld [vmem:[#allocation25 + $0x128] sm:$0xff]  }
 0xcc6   :  { %v6655_v31 = vmul.f32 %v6650_v29, %v6645_v21  ;;  %v6654_v40 = vrot.slane %v6636_v8, %v10954_v13  ;;  %v9783_v29 = vld [vmem:[#allocation25 + $0x160] sm:$0xff]   ;;  %v9784_v8 = vld [vmem:[#allocation25 + $0x1f0] sm:$0xff]  }
 0xcc8   :  { %v6656_v53 = vmul.f32 %v6654_v40, %v6646_v17  ;;  %v6669_v36 = vadd.f32 %v6662_v59, %v6655_v31  ;;  %v9785_v31 = vld [vmem:[#allocation25 + $0x120] sm:$0xff]   ;;  %v9786_v17 = vld [vmem:[#allocation25 + $0x1b0] sm:$0xff]   ;;  %v9787_v40 = vld [vmem:[#allocation25 + $0x158] sm:$0xff]  }
 0xcca   :  { %v6670_v12 = vadd.f32 %v6666_v35, %v6656_v53  ;;  %vm6671_vm2 = vcmp.ge.f32.partialorder %v6669_v36, 0.0  ;;  %v6673_v39 = vmul.f32 0.2, %v6669_v36  ;;  %v9788_v35 = vld [vmem:[#allocation25 + $0x1e8] sm:$0xff]  }
 0xccc   :  { %vm6672_vm3 = vcmp.ge.f32.partialorder %v6670_v12, 0.0  ;;  %v6674_v20 = vmul.f32 0.2, %v6670_v12  ;;  %v6675_v25 = vsel %vm6671_vm2, %v6669_v36, %v6673_v39  ;;  %v9790_v39 = vld [vmem:[#allocation25 + $0x1a8] sm:$0xff]  }
 0xccd   :  { %v6677_v43 = vpack.c.bf16 %v6675_v25, %v6675_v25  ;;  %v9791_v25 = vld [vmem:[#allocation25 + $0x150] sm:$0xff]  }
 0xcce   :  { %v6676_v4 = vsel %vm6672_vm3, %v6670_v12, %v6674_v20  ;;  %v9789_v12 = vld [vmem:[#allocation25 + $0x118] sm:$0xff]  }
 0xccf   :  { %v6678_v33 = vpack.c.bf16 %v6676_v4, %v6676_v4  ;;  %v6686_v28 = vsel %vm6684_vm4, %v6677_v43, 0  ;;  %v9792_v43 = vld [vmem:[#allocation25 + $0x1e0] sm:$0xff]  }
 0xcd1   :  { %8612 = vmatprep.subr.msk.bf16.mxu0 %vm6684_vm4, %v6678_v33 }
 0xcd2   :  { %6706 = vmatpush1.bf16.msra.mxu0 %v6686_v28 }
 0xcd3   :  { %8614 = vmatprep.subr.msk.bf16.mxu0 %vm6684_vm4, %v6678_v33 }
 0xcd5   :  { %8613 = vmatmul.mubr.msk.bf16.vlgmr.msra.gmra.mxu0 %vm6680_vm5, %v6679_v37  ;;  %v9794_v37 = vld [vmem:[#allocation25 + $0x1a0] sm:$0xff]  }
 0xcd6   :  { %6752 = vmatpush1.bf16.msra.mxu0 %v6686_v28  ;;  %6769 = vmatprep.mubr.bf16.mxu0 %v10345_v0 }
 0xcd7   :  { %8616 = vmatprep.subr.msk.bf16.mxu0 %vm6684_vm4, %v6678_v33 }
 0xcdd   :  { %8615 = vmatmul.mubr.msk.bf16.vlgmr.msra.gmra.mxu0 %vm6680_vm5, %v6733_v14  ;;  %v9795_v14 = vld [vmem:[#allocation25 + $0x148] sm:$0xff]  }
 0xcde   :  { %6798 = vmatpush1.bf16.msra.mxu0 %v6686_v28  ;;  %6815 = vmatprep.mubr.bf16.mxu0 %v10345_v0 }
 0xcdf   :  { %8618 = vmatprep.subr.msk.bf16.mxu0 %vm6684_vm4, %v6678_v33 }
 0xce5   :  { %8617 = vmatmul.mubr.msk.bf16.vlgmr.msra.gmra.mxu0 %vm6680_vm5, %v6779_v55  ;;  %v9796_v55 = vld [vmem:[#allocation25 + $0x1d8] sm:$0xff]  }
 0xce6   :  { %6844 = vmatpush1.bf16.msra.mxu0 %v6686_v28  ;;  %6861 = vmatprep.mubr.bf16.mxu0 %v10345_v0  ;;  %v9757_v0 = vld [vmem:[#allocation25 + $0x18] sm:$0xff]   ;;  %v9793_v28 = vld [vmem:[#allocation25 + $0x110] sm:$0xff]  }
 0xce7   :  { %8705 = vmatprep.subr.bf16.mxu0 %v9743_v45 }
 0xced   :  { %8619 = vmatmul.mubr.msk.bf16.vlgmr.msra.gmra.mxu0 %vm6680_vm5, %v6825_v51 }
 0xcee   :  { %8706 = vmatpush3.bf16.msra.mxu0 %v9744_v23  ;;  %v9797_v23 = vld [vmem:[#allocation25 + $0x108] sm:$0xff]  }
 0xcef   :  { %8707 = vmatprep.subr.bf16.mxu0 %v9745_v34  ;;  %v9798_v34 = vld [vmem:[#allocation25 + $0x198] sm:$0xff]  }
 0xcf2   :  { %8708 = vmatpush3.bf16.msra.mxu0 %v9746_v15 }
 0xcf3   :  { %8709 = vmatprep.subr.bf16.mxu0 %v9747_v58  ;;  %v9799_v58 = vld [vmem:[#allocation25 + $0x140] sm:$0xff]  }
 0xcf6   :  { %8710 = vmatpush3.bf16.msra.mxu0 %v9749_v41  ;;  %v9800_v41 = vld [vmem:[#allocation25 + $0x1d0] sm:$0xff]  }
 0xcf7   :  { %8711 = vmatprep.subr.bf16.mxu0 %v9751_v7 }
 0xcfa   :  { %8712 = vmatpush3.bf16.msra.mxu0 %v9753_v47 }
 0xcfb   :  { %8713 = vmatprep.subr.bf16.mxu0 %v9755_v32  ;;  %v9801_v32 = vld [vmem:[#allocation25 + $0x100] sm:$0xff]  }
 0xcfe   :  { %8714 = vmatpush3.bf16.msra.mxu0 %v9757_v0  ;;  %v9802_v0 = vld [vmem:[#allocation25 + $0x190] sm:$0xff]  }
 0xcff   :  { %8715 = vmatprep.subr.bf16.mxu0 %v9759_v44  ;;  %v9803_v44 = vld [vmem:[#allocation25 + $0x1c8] sm:$0xff]  }
 0xd02   :  { %8716 = vmatpush3.bf16.msra.mxu0 %v9761_v9  ;;  %v9804_v9 = vld [vmem:[#allocation25 + $0x188] sm:$0xff]  }
 0xd03   :  { %8717 = vmatprep.subr.bf16.mxu0 %v9763_v49 }
 0xd06   :  { %8718 = vmatpush3.bf16.msra.mxu0 %v9765_v50  ;;  %v9805_v50 = vld [vmem:[#allocation25 + $0x1c0] sm:$0xff]  }
 0xd07   :  { %8719 = vmatprep.subr.bf16.mxu0 %v9767_v42  ;;  %v9806_v42 = vld [vmem:[#allocation25 + $0x180] sm:$0xff]  }
 0xd0a   :  { %8720 = vmatpush3.bf16.msra.mxu0 %v9769_v54  ;;  %v10346_v54 = vmov 0.0  }
 0xd0b   :  { %8749 = vmatprep.subr.bf16.mxu0 %v9772_v52  ;;  %v7579_v52 = vld [vmem:[%s11627_s16 + $0x68] sm:$0xff] }
 0xd95   :  { %v6725_v56 = vpop.f32.mrf.mxu0 }
 0xd96   :  { %v6870_v62 = vpack.c.bf16 %v6725_v56, %v6725_v56  ;;  %v7574_v56 = vld [vmem:[%s11627_s16 + $0x40] sm:$0xff] }
 0xd97   :  { %v6727_v57 = vpop.f32.mrf.mxu0 }
 0xd98   :  { %v6871_v60 = vpack.c.bf16 %v6727_v57, %v6727_v57  ;;  %v7573_v57 = vld [vmem:[%s11627_s16 + $0x38] sm:$0xff] }
 0xd99   :  { %v6729_v63 = vpop.f32.mrf.mxu0 }
 0xd9a   :  { %7422 = vmatprep.mubr.bf16.mxu0 %v6871_v60  ;;  %v7572_v60 = vld [vmem:[%s11627_s16 + $0x30] sm:$0xff]  ;;  %v7569_v63 = vld [vmem:[%s11627_s16 + $0x18] sm:$0xff] }
 0xd9b   :  { %v6730_v2 = vpop.f32.mrf.mxu0  ;;  %7423 = vmatmul.mubr.bf16.vlgmr.msra.gmra.mxu0 %v6870_v62  ;;  %v7570_v62 = vld [vmem:[%s11627_s16 + $0x20] sm:$0xff] }
 0xd9c   :  { %8750 = vmatpush3.bf16.msra.mxu0 %v9774_v61  ;;  %v7571_v61 = vld [vmem:[%s11627_s16 + $0x28] sm:$0xff] }
 0xd9d   :  { %v6771_v3 = vpop.f32.mrf.mxu0  ;;  %8751 = vmatprep.subr.bf16.mxu0 %v9776_v11  ;;  %v7568_v11 = vld [vmem:[%s11627_s16 + $0x10] sm:$0xff]  ;;  %v7567_v2 = vld [vmem:[%s11627_s16 + $0x8] sm:$0xff] }
 0xd9e   :  { %v6872_v30 = vpack.c.bf16 %v6771_v3, %v6771_v3 }
 0xd9f   :  { %v6773_v22 = vpop.f32.mrf.mxu0 }
 0xda0   :  { %v6873_v24 = vpack.c.bf16 %v6773_v22, %v6773_v22  ;;  %8752 = vmatpush3.bf16.msra.mxu0 %v9778_v16  ;;  %v7566_v16 = vld [vmem:[%s11627_s16] sm:$0xff] }
 0xda1   :  { %8753 = vmatprep.subr.bf16.mxu0 %v9779_v18  ;;  %v6775_v21 = vpop.f32.mrf.mxu0 }
 0xda2   :  { %7462 = vmatprep.mubr.bf16.mxu1 %v6873_v24 }
 0xda3   :  { %7463 = vmatmul.mubr.bf16.vlgmr.msra.gmra.mxu1 %v6872_v30  ;;  %v6776_v59 = vpop.f32.mrf.mxu0 }
 0xda4   :  { %8754 = vmatpush3.bf16.msra.mxu0 %v9781_v26  ;;  %8772 = vmatpush3.bf16.msra.mxu1 %v9782_v27 }
 0xda5   :  { %8755 = vmatprep.subr.bf16.mxu0 %v9783_v29  ;;  %8773 = vmatprep.subr.bf16.mxu1 %v9784_v8  ;;  %v6817_v53 = vpop.f32.mrf.mxu0 }
 0xda6   :  { %v6874_v49 = vpack.c.bf16 %v6817_v53, %v6817_v53 }
 0xda7   :  { %v6819_v36 = vpop.f32.mrf.mxu0 }
 0xda8   :  { %8756 = vmatpush3.bf16.msra.mxu0 %v9785_v31  ;;  %8774 = vmatpush3.bf16.msra.mxu1 %v9786_v17  ;;  %v6875_v20 = vpack.c.bf16 %v6819_v36, %v6819_v36 }
 0xda9   :  { %8757 = vmatprep.subr.bf16.mxu0 %v9787_v40  ;;  %8775 = vmatprep.subr.bf16.mxu1 %v9788_v35  ;;  %v6821_v4 = vpop.f32.mrf.mxu0 }
 0xdaa   :  { %7502 = vmatprep.mubr.bf16.mxu0 %v6875_v20 }
 0xdab   :  { %v6822_v33 = vpop.f32.mrf.mxu0 }
 0xdac   :  { %8758 = vmatpush3.bf16.msra.mxu0 %v9789_v12  ;;  %8776 = vmatpush3.bf16.msra.mxu1 %v9790_v39 }
 0xdad   :  { %8759 = vmatprep.subr.bf16.mxu0 %v9791_v25  ;;  %8777 = vmatprep.subr.bf16.mxu1 %v9792_v43  ;;  %v6863_v45 = vpop.f32.mrf.mxu0 }
 0xdae   :  { %v6876_v19 = vpack.c.bf16 %v6863_v45, %v6863_v45 }
 0xdaf   :  { %v6865_v51 = vpop.f32.mrf.mxu0 }
 0xdb0   :  { %8760 = vmatpush3.bf16.msra.mxu0 %v9793_v28  ;;  %8778 = vmatpush3.bf16.msra.mxu1 %v9794_v37  ;;  %v6877_v15 = vpack.c.bf16 %v6865_v51, %v6865_v51 }
 0xdb1   :  { %8761 = vmatprep.subr.bf16.mxu0 %v9795_v14  ;;  %8779 = vmatprep.subr.bf16.mxu1 %v9796_v55  ;;  %v6867_v7 = vpop.f32.mrf.mxu0 }
 0xdb2   :  { %7542 = vmatprep.mubr.bf16.mxu1 %v6877_v15 }
 0xdb3   :  { %v6868_v47 = vpop.f32.mrf.mxu0 }
 0xdb4   :  { %8762 = vmatpush3.bf16.msra.mxu0 %v9797_v23  ;;  %8780 = vmatpush3.bf16.msra.mxu1 %v9798_v34 }
 0xdb5   :  { %8763 = vmatprep.subr.bf16.mxu0 %v9799_v58  ;;  %8781 = vmatprep.subr.bf16.mxu1 %v9800_v41 }
 0xdb8   :  { %8764 = vmatpush3.bf16.msra.mxu0 %v9801_v32  ;;  %8782 = vmatpush3.bf16.msra.mxu1 %v9802_v0 }
 0xdb9   :  { %8783 = vmatprep.subr.bf16.mxu1 %v9803_v44  ;;  %8836 = vmatprep.subr.mxu0 %v10346_v54 }
 0xdbb   :  { %7503 = vmatmul.mubr.bf16.vlgmr.msra.gmra.mxu0 %v6874_v49 }
 0xdbc   :  { %8784 = vmatpush3.bf16.msra.mxu1 %v9804_v9  ;;  %8837 = vmatpush3.msra.mxu0 %v7581_v38 }
 0xdbd   :  { %8785 = vmatprep.subr.bf16.mxu1 %v9805_v50  ;;  %8838 = vmatprep.subr.mxu0 %v10346_v54 }
 0xdbe   :  { %8839 = vmatpush3.msra.mxu0 %v7580_v48  ;;  %8868 = vmatprep.mubr.msk.f32.mxu0 %vm10347_vm6, %v10346_v54  ;;  %v8684_v48 = vld [vmem:[#allocation27] ss:$0 sm:$0xff] }
 0xdbf   :  { %8840 = vmatprep.subr.mxu0 %v10346_v54 }
 0xdc0   :  { %8786 = vmatpush3.bf16.msra.mxu1 %v9806_v42  ;;  %8841 = vmatpush3.msra.mxu0 %v7579_v52 }
 0xdc1   :  { %8871 = vmatprep.subr.bf16.mxu1 %v10346_v54  ;;  %8842 = vmatprep.subr.mxu0 %v10346_v54 }
 0xdc2   :  { %8843 = vmatpush3.msra.mxu0 %v7578_v5 }
 0xdc3   :  { %7543 = vmatmul.mubr.bf16.vlgmr.msra.gmra.mxu1 %v6876_v19  ;;  %8844 = vmatprep.subr.mxu0 %v10346_v54 }
 0xdc4   :  { %8845 = vmatpush3.msra.mxu0 %v7577_v6  ;;  %8873 = vmatprep.mubr.msk.bf16.mxu1 %vm10347_vm6, %v10346_v54 }
 0xdc5   :  { %8846 = vmatprep.subr.mxu0 %v10346_v54 }
 0xdc6   :  { %8847 = vmatpush3.msra.mxu0 %v7576_v10 }
 0xdc7   :  { %8848 = vmatprep.subr.mxu0 %v10346_v54 }
 0xdc8   :  { %8849 = vmatpush3.msra.mxu0 %v7575_v46 }
 0xdc9   :  { %8850 = vmatprep.subr.mxu0 %v10346_v54 }
 0xdca   :  { %8851 = vmatpush3.msra.mxu0 %v7574_v56  ;;  %v8685_v56 = vld [vmem:[#allocation28] ss:$0 sm:$0xff] }
 0xdcb   :  { %8852 = vmatprep.subr.mxu0 %v10346_v54 }
 0xdcc   :  { %8853 = vmatpush3.msra.mxu0 %v7573_v57 }
 0xdcd   :  { %8854 = vmatprep.subr.mxu0 %v10346_v54 }
 0xdce   :  { %8855 = vmatpush3.msra.mxu0 %v7572_v60 }
 0xdcf   :  { %8856 = vmatprep.subr.mxu0 %v10346_v54 }
 0xdd0   :  { %8857 = vmatpush3.msra.mxu0 %v7571_v61 }
 0xdd1   :  { %8858 = vmatprep.subr.mxu0 %v10346_v54 }
 0xdd2   :  { %8859 = vmatpush3.msra.mxu0 %v7570_v62 }
 0xdd3   :  { %8860 = vmatprep.subr.mxu0 %v10346_v54 }
 0xdd4   :  { %8861 = vmatpush3.msra.mxu0 %v7569_v63 }
 0xdd5   :  { %8862 = vmatprep.subr.mxu0 %v10346_v54 }
 0xdd6   :  { %8863 = vmatpush3.msra.mxu0 %v7568_v11 }
 0xdd7   :  { %8864 = vmatprep.subr.mxu0 %v10346_v54 }
 0xdd8   :  { %8865 = vmatpush3.msra.mxu0 %v7567_v2  ;;  %v7740_v2 = vld [vmem:[#allocation30 + $0x1] sm:$0x1] }
 0xdd9   :  { %8866 = vmatprep.subr.mxu0 %v10346_v54 }
 0xdda   :  { %8867 = vmatpush3.msra.mxu0 %v7566_v16  ;;  %v9808_v16 = vld [vmem:[%s10492_s9 + $0x38] sm:$0xff]  }
 0xe5b   :  { %v8721_v3 = vpop.f32.mrf.mxu0 }
 0xe5d   :  { %v8722_v18 = vpop.f32.mrf.mxu0 }
 0xe5e   :  { %v8723_v40 = vadd.f32 %v8722_v18, %v8721_v3  ;;  %v9809_v3 = vld [vmem:[%s10492_s9 + $0x70] sm:$0xff]  }
 0xe5f   :  { %v8724_v22 = vpop.f32.mrf.mxu0  ;;  %v9810_v18 = vld [vmem:[%s10492_s9 + $0x30] sm:$0xff]  }
 0xe60   :  { %v9811_v22 = vld [vmem:[%s10492_s9 + $0x68] sm:$0xff]  }
 0xe61   :  { %v8725_v24 = vpop.f32.mrf.mxu0 }
 0xe62   :  { %v9812_v24 = vld [vmem:[%s10492_s9 + $0x28] sm:$0xff]  }
 0xe63   :  { %v8743_v26 = vpop.f32.mrf.mxu1 }
 0xe65   :  { %v8744_v27 = vpop.f32.mrf.mxu1 }
 0xe66   :  { %v8745_v31 = vadd.f32 %v8744_v27, %v8743_v26  ;;  %v9813_v26 = vld [vmem:[%s10492_s9 + $0x60] sm:$0xff]   ;;  %v9815_v27 = vld [vmem:[%s10492_s9 + $0x58] sm:$0xff]  }
 0xe67   :  { %v8746_v30 = vpop.f32.mrf.mxu1 }
 0xe68   :  { %v7465_v36 = vadd.f32 %v8745_v31, %v8723_v40  ;;  %v9816_v30 = vld [vmem:[%s10492_s9 + $0x18] sm:$0xff]   ;;  %v9821_v31 = vld [vmem:[%s10492_s9 + $0x40] sm:$0xff]  }
 0xe69   :  { %v8747_v21 = vpop.f32.mrf.mxu1 }
 0xe6a   :  { %v9817_v21 = vld [vmem:[%s10492_s9 + $0x50] sm:$0xff]  }
 0xe7b   :  { %v8765_v29 = vpop.f32.mrf.mxu0 }
 0xe7d   :  { %v8766_v8 = vpop.f32.mrf.mxu0 }
 0xe7e   :  { %v8767_v35 = vadd.f32 %v8766_v8, %v8765_v29  ;;  %v9818_v29 = vld [vmem:[%s10492_s9 + $0x10] sm:$0xff]   ;;  %v9819_v8 = vld [vmem:[%s10492_s9 + $0x48] sm:$0xff]  }
 0xe7f   :  { %v8768_v59 = vpop.f32.mrf.mxu0 }
 0xe80   :  { %v7505_v39 = vadd.f32 %v8767_v35, %v7465_v36  ;;  %v9820_v59 = vld [vmem:[%s10492_s9 + $0x8] sm:$0xff]  }
 0xe81   :  { %v8769_v17 = vpop.f32.mrf.mxu0 }
 0xe82   :  { %v9822_v17 = vld [vmem:[%s10492_s9] sm:$0xff]  }
 0xe83   :  { %v8787_v53 = vpop.f32.mrf.mxu1 }
 0xe85   :  { %v8788_v12 = vpop.f32.mrf.mxu1 }
 0xe86   :  { %v8789_v20 = vadd.f32 %v8788_v12, %v8787_v53 }
 0xe87   :  { %v8790_v25 = vpop.f32.mrf.mxu1 }
 0xe88   :  { %v7545_v43 = vadd.f32 %v8789_v20, %v7505_v39 }
 0xe89   :  { %v8791_v4 = vpop.f32.mrf.mxu1 }
 0xe8a   :  { %v7550_v33 = vsel %vm6684_vm4, %v7545_v43, 0.0  ;;  %v7557_v28 = vmul.f32 %v7545_v43, %v7545_v43 }
 0xe8b   :  { %v7551_v37 = vrot.slane %v7550_v33, 4 }
 0xe8c   :  { %v7558_v14 = vsel %vm6684_vm4, %v7557_v28, 0.0  ;;  %v8688_v28 = vld [vmem:[#allocation31] ss:$0 sm:$0xff] }
 0xe8d   :  { %v7552_v55 = vadd.f32 %v7551_v37, %v7550_v33  ;;  %v7559_v45 = vrot.slane %v7558_v14, 4 }
 0xe8f   :  { %v7553_v51 = vrot.slane %v7552_v55, 2  ;;  %v7560_v23 = vadd.f32 %v7559_v45, %v7558_v14 }
 0xe91   :  { %v7554_v34 = vadd.f32 %v7553_v51, %v7552_v55  ;;  %v7561_v15 = vrot.slane %v7560_v23, 2 }
 0xe93   :  { %v7555_v58 = vrot.slane %v7554_v34, 1  ;;  %v7562_v41 = vadd.f32 %v7561_v15, %v7560_v23 }
 0xe95   :  { %v7563_v7 = vrot.slane %v7562_v41, 1  ;;  %v7556_v47 = vadd.f32 %v7555_v58, %v7554_v34  ;;  %v7964_v58 = vld [vmem:[#allocation33] sm:$0x3] }
 0xe97   :  { %v7564_v32 = vadd.f32 %v7563_v7, %v7562_v41 }
 0xe99   :  { %v7565_v0 = vsel %vm2020_vm0, %v7556_v47, %v7564_v32 }
 0xe9a   :  { %8869 = vmatmul.mubr.f32.vlgmr.msra.gmra.mxu0 %v7565_v0 }
 0xf5a   :  { %v7648_v44 = vpop.f32.mrf.mxu0 }
 0xf5b   :  { %v7652_v9 = vmul.f32 0.125, %v7648_v44 }
 0xf5c   :  { %v8870_v49 = vpop.f32.mrf.mxu0 }
 0xf5d   :  { %v7653_v50 = vmul.f32 %v7652_v9, %v7652_v9  ;;  %v7671_v52 = vrot.slane %v7652_v9, %v10952_v1  ;;  %v7690_v1 = vld [vmem:[#allocation30] sm:$0x1] }
 0xf5f   :  { %v7655_v42 = vrot.slane %v7653_v50, 7  ;;  %v7672_v10 = vsub.f32 %v7545_v43, %v7671_v52 }
 0xf61   :  { %v7657_v19 = vsub.f32 %v7652_v9, %v7655_v42 }
 0xf63   :  { %v7658_v38 = vadd.f32 1e-05, %v7657_v19 }
 0xf65   :  { %9839 = vrsqrt.f32 %v7658_v38 }
 0xf72   :  { %v9840_v5 = vpop.eup %9839 }
 0xf73   :  { %v7667_v6 = vmul.f32 %v9840_v5, %v8684_v48 }
 0xf75   :  { %v7676_v46 = vrot.slane %v7667_v6, %v10954_v13  ;;  %v9807_v13 = vld [vmem:[%s10492_s9 + $0x78] sm:$0xff]  }
 0xf77   :  { %v7677_v57 = vmul.f32 %v7676_v46, %v7672_v10 }
 0xf79   :  { %v7685_v60 = vadd.f32 %v8685_v56, %v7677_v57 }
 0xf7b   :  { %vm7686_vm0 = vcmp.ge.f32.partialorder %v7685_v60, 0.0  ;;  %v7687_v61 = vmul.f32 0.2, %v7685_v60 }
 0xf7d   :  { %v7688_v62 = vsel %vm7686_vm0, %v7685_v60, %v7687_v61 }
 0xf7e   :  { %v7689_v63 = vpack.c.bf16 %v7688_v62, %v7688_v62 }
 0xf80   :  { %v7697_v11 = vsel %vm7695_vm7, %v7689_v63, 0 }
 0xf81   :  { %8872 = vmatpush3.bf16.msra.mxu1 %v7697_v11 }
 0xf82   :  { %8877 = vmatprep.subr.bf16.mxu1 %v10346_v54 }
 0xf84   :  { %8874 = vmatmul.mubr.msk.bf16.vlgmr.msra.gmra.mxu1 %vm7691_vm8, %v7690_v1 }
 0xf85   :  { %8878 = vmatpush3.bf16.msra.mxu1 %v7697_v11  ;;  %8879 = vmatprep.mubr.msk.bf16.mxu1 %vm10347_vm6, %v10346_v54  ;;  %v9814_v54 = vld [vmem:[%s10492_s9 + $0x20] sm:$0xff]   ;;  %s10348_s9 = smov 112  }
 0xf86   :  { %8814 = vmatprep.subr.bf16.mxu1 %v9807_v13 }
 0xf8c   :  { %8880 = vmatmul.mubr.msk.bf16.vlgmr.msra.gmra.mxu1 %vm7691_vm8, %v7740_v2 }
 0xf8d   :  { %8815 = vmatpush3.bf16.msra.mxu1 %v9808_v16 }
 0xf8e   :  { %8816 = vmatprep.subr.bf16.mxu1 %v9809_v3 }
 0xf91   :  { %8817 = vmatpush3.bf16.msra.mxu1 %v9810_v18 }
 0xf92   :  { %8818 = vmatprep.subr.bf16.mxu1 %v9811_v22 }
 0xf95   :  { %8819 = vmatpush3.bf16.msra.mxu1 %v9812_v24 }
 0xf96   :  { %8820 = vmatprep.subr.bf16.mxu1 %v9813_v26 }
 0xf99   :  { %8821 = vmatpush3.bf16.msra.mxu1 %v9814_v54 }
 0xf9a   :  { %8822 = vmatprep.subr.bf16.mxu1 %v9815_v27 }
 0xf9d   :  { %8823 = vmatpush3.bf16.msra.mxu1 %v9816_v30 }
 0xf9e   :  { %8824 = vmatprep.subr.bf16.mxu1 %v9817_v21 }
 0xfa1   :  { %8825 = vmatpush3.bf16.msra.mxu1 %v9818_v29 }
 0xfa2   :  { %8826 = vmatprep.subr.bf16.mxu1 %v9819_v8 }
 0xfa5   :  { %8827 = vmatpush3.bf16.msra.mxu1 %v9820_v59 }
 0xfa6   :  { %8828 = vmatprep.subr.bf16.mxu1 %v9821_v31 }
 0xfa9   :  { %8829 = vmatpush3.bf16.msra.mxu1 %v9822_v17 }
0x1044   :  { %v7733_v40 = vpop.f32.mrf.mxu1 }
0x1045   :  { %v7784_v20 = vpack.c.bf16 %v7733_v40, %v7733_v40 }
0x1046   :  { %v8875_v35 = vpop.f32.mrf.mxu1 }
0x1048   :  { %v7736_v53 = vpop.f32.mrf.mxu1 }
0x104a   :  { %v8876_v36 = vpop.f32.mrf.mxu1 }
0x104c   :  { %v7778_v12 = vpop.f32.mrf.mxu1 }
0x104d   :  { %v7785_v39 = vpack.c.bf16 %v7778_v12, %v7778_v12 }
0x104e   :  { %v8881_v25 = vpop.f32.mrf.mxu1 }
0x104f   :  { %7953 = vmatprep.mubr.bf16.mxu1 %v7785_v39 }
0x1050   :  { %7954 = vmatmul.mubr.bf16.vlgmr.msra.gmra.mxu1 %v7784_v20  ;;  %v7781_v43 = vpop.f32.mrf.mxu1 }
0x1052   :  { %v8882_v4 = vpop.f32.mrf.mxu1 }
0x1110   :  { %v8830_v33 = vpop.f32.mrf.mxu1 }
0x1112   :  { %v8831_v37 = vpop.f32.mrf.mxu1 }
0x1113   :  { %v8832_v14 = vadd.f32 %v8831_v37, %v8830_v33 }
0x1114   :  { %v8833_v55 = vpop.f32.mrf.mxu1 }
0x1115   :  { %v7956_v45 = vadd.f32 %v8832_v14, %v8688_v28 }
0x1116   :  { %v8834_v51 = vpop.f32.mrf.mxu1 }
0x1117   :  { %v7961_v23 = vmul.f32 0.5, %v7956_v45 }
0x1119   :  { %v7962_v34 = vmul.f32 1.442695, %v7961_v23 }
0x111b   :  { %9841 = vpow2.f32 %v7962_v34 }
0x1128   :  { %v9842_v15 = vpop.eup %9841 }
0x1129   :  { %7966 = vrot.lane.b32.xlu0 %v9842_v15, %s10348_s9 }
0x112d   :  { %7974 = vrot.lane.b32.xlu0 %v7956_v45, %s10323_s18 }
0x119b   :  { %v7967_v41 = vpop.permute.xlu0 %7966 }
0x119c   :  { %v7969_v7 = vmul.f32 %v7967_v41, %v7964_v58 }
0x119e   :  { %v7970_v47 = vadd.f32 %v7969_v7, %v7956_v45 }
0x119f   :  { %v7975_v32 = vpop.permute.xlu0 %7974 }
0x11a0   :  { %7972 = vst.msk [vmem:[%s10507_s24] sm:$0x3] %vm7971_vm9, %v7970_v47 }
0x11a1   :  { %7978 = vst.msk [vmem:[%s10507_s24] sm:$0x3] %vm7977_vm10, %v7975_v32 }
0x11a2   :  { %7980 = vst.msk [vmem:[%s10507_s24] sm:$0x3] %vm7979_vm11, %v7975_v32 }
0x11a3   :  { %7985 = vsyncpa [#allocation3], 1 }
0x11a4   :  { %7986 = vsyncpa [#allocation5], 1 }
0x11a5   :  { %7987 = vsyncpa [#allocation8], 1 }
0x11a6   :  { %7988 = vsyncpa [#allocation11], 1 }
0x11a7   :  { %7989 = vsyncpa [#allocation14], 1 }
0x11a8   :  { %7990 = vsyncpa [#allocation17], 1 }
0x11a9   :  { %7991 = vsyncpa [#allocation20], 1 }
0x11aa   :  { %7992 = vsyncpa [#allocation23], 1 }
0x11ab   :  { %7993 = vsyncpa [#allocation26], 1 }
0x11ac   :  { %7994 = vsyncpa [#allocation29], 1 }
0x11ad   :  { %7995 = vsyncpa [#allocation32], 1 }

</bundles_post_ra>
